<compile_context>
chip_gen: v7x
topology: tpu7x:2x2x1
jax: 0.10.0
libtpu: 0.0.40
codegen_flags: <defaults>
</compile_context>

<pallas_src>
import math

import jax
import jax.numpy as jnp
from jax import lax
from jax.experimental import pallas as pl
from jax.experimental.pallas import tpu as pltpu

# ---------------- small-but-consistent configuration ----------------
BATCH = 2
IN_C, IN_H, IN_W = 3, 16, 16          # x: (B, C, H, W)
NUM_CLASSES = 10
NUM_TASKS = 4
DETECTED_TASK_ID = 0.0                # self.detected_task_id

# scaled-down LeNet 'cifar'-style mnet: conv5x5 -> pool -> conv5x5 -> pool -> 3 FC
K, PAD = 5, 2
C1, C2 = 8, 16
POOL1_SP = IN_H // 2                  # 8
POOL2_SP = IN_H // 4                  # 4
FC_IN = C2 * POOL2_SP * POOL2_SP      # 256
F1, F2 = 32, 32

# HMLP hypernetwork: uncond_in_size=1, cond_in_size=0, layers=[100, 100]
HNET_H = 100
HNET_H_PAD = 128

# -------- generated-weight buffer "G": per-tensor padded, 32 lanes wide --------
G_COLS = 32
C1W_OFF, C1W_ROWS = 0, K * K * IN_C           # rows 0..74   : row = tap*3 + cin,  cols 0..7
C1B_OFF = C1W_OFF + C1W_ROWS                  # row 75
C2W_OFF = C1B_OFF + 1                         # rows 76..275 : row = tap*8 + cin,  cols 0..15
C2W_ROWS = K * K * C1
C2B_OFF = C2W_OFF + C2W_ROWS                  # row 276
FC1W_OFF = C2B_OFF + 1                        # rows 277..532: row = s*16 + c,     cols 0..31
FC1W_ROWS = FC_IN
FC1B_OFF = FC1W_OFF + FC1W_ROWS               # row 533
FC2W_OFF = FC1B_OFF + 1                       # rows 534..565
FC2B_OFF = FC2W_OFF + F1                      # row 566
FC3W_OFF = FC2B_OFF + 1                       # rows 567..598
FC3B_OFF = FC3W_OFF + F2                      # row 599
G_ROWS_REAL = FC3B_OFF + 1                    # 600
G_ROWS = 608                                  # padded so N_FLAT tiles into 128-lane blocks
N_FLAT = G_ROWS * G_COLS                      # 19456 = 152 * 128

# hypernet output tiling: 2 tiles (review: 8 steps of ~0.35us overhead rival the
# whole w3 DMA; 2 tiles still let v7x split the axis over both TensorCores).
N_TILES = 2
TILE_N = N_FLAT // N_TILES                    # 9728 = 76 * 128
assert TILE_N % 128 == 0

# real parameter count of the main net (documentation / sanity)
P_TOTAL = (K * K * IN_C * C1 + C1 + K * K * C1 * C2 + C2 +
           FC_IN * F1 + F1 + F1 * F2 + F2 + F2 * NUM_CLASSES + NUM_CLASSES)  # 13434

# conv2 runs on a padded flat-row activation layout (row = b*SP2P*SP2P + p*SP2P + q)
SP2P = POOL1_SP + 2 * PAD                     # 12
C2IN_CORE = BATCH * SP2P * SP2P               # 288
MARGIN2 = 32                                  # > 2*SP2P + 2 = 26, multiple of 8
C2IN_ROWS = C2IN_CORE + 2 * MARGIN2           # 352
C1_ROWS = BATCH * IN_H * IN_W                 # 512
F_ROWS = BATCH * POOL2_SP * POOL2_SP          # 32

# live-range-bounding chunk sizes (review: acc2/a1 would otherwise spill)
C1_CHUNK = 128                                # 4 chunks of the conv1 im2col matmul
C2_CHUNK = 96                                 # 3 chunks of conv2's 288 output rows
assert C1_ROWS % C1_CHUNK == 0 and C2IN_CORE % C2_CHUNK == 0

OUT_COLS = 128                                # lane-dense output (review: avoid vst.msk)

assert BATCH <= 8

_VMEM = pl.BlockSpec(memory_space=pltpu.MemorySpace.VMEM)


# ----------------------------- kernel 1: HMLP hypernetwork -----------------------------
def _hnet_kernel(t_ref, w1_ref, b1_ref, w2_ref, b2_ref, w3_ref, b3_ref, o_ref):
    """task id -> [100] -> [100] -> one tile of the flat (G-layout) mnet weights.

    Grid axis = 2 tiles of the 19456-wide output; h1/h2 are recomputed per tile
    (one 128x128 matmul, negligible) so the axis can stay "parallel" and v7x can
    split the w3 stream across both TensorCores.
    """
    h1 = jnp.maximum(t_ref[...] * w1_ref[...] + b1_ref[...], 0.0)          # (1, 128) f32
    h2 = jnp.maximum(
        jnp.dot(h1, w2_ref[...], preferred_element_type=jnp.float32) + b2_ref[...], 0.0)
    # bf16 weights on the MXU, f32 accumulation (v5e keeps all VPU math in f32).
    o_ref[...] = (jnp.dot(h2.astype(jnp.bfloat16), w3_ref[...],
                          preferred_element_type=jnp.float32) + b3_ref[...])


def hnet_apply(t_vec, hparams):
    """w = hnet(uncond_input=task_id) -> flat weights (1, N_FLAT) in G layout."""
    w1, b1, w2, b2, w3, b3 = hparams
    const = lambda j: (0, 0)
    return pl.pallas_call(
        _hnet_kernel,
        out_shape=jax.ShapeDtypeStruct((1, N_FLAT), jnp.float32),
        grid=(N_TILES,),
        in_specs=[
            pl.BlockSpec((1, HNET_H_PAD), const),            # broadcast task id
            pl.BlockSpec((1, HNET_H_PAD), const),            # w1
            pl.BlockSpec((1, HNET_H_PAD), const),            # b1
            pl.BlockSpec((HNET_H_PAD, HNET_H_PAD), const),   # w2
            pl.BlockSpec((1, HNET_H_PAD), const),            # b2
            pl.BlockSpec((HNET_H_PAD, TILE_N), lambda j: (0, j)),   # w3 (bf16, tiled)
            pl.BlockSpec((1, TILE_N), lambda j: (0, j)),            # b3
        ],
        out_specs=pl.BlockSpec((1, TILE_N), lambda j: (0, j)),
        compiler_params=pltpu.CompilerParams(dimension_semantics=("parallel",)),
    )(t_vec, w1, b1, w2, b2, w3, b3)


# ----------------------------- kernel 2: fused LeNet forward -----------------------------
def _mnet_kernel(p1_ref, g_ref, o_ref, c1_ref, c2in_ref, c2_ref, f_ref):
    """conv1 + pool1 + conv2 + pool2 + fc1/fc2/fc3, all weights/activations in VMEM.

    Exactness notes:
      * G blocks have zeros in all padding lanes, so activations keep exact zeros
        in lanes >= their real channel count at every stage.
      * Where a weight slice is read wider than its real row count ("junk rows"),
        those rows are multiplied by activation lanes that are exactly zero, so
        they contribute nothing.
    """
    f32 = jnp.float32

    # ---- conv1: im2col matmul, chunked over 128-row blocks (bounded live range) ----
    w1 = g_ref[pl.ds(C1W_OFF, C1W_ROWS), :]                         # (75, 32)
    b1 = g_ref[pl.ds(C1B_OFF, 1), :]                                # (1, 32)

    def conv1_chunk(c, carry):
        off = pl.multiple_of(c * C1_CHUNK, C1_CHUNK)
        a = jnp.dot(p1_ref[pl.ds(off, C1_CHUNK), :], w1, preferred_element_type=f32)
        c1_ref[pl.ds(off, C1_CHUNK), :] = jnp.maximum(a + b1, 0.0)   # lanes >= 8 stay 0
        return carry

    lax.fori_loop(0, C1_ROWS // C1_CHUNK, conv1_chunk, 0)

    # ---- zero conv2's padded input buffer (margins + 'same' zero padding) ----
    c2in_ref[...] = jnp.zeros(c2in_ref.shape, f32)

    # ---- pool1: 2x2/2 max pool via strided sublane loads (no selector matmuls) ----
    for b in range(BATCH):
        for u in range(POOL1_SP):
            r0 = b * IN_H * IN_W + (2 * u) * IN_W                    # row i = 2u
            r1 = b * IN_H * IN_W + (2 * u + 1) * IN_W                # row i = 2u+1
            m = jnp.maximum(
                jnp.maximum(c1_ref[pl.ds(r0, POOL1_SP, stride=2), :],       # j even
                            c1_ref[pl.ds(r0 + 1, POOL1_SP, stride=2), :]),  # j odd
                jnp.maximum(c1_ref[pl.ds(r1, POOL1_SP, stride=2), :],
                            c1_ref[pl.ds(r1 + 1, POOL1_SP, stride=2), :]))  # (8, 32)
            dst = MARGIN2 + b * SP2P * SP2P + (u + PAD) * SP2P + PAD
            c2in_ref[pl.ds(dst, POOL1_SP), :] = m

    # ---- conv2: 25 shifted-row matmuls, 96-row accumulator in nested fori loops ----
    b2 = g_ref[pl.ds(C2B_OFF, 1), :]                                 # (1, 32)

    def conv2_chunk(mc, carry):
        base = mc * C2_CHUNK

        def di_body(di, acc_di):
            def dj_body(dj, acc):
                shift = (di - PAD) * SP2P + (dj - PAD)
                tap = di * K + dj
                x2 = c2in_ref[pl.ds(MARGIN2 + base + shift, C2_CHUNK), :]  # lanes >= 8 are 0
                # 32-row weight read: rows >= 8 are junk, killed by the zero lanes above.
                wt = g_ref[pl.ds(C2W_OFF + tap * C1, G_COLS), :]           # (32, 32)
                return acc + jnp.dot(x2, wt, preferred_element_type=f32)
            return lax.fori_loop(0, K, dj_body, acc_di)

        acc = lax.fori_loop(0, K, di_body, jnp.zeros((C2_CHUNK, G_COLS), f32))
        c2_ref[pl.ds(base, C2_CHUNK), :] = jnp.maximum(acc + b2, 0.0)      # lanes >= 16 stay 0
        return carry

    lax.fori_loop(0, C2IN_CORE // C2_CHUNK, conv2_chunk, 0)

    # ---- pool2: 2x2/2 max pool of the interior via strided loads -> FC rows (b*16 + s) ----
    for b in range(BATCH):
        for u2 in range(POOL2_SP):
            row_p0 = b * SP2P * SP2P + (2 * u2 + PAD) * SP2P + PAD          # p = 2u2+2, q = 2
            row_p1 = b * SP2P * SP2P + (2 * u2 + PAD + 1) * SP2P + PAD      # p = 2u2+3, q = 2
            m = jnp.maximum(
                jnp.maximum(c2_ref[pl.ds(row_p0, POOL2_SP, stride=2), :],      # q = 2v+2
                            c2_ref[pl.ds(row_p0 + 1, POOL2_SP, stride=2), :]), # q = 2v+3
                jnp.maximum(c2_ref[pl.ds(row_p1, POOL2_SP, stride=2), :],
                            c2_ref[pl.ds(row_p1 + 1, POOL2_SP, stride=2), :]))  # (4, 32)
            f_ref[pl.ds(b * POOL2_SP * POOL2_SP + u2 * POOL2_SP, POOL2_SP), :] = m

    # ---- FC head (per-tap batch rows gathered with one strided load, not concat) ----
    acc = jnp.zeros((BATCH, G_COLS), f32)
    for s in range(POOL2_SP * POOL2_SP):                             # 16 spatial taps of fc1
        lhs = f_ref[pl.ds(s, BATCH, stride=POOL2_SP * POOL2_SP), :]  # (2, 32), row = batch
        # 32-row weight read: rows >= 16 are junk, killed by the zero lanes of lhs.
        wf = g_ref[pl.ds(FC1W_OFF + s * C2, G_COLS), :]              # (32, 32)
        acc = acc + jnp.dot(lhs, wf, preferred_element_type=f32)
    h = jnp.maximum(acc + g_ref[pl.ds(FC1B_OFF, 1), :], 0.0)         # (2, 32)
    h = jnp.maximum(
        jnp.dot(h, g_ref[pl.ds(FC2W_OFF, F1), :], preferred_element_type=f32)
        + g_ref[pl.ds(FC2B_OFF, 1), :], 0.0)                         # (2, 32)
    logits = (jnp.dot(h, g_ref[pl.ds(FC3W_OFF, F2), :], preferred_element_type=f32)
              + g_ref[pl.ds(FC3B_OFF, 1), :])                        # (2, 32); cols >= 10 are 0

    block = jnp.concatenate(
        [logits, jnp.zeros((8 - BATCH, G_COLS), f32)], axis=0)       # (8, 32)
    o_ref[...] = jnp.concatenate(
        [block, jnp.zeros((8, OUT_COLS - G_COLS), f32)], axis=1)     # lane-dense (8, 128) store


def mnet_apply(patches1, g):
    return pl.pallas_call(
        _mnet_kernel,
        out_shape=jax.ShapeDtypeStruct((8, OUT_COLS), jnp.float32),
        in_specs=[_VMEM, _VMEM],
        out_specs=_VMEM,
        scratch_shapes=[
            pltpu.VMEM((C1_ROWS, G_COLS), jnp.float32),     # conv1 output (compact rows)
            pltpu.VMEM((C2IN_ROWS, G_COLS), jnp.float32),   # conv2 padded input (+margins)
            pltpu.VMEM((C2IN_CORE, G_COLS), jnp.float32),   # conv2 output (padded rows)
            pltpu.VMEM((F_ROWS, G_COLS), jnp.float32),      # FC input
        ],
    )(patches1, g)


# ----------------------------- host-side preparation (weight-independent) -----------------------------
def build_conv1_patches(x_nchw):
    """Reference xx quirk + 'same' 5x5 im2col -> (B*H*W, 75); column = tap*3 + cin."""
    B = x_nchw.shape[0]
    xx = jnp.swapaxes(x_nchw, 1, 3).reshape(B, -1)        # torch.swapdims(x, 1, 3).reshape(B, -1)
    xh = xx.reshape(B, IN_H, IN_W, IN_C)                  # mnet views the flat vector as (H, W, C)
    xp = jnp.pad(xh, ((0, 0), (PAD, PAD), (PAD, PAD), (0, 0)))
    cols = [xp[:, di:di + IN_H, dj:dj + IN_W, :] for di in range(K) for dj in range(K)]
    return jnp.stack(cols, axis=3).reshape(B * IN_H * IN_W, K * K * IN_C)


# ----------------------------- hypernetwork (HMLP) parameters -----------------------------
def init_hnet_params(key):
    """Deterministic stand-in for HMLP(..., layers=[100,100]) + apply_hyperfan_init.

    w3/b3 are stored directly in the pre-padded G layout (structural zeros in all
    padding lanes/rows — the LeNet kernel's junk-row reads rely on this); w3 is
    bfloat16 since its DMA is the only real HBM traffic.
    """
    k1, k2, k3, k4, k5 = jax.random.split(key, 5)
    w1 = jnp.zeros((1, HNET_H_PAD), jnp.float32).at[0, :HNET_H].set(
        jax.random.normal(k1, (HNET_H,), jnp.float32))
    b1 = jnp.zeros((1, HNET_H_PAD), jnp.float32).at[0, :HNET_H].set(
        0.1 * jax.random.normal(k2, (HNET_H,), jnp.float32))
    w2 = jnp.zeros((HNET_H_PAD, HNET_H_PAD), jnp.float32).at[:HNET_H, :HNET_H].set(
        jax.random.normal(k3, (HNET_H, HNET_H), jnp.float32) / math.sqrt(HNET_H))
    b2 = jnp.zeros((1, HNET_H_PAD), jnp.float32).at[0, :HNET_H].set(
        0.1 * jax.random.normal(k4, (HNET_H,), jnp.float32))

    blocks = [
        (C1W_OFF, C1W_ROWS, C1), (C1B_OFF, 1, C1),
        (C2W_OFF, C2W_ROWS, C2), (C2B_OFF, 1, C2),
        (FC1W_OFF, FC1W_ROWS, F1), (FC1B_OFF, 1, F1),
        (FC2W_OFF, F1, F2), (FC2B_OFF, 1, F2),
        (FC3W_OFF, F2, NUM_CLASSES), (FC3B_OFF, 1, NUM_CLASSES),
    ]
    assert sum(r * c for _, r, c in blocks) == P_TOTAL
    w3g = jnp.zeros((HNET_H_PAD, G_ROWS, G_COLS), jnp.float32)
    scale = 0.05 / math.sqrt(HNET_H)
    for kk, (off, rows, cols) in zip(jax.random.split(k5, len(blocks)), blocks):
        w3g = w3g.at[:HNET_H, off:off + rows, :cols].set(
            scale * jax.random.normal(kk, (HNET_H, rows, cols), jnp.float32))
    w3 = w3g.reshape(HNET_H_PAD, N_FLAT).astype(jnp.bfloat16)
    b3 = jnp.zeros((1, N_FLAT), jnp.float32)
    return (w1, b1, w2, b2, w3, b3)


# ----------------------------- HCNN forward (call_predict=True path) -----------------------------
def hcnn_forward(x_nchw, hnet_params):
    """HCNN.forward -> logits of shape (B, num_classes)."""
    # TODO(synk): static feature extractor + NaiveBayes task prediction replaced by the
    # fixed detected task id (shared across the batch, as in the reference predict path).
    B = x_nchw.shape[0]
    t_vec = jnp.full((1, HNET_H_PAD), DETECTED_TASK_ID, jnp.float32)
    patches1 = build_conv1_patches(x_nchw)               # weight-independent input prep
    flat = hnet_apply(t_vec, hnet_params)                # w = hnet(uncond_input=pred_t_id)
    g = flat.reshape(G_ROWS, G_COLS)                     # free row-major HBM re-view
    out = mnet_apply(patches1, g)                        # p = mnet.forward(xx, weights=w)
    return out[:B, :NUM_CLASSES]


if __name__ == "__main__":
    key = jax.random.PRNGKey(0)
    kx, kh = jax.random.split(key)
    x = jax.random.normal(kx, (BATCH, IN_C, IN_H, IN_W), jnp.float32)  # NCHW, as PyTorch
    hparams = init_hnet_params(kh)

    fwd = jax.jit(hcnn_forward)
    logits = jax.block_until_ready(fwd(x, hparams))

    assert logits.shape == (BATCH, NUM_CLASSES), logits.shape
    assert bool(jnp.all(jnp.isfinite(logits)))
    print("KERNEL_OK")
</pallas_src>

<mosaic_0001>
module attributes {stable_mosaic.version = 11 : i64} {
  func.func @_hnet_kernel(%arg0: i32, %arg1: memref<1x128xf32, #tpu.memory_space<vmem>>, %arg2: memref<1x128xf32, #tpu.memory_space<vmem>>, %arg3: memref<1x128xf32, #tpu.memory_space<vmem>>, %arg4: memref<128x128xf32, #tpu.memory_space<vmem>>, %arg5: memref<1x128xf32, #tpu.memory_space<vmem>>, %arg6: memref<128x9728xbf16, #tpu.memory_space<vmem>>, %arg7: memref<1x9728xf32, #tpu.memory_space<vmem>>, %arg8: memref<1x9728xf32, #tpu.memory_space<vmem>>) attributes {dimension_semantics = [#tpu.dimension_semantics<parallel>], iteration_bounds = array<i64: 2>, scalar_prefetch = 0 : i64, scratch_operands = 0 : i64, tpu.core_type = #tpu.core_type<tc>, window_params = [{pipeline_mode = #tpu.pipeline_mode<synchronous>, transform_indices = @transform_0, window_bounds = array<i64: 1, 128>}, {pipeline_mode = #tpu.pipeline_mode<synchronous>, transform_indices = @transform_1, window_bounds = array<i64: 1, 128>}, {pipeline_mode = #tpu.pipeline_mode<synchronous>, transform_indices = @transform_2, window_bounds = array<i64: 1, 128>}, {pipeline_mode = #tpu.pipeline_mode<synchronous>, transform_indices = @transform_3, window_bounds = array<i64: 128, 128>}, {pipeline_mode = #tpu.pipeline_mode<synchronous>, transform_indices = @transform_4, window_bounds = array<i64: 1, 128>}, {transform_indices = @transform_5, window_bounds = array<i64: 128, 9728>}, {transform_indices = @transform_6, window_bounds = array<i64: 1, 9728>}, {transform_indices = @transform_7, window_bounds = array<i64: 1, 9728>}]} {
    %c0 = arith.constant 0 : index
    %c0_0 = arith.constant 0 : index
    %0 = vector.load %arg1[%c0, %c0_0] : memref<1x128xf32, #tpu.memory_space<vmem>>, vector<1x128xf32>
    %c0_1 = arith.constant 0 : index
    %c0_2 = arith.constant 0 : index
    %1 = vector.load %arg2[%c0_1, %c0_2] : memref<1x128xf32, #tpu.memory_space<vmem>>, vector<1x128xf32>
    %2 = arith.mulf %0, %1 : vector<1x128xf32>
    %c0_3 = arith.constant 0 : index
    %c0_4 = arith.constant 0 : index
    %3 = vector.load %arg3[%c0_3, %c0_4] : memref<1x128xf32, #tpu.memory_space<vmem>>, vector<1x128xf32>
    %4 = arith.addf %2, %3 : vector<1x128xf32>
    %cst = arith.constant 0.000000e+00 : f32
    %5 = vector.broadcast %cst : f32 to vector<1x128xf32>
    %6 = arith.maximumf %4, %5 : vector<1x128xf32>
    %c0_5 = arith.constant 0 : index
    %c0_6 = arith.constant 0 : index
    %7 = vector.load %arg4[%c0_5, %c0_6] : memref<128x128xf32, #tpu.memory_space<vmem>>, vector<128x128xf32>
    %cst_7 = arith.constant dense<0.000000e+00> : vector<1x128xf32>
    %8 = tpu.matmul %6, %7, %cst_7 {dimension_numbers = #tpu.dot_dimension_numbers<[1], [0], [0], [1], [0, 0, 1, 1], [], []>} : vector<1x128xf32>, vector<128x128xf32>, vector<1x128xf32> -> vector<1x128xf32>
    %c0_8 = arith.constant 0 : index
    %c0_9 = arith.constant 0 : index
    %9 = vector.load %arg5[%c0_8, %c0_9] : memref<1x128xf32, #tpu.memory_space<vmem>>, vector<1x128xf32>
    %10 = arith.addf %8, %9 : vector<1x128xf32>
    %cst_10 = arith.constant 0.000000e+00 : f32
    %11 = vector.broadcast %cst_10 : f32 to vector<1x128xf32>
    %12 = arith.maximumf %10, %11 : vector<1x128xf32>
    %13 = arith.truncf %12 : vector<1x128xf32> to vector<1x128xbf16>
    %c0_11 = arith.constant 0 : index
    %c0_12 = arith.constant 0 : index
    %14 = vector.load %arg6[%c0_11, %c0_12] : memref<128x9728xbf16, #tpu.memory_space<vmem>>, vector<128x9728xbf16>
    %cst_13 = arith.constant dense<0.000000e+00> : vector<1x9728xf32>
    %15 = tpu.matmul %13, %14, %cst_13 {dimension_numbers = #tpu.dot_dimension_numbers<[1], [0], [0], [1], [0, 0, 1, 1], [], []>} : vector<1x128xbf16>, vector<128x9728xbf16>, vector<1x9728xf32> -> vector<1x9728xf32>
    %c0_14 = arith.constant 0 : index
    %c0_15 = arith.constant 0 : index
    %16 = vector.load %arg7[%c0_14, %c0_15] : memref<1x9728xf32, #tpu.memory_space<vmem>>, vector<1x9728xf32>
    %17 = arith.addf %15, %16 : vector<1x9728xf32>
    %c0_16 = arith.constant 0 : index
    %c0_17 = arith.constant 0 : index
    %18 = vector.load %arg8[%c0_16, %c0_17] : memref<1x9728xf32, #tpu.memory_space<vmem>>, vector<1x9728xf32>
    tpu.vector_store %arg8[%c0_16, %c0_17], %17 {strides = array<i32>} : memref<1x9728xf32, #tpu.memory_space<vmem>>, vector<1x9728xf32>,
    return
  }
  func.func @transform_0(%arg0: i32) -> (i32, i32) {
    %c0_i32 = arith.constant 0 : i32
    %c0_i32_0 = arith.constant 0 : i32
    %c0_i32_1 = arith.constant 0 : i32
    return %c0_i32, %c0_i32_0 : i32, i32
  }
  func.func @transform_1(%arg0: i32) -> (i32, i32) {
    %c0_i32 = arith.constant 0 : i32
    %c0_i32_0 = arith.constant 0 : i32
    %c0_i32_1 = arith.constant 0 : i32
    return %c0_i32, %c0_i32_0 : i32, i32
  }
  func.func @transform_2(%arg0: i32) -> (i32, i32) {
    %c0_i32 = arith.constant 0 : i32
    %c0_i32_0 = arith.constant 0 : i32
    %c0_i32_1 = arith.constant 0 : i32
    return %c0_i32, %c0_i32_0 : i32, i32
  }
  func.func @transform_3(%arg0: i32) -> (i32, i32) {
    %c0_i32 = arith.constant 0 : i32
    %c0_i32_0 = arith.constant 0 : i32
    %c0_i32_1 = arith.constant 0 : i32
    return %c0_i32, %c0_i32_0 : i32, i32
  }
  func.func @transform_4(%arg0: i32) -> (i32, i32) {
    %c0_i32 = arith.constant 0 : i32
    %c0_i32_0 = arith.constant 0 : i32
    %c0_i32_1 = arith.constant 0 : i32
    return %c0_i32, %c0_i32_0 : i32, i32
  }
  func.func @transform_5(%arg0: i32) -> (i32, i32) {
    %c0_i32 = arith.constant 0 : i32
    %c0_i32_0 = arith.constant 0 : i32
    return %c0_i32, %arg0 : i32, i32
  }
  func.func @transform_6(%arg0: i32) -> (i32, i32) {
    %c0_i32 = arith.constant 0 : i32
    %c0_i32_0 = arith.constant 0 : i32
    return %c0_i32, %arg0 : i32, i32
  }
  func.func @transform_7(%arg0: i32) -> (i32, i32) {
    %c0_i32 = arith.constant 0 : i32
    %c0_i32_0 = arith.constant 0 : i32
    return %c0_i32, %arg0 : i32, i32
  }
}

module attributes {stable_mosaic.version = 11 : i64} {
  func.func @_mnet_kernel(%arg0: memref<512x75xf32, #tpu.memory_space<vmem>>, %arg1: memref<608x32xf32, #tpu.memory_space<vmem>>, %arg2: memref<8x128xf32, #tpu.memory_space<vmem>>, %arg3: memref<512x32xf32, #tpu.memory_space<vmem>>, %arg4: memref<352x32xf32, #tpu.memory_space<vmem>>, %arg5: memref<288x32xf32, #tpu.memory_space<vmem>>, %arg6: memref<32x32xf32, #tpu.memory_space<vmem>>) attributes {dimension_semantics = [], scalar_prefetch = 0 : i64, scratch_operands = 4 : i64, tpu.core_type = #tpu.core_type<tc>} {
    %c0 = arith.constant 0 : index
    %c0_0 = arith.constant 0 : index
    %0 = vector.load %arg1[%c0, %c0_0] : memref<608x32xf32, #tpu.memory_space<vmem>>, vector<75x32xf32>
    %c75 = arith.constant 75 : index
    %c0_1 = arith.constant 0 : index
    %1 = vector.load %arg1[%c75, %c0_1] : memref<608x32xf32, #tpu.memory_space<vmem>>, vector<1x32xf32>
    %c0_i32 = arith.constant 0 : i32
    %c4_i32 = arith.constant 4 : i32
    %2 = arith.addi %c0_i32, %c4_i32 : i32
    %c1_i32 = arith.constant 1 : i32
    scf.for %arg7 = %c0_i32 to %2 step %c1_i32  : i32 {
      %c128_i32 = arith.constant 128 : i32
      %286 = arith.muli %arg7, %c128_i32 : i32
      %287 = tpu.assume_multiple %286, 128 : i32
      %288 = arith.index_cast %287 : i32 to index
      %c0_200 = arith.constant 0 : index
      %289 = vector.load %arg0[%288, %c0_200] : memref<512x75xf32, #tpu.memory_space<vmem>>, vector<128x75xf32>
      %cst_201 = arith.constant dense<0.000000e+00> : vector<128x32xf32>
      %290 = tpu.matmul %289, %0, %cst_201 {dimension_numbers = #tpu.dot_dimension_numbers<[1], [0], [0], [1], [0, 0, 1, 1], [], []>} : vector<128x75xf32>, vector<75x32xf32>, vector<128x32xf32> -> vector<128x32xf32>
      %291 = vector.broadcast %1 : vector<1x32xf32> to vector<128x32xf32>
      %292 = arith.addf %290, %291 : vector<128x32xf32>
      %cst_202 = arith.constant 0.000000e+00 : f32
      %293 = vector.broadcast %cst_202 : f32 to vector<128x32xf32>
      %294 = arith.maximumf %292, %293 : vector<128x32xf32>
      %295 = arith.index_cast %287 : i32 to index
      %c0_203 = arith.constant 0 : index
      %296 = vector.load %arg3[%295, %c0_203] : memref<512x32xf32, #tpu.memory_space<vmem>>, vector<128x32xf32>
      tpu.vector_store %arg3[%295, %c0_203], %294 {strides = array<i32>} : memref<512x32xf32, #tpu.memory_space<vmem>>, vector<128x32xf32>,
    }
    %c4_i32_2 = arith.constant 4 : i32
    %cst = arith.constant 0.000000e+00 : f32
    %3 = vector.broadcast %cst : f32 to vector<352x32xf32>
    %c0_3 = arith.constant 0 : index
    %c0_4 = arith.constant 0 : index
    %4 = vector.load %arg4[%c0_3, %c0_4] : memref<352x32xf32, #tpu.memory_space<vmem>>, vector<352x32xf32>
    tpu.vector_store %arg4[%c0_3, %c0_4], %3 {strides = array<i32>} : memref<352x32xf32, #tpu.memory_space<vmem>>, vector<352x32xf32>,
    %c0_5 = arith.constant 0 : index
    %c0_6 = arith.constant 0 : index
    %5 = tpu.strided_load %arg3[%c0_5, %c0_6] {strides = array<i32: 2, 1>} : memref<512x32xf32, #tpu.memory_space<vmem>>, vector<8x32xf32>
    %c1 = arith.constant 1 : index
    %c0_7 = arith.constant 0 : index
    %6 = tpu.strided_load %arg3[%c1, %c0_7] {strides = array<i32: 2, 1>} : memref<512x32xf32, #tpu.memory_space<vmem>>, vector<8x32xf32>
    %7 = arith.maximumf %5, %6 : vector<8x32xf32>
    %c16 = arith.constant 16 : index
    %c0_8 = arith.constant 0 : index
    %8 = tpu.strided_load %arg3[%c16, %c0_8] {strides = array<i32: 2, 1>} : memref<512x32xf32, #tpu.memory_space<vmem>>, vector<8x32xf32>
    %c17 = arith.constant 17 : index
    %c0_9 = arith.constant 0 : index
    %9 = tpu.strided_load %arg3[%c17, %c0_9] {strides = array<i32: 2, 1>} : memref<512x32xf32, #tpu.memory_space<vmem>>, vector<8x32xf32>
    %10 = arith.maximumf %8, %9 : vector<8x32xf32>
    %11 = arith.maximumf %7, %10 : vector<8x32xf32>
    %c58 = arith.constant 58 : index
    %c0_10 = arith.constant 0 : index
    %12 = vector.load %arg4[%c58, %c0_10] : memref<352x32xf32, #tpu.memory_space<vmem>>, vector<8x32xf32>
    tpu.vector_store %arg4[%c58, %c0_10], %11 {strides = array<i32>} : memref<352x32xf32, #tpu.memory_space<vmem>>, vector<8x32xf32>,
    %c32 = arith.constant 32 : index
    %c0_11 = arith.constant 0 : index
    %13 = tpu.strided_load %arg3[%c32, %c0_11] {strides = array<i32: 2, 1>} : memref<512x32xf32, #tpu.memory_space<vmem>>, vector<8x32xf32>
    %c33 = arith.constant 33 : index
    %c0_12 = arith.constant 0 : index
    %14 = tpu.strided_load %arg3[%c33, %c0_12] {strides = array<i32: 2, 1>} : memref<512x32xf32, #tpu.memory_space<vmem>>, vector<8x32xf32>
    %15 = arith.maximumf %13, %14 : vector<8x32xf32>
    %c48 = arith.constant 48 : index
    %c0_13 = arith.constant 0 : index
    %16 = tpu.strided_load %arg3[%c48, %c0_13] {strides = array<i32: 2, 1>} : memref<512x32xf32, #tpu.memory_space<vmem>>, vector<8x32xf32>
    %c49 = arith.constant 49 : index
    %c0_14 = arith.constant 0 : index
    %17 = tpu.strided_load %arg3[%c49, %c0_14] {strides = array<i32: 2, 1>} : memref<512x32xf32, #tpu.memory_space<vmem>>, vector<8x32xf32>
    %18 = arith.maximumf %16, %17 : vector<8x32xf32>
    %19 = arith.maximumf %15, %18 : vector<8x32xf32>
    %c70 = arith.constant 70 : index
    %c0_15 = arith.constant 0 : index
    %20 = vector.load %arg4[%c70, %c0_15] : memref<352x32xf32, #tpu.memory_space<vmem>>, vector<8x32xf32>
    tpu.vector_store %arg4[%c70, %c0_15], %19 {strides = array<i32>} : memref<352x32xf32, #tpu.memory_space<vmem>>, vector<8x32xf32>,
    %c64 = arith.constant 64 : index
    %c0_16 = arith.constant 0 : index
    %21 = tpu.strided_load %arg3[%c64, %c0_16] {strides = array<i32: 2, 1>} : memref<512x32xf32, #tpu.memory_space<vmem>>, vector<8x32xf32>
    %c65 = arith.constant 65 : index
    %c0_17 = arith.constant 0 : index
    %22 = tpu.strided_load %arg3[%c65, %c0_17] {strides = array<i32: 2, 1>} : memref<512x32xf32, #tpu.memory_space<vmem>>, vector<8x32xf32>
    %23 = arith.maximumf %21, %22 : vector<8x32xf32>
    %c80 = arith.constant 80 : index
    %c0_18 = arith.constant 0 : index
    %24 = tpu.strided_load %arg3[%c80, %c0_18] {strides = array<i32: 2, 1>} : memref<512x32xf32, #tpu.memory_space<vmem>>, vector<8x32xf32>
    %c81 = arith.constant 81 : index
    %c0_19 = arith.constant 0 : index
    %25 = tpu.strided_load %arg3[%c81, %c0_19] {strides = array<i32: 2, 1>} : memref<512x32xf32, #tpu.memory_space<vmem>>, vector<8x32xf32>
    %26 = arith.maximumf %24, %25 : vector<8x32xf32>
    %27 = arith.maximumf %23, %26 : vector<8x32xf32>
    %c82 = arith.constant 82 : index
    %c0_20 = arith.constant 0 : index
    %28 = vector.load %arg4[%c82, %c0_20] : memref<352x32xf32, #tpu.memory_space<vmem>>, vector<8x32xf32>
    tpu.vector_store %arg4[%c82, %c0_20], %27 {strides = array<i32>} : memref<352x32xf32, #tpu.memory_space<vmem>>, vector<8x32xf32>,
    %c96 = arith.constant 96 : index
    %c0_21 = arith.constant 0 : index
    %29 = tpu.strided_load %arg3[%c96, %c0_21] {strides = array<i32: 2, 1>} : memref<512x32xf32, #tpu.memory_space<vmem>>, vector<8x32xf32>
    %c97 = arith.constant 97 : index
    %c0_22 = arith.constant 0 : index
    %30 = tpu.strided_load %arg3[%c97, %c0_22] {strides = array<i32: 2, 1>} : memref<512x32xf32, #tpu.memory_space<vmem>>, vector<8x32xf32>
    %31 = arith.maximumf %29, %30 : vector<8x32xf32>
    %c112 = arith.constant 112 : index
    %c0_23 = arith.constant 0 : index
    %32 = tpu.strided_load %arg3[%c112, %c0_23] {strides = array<i32: 2, 1>} : memref<512x32xf32, #tpu.memory_space<vmem>>, vector<8x32xf32>
    %c113 = arith.constant 113 : index
    %c0_24 = arith.constant 0 : index
    %33 = tpu.strided_load %arg3[%c113, %c0_24] {strides = array<i32: 2, 1>} : memref<512x32xf32, #tpu.memory_space<vmem>>, vector<8x32xf32>
    %34 = arith.maximumf %32, %33 : vector<8x32xf32>
    %35 = arith.maximumf %31, %34 : vector<8x32xf32>
    %c94 = arith.constant 94 : index
    %c0_25 = arith.constant 0 : index
    %36 = vector.load %arg4[%c94, %c0_25] : memref<352x32xf32, #tpu.memory_space<vmem>>, vector<8x32xf32>
    tpu.vector_store %arg4[%c94, %c0_25], %35 {strides = array<i32>} : memref<352x32xf32, #tpu.memory_space<vmem>>, vector<8x32xf32>,
    %c128 = arith.constant 128 : index
    %c0_26 = arith.constant 0 : index
    %37 = tpu.strided_load %arg3[%c128, %c0_26] {strides = array<i32: 2, 1>} : memref<512x32xf32, #tpu.memory_space<vmem>>, vector<8x32xf32>
    %c129 = arith.constant 129 : index
    %c0_27 = arith.constant 0 : index
    %38 = tpu.strided_load %arg3[%c129, %c0_27] {strides = array<i32: 2, 1>} : memref<512x32xf32, #tpu.memory_space<vmem>>, vector<8x32xf32>
    %39 = arith.maximumf %37, %38 : vector<8x32xf32>
    %c144 = arith.constant 144 : index
    %c0_28 = arith.constant 0 : index
    %40 = tpu.strided_load %arg3[%c144, %c0_28] {strides = array<i32: 2, 1>} : memref<512x32xf32, #tpu.memory_space<vmem>>, vector<8x32xf32>
    %c145 = arith.constant 145 : index
    %c0_29 = arith.constant 0 : index
    %41 = tpu.strided_load %arg3[%c145, %c0_29] {strides = array<i32: 2, 1>} : memref<512x32xf32, #tpu.memory_space<vmem>>, vector<8x32xf32>
    %42 = arith.maximumf %40, %41 : vector<8x32xf32>
    %43 = arith.maximumf %39, %42 : vector<8x32xf32>
    %c106 = arith.constant 106 : index
    %c0_30 = arith.constant 0 : index
    %44 = vector.load %arg4[%c106, %c0_30] : memref<352x32xf32, #tpu.memory_space<vmem>>, vector<8x32xf32>
    tpu.vector_store %arg4[%c106, %c0_30], %43 {strides = array<i32>} : memref<352x32xf32, #tpu.memory_space<vmem>>, vector<8x32xf32>,
    %c160 = arith.constant 160 : index
    %c0_31 = arith.constant 0 : index
    %45 = tpu.strided_load %arg3[%c160, %c0_31] {strides = array<i32: 2, 1>} : memref<512x32xf32, #tpu.memory_space<vmem>>, vector<8x32xf32>
    %c161 = arith.constant 161 : index
    %c0_32 = arith.constant 0 : index
    %46 = tpu.strided_load %arg3[%c161, %c0_32] {strides = array<i32: 2, 1>} : memref<512x32xf32, #tpu.memory_space<vmem>>, vector<8x32xf32>
    %47 = arith.maximumf %45, %46 : vector<8x32xf32>
    %c176 = arith.constant 176 : index
    %c0_33 = arith.constant 0 : index
    %48 = tpu.strided_load %arg3[%c176, %c0_33] {strides = array<i32: 2, 1>} : memref<512x32xf32, #tpu.memory_space<vmem>>, vector<8x32xf32>
    %c177 = arith.constant 177 : index
    %c0_34 = arith.constant 0 : index
    %49 = tpu.strided_load %arg3[%c177, %c0_34] {strides = array<i32: 2, 1>} : memref<512x32xf32, #tpu.memory_space<vmem>>, vector<8x32xf32>
    %50 = arith.maximumf %48, %49 : vector<8x32xf32>
    %51 = arith.maximumf %47, %50 : vector<8x32xf32>
    %c118 = arith.constant 118 : index
    %c0_35 = arith.constant 0 : index
    %52 = vector.load %arg4[%c118, %c0_35] : memref<352x32xf32, #tpu.memory_space<vmem>>, vector<8x32xf32>
    tpu.vector_store %arg4[%c118, %c0_35], %51 {strides = array<i32>} : memref<352x32xf32, #tpu.memory_space<vmem>>, vector<8x32xf32>,
    %c192 = arith.constant 192 : index
    %c0_36 = arith.constant 0 : index
    %53 = tpu.strided_load %arg3[%c192, %c0_36] {strides = array<i32: 2, 1>} : memref<512x32xf32, #tpu.memory_space<vmem>>, vector<8x32xf32>
    %c193 = arith.constant 193 : index
    %c0_37 = arith.constant 0 : index
    %54 = tpu.strided_load %arg3[%c193, %c0_37] {strides = array<i32: 2, 1>} : memref<512x32xf32, #tpu.memory_space<vmem>>, vector<8x32xf32>
    %55 = arith.maximumf %53, %54 : vector<8x32xf32>
    %c208 = arith.constant 208 : index
    %c0_38 = arith.constant 0 : index
    %56 = tpu.strided_load %arg3[%c208, %c0_38] {strides = array<i32: 2, 1>} : memref<512x32xf32, #tpu.memory_space<vmem>>, vector<8x32xf32>
    %c209 = arith.constant 209 : index
    %c0_39 = arith.constant 0 : index
    %57 = tpu.strided_load %arg3[%c209, %c0_39] {strides = array<i32: 2, 1>} : memref<512x32xf32, #tpu.memory_space<vmem>>, vector<8x32xf32>
    %58 = arith.maximumf %56, %57 : vector<8x32xf32>
    %59 = arith.maximumf %55, %58 : vector<8x32xf32>
    %c130 = arith.constant 130 : index
    %c0_40 = arith.constant 0 : index
    %60 = vector.load %arg4[%c130, %c0_40] : memref<352x32xf32, #tpu.memory_space<vmem>>, vector<8x32xf32>
    tpu.vector_store %arg4[%c130, %c0_40], %59 {strides = array<i32>} : memref<352x32xf32, #tpu.memory_space<vmem>>, vector<8x32xf32>,
    %c224 = arith.constant 224 : index
    %c0_41 = arith.constant 0 : index
    %61 = tpu.strided_load %arg3[%c224, %c0_41] {strides = array<i32: 2, 1>} : memref<512x32xf32, #tpu.memory_space<vmem>>, vector<8x32xf32>
    %c225 = arith.constant 225 : index
    %c0_42 = arith.constant 0 : index
    %62 = tpu.strided_load %arg3[%c225, %c0_42] {strides = array<i32: 2, 1>} : memref<512x32xf32, #tpu.memory_space<vmem>>, vector<8x32xf32>
    %63 = arith.maximumf %61, %62 : vector<8x32xf32>
    %c240 = arith.constant 240 : index
    %c0_43 = arith.constant 0 : index
    %64 = tpu.strided_load %arg3[%c240, %c0_43] {strides = array<i32: 2, 1>} : memref<512x32xf32, #tpu.memory_space<vmem>>, vector<8x32xf32>
    %c241 = arith.constant 241 : index
    %c0_44 = arith.constant 0 : index
    %65 = tpu.strided_load %arg3[%c241, %c0_44] {strides = array<i32: 2, 1>} : memref<512x32xf32, #tpu.memory_space<vmem>>, vector<8x32xf32>
    %66 = arith.maximumf %64, %65 : vector<8x32xf32>
    %67 = arith.maximumf %63, %66 : vector<8x32xf32>
    %c142 = arith.constant 142 : index
    %c0_45 = arith.constant 0 : index
    %68 = vector.load %arg4[%c142, %c0_45] : memref<352x32xf32, #tpu.memory_space<vmem>>, vector<8x32xf32>
    tpu.vector_store %arg4[%c142, %c0_45], %67 {strides = array<i32>} : memref<352x32xf32, #tpu.memory_space<vmem>>, vector<8x32xf32>,
    %c256 = arith.constant 256 : index
    %c0_46 = arith.constant 0 : index
    %69 = tpu.strided_load %arg3[%c256, %c0_46] {strides = array<i32: 2, 1>} : memref<512x32xf32, #tpu.memory_space<vmem>>, vector<8x32xf32>
    %c257 = arith.constant 257 : index
    %c0_47 = arith.constant 0 : index
    %70 = tpu.strided_load %arg3[%c257, %c0_47] {strides = array<i32: 2, 1>} : memref<512x32xf32, #tpu.memory_space<vmem>>, vector<8x32xf32>
    %71 = arith.maximumf %69, %70 : vector<8x32xf32>
    %c272 = arith.constant 272 : index
    %c0_48 = arith.constant 0 : index
    %72 = tpu.strided_load %arg3[%c272, %c0_48] {strides = array<i32: 2, 1>} : memref<512x32xf32, #tpu.memory_space<vmem>>, vector<8x32xf32>
    %c273 = arith.constant 273 : index
    %c0_49 = arith.constant 0 : index
    %73 = tpu.strided_load %arg3[%c273, %c0_49] {strides = array<i32: 2, 1>} : memref<512x32xf32, #tpu.memory_space<vmem>>, vector<8x32xf32>
    %74 = arith.maximumf %72, %73 : vector<8x32xf32>
    %75 = arith.maximumf %71, %74 : vector<8x32xf32>
    %c202 = arith.constant 202 : index
    %c0_50 = arith.constant 0 : index
    %76 = vector.load %arg4[%c202, %c0_50] : memref<352x32xf32, #tpu.memory_space<vmem>>, vector<8x32xf32>
    tpu.vector_store %arg4[%c202, %c0_50], %75 {strides = array<i32>} : memref<352x32xf32, #tpu.memory_space<vmem>>, vector<8x32xf32>,
    %c288 = arith.constant 288 : index
    %c0_51 = arith.constant 0 : index
    %77 = tpu.strided_load %arg3[%c288, %c0_51] {strides = array<i32: 2, 1>} : memref<512x32xf32, #tpu.memory_space<vmem>>, vector<8x32xf32>
    %c289 = arith.constant 289 : index
    %c0_52 = arith.constant 0 : index
    %78 = tpu.strided_load %arg3[%c289, %c0_52] {strides = array<i32: 2, 1>} : memref<512x32xf32, #tpu.memory_space<vmem>>, vector<8x32xf32>
    %79 = arith.maximumf %77, %78 : vector<8x32xf32>
    %c304 = arith.constant 304 : index
    %c0_53 = arith.constant 0 : index
    %80 = tpu.strided_load %arg3[%c304, %c0_53] {strides = array<i32: 2, 1>} : memref<512x32xf32, #tpu.memory_space<vmem>>, vector<8x32xf32>
    %c305 = arith.constant 305 : index
    %c0_54 = arith.constant 0 : index
    %81 = tpu.strided_load %arg3[%c305, %c0_54] {strides = array<i32: 2, 1>} : memref<512x32xf32, #tpu.memory_space<vmem>>, vector<8x32xf32>
    %82 = arith.maximumf %80, %81 : vector<8x32xf32>
    %83 = arith.maximumf %79, %82 : vector<8x32xf32>
    %c214 = arith.constant 214 : index
    %c0_55 = arith.constant 0 : index
    %84 = vector.load %arg4[%c214, %c0_55] : memref<352x32xf32, #tpu.memory_space<vmem>>, vector<8x32xf32>
    tpu.vector_store %arg4[%c214, %c0_55], %83 {strides = array<i32>} : memref<352x32xf32, #tpu.memory_space<vmem>>, vector<8x32xf32>,
    %c320 = arith.constant 320 : index
    %c0_56 = arith.constant 0 : index
    %85 = tpu.strided_load %arg3[%c320, %c0_56] {strides = array<i32: 2, 1>} : memref<512x32xf32, #tpu.memory_space<vmem>>, vector<8x32xf32>
    %c321 = arith.constant 321 : index
    %c0_57 = arith.constant 0 : index
    %86 = tpu.strided_load %arg3[%c321, %c0_57] {strides = array<i32: 2, 1>} : memref<512x32xf32, #tpu.memory_space<vmem>>, vector<8x32xf32>
    %87 = arith.maximumf %85, %86 : vector<8x32xf32>
    %c336 = arith.constant 336 : index
    %c0_58 = arith.constant 0 : index
    %88 = tpu.strided_load %arg3[%c336, %c0_58] {strides = array<i32: 2, 1>} : memref<512x32xf32, #tpu.memory_space<vmem>>, vector<8x32xf32>
    %c337 = arith.constant 337 : index
    %c0_59 = arith.constant 0 : index
    %89 = tpu.strided_load %arg3[%c337, %c0_59] {strides = array<i32: 2, 1>} : memref<512x32xf32, #tpu.memory_space<vmem>>, vector<8x32xf32>
    %90 = arith.maximumf %88, %89 : vector<8x32xf32>
    %91 = arith.maximumf %87, %90 : vector<8x32xf32>
    %c226 = arith.constant 226 : index
    %c0_60 = arith.constant 0 : index
    %92 = vector.load %arg4[%c226, %c0_60] : memref<352x32xf32, #tpu.memory_space<vmem>>, vector<8x32xf32>
    tpu.vector_store %arg4[%c226, %c0_60], %91 {strides = array<i32>} : memref<352x32xf32, #tpu.memory_space<vmem>>, vector<8x32xf32>,
    %c352 = arith.constant 352 : index
    %c0_61 = arith.constant 0 : index
    %93 = tpu.strided_load %arg3[%c352, %c0_61] {strides = array<i32: 2, 1>} : memref<512x32xf32, #tpu.memory_space<vmem>>, vector<8x32xf32>
    %c353 = arith.constant 353 : index
    %c0_62 = arith.constant 0 : index
    %94 = tpu.strided_load %arg3[%c353, %c0_62] {strides = array<i32: 2, 1>} : memref<512x32xf32, #tpu.memory_space<vmem>>, vector<8x32xf32>
    %95 = arith.maximumf %93, %94 : vector<8x32xf32>
    %c368 = arith.constant 368 : index
    %c0_63 = arith.constant 0 : index
    %96 = tpu.strided_load %arg3[%c368, %c0_63] {strides = array<i32: 2, 1>} : memref<512x32xf32, #tpu.memory_space<vmem>>, vector<8x32xf32>
    %c369 = arith.constant 369 : index
    %c0_64 = arith.constant 0 : index
    %97 = tpu.strided_load %arg3[%c369, %c0_64] {strides = array<i32: 2, 1>} : memref<512x32xf32, #tpu.memory_space<vmem>>, vector<8x32xf32>
    %98 = arith.maximumf %96, %97 : vector<8x32xf32>
    %99 = arith.maximumf %95, %98 : vector<8x32xf32>
    %c238 = arith.constant 238 : index
    %c0_65 = arith.constant 0 : index
    %100 = vector.load %arg4[%c238, %c0_65] : memref<352x32xf32, #tpu.memory_space<vmem>>, vector<8x32xf32>
    tpu.vector_store %arg4[%c238, %c0_65], %99 {strides = array<i32>} : memref<352x32xf32, #tpu.memory_space<vmem>>, vector<8x32xf32>,
    %c384 = arith.constant 384 : index
    %c0_66 = arith.constant 0 : index
    %101 = tpu.strided_load %arg3[%c384, %c0_66] {strides = array<i32: 2, 1>} : memref<512x32xf32, #tpu.memory_space<vmem>>, vector<8x32xf32>
    %c385 = arith.constant 385 : index
    %c0_67 = arith.constant 0 : index
    %102 = tpu.strided_load %arg3[%c385, %c0_67] {strides = array<i32: 2, 1>} : memref<512x32xf32, #tpu.memory_space<vmem>>, vector<8x32xf32>
    %103 = arith.maximumf %101, %102 : vector<8x32xf32>
    %c400 = arith.constant 400 : index
    %c0_68 = arith.constant 0 : index
    %104 = tpu.strided_load %arg3[%c400, %c0_68] {strides = array<i32: 2, 1>} : memref<512x32xf32, #tpu.memory_space<vmem>>, vector<8x32xf32>
    %c401 = arith.constant 401 : index
    %c0_69 = arith.constant 0 : index
    %105 = tpu.strided_load %arg3[%c401, %c0_69] {strides = array<i32: 2, 1>} : memref<512x32xf32, #tpu.memory_space<vmem>>, vector<8x32xf32>
    %106 = arith.maximumf %104, %105 : vector<8x32xf32>
    %107 = arith.maximumf %103, %106 : vector<8x32xf32>
    %c250 = arith.constant 250 : index
    %c0_70 = arith.constant 0 : index
    %108 = vector.load %arg4[%c250, %c0_70] : memref<352x32xf32, #tpu.memory_space<vmem>>, vector<8x32xf32>
    tpu.vector_store %arg4[%c250, %c0_70], %107 {strides = array<i32>} : memref<352x32xf32, #tpu.memory_space<vmem>>, vector<8x32xf32>,
    %c416 = arith.constant 416 : index
    %c0_71 = arith.constant 0 : index
    %109 = tpu.strided_load %arg3[%c416, %c0_71] {strides = array<i32: 2, 1>} : memref<512x32xf32, #tpu.memory_space<vmem>>, vector<8x32xf32>
    %c417 = arith.constant 417 : index
    %c0_72 = arith.constant 0 : index
    %110 = tpu.strided_load %arg3[%c417, %c0_72] {strides = array<i32: 2, 1>} : memref<512x32xf32, #tpu.memory_space<vmem>>, vector<8x32xf32>
    %111 = arith.maximumf %109, %110 : vector<8x32xf32>
    %c432 = arith.constant 432 : index
    %c0_73 = arith.constant 0 : index
    %112 = tpu.strided_load %arg3[%c432, %c0_73] {strides = array<i32: 2, 1>} : memref<512x32xf32, #tpu.memory_space<vmem>>, vector<8x32xf32>
    %c433 = arith.constant 433 : index
    %c0_74 = arith.constant 0 : index
    %113 = tpu.strided_load %arg3[%c433, %c0_74] {strides = array<i32: 2, 1>} : memref<512x32xf32, #tpu.memory_space<vmem>>, vector<8x32xf32>
    %114 = arith.maximumf %112, %113 : vector<8x32xf32>
    %115 = arith.maximumf %111, %114 : vector<8x32xf32>
    %c262 = arith.constant 262 : index
    %c0_75 = arith.constant 0 : index
    %116 = vector.load %arg4[%c262, %c0_75] : memref<352x32xf32, #tpu.memory_space<vmem>>, vector<8x32xf32>
    tpu.vector_store %arg4[%c262, %c0_75], %115 {strides = array<i32>} : memref<352x32xf32, #tpu.memory_space<vmem>>, vector<8x32xf32>,
    %c448 = arith.constant 448 : index
    %c0_76 = arith.constant 0 : index
    %117 = tpu.strided_load %arg3[%c448, %c0_76] {strides = array<i32: 2, 1>} : memref<512x32xf32, #tpu.memory_space<vmem>>, vector<8x32xf32>
    %c449 = arith.constant 449 : index
    %c0_77 = arith.constant 0 : index
    %118 = tpu.strided_load %arg3[%c449, %c0_77] {strides = array<i32: 2, 1>} : memref<512x32xf32, #tpu.memory_space<vmem>>, vector<8x32xf32>
    %119 = arith.maximumf %117, %118 : vector<8x32xf32>
    %c464 = arith.constant 464 : index
    %c0_78 = arith.constant 0 : index
    %120 = tpu.strided_load %arg3[%c464, %c0_78] {strides = array<i32: 2, 1>} : memref<512x32xf32, #tpu.memory_space<vmem>>, vector<8x32xf32>
    %c465 = arith.constant 465 : index
    %c0_79 = arith.constant 0 : index
    %121 = tpu.strided_load %arg3[%c465, %c0_79] {strides = array<i32: 2, 1>} : memref<512x32xf32, #tpu.memory_space<vmem>>, vector<8x32xf32>
    %122 = arith.maximumf %120, %121 : vector<8x32xf32>
    %123 = arith.maximumf %119, %122 : vector<8x32xf32>
    %c274 = arith.constant 274 : index
    %c0_80 = arith.constant 0 : index
    %124 = vector.load %arg4[%c274, %c0_80] : memref<352x32xf32, #tpu.memory_space<vmem>>, vector<8x32xf32>
    tpu.vector_store %arg4[%c274, %c0_80], %123 {strides = array<i32>} : memref<352x32xf32, #tpu.memory_space<vmem>>, vector<8x32xf32>,
    %c480 = arith.constant 480 : index
    %c0_81 = arith.constant 0 : index
    %125 = tpu.strided_load %arg3[%c480, %c0_81] {strides = array<i32: 2, 1>} : memref<512x32xf32, #tpu.memory_space<vmem>>, vector<8x32xf32>
    %c481 = arith.constant 481 : index
    %c0_82 = arith.constant 0 : index
    %126 = tpu.strided_load %arg3[%c481, %c0_82] {strides = array<i32: 2, 1>} : memref<512x32xf32, #tpu.memory_space<vmem>>, vector<8x32xf32>
    %127 = arith.maximumf %125, %126 : vector<8x32xf32>
    %c496 = arith.constant 496 : index
    %c0_83 = arith.constant 0 : index
    %128 = tpu.strided_load %arg3[%c496, %c0_83] {strides = array<i32: 2, 1>} : memref<512x32xf32, #tpu.memory_space<vmem>>, vector<8x32xf32>
    %c497 = arith.constant 497 : index
    %c0_84 = arith.constant 0 : index
    %129 = tpu.strided_load %arg3[%c497, %c0_84] {strides = array<i32: 2, 1>} : memref<512x32xf32, #tpu.memory_space<vmem>>, vector<8x32xf32>
    %130 = arith.maximumf %128, %129 : vector<8x32xf32>
    %131 = arith.maximumf %127, %130 : vector<8x32xf32>
    %c286 = arith.constant 286 : index
    %c0_85 = arith.constant 0 : index
    %132 = vector.load %arg4[%c286, %c0_85] : memref<352x32xf32, #tpu.memory_space<vmem>>, vector<8x32xf32>
    tpu.vector_store %arg4[%c286, %c0_85], %131 {strides = array<i32>} : memref<352x32xf32, #tpu.memory_space<vmem>>, vector<8x32xf32>,
    %c276 = arith.constant 276 : index
    %c0_86 = arith.constant 0 : index
    %133 = vector.load %arg1[%c276, %c0_86] : memref<608x32xf32, #tpu.memory_space<vmem>>, vector<1x32xf32>
    %c0_i32_87 = arith.constant 0 : i32
    %c3_i32 = arith.constant 3 : i32
    %134 = arith.addi %c0_i32_87, %c3_i32 : i32
    %c1_i32_88 = arith.constant 1 : i32
    scf.for %arg7 = %c0_i32_87 to %134 step %c1_i32_88  : i32 {
      %c96_i32 = arith.constant 96 : i32
      %286 = arith.muli %arg7, %c96_i32 : i32
      %cst_200 = arith.constant 0.000000e+00 : f32
      %287 = vector.broadcast %cst_200 : f32 to vector<96x32xf32>
      %c0_i32_201 = arith.constant 0 : i32
      %c5_i32 = arith.constant 5 : i32
      %288 = arith.addi %c0_i32_201, %c5_i32 : i32
      %c1_i32_202 = arith.constant 1 : i32
      %289 = scf.for %arg8 = %c0_i32_201 to %288 step %c1_i32_202 iter_args(%arg9 = %287) -> (vector<96x32xf32>)  : i32 {
        %c0_i32_206 = arith.constant 0 : i32
        %c5_i32_207 = arith.constant 5 : i32
        %296 = arith.addi %c0_i32_206, %c5_i32_207 : i32
        %c1_i32_208 = arith.constant 1 : i32
        %297 = scf.for %arg10 = %c0_i32_206 to %296 step %c1_i32_208 iter_args(%arg11 = %arg9) -> (vector<96x32xf32>)  : i32 {
          %c2_i32 = arith.constant 2 : i32
          %298 = arith.subi %arg8, %c2_i32 : i32
          %c12_i32 = arith.constant 12 : i32
          %299 = arith.muli %298, %c12_i32 : i32
          %c2_i32_210 = arith.constant 2 : i32
          %300 = arith.subi %arg10, %c2_i32_210 : i32
          %301 = arith.addi %299, %300 : i32
          %c5_i32_211 = arith.constant 5 : i32
          %302 = arith.muli %arg8, %c5_i32_211 : i32
          %303 = arith.addi %302, %arg10 : i32
          %c32_i32 = arith.constant 32 : i32
          %304 = arith.addi %c32_i32, %286 : i32
          %305 = arith.addi %304, %301 : i32
          %306 = arith.index_cast %305 : i32 to index
          %c0_212 = arith.constant 0 : index
          %307 = vector.load %arg4[%306, %c0_212] : memref<352x32xf32, #tpu.memory_space<vmem>>, vector<96x32xf32>
          %c8_i32 = arith.constant 8 : i32
          %308 = arith.muli %303, %c8_i32 : i32
          %c76_i32 = arith.constant 76 : i32
          %309 = arith.addi %c76_i32, %308 : i32
          %310 = arith.index_cast %309 : i32 to index
          %c0_213 = arith.constant 0 : index
          %311 = vector.load %arg1[%310, %c0_213] : memref<608x32xf32, #tpu.memory_space<vmem>>, vector<32x32xf32>
          %cst_214 = arith.constant dense<0.000000e+00> : vector<96x32xf32>
          %312 = tpu.matmul %307, %311, %cst_214 {dimension_numbers = #tpu.dot_dimension_numbers<[1], [0], [0], [1], [0, 0, 1, 1], [], []>} : vector<96x32xf32>, vector<32x32xf32>, vector<96x32xf32> -> vector<96x32xf32>
          %313 = arith.addf %arg11, %312 : vector<96x32xf32>
          scf.yield %313 : vector<96x32xf32>
        }
        %c5_i32_209 = arith.constant 5 : i32
        scf.yield %297 : vector<96x32xf32>
      }
      %c5_i32_203 = arith.constant 5 : i32
      %290 = vector.broadcast %133 : vector<1x32xf32> to vector<96x32xf32>
      %291 = arith.addf %289, %290 : vector<96x32xf32>
      %cst_204 = arith.constant 0.000000e+00 : f32
      %292 = vector.broadcast %cst_204 : f32 to vector<96x32xf32>
      %293 = arith.maximumf %291, %292 : vector<96x32xf32>
      %294 = arith.index_cast %286 : i32 to index
      %c0_205 = arith.constant 0 : index
      %295 = vector.load %arg5[%294, %c0_205] : memref<288x32xf32, #tpu.memory_space<vmem>>, vector<96x32xf32>
      tpu.vector_store %arg5[%294, %c0_205], %293 {strides = array<i32>} : memref<288x32xf32, #tpu.memory_space<vmem>>, vector<96x32xf32>,
    }
    %c3_i32_89 = arith.constant 3 : i32
    %c26 = arith.constant 26 : index
    %c0_90 = arith.constant 0 : index
    %135 = tpu.strided_load %arg5[%c26, %c0_90] {strides = array<i32: 2, 1>} : memref<288x32xf32, #tpu.memory_space<vmem>>, vector<4x32xf32>
    %c27 = arith.constant 27 : index
    %c0_91 = arith.constant 0 : index
    %136 = tpu.strided_load %arg5[%c27, %c0_91] {strides = array<i32: 2, 1>} : memref<288x32xf32, #tpu.memory_space<vmem>>, vector<4x32xf32>
    %137 = arith.maximumf %135, %136 : vector<4x32xf32>
    %c38 = arith.constant 38 : index
    %c0_92 = arith.constant 0 : index
    %138 = tpu.strided_load %arg5[%c38, %c0_92] {strides = array<i32: 2, 1>} : memref<288x32xf32, #tpu.memory_space<vmem>>, vector<4x32xf32>
    %c39 = arith.constant 39 : index
    %c0_93 = arith.constant 0 : index
    %139 = tpu.strided_load %arg5[%c39, %c0_93] {strides = array<i32: 2, 1>} : memref<288x32xf32, #tpu.memory_space<vmem>>, vector<4x32xf32>
    %140 = arith.maximumf %138, %139 : vector<4x32xf32>
    %141 = arith.maximumf %137, %140 : vector<4x32xf32>
    %c0_94 = arith.constant 0 : index
    %c0_95 = arith.constant 0 : index
    %142 = vector.load %arg6[%c0_94, %c0_95] : memref<32x32xf32, #tpu.memory_space<vmem>>, vector<4x32xf32>
    tpu.vector_store %arg6[%c0_94, %c0_95], %141 {strides = array<i32>} : memref<32x32xf32, #tpu.memory_space<vmem>>, vector<4x32xf32>,
    %c50 = arith.constant 50 : index
    %c0_96 = arith.constant 0 : index
    %143 = tpu.strided_load %arg5[%c50, %c0_96] {strides = array<i32: 2, 1>} : memref<288x32xf32, #tpu.memory_space<vmem>>, vector<4x32xf32>
    %c51 = arith.constant 51 : index
    %c0_97 = arith.constant 0 : index
    %144 = tpu.strided_load %arg5[%c51, %c0_97] {strides = array<i32: 2, 1>} : memref<288x32xf32, #tpu.memory_space<vmem>>, vector<4x32xf32>
    %145 = arith.maximumf %143, %144 : vector<4x32xf32>
    %c62 = arith.constant 62 : index
    %c0_98 = arith.constant 0 : index
    %146 = tpu.strided_load %arg5[%c62, %c0_98] {strides = array<i32: 2, 1>} : memref<288x32xf32, #tpu.memory_space<vmem>>, vector<4x32xf32>
    %c63 = arith.constant 63 : index
    %c0_99 = arith.constant 0 : index
    %147 = tpu.strided_load %arg5[%c63, %c0_99] {strides = array<i32: 2, 1>} : memref<288x32xf32, #tpu.memory_space<vmem>>, vector<4x32xf32>
    %148 = arith.maximumf %146, %147 : vector<4x32xf32>
    %149 = arith.maximumf %145, %148 : vector<4x32xf32>
    %c4 = arith.constant 4 : index
    %c0_100 = arith.constant 0 : index
    %150 = vector.load %arg6[%c4, %c0_100] : memref<32x32xf32, #tpu.memory_space<vmem>>, vector<4x32xf32>
    tpu.vector_store %arg6[%c4, %c0_100], %149 {strides = array<i32>} : memref<32x32xf32, #tpu.memory_space<vmem>>, vector<4x32xf32>,
    %c74 = arith.constant 74 : index
    %c0_101 = arith.constant 0 : index
    %151 = tpu.strided_load %arg5[%c74, %c0_101] {strides = array<i32: 2, 1>} : memref<288x32xf32, #tpu.memory_space<vmem>>, vector<4x32xf32>
    %c75_102 = arith.constant 75 : index
    %c0_103 = arith.constant 0 : index
    %152 = tpu.strided_load %arg5[%c75_102, %c0_103] {strides = array<i32: 2, 1>} : memref<288x32xf32, #tpu.memory_space<vmem>>, vector<4x32xf32>
    %153 = arith.maximumf %151, %152 : vector<4x32xf32>
    %c86 = arith.constant 86 : index
    %c0_104 = arith.constant 0 : index
    %154 = tpu.strided_load %arg5[%c86, %c0_104] {strides = array<i32: 2, 1>} : memref<288x32xf32, #tpu.memory_space<vmem>>, vector<4x32xf32>
    %c87 = arith.constant 87 : index
    %c0_105 = arith.constant 0 : index
    %155 = tpu.strided_load %arg5[%c87, %c0_105] {strides = array<i32: 2, 1>} : memref<288x32xf32, #tpu.memory_space<vmem>>, vector<4x32xf32>
    %156 = arith.maximumf %154, %155 : vector<4x32xf32>
    %157 = arith.maximumf %153, %156 : vector<4x32xf32>
    %c8 = arith.constant 8 : index
    %c0_106 = arith.constant 0 : index
    %158 = vector.load %arg6[%c8, %c0_106] : memref<32x32xf32, #tpu.memory_space<vmem>>, vector<4x32xf32>
    tpu.vector_store %arg6[%c8, %c0_106], %157 {strides = array<i32>} : memref<32x32xf32, #tpu.memory_space<vmem>>, vector<4x32xf32>,
    %c98 = arith.constant 98 : index
    %c0_107 = arith.constant 0 : index
    %159 = tpu.strided_load %arg5[%c98, %c0_107] {strides = array<i32: 2, 1>} : memref<288x32xf32, #tpu.memory_space<vmem>>, vector<4x32xf32>
    %c99 = arith.constant 99 : index
    %c0_108 = arith.constant 0 : index
    %160 = tpu.strided_load %arg5[%c99, %c0_108] {strides = array<i32: 2, 1>} : memref<288x32xf32, #tpu.memory_space<vmem>>, vector<4x32xf32>
    %161 = arith.maximumf %159, %160 : vector<4x32xf32>
    %c110 = arith.constant 110 : index
    %c0_109 = arith.constant 0 : index
    %162 = tpu.strided_load %arg5[%c110, %c0_109] {strides = array<i32: 2, 1>} : memref<288x32xf32, #tpu.memory_space<vmem>>, vector<4x32xf32>
    %c111 = arith.constant 111 : index
    %c0_110 = arith.constant 0 : index
    %163 = tpu.strided_load %arg5[%c111, %c0_110] {strides = array<i32: 2, 1>} : memref<288x32xf32, #tpu.memory_space<vmem>>, vector<4x32xf32>
    %164 = arith.maximumf %162, %163 : vector<4x32xf32>
    %165 = arith.maximumf %161, %164 : vector<4x32xf32>
    %c12 = arith.constant 12 : index
    %c0_111 = arith.constant 0 : index
    %166 = vector.load %arg6[%c12, %c0_111] : memref<32x32xf32, #tpu.memory_space<vmem>>, vector<4x32xf32>
    tpu.vector_store %arg6[%c12, %c0_111], %165 {strides = array<i32>} : memref<32x32xf32, #tpu.memory_space<vmem>>, vector<4x32xf32>,
    %c170 = arith.constant 170 : index
    %c0_112 = arith.constant 0 : index
    %167 = tpu.strided_load %arg5[%c170, %c0_112] {strides = array<i32: 2, 1>} : memref<288x32xf32, #tpu.memory_space<vmem>>, vector<4x32xf32>
    %c171 = arith.constant 171 : index
    %c0_113 = arith.constant 0 : index
    %168 = tpu.strided_load %arg5[%c171, %c0_113] {strides = array<i32: 2, 1>} : memref<288x32xf32, #tpu.memory_space<vmem>>, vector<4x32xf32>
    %169 = arith.maximumf %167, %168 : vector<4x32xf32>
    %c182 = arith.constant 182 : index
    %c0_114 = arith.constant 0 : index
    %170 = tpu.strided_load %arg5[%c182, %c0_114] {strides = array<i32: 2, 1>} : memref<288x32xf32, #tpu.memory_space<vmem>>, vector<4x32xf32>
    %c183 = arith.constant 183 : index
    %c0_115 = arith.constant 0 : index
    %171 = tpu.strided_load %arg5[%c183, %c0_115] {strides = array<i32: 2, 1>} : memref<288x32xf32, #tpu.memory_space<vmem>>, vector<4x32xf32>
    %172 = arith.maximumf %170, %171 : vector<4x32xf32>
    %173 = arith.maximumf %169, %172 : vector<4x32xf32>
    %c16_116 = arith.constant 16 : index
    %c0_117 = arith.constant 0 : index
    %174 = vector.load %arg6[%c16_116, %c0_117] : memref<32x32xf32, #tpu.memory_space<vmem>>, vector<4x32xf32>
    tpu.vector_store %arg6[%c16_116, %c0_117], %173 {strides = array<i32>} : memref<32x32xf32, #tpu.memory_space<vmem>>, vector<4x32xf32>,
    %c194 = arith.constant 194 : index
    %c0_118 = arith.constant 0 : index
    %175 = tpu.strided_load %arg5[%c194, %c0_118] {strides = array<i32: 2, 1>} : memref<288x32xf32, #tpu.memory_space<vmem>>, vector<4x32xf32>
    %c195 = arith.constant 195 : index
    %c0_119 = arith.constant 0 : index
    %176 = tpu.strided_load %arg5[%c195, %c0_119] {strides = array<i32: 2, 1>} : memref<288x32xf32, #tpu.memory_space<vmem>>, vector<4x32xf32>
    %177 = arith.maximumf %175, %176 : vector<4x32xf32>
    %c206 = arith.constant 206 : index
    %c0_120 = arith.constant 0 : index
    %178 = tpu.strided_load %arg5[%c206, %c0_120] {strides = array<i32: 2, 1>} : memref<288x32xf32, #tpu.memory_space<vmem>>, vector<4x32xf32>
    %c207 = arith.constant 207 : index
    %c0_121 = arith.constant 0 : index
    %179 = tpu.strided_load %arg5[%c207, %c0_121] {strides = array<i32: 2, 1>} : memref<288x32xf32, #tpu.memory_space<vmem>>, vector<4x32xf32>
    %180 = arith.maximumf %178, %179 : vector<4x32xf32>
    %181 = arith.maximumf %177, %180 : vector<4x32xf32>
    %c20 = arith.constant 20 : index
    %c0_122 = arith.constant 0 : index
    %182 = vector.load %arg6[%c20, %c0_122] : memref<32x32xf32, #tpu.memory_space<vmem>>, vector<4x32xf32>
    tpu.vector_store %arg6[%c20, %c0_122], %181 {strides = array<i32>} : memref<32x32xf32, #tpu.memory_space<vmem>>, vector<4x32xf32>,
    %c218 = arith.constant 218 : index
    %c0_123 = arith.constant 0 : index
    %183 = tpu.strided_load %arg5[%c218, %c0_123] {strides = array<i32: 2, 1>} : memref<288x32xf32, #tpu.memory_space<vmem>>, vector<4x32xf32>
    %c219 = arith.constant 219 : index
    %c0_124 = arith.constant 0 : index
    %184 = tpu.strided_load %arg5[%c219, %c0_124] {strides = array<i32: 2, 1>} : memref<288x32xf32, #tpu.memory_space<vmem>>, vector<4x32xf32>
    %185 = arith.maximumf %183, %184 : vector<4x32xf32>
    %c230 = arith.constant 230 : index
    %c0_125 = arith.constant 0 : index
    %186 = tpu.strided_load %arg5[%c230, %c0_125] {strides = array<i32: 2, 1>} : memref<288x32xf32, #tpu.memory_space<vmem>>, vector<4x32xf32>
    %c231 = arith.constant 231 : index
    %c0_126 = arith.constant 0 : index
    %187 = tpu.strided_load %arg5[%c231, %c0_126] {strides = array<i32: 2, 1>} : memref<288x32xf32, #tpu.memory_space<vmem>>, vector<4x32xf32>
    %188 = arith.maximumf %186, %187 : vector<4x32xf32>
    %189 = arith.maximumf %185, %188 : vector<4x32xf32>
    %c24 = arith.constant 24 : index
    %c0_127 = arith.constant 0 : index
    %190 = vector.load %arg6[%c24, %c0_127] : memref<32x32xf32, #tpu.memory_space<vmem>>, vector<4x32xf32>
    tpu.vector_store %arg6[%c24, %c0_127], %189 {strides = array<i32>} : memref<32x32xf32, #tpu.memory_space<vmem>>, vector<4x32xf32>,
    %c242 = arith.constant 242 : index
    %c0_128 = arith.constant 0 : index
    %191 = tpu.strided_load %arg5[%c242, %c0_128] {strides = array<i32: 2, 1>} : memref<288x32xf32, #tpu.memory_space<vmem>>, vector<4x32xf32>
    %c243 = arith.constant 243 : index
    %c0_129 = arith.constant 0 : index
    %192 = tpu.strided_load %arg5[%c243, %c0_129] {strides = array<i32: 2, 1>} : memref<288x32xf32, #tpu.memory_space<vmem>>, vector<4x32xf32>
    %193 = arith.maximumf %191, %192 : vector<4x32xf32>
    %c254 = arith.constant 254 : index
    %c0_130 = arith.constant 0 : index
    %194 = tpu.strided_load %arg5[%c254, %c0_130] {strides = array<i32: 2, 1>} : memref<288x32xf32, #tpu.memory_space<vmem>>, vector<4x32xf32>
    %c255 = arith.constant 255 : index
    %c0_131 = arith.constant 0 : index
    %195 = tpu.strided_load %arg5[%c255, %c0_131] {strides = array<i32: 2, 1>} : memref<288x32xf32, #tpu.memory_space<vmem>>, vector<4x32xf32>
    %196 = arith.maximumf %194, %195 : vector<4x32xf32>
    %197 = arith.maximumf %193, %196 : vector<4x32xf32>
    %c28 = arith.constant 28 : index
    %c0_132 = arith.constant 0 : index
    %198 = vector.load %arg6[%c28, %c0_132] : memref<32x32xf32, #tpu.memory_space<vmem>>, vector<4x32xf32>
    tpu.vector_store %arg6[%c28, %c0_132], %197 {strides = array<i32>} : memref<32x32xf32, #tpu.memory_space<vmem>>, vector<4x32xf32>,
    %cst_133 = arith.constant 0.000000e+00 : f32
    %199 = vector.broadcast %cst_133 : f32 to vector<2x32xf32>
    %c0_134 = arith.constant 0 : index
    %c0_135 = arith.constant 0 : index
    %200 = tpu.strided_load %arg6[%c0_134, %c0_135] {strides = array<i32: 16, 1>} : memref<32x32xf32, #tpu.memory_space<vmem>>, vector<2x32xf32>
    %c277 = arith.constant 277 : index
    %c0_136 = arith.constant 0 : index
    %201 = vector.load %arg1[%c277, %c0_136] : memref<608x32xf32, #tpu.memory_space<vmem>>, vector<32x32xf32>
    %cst_137 = arith.constant dense<0.000000e+00> : vector<2x32xf32>
    %202 = tpu.matmul %200, %201, %cst_137 {dimension_numbers = #tpu.dot_dimension_numbers<[1], [0], [0], [1], [0, 0, 1, 1], [], []>} : vector<2x32xf32>, vector<32x32xf32>, vector<2x32xf32> -> vector<2x32xf32>
    %203 = arith.addf %199, %202 : vector<2x32xf32>
    %c1_138 = arith.constant 1 : index
    %c0_139 = arith.constant 0 : index
    %204 = tpu.strided_load %arg6[%c1_138, %c0_139] {strides = array<i32: 16, 1>} : memref<32x32xf32, #tpu.memory_space<vmem>>, vector<2x32xf32>
    %c293 = arith.constant 293 : index
    %c0_140 = arith.constant 0 : index
    %205 = vector.load %arg1[%c293, %c0_140] : memref<608x32xf32, #tpu.memory_space<vmem>>, vector<32x32xf32>
    %cst_141 = arith.constant dense<0.000000e+00> : vector<2x32xf32>
    %206 = tpu.matmul %204, %205, %cst_141 {dimension_numbers = #tpu.dot_dimension_numbers<[1], [0], [0], [1], [0, 0, 1, 1], [], []>} : vector<2x32xf32>, vector<32x32xf32>, vector<2x32xf32> -> vector<2x32xf32>
    %207 = arith.addf %203, %206 : vector<2x32xf32>
    %c2 = arith.constant 2 : index
    %c0_142 = arith.constant 0 : index
    %208 = tpu.strided_load %arg6[%c2, %c0_142] {strides = array<i32: 16, 1>} : memref<32x32xf32, #tpu.memory_space<vmem>>, vector<2x32xf32>
    %c309 = arith.constant 309 : index
    %c0_143 = arith.constant 0 : index
    %209 = vector.load %arg1[%c309, %c0_143] : memref<608x32xf32, #tpu.memory_space<vmem>>, vector<32x32xf32>
    %cst_144 = arith.constant dense<0.000000e+00> : vector<2x32xf32>
    %210 = tpu.matmul %208, %209, %cst_144 {dimension_numbers = #tpu.dot_dimension_numbers<[1], [0], [0], [1], [0, 0, 1, 1], [], []>} : vector<2x32xf32>, vector<32x32xf32>, vector<2x32xf32> -> vector<2x32xf32>
    %211 = arith.addf %207, %210 : vector<2x32xf32>
    %c3 = arith.constant 3 : index
    %c0_145 = arith.constant 0 : index
    %212 = tpu.strided_load %arg6[%c3, %c0_145] {strides = array<i32: 16, 1>} : memref<32x32xf32, #tpu.memory_space<vmem>>, vector<2x32xf32>
    %c325 = arith.constant 325 : index
    %c0_146 = arith.constant 0 : index
    %213 = vector.load %arg1[%c325, %c0_146] : memref<608x32xf32, #tpu.memory_space<vmem>>, vector<32x32xf32>
    %cst_147 = arith.constant dense<0.000000e+00> : vector<2x32xf32>
    %214 = tpu.matmul %212, %213, %cst_147 {dimension_numbers = #tpu.dot_dimension_numbers<[1], [0], [0], [1], [0, 0, 1, 1], [], []>} : vector<2x32xf32>, vector<32x32xf32>, vector<2x32xf32> -> vector<2x32xf32>
    %215 = arith.addf %211, %214 : vector<2x32xf32>
    %c4_148 = arith.constant 4 : index
    %c0_149 = arith.constant 0 : index
    %216 = tpu.strided_load %arg6[%c4_148, %c0_149] {strides = array<i32: 16, 1>} : memref<32x32xf32, #tpu.memory_space<vmem>>, vector<2x32xf32>
    %c341 = arith.constant 341 : index
    %c0_150 = arith.constant 0 : index
    %217 = vector.load %arg1[%c341, %c0_150] : memref<608x32xf32, #tpu.memory_space<vmem>>, vector<32x32xf32>
    %cst_151 = arith.constant dense<0.000000e+00> : vector<2x32xf32>
    %218 = tpu.matmul %216, %217, %cst_151 {dimension_numbers = #tpu.dot_dimension_numbers<[1], [0], [0], [1], [0, 0, 1, 1], [], []>} : vector<2x32xf32>, vector<32x32xf32>, vector<2x32xf32> -> vector<2x32xf32>
    %219 = arith.addf %215, %218 : vector<2x32xf32>
    %c5 = arith.constant 5 : index
    %c0_152 = arith.constant 0 : index
    %220 = tpu.strided_load %arg6[%c5, %c0_152] {strides = array<i32: 16, 1>} : memref<32x32xf32, #tpu.memory_space<vmem>>, vector<2x32xf32>
    %c357 = arith.constant 357 : index
    %c0_153 = arith.constant 0 : index
    %221 = vector.load %arg1[%c357, %c0_153] : memref<608x32xf32, #tpu.memory_space<vmem>>, vector<32x32xf32>
    %cst_154 = arith.constant dense<0.000000e+00> : vector<2x32xf32>
    %222 = tpu.matmul %220, %221, %cst_154 {dimension_numbers = #tpu.dot_dimension_numbers<[1], [0], [0], [1], [0, 0, 1, 1], [], []>} : vector<2x32xf32>, vector<32x32xf32>, vector<2x32xf32> -> vector<2x32xf32>
    %223 = arith.addf %219, %222 : vector<2x32xf32>
    %c6 = arith.constant 6 : index
    %c0_155 = arith.constant 0 : index
    %224 = tpu.strided_load %arg6[%c6, %c0_155] {strides = array<i32: 16, 1>} : memref<32x32xf32, #tpu.memory_space<vmem>>, vector<2x32xf32>
    %c373 = arith.constant 373 : index
    %c0_156 = arith.constant 0 : index
    %225 = vector.load %arg1[%c373, %c0_156] : memref<608x32xf32, #tpu.memory_space<vmem>>, vector<32x32xf32>
    %cst_157 = arith.constant dense<0.000000e+00> : vector<2x32xf32>
    %226 = tpu.matmul %224, %225, %cst_157 {dimension_numbers = #tpu.dot_dimension_numbers<[1], [0], [0], [1], [0, 0, 1, 1], [], []>} : vector<2x32xf32>, vector<32x32xf32>, vector<2x32xf32> -> vector<2x32xf32>
    %227 = arith.addf %223, %226 : vector<2x32xf32>
    %c7 = arith.constant 7 : index
    %c0_158 = arith.constant 0 : index
    %228 = tpu.strided_load %arg6[%c7, %c0_158] {strides = array<i32: 16, 1>} : memref<32x32xf32, #tpu.memory_space<vmem>>, vector<2x32xf32>
    %c389 = arith.constant 389 : index
    %c0_159 = arith.constant 0 : index
    %229 = vector.load %arg1[%c389, %c0_159] : memref<608x32xf32, #tpu.memory_space<vmem>>, vector<32x32xf32>
    %cst_160 = arith.constant dense<0.000000e+00> : vector<2x32xf32>
    %230 = tpu.matmul %228, %229, %cst_160 {dimension_numbers = #tpu.dot_dimension_numbers<[1], [0], [0], [1], [0, 0, 1, 1], [], []>} : vector<2x32xf32>, vector<32x32xf32>, vector<2x32xf32> -> vector<2x32xf32>
    %231 = arith.addf %227, %230 : vector<2x32xf32>
    %c8_161 = arith.constant 8 : index
    %c0_162 = arith.constant 0 : index
    %232 = tpu.strided_load %arg6[%c8_161, %c0_162] {strides = array<i32: 16, 1>} : memref<32x32xf32, #tpu.memory_space<vmem>>, vector<2x32xf32>
    %c405 = arith.constant 405 : index
    %c0_163 = arith.constant 0 : index
    %233 = vector.load %arg1[%c405, %c0_163] : memref<608x32xf32, #tpu.memory_space<vmem>>, vector<32x32xf32>
    %cst_164 = arith.constant dense<0.000000e+00> : vector<2x32xf32>
    %234 = tpu.matmul %232, %233, %cst_164 {dimension_numbers = #tpu.dot_dimension_numbers<[1], [0], [0], [1], [0, 0, 1, 1], [], []>} : vector<2x32xf32>, vector<32x32xf32>, vector<2x32xf32> -> vector<2x32xf32>
    %235 = arith.addf %231, %234 : vector<2x32xf32>
    %c9 = arith.constant 9 : index
    %c0_165 = arith.constant 0 : index
    %236 = tpu.strided_load %arg6[%c9, %c0_165] {strides = array<i32: 16, 1>} : memref<32x32xf32, #tpu.memory_space<vmem>>, vector<2x32xf32>
    %c421 = arith.constant 421 : index
    %c0_166 = arith.constant 0 : index
    %237 = vector.load %arg1[%c421, %c0_166] : memref<608x32xf32, #tpu.memory_space<vmem>>, vector<32x32xf32>
    %cst_167 = arith.constant dense<0.000000e+00> : vector<2x32xf32>
    %238 = tpu.matmul %236, %237, %cst_167 {dimension_numbers = #tpu.dot_dimension_numbers<[1], [0], [0], [1], [0, 0, 1, 1], [], []>} : vector<2x32xf32>, vector<32x32xf32>, vector<2x32xf32> -> vector<2x32xf32>
    %239 = arith.addf %235, %238 : vector<2x32xf32>
    %c10 = arith.constant 10 : index
    %c0_168 = arith.constant 0 : index
    %240 = tpu.strided_load %arg6[%c10, %c0_168] {strides = array<i32: 16, 1>} : memref<32x32xf32, #tpu.memory_space<vmem>>, vector<2x32xf32>
    %c437 = arith.constant 437 : index
    %c0_169 = arith.constant 0 : index
    %241 = vector.load %arg1[%c437, %c0_169] : memref<608x32xf32, #tpu.memory_space<vmem>>, vector<32x32xf32>
    %cst_170 = arith.constant dense<0.000000e+00> : vector<2x32xf32>
    %242 = tpu.matmul %240, %241, %cst_170 {dimension_numbers = #tpu.dot_dimension_numbers<[1], [0], [0], [1], [0, 0, 1, 1], [], []>} : vector<2x32xf32>, vector<32x32xf32>, vector<2x32xf32> -> vector<2x32xf32>
    %243 = arith.addf %239, %242 : vector<2x32xf32>
    %c11 = arith.constant 11 : index
    %c0_171 = arith.constant 0 : index
    %244 = tpu.strided_load %arg6[%c11, %c0_171] {strides = array<i32: 16, 1>} : memref<32x32xf32, #tpu.memory_space<vmem>>, vector<2x32xf32>
    %c453 = arith.constant 453 : index
    %c0_172 = arith.constant 0 : index
    %245 = vector.load %arg1[%c453, %c0_172] : memref<608x32xf32, #tpu.memory_space<vmem>>, vector<32x32xf32>
    %cst_173 = arith.constant dense<0.000000e+00> : vector<2x32xf32>
    %246 = tpu.matmul %244, %245, %cst_173 {dimension_numbers = #tpu.dot_dimension_numbers<[1], [0], [0], [1], [0, 0, 1, 1], [], []>} : vector<2x32xf32>, vector<32x32xf32>, vector<2x32xf32> -> vector<2x32xf32>
    %247 = arith.addf %243, %246 : vector<2x32xf32>
    %c12_174 = arith.constant 12 : index
    %c0_175 = arith.constant 0 : index
    %248 = tpu.strided_load %arg6[%c12_174, %c0_175] {strides = array<i32: 16, 1>} : memref<32x32xf32, #tpu.memory_space<vmem>>, vector<2x32xf32>
    %c469 = arith.constant 469 : index
    %c0_176 = arith.constant 0 : index
    %249 = vector.load %arg1[%c469, %c0_176] : memref<608x32xf32, #tpu.memory_space<vmem>>, vector<32x32xf32>
    %cst_177 = arith.constant dense<0.000000e+00> : vector<2x32xf32>
    %250 = tpu.matmul %248, %249, %cst_177 {dimension_numbers = #tpu.dot_dimension_numbers<[1], [0], [0], [1], [0, 0, 1, 1], [], []>} : vector<2x32xf32>, vector<32x32xf32>, vector<2x32xf32> -> vector<2x32xf32>
    %251 = arith.addf %247, %250 : vector<2x32xf32>
    %c13 = arith.constant 13 : index
    %c0_178 = arith.constant 0 : index
    %252 = tpu.strided_load %arg6[%c13, %c0_178] {strides = array<i32: 16, 1>} : memref<32x32xf32, #tpu.memory_space<vmem>>, vector<2x32xf32>
    %c485 = arith.constant 485 : index
    %c0_179 = arith.constant 0 : index
    %253 = vector.load %arg1[%c485, %c0_179] : memref<608x32xf32, #tpu.memory_space<vmem>>, vector<32x32xf32>
    %cst_180 = arith.constant dense<0.000000e+00> : vector<2x32xf32>
    %254 = tpu.matmul %252, %253, %cst_180 {dimension_numbers = #tpu.dot_dimension_numbers<[1], [0], [0], [1], [0, 0, 1, 1], [], []>} : vector<2x32xf32>, vector<32x32xf32>, vector<2x32xf32> -> vector<2x32xf32>
    %255 = arith.addf %251, %254 : vector<2x32xf32>
    %c14 = arith.constant 14 : index
    %c0_181 = arith.constant 0 : index
    %256 = tpu.strided_load %arg6[%c14, %c0_181] {strides = array<i32: 16, 1>} : memref<32x32xf32, #tpu.memory_space<vmem>>, vector<2x32xf32>
    %c501 = arith.constant 501 : index
    %c0_182 = arith.constant 0 : index
    %257 = vector.load %arg1[%c501, %c0_182] : memref<608x32xf32, #tpu.memory_space<vmem>>, vector<32x32xf32>
    %cst_183 = arith.constant dense<0.000000e+00> : vector<2x32xf32>
    %258 = tpu.matmul %256, %257, %cst_183 {dimension_numbers = #tpu.dot_dimension_numbers<[1], [0], [0], [1], [0, 0, 1, 1], [], []>} : vector<2x32xf32>, vector<32x32xf32>, vector<2x32xf32> -> vector<2x32xf32>
    %259 = arith.addf %255, %258 : vector<2x32xf32>
    %c15 = arith.constant 15 : index
    %c0_184 = arith.constant 0 : index
    %260 = tpu.strided_load %arg6[%c15, %c0_184] {strides = array<i32: 16, 1>} : memref<32x32xf32, #tpu.memory_space<vmem>>, vector<2x32xf32>
    %c517 = arith.constant 517 : index
    %c0_185 = arith.constant 0 : index
    %261 = vector.load %arg1[%c517, %c0_185] : memref<608x32xf32, #tpu.memory_space<vmem>>, vector<32x32xf32>
    %cst_186 = arith.constant dense<0.000000e+00> : vector<2x32xf32>
    %262 = tpu.matmul %260, %261, %cst_186 {dimension_numbers = #tpu.dot_dimension_numbers<[1], [0], [0], [1], [0, 0, 1, 1], [], []>} : vector<2x32xf32>, vector<32x32xf32>, vector<2x32xf32> -> vector<2x32xf32>
    %263 = arith.addf %259, %262 : vector<2x32xf32>
    %c533 = arith.constant 533 : index
    %c0_187 = arith.constant 0 : index
    %264 = vector.load %arg1[%c533, %c0_187] : memref<608x32xf32, #tpu.memory_space<vmem>>, vector<1x32xf32>
    %265 = vector.broadcast %264 : vector<1x32xf32> to vector<2x32xf32>
    %266 = arith.addf %263, %265 : vector<2x32xf32>
    %cst_188 = arith.constant 0.000000e+00 : f32
    %267 = vector.broadcast %cst_188 : f32 to vector<2x32xf32>
    %268 = arith.maximumf %266, %267 : vector<2x32xf32>
    %c534 = arith.constant 534 : index
    %c0_189 = arith.constant 0 : index
    %269 = vector.load %arg1[%c534, %c0_189] : memref<608x32xf32, #tpu.memory_space<vmem>>, vector<32x32xf32>
    %cst_190 = arith.constant dense<0.000000e+00> : vector<2x32xf32>
    %270 = tpu.matmul %268, %269, %cst_190 {dimension_numbers = #tpu.dot_dimension_numbers<[1], [0], [0], [1], [0, 0, 1, 1], [], []>} : vector<2x32xf32>, vector<32x32xf32>, vector<2x32xf32> -> vector<2x32xf32>
    %c566 = arith.constant 566 : index
    %c0_191 = arith.constant 0 : index
    %271 = vector.load %arg1[%c566, %c0_191] : memref<608x32xf32, #tpu.memory_space<vmem>>, vector<1x32xf32>
    %272 = vector.broadcast %271 : vector<1x32xf32> to vector<2x32xf32>
    %273 = arith.addf %270, %272 : vector<2x32xf32>
    %cst_192 = arith.constant 0.000000e+00 : f32
    %274 = vector.broadcast %cst_192 : f32 to vector<2x32xf32>
    %275 = arith.maximumf %273, %274 : vector<2x32xf32>
    %c567 = arith.constant 567 : index
    %c0_193 = arith.constant 0 : index
    %276 = vector.load %arg1[%c567, %c0_193] : memref<608x32xf32, #tpu.memory_space<vmem>>, vector<32x32xf32>
    %cst_194 = arith.constant dense<0.000000e+00> : vector<2x32xf32>
    %277 = tpu.matmul %275, %276, %cst_194 {dimension_numbers = #tpu.dot_dimension_numbers<[1], [0], [0], [1], [0, 0, 1, 1], [], []>} : vector<2x32xf32>, vector<32x32xf32>, vector<2x32xf32> -> vector<2x32xf32>
    %c599 = arith.constant 599 : index
    %c0_195 = arith.constant 0 : index
    %278 = vector.load %arg1[%c599, %c0_195] : memref<608x32xf32, #tpu.memory_space<vmem>>, vector<1x32xf32>
    %279 = vector.broadcast %278 : vector<1x32xf32> to vector<2x32xf32>
    %280 = arith.addf %277, %279 : vector<2x32xf32>
    %cst_196 = arith.constant 0.000000e+00 : f32
    %281 = vector.broadcast %cst_196 : f32 to vector<6x32xf32>
    %282 = tpu.concatenate %280, %281 in 0 : vector<2x32xf32>, vector<6x32xf32> -> vector<8x32xf32>
    %cst_197 = arith.constant 0.000000e+00 : f32
    %283 = vector.broadcast %cst_197 : f32 to vector<8x96xf32>
    %284 = tpu.concatenate %282, %283 in 1 : vector<8x32xf32>, vector<8x96xf32> -> vector<8x128xf32>
    %c0_198 = arith.constant 0 : index
    %c0_199 = arith.constant 0 : index
    %285 = vector.load %arg2[%c0_198, %c0_199] : memref<8x128xf32, #tpu.memory_space<vmem>>, vector<8x128xf32>
    tpu.vector_store %arg2[%c0_198, %c0_199], %284 {strides = array<i32>} : memref<8x128xf32, #tpu.memory_space<vmem>>, vector<8x128xf32>,
    return
  }
}

</mosaic_0001>

<bundles_post_ra>
// kernel: hcnn_forward.3
= control target key start
LH: loop header
LB: loop body
LE: loop exit
PB: predicated region body
PF: predicated region fallthrough
CT: control target
= control target key end

     0   :  { %s3615_s3 = smov 0   ;;  %s4321_s0 = inlined_call_operand.vmem [shape: f32[512,75], index: 0, kind: input, shape index: {}]   ;;  %s4322_s1 = inlined_call_operand.vmem [shape: f32[608,32], index: 1, kind: input, shape index: {}]   ;;  %s4323_s2 = inlined_call_operand.vmem [shape: f32[8,128], index: 2, kind: output, shape index: {}]  }
   0x1   :  { %v3563_v0 = vld [vmem:[%s4322_s1] sm:$0xff]  ;;  %v3568_v1 = vld [vmem:[%s4322_s1 + $0x8] sm:$0xff]  ;;  %v3573_v2 = vld [vmem:[%s4322_s1 + $0x10] sm:$0xff] }
   0x2   :  { %v3578_v3 = vld [vmem:[%s4322_s1 + $0x18] sm:$0xff]  ;;  %v3583_v4 = vld [vmem:[%s4322_s1 + $0x20] sm:$0xff]  ;;  %v3588_v5 = vld [vmem:[%s4322_s1 + $0x28] sm:$0xff] }
   0x3   :  { %v3593_v6 = vld [vmem:[%s4322_s1 + $0x30] sm:$0xff]  ;;  %v3598_v7 = vld [vmem:[%s4322_s1 + $0x38] sm:$0xff]  ;;  %v3603_v8 = vld [vmem:[%s4322_s1 + $0x40] sm:$0xff] }
   0x4   :  { %v3608_v9 = vld [vmem:[%s4322_s1 + $0x48] sm:$0x7]  ;;  %v3613_v10 = vld [vmem:[%s4322_s1 + $0x4b] ss:$0 sm:$0xff] }
   0x5 LB: > { %v2937_v11 = vpack.c.bf16 %v3568_v1, %v3563_v0  ;;  %v2941_v12 = vpack.c.bf16 %v3578_v3, %v3573_v2  ;;  %s2465_s4 = sshll.u32 %s3431_s3, 7  ;;  %vm50_vm0 = vcmask 613376   ;;  %v2945_v13 = vpack.c.bf16 %v3588_v5, %v3583_v4  ;;  %s27_s3 = sadd.s32 1, %s3431_s3   ;;  %s3431_s3 = sphi %s3615_s3, %s27_s3  }
   0x6   : > { %s3630_s7 = scalar_lea.vmem %s4321_s0, %s2465_s4  ;;  %v2949_v16 = vpack.c.bf16 %v3598_v7, %v3593_v6  ;;  %vm99_vm1 = vcmask 1042432   ;;  %v2953_v17 = vpack.c.bf16 %v3608_v9, %v3603_v8  ;;  %vm3541_vm2 = vmmov 1   ;;  %s3676_s8 = scalar_lea.vmem [#allocation2], %s2465_s4 }
   0x7   : > { %2938 = vmatprep.subr.bf16.mxu0 %v2937_v11  ;;  %3075 = vmatprep.subr.bf16.mxu1 %v2937_v11  ;;  %v30_v14 = vld [vmem:[%s3630_s7] sm:$0xff]  ;;  %vm2954_vm3 = vmpackc.low %vm99_vm1, %vm3541_vm2  ;;  %v31_v18 = vld [vmem:[%s3630_s7 + $0x8] sm:$0xff]  ;;  %vm265_vm4 = vcmask 261120   ;;  %p24_p0 = scmp.ge.s32.totalorder %s27_s3, 4  }
   0x8   : > { %2940 = vmatpush3.bf16.msra.mxu0 %v2937_v11  ;;  %3080 = vmatpush3.bf16.msra.mxu1 %v2937_v11  ;;  %v38_v15 = vld [vmem:[%s3630_s7 + $0x40] sm:$0xff]  ;;  %v39_v19 = vld [vmem:[%s3630_s7 + $0x48] sm:$0xff]  ;;  %v32_v20 = vld [vmem:[%s3630_s7 + $0x10] sm:$0xff]  ;;  %s3834_s0 = smov (%p24_p0), 0  }
   0x9   : > { %2942 = vmatprep.subr.bf16.mxu0 %v2941_v12  ;;  %3076 = vmatprep.subr.bf16.mxu1 %v2941_v12  ;;  %v40_v21 = vld [vmem:[%s3630_s7 + $0x50] sm:$0xff]  ;;  %v33_v22 = vld [vmem:[%s3630_s7 + $0x18] sm:$0xff]  ;;  %v34_v24 = vld [vmem:[%s3630_s7 + $0x20] sm:$0xff] }
   0xa   : > { %2689 = vmatprep.mubr.msk.f32.mxu0 %vm50_vm0, %v30_v14  ;;  %2701 = vmatprep.mubr.msk.f32.mxu1 %vm50_vm0, %v38_v15  ;;  %v41_v23 = vld [vmem:[%s3630_s7 + $0x58] sm:$0xff]  ;;  %v42_v25 = vld [vmem:[%s3630_s7 + $0x60] sm:$0xff]  ;;  %v35_v26 = vld [vmem:[%s3630_s7 + $0x28] sm:$0xff] }
   0xb   : > { %v43_v27 = vld [vmem:[%s3630_s7 + $0x68] sm:$0xff]  ;;  %v36_v28 = vld [vmem:[%s3630_s7 + $0x30] sm:$0xff]  ;;  %v37_v30 = vld [vmem:[%s3630_s7 + $0x38] sm:$0xff] }
   0xc   : > { %2944 = vmatpush3.bf16.msra.mxu0 %v2941_v12  ;;  %3081 = vmatpush3.bf16.msra.mxu1 %v2941_v12  ;;  %v44_v29 = vld [vmem:[%s3630_s7 + $0x70] sm:$0xff]  ;;  %v45_v31 = vld [vmem:[%s3630_s7 + $0x78] sm:$0xff] }
   0xd   : > { %2946 = vmatprep.subr.bf16.mxu0 %v2945_v13  ;;  %3077 = vmatprep.subr.bf16.mxu1 %v2945_v13 }
  0x10   : > { %2948 = vmatpush3.bf16.msra.mxu0 %v2945_v13  ;;  %3082 = vmatpush3.bf16.msra.mxu1 %v2945_v13 }
  0x11   : > { %2950 = vmatprep.subr.bf16.mxu0 %v2949_v16  ;;  %3078 = vmatprep.subr.bf16.mxu1 %v2949_v16 }
  0x14   : > { %2952 = vmatpush3.bf16.msra.mxu0 %v2949_v16  ;;  %3083 = vmatpush3.bf16.msra.mxu1 %v2949_v16 }
  0x15   : > { %2955 = vmatprep.subr.msk.bf16.mxu0 %vm2954_vm3, %v2953_v17  ;;  %3079 = vmatprep.subr.msk.bf16.mxu1 %vm2954_vm3, %v2953_v17 }
  0x18   : > { %2958 = vmatpush3.bf16.msk.msra.mxu0 %vm2954_vm3, %v2953_v17  ;;  %3084 = vmatpush3.bf16.msk.msra.mxu1 %vm2954_vm3, %v2953_v17 }
  0x1b   : > { %2690 = vmatmul.mubr.msk.f32.vlgmr.msra.gmra.mrb[0].mxu0 %vm50_vm0, %v31_v18  ;;  %2702 = vmatmul.mubr.msk.f32.vlgmr.msra.gmra.mrb[0].mxu1 %vm50_vm0, %v39_v19 }
  0x1c   : > { %2692 = vmatprep.mubr.msk.f32.mxu0 %vm50_vm0, %v32_v20  ;;  %2704 = vmatprep.mubr.msk.f32.mxu1 %vm50_vm0, %v40_v21 }
  0x1f   : > { %2693 = vmatmul.mubr.msk.f32.gmra.mrb[2].mxu0 %vm50_vm0, %v33_v22  ;;  %2705 = vmatmul.mubr.msk.f32.gmra.mrb[2].mxu1 %vm50_vm0, %v41_v23 }
  0x20   : > { %2695 = vmatprep.mubr.msk.f32.mxu0 %vm50_vm0, %v34_v24  ;;  %2707 = vmatprep.mubr.msk.f32.mxu1 %vm50_vm0, %v42_v25 }
  0x23   : > { %2696 = vmatmul.mubr.msk.f32.gmra.mrb[4].mxu0 %vm50_vm0, %v35_v26  ;;  %2708 = vmatmul.mubr.msk.f32.gmra.mrb[4].mxu1 %vm50_vm0, %v43_v27  ;;  %v3728_v27 = vld [vmem:[%s4322_s1 + $0x114] ss:$0 sm:$0xff] (%p24_p0) }
  0x24   : > { %2698 = vmatprep.mubr.msk.f32.mxu0 %vm50_vm0, %v36_v28  ;;  %2710 = vmatprep.mubr.msk.f32.mxu1 %vm50_vm0, %v44_v29  ;;  %v3542_v29 = vmov (%p24_p0), 0.0  }
  0x25   :  { %290 = vst.msk [vmem:[#allocation3 + $0x38] sm:$0xff] (%p24_p0), %vm265_vm4, %v3542_v29  ;;  %283 = vst.msk [vmem:[#allocation3] sm:$0xff] (%p24_p0), %vm265_vm4, %v3542_v29 }
  0x26   :  { %284 = vst.msk [vmem:[#allocation3 + $0x8] sm:$0xff] (%p24_p0), %vm265_vm4, %v3542_v29  ;;  %285 = vst.msk [vmem:[#allocation3 + $0x10] sm:$0xff] (%p24_p0), %vm265_vm4, %v3542_v29 }
  0x27   : > { %2699 = vmatmul.mubr.msk.f32.gmra.mrb[6].mxu0 %vm50_vm0, %v37_v30  ;;  %2711 = vmatmul.mubr.msk.f32.gmra.mrb[6].mxu1 %vm50_vm0, %v45_v31  ;;  %286 = vst.msk [vmem:[#allocation3 + $0x18] sm:$0xff] (%p24_p0), %vm265_vm4, %v3542_v29  ;;  %287 = vst.msk [vmem:[#allocation3 + $0x20] sm:$0xff] (%p24_p0), %vm265_vm4, %v3542_v29 }
  0x28   :  { %288 = vst.msk [vmem:[#allocation3 + $0x28] sm:$0xff] (%p24_p0), %vm265_vm4, %v3542_v29  ;;  %289 = vst.msk [vmem:[#allocation3 + $0x30] sm:$0xff] (%p24_p0), %vm265_vm4, %v3542_v29 }
  0x29   :  { %291 = vst.msk [vmem:[#allocation3 + $0x40] sm:$0xff] (%p24_p0), %vm265_vm4, %v3542_v29  ;;  %292 = vst.msk [vmem:[#allocation3 + $0x48] sm:$0xff] (%p24_p0), %vm265_vm4, %v3542_v29 }
  0x2a   :  { %293 = vst.msk [vmem:[#allocation3 + $0x50] sm:$0xff] (%p24_p0), %vm265_vm4, %v3542_v29  ;;  %294 = vst.msk [vmem:[#allocation3 + $0x58] sm:$0xff] (%p24_p0), %vm265_vm4, %v3542_v29 }
  0x2b   :  { %295 = vst.msk [vmem:[#allocation3 + $0x60] sm:$0xff] (%p24_p0), %vm265_vm4, %v3542_v29  ;;  %296 = vst.msk [vmem:[#allocation3 + $0x68] sm:$0xff] (%p24_p0), %vm265_vm4, %v3542_v29 }
  0x2c   :  { %297 = vst.msk [vmem:[#allocation3 + $0x70] sm:$0xff] (%p24_p0), %vm265_vm4, %v3542_v29  ;;  %298 = vst.msk [vmem:[#allocation3 + $0x78] sm:$0xff] (%p24_p0), %vm265_vm4, %v3542_v29 }
  0x2d   :  { %299 = vst.msk [vmem:[#allocation3 + $0x80] sm:$0xff] (%p24_p0), %vm265_vm4, %v3542_v29  ;;  %300 = vst.msk [vmem:[#allocation3 + $0x88] sm:$0xff] (%p24_p0), %vm265_vm4, %v3542_v29 }
  0x2e   :  { %301 = vst.msk [vmem:[#allocation3 + $0x90] sm:$0xff] (%p24_p0), %vm265_vm4, %v3542_v29  ;;  %302 = vst.msk [vmem:[#allocation3 + $0x98] sm:$0xff] (%p24_p0), %vm265_vm4, %v3542_v29 }
  0x2f   :  { %303 = vst.msk [vmem:[#allocation3 + $0xa0] sm:$0xff] (%p24_p0), %vm265_vm4, %v3542_v29  ;;  %304 = vst.msk [vmem:[#allocation3 + $0xa8] sm:$0xff] (%p24_p0), %vm265_vm4, %v3542_v29 }
  0x30   :  { %305 = vst.msk [vmem:[#allocation3 + $0xb0] sm:$0xff] (%p24_p0), %vm265_vm4, %v3542_v29  ;;  %306 = vst.msk [vmem:[#allocation3 + $0xb8] sm:$0xff] (%p24_p0), %vm265_vm4, %v3542_v29 }
  0x31   :  { %307 = vst.msk [vmem:[#allocation3 + $0xc0] sm:$0xff] (%p24_p0), %vm265_vm4, %v3542_v29  ;;  %308 = vst.msk [vmem:[#allocation3 + $0xc8] sm:$0xff] (%p24_p0), %vm265_vm4, %v3542_v29 }
  0x32   :  { %309 = vst.msk [vmem:[#allocation3 + $0xd0] sm:$0xff] (%p24_p0), %vm265_vm4, %v3542_v29  ;;  %310 = vst.msk [vmem:[#allocation3 + $0xd8] sm:$0xff] (%p24_p0), %vm265_vm4, %v3542_v29 }
  0x33   :  { %311 = vst.msk [vmem:[#allocation3 + $0xe0] sm:$0xff] (%p24_p0), %vm265_vm4, %v3542_v29  ;;  %312 = vst.msk [vmem:[#allocation3 + $0xe8] sm:$0xff] (%p24_p0), %vm265_vm4, %v3542_v29 }
  0x34   :  { %313 = vst.msk [vmem:[#allocation3 + $0xf0] sm:$0xff] (%p24_p0), %vm265_vm4, %v3542_v29  ;;  %314 = vst.msk [vmem:[#allocation3 + $0xf8] sm:$0xff] (%p24_p0), %vm265_vm4, %v3542_v29 }
  0x35   :  { %315 = vst.msk [vmem:[#allocation3 + $0x100] sm:$0xff] (%p24_p0), %vm265_vm4, %v3542_v29  ;;  %316 = vst.msk [vmem:[#allocation3 + $0x108] sm:$0xff] (%p24_p0), %vm265_vm4, %v3542_v29 }
  0x36   :  { %317 = vst.msk [vmem:[#allocation3 + $0x110] sm:$0xff] (%p24_p0), %vm265_vm4, %v3542_v29  ;;  %318 = vst.msk [vmem:[#allocation3 + $0x118] sm:$0xff] (%p24_p0), %vm265_vm4, %v3542_v29 }
  0x37   :  { %319 = vst.msk [vmem:[#allocation3 + $0x120] sm:$0xff] (%p24_p0), %vm265_vm4, %v3542_v29  ;;  %320 = vst.msk [vmem:[#allocation3 + $0x128] sm:$0xff] (%p24_p0), %vm265_vm4, %v3542_v29 }
  0x38   :  { %321 = vst.msk [vmem:[#allocation3 + $0x130] sm:$0xff] (%p24_p0), %vm265_vm4, %v3542_v29  ;;  %322 = vst.msk [vmem:[#allocation3 + $0x138] sm:$0xff] (%p24_p0), %vm265_vm4, %v3542_v29 }
  0x39   :  { %323 = vst.msk [vmem:[#allocation3 + $0x140] sm:$0xff] (%p24_p0), %vm265_vm4, %v3542_v29  ;;  %324 = vst.msk [vmem:[#allocation3 + $0x148] sm:$0xff] (%p24_p0), %vm265_vm4, %v3542_v29 }
  0x3a   :  { %325 = vst.msk [vmem:[#allocation3 + $0x150] sm:$0xff] (%p24_p0), %vm265_vm4, %v3542_v29  ;;  %326 = vst.msk [vmem:[#allocation3 + $0x158] sm:$0xff] (%p24_p0), %vm265_vm4, %v3542_v29 }
  0xee   : > { %v2691_v32 = vpop.f32.mrb[0].mxu0  ;;  %v2703_v33 = vpop.f32.mrb[0].mxu1 }
  0xef   : > { %v175_v34 = vadd.f32 %v2691_v32, %v3613_v10  ;;  %v215_v35 = vadd.f32 %v2703_v33, %v3613_v10  ;;  %v169_v36 = vpop.f32.mrb[1].mxu0  ;;  %v209_v37 = vpop.f32.mrb[1].mxu1 }
  0xf0   : > { %v170_v38 = vadd.f32 %v3613_v10, %v169_v36  ;;  %v210_v39 = vadd.f32 %v3613_v10, %v209_v37 }
  0xf1   : > { %v249_v40 = vmax.f32 %v175_v34, 0.0  ;;  %v257_v41 = vmax.f32 %v215_v35, 0.0 }
  0xf2   : > { %v248_v42 = vmax.f32 %v170_v38, 0.0  ;;  %v256_v43 = vmax.f32 %v210_v39, 0.0  ;;  %v2694_v44 = vpop.f32.mrb[2].mxu0  ;;  %v2706_v45 = vpop.f32.mrb[2].mxu1 }
  0xf3   : > { %267 = vst.msk [vmem:[%s3676_s8 + $0x8] sm:$0xff] %vm265_vm4, %v249_v40  ;;  %275 = vst.msk [vmem:[%s3676_s8 + $0x48] sm:$0xff] %vm265_vm4, %v257_v41  ;;  %v185_v46 = vadd.f32 %v2694_v44, %v3613_v10  ;;  %v225_v47 = vadd.f32 %v2706_v45, %v3613_v10  ;;  %v179_v48 = vpop.f32.mrb[3].mxu0  ;;  %v219_v49 = vpop.f32.mrb[3].mxu1 }
  0xf4   : > { %266 = vst.msk [vmem:[%s3676_s8] sm:$0xff] %vm265_vm4, %v248_v42  ;;  %274 = vst.msk [vmem:[%s3676_s8 + $0x40] sm:$0xff] %vm265_vm4, %v256_v43  ;;  %v180_v50 = vadd.f32 %v3613_v10, %v179_v48  ;;  %v220_v51 = vadd.f32 %v3613_v10, %v219_v49 }
  0xf5   : > { %v251_v52 = vmax.f32 %v185_v46, 0.0  ;;  %v259_v53 = vmax.f32 %v225_v47, 0.0 }
  0xf6   : > { %v250_v54 = vmax.f32 %v180_v50, 0.0  ;;  %v258_v55 = vmax.f32 %v220_v51, 0.0  ;;  %v2697_v56 = vpop.f32.mrb[4].mxu0  ;;  %v2709_v57 = vpop.f32.mrb[4].mxu1 }
  0xf7   : > { %269 = vst.msk [vmem:[%s3676_s8 + $0x18] sm:$0xff] %vm265_vm4, %v251_v52  ;;  %277 = vst.msk [vmem:[%s3676_s8 + $0x58] sm:$0xff] %vm265_vm4, %v259_v53  ;;  %v195_v58 = vadd.f32 %v2697_v56, %v3613_v10  ;;  %v235_v59 = vadd.f32 %v2709_v57, %v3613_v10  ;;  %v189_v60 = vpop.f32.mrb[5].mxu0  ;;  %v229_v61 = vpop.f32.mrb[5].mxu1 }
  0xf8   : > { %268 = vst.msk [vmem:[%s3676_s8 + $0x10] sm:$0xff] %vm265_vm4, %v250_v54  ;;  %276 = vst.msk [vmem:[%s3676_s8 + $0x50] sm:$0xff] %vm265_vm4, %v258_v55  ;;  %v190_v62 = vadd.f32 %v3613_v10, %v189_v60  ;;  %v230_v63 = vadd.f32 %v3613_v10, %v229_v61 }
  0xf9   : > { %v253_v11 = vmax.f32 %v195_v58, 0.0  ;;  %v261_v12 = vmax.f32 %v235_v59, 0.0 }
  0xfa   : > { %v252_v13 = vmax.f32 %v190_v62, 0.0  ;;  %v260_v14 = vmax.f32 %v230_v63, 0.0  ;;  %v2700_v15 = vpop.f32.mrb[6].mxu0  ;;  %v2712_v16 = vpop.f32.mrb[6].mxu1  ;;  %26 = sbr.rel (!%p24_p0) target bundleno = 5 (0x5), region = 171 }
  0xfb   : > { %271 = vst.msk [vmem:[%s3676_s8 + $0x28] sm:$0xff] %vm265_vm4, %v253_v11  ;;  %279 = vst.msk [vmem:[%s3676_s8 + $0x68] sm:$0xff] %vm265_vm4, %v261_v12  ;;  %v205_v17 = vadd.f32 %v2700_v15, %v3613_v10  ;;  %v245_v18 = vadd.f32 %v2712_v16, %v3613_v10  ;;  %v199_v19 = vpop.f32.mrb[7].mxu0  ;;  %v239_v20 = vpop.f32.mrb[7].mxu1 }
  0xfc   : > { %270 = vst.msk [vmem:[%s3676_s8 + $0x20] sm:$0xff] %vm265_vm4, %v252_v13  ;;  %278 = vst.msk [vmem:[%s3676_s8 + $0x60] sm:$0xff] %vm265_vm4, %v260_v14  ;;  %v200_v21 = vadd.f32 %v3613_v10, %v199_v19  ;;  %v240_v22 = vadd.f32 %v3613_v10, %v239_v20 }
  0xfd   : > { %v255_v23 = vmax.f32 %v205_v17, 0.0  ;;  %v263_v24 = vmax.f32 %v245_v18, 0.0 }
  0xfe   : > { %v254_v25 = vmax.f32 %v200_v21, 0.0  ;;  %v262_v26 = vmax.f32 %v240_v22, 0.0 }
  0xff   : > { %273 = vst.msk [vmem:[%s3676_s8 + $0x38] sm:$0xff] %vm265_vm4, %v255_v23  ;;  %281 = vst.msk [vmem:[%s3676_s8 + $0x78] sm:$0xff] %vm265_vm4, %v263_v24 }
 0x100   : > { %272 = vst.msk [vmem:[%s3676_s8 + $0x30] sm:$0xff] %vm265_vm4, %v254_v25  ;;  %280 = vst.msk [vmem:[%s3676_s8 + $0x70] sm:$0xff] %vm265_vm4, %v262_v26 }
 0x107   :  { %v327_v28 = vld [vmem:[#allocation2] ss:$2 sm:$0xff]  ;;  %v329_v0 = vld [vmem:[#allocation2 + $0x1] ss:$2 sm:$0xff]  ;;  %v332_v1 = vld [vmem:[#allocation2 + $0x10] ss:$2 sm:$0xff] }
 0x108   :  { %v334_v2 = vld [vmem:[#allocation2 + $0x11] ss:$2 sm:$0xff]  ;;  %v330_v3 = vmax.f32 %v327_v28, %v329_v0  ;;  %v339_v5 = vld [vmem:[#allocation2 + $0x20] ss:$2 sm:$0xff]  ;;  %v341_v6 = vld [vmem:[#allocation2 + $0x21] ss:$2 sm:$0xff] }
 0x109   :  { %v335_v4 = vmax.f32 %v332_v1, %v334_v2  ;;  %v344_v7 = vld [vmem:[#allocation2 + $0x30] ss:$2 sm:$0xff]  ;;  %v342_v8 = vmax.f32 %v339_v5, %v341_v6  ;;  %v346_v9 = vld [vmem:[#allocation2 + $0x31] ss:$2 sm:$0xff]  ;;  %v351_v10 = vld [vmem:[#allocation2 + $0x40] ss:$2 sm:$0xff] }
 0x10a   :  { %v353_v30 = vld [vmem:[#allocation2 + $0x41] ss:$2 sm:$0xff]  ;;  %v347_v32 = vmax.f32 %v344_v7, %v346_v9  ;;  %v356_v34 = vld [vmem:[#allocation2 + $0x50] ss:$2 sm:$0xff]  ;;  %v358_v35 = vld [vmem:[#allocation2 + $0x51] ss:$2 sm:$0xff] }
 0x10b   :  { %v336_v31 = vmax.f32 %v330_v3, %v335_v4  ;;  %v354_v33 = vmax.f32 %v351_v10, %v353_v30  ;;  %v363_v36 = vld [vmem:[#allocation2 + $0x60] ss:$2 sm:$0xff]  ;;  %v359_v37 = vmax.f32 %v356_v34, %v358_v35  ;;  %v365_v38 = vld [vmem:[#allocation2 + $0x61] ss:$2 sm:$0xff]  ;;  %v368_v39 = vld [vmem:[#allocation2 + $0x70] ss:$2 sm:$0xff] }
 0x10c   :  { %v370_v40 = vld [vmem:[#allocation2 + $0x71] ss:$2 sm:$0xff]  ;;  %v348_v41 = vmax.f32 %v342_v8, %v347_v32  ;;  %v366_v42 = vmax.f32 %v363_v36, %v365_v38  ;;  %v375_v44 = vld [vmem:[#allocation2 + $0x80] ss:$2 sm:$0xff]  ;;  %v377_v45 = vld [vmem:[#allocation2 + $0x81] ss:$2 sm:$0xff] }
 0x10d   :  { %337 = vst.msk [vmem:[#allocation3 + $0x3a] sm:$0xff] %vm265_vm4, %v336_v31  ;;  %v371_v43 = vmax.f32 %v368_v39, %v370_v40  ;;  %v380_v46 = vld [vmem:[#allocation2 + $0x90] ss:$2 sm:$0xff]  ;;  %v360_v47 = vmax.f32 %v354_v33, %v359_v37  ;;  %v378_v48 = vmax.f32 %v375_v44, %v377_v45  ;;  %v382_v49 = vld [vmem:[#allocation2 + $0x91] ss:$2 sm:$0xff] }
 0x10e   :  { %v387_v50 = vld [vmem:[#allocation2 + $0xa0] ss:$2 sm:$0xff]  ;;  %v389_v51 = vld [vmem:[#allocation2 + $0xa1] ss:$2 sm:$0xff]  ;;  %349 = vst.msk [vmem:[#allocation3 + $0x46] sm:$0xff] %vm265_vm4, %v348_v41  ;;  %v383_v53 = vmax.f32 %v380_v46, %v382_v49 }
 0x10f   :  { %v372_v52 = vmax.f32 %v366_v42, %v371_v43  ;;  %v390_v54 = vmax.f32 %v387_v50, %v389_v51  ;;  %v392_v55 = vld [vmem:[#allocation2 + $0xb0] ss:$2 sm:$0xff]  ;;  %v394_v56 = vld [vmem:[#allocation2 + $0xb1] ss:$2 sm:$0xff]  ;;  %v399_v57 = vld [vmem:[#allocation2 + $0xc0] ss:$2 sm:$0xff] }
 0x110   :  { %361 = vst.msk [vmem:[#allocation3 + $0x52] sm:$0xff] %vm265_vm4, %v360_v47  ;;  %v395_v58 = vmax.f32 %v392_v55, %v394_v56  ;;  %v401_v59 = vld [vmem:[#allocation2 + $0xc1] ss:$2 sm:$0xff]  ;;  %v404_v60 = vld [vmem:[#allocation2 + $0xd0] ss:$2 sm:$0xff]  ;;  %v384_v62 = vmax.f32 %v378_v48, %v383_v53 }
 0x111   :  { %v406_v61 = vld [vmem:[#allocation2 + $0xd1] ss:$2 sm:$0xff]  ;;  %373 = vst.msk [vmem:[#allocation3 + $0x5e] sm:$0xff] %vm265_vm4, %v372_v52  ;;  %v402_v63 = vmax.f32 %v399_v57, %v401_v59  ;;  %v411_v12 = vld [vmem:[#allocation2 + $0xe0] ss:$2 sm:$0xff] }
 0x112   :  { %v407_v11 = vmax.f32 %v404_v60, %v406_v61  ;;  %v413_v13 = vld [vmem:[#allocation2 + $0xe1] ss:$2 sm:$0xff]  ;;  %v416_v14 = vld [vmem:[#allocation2 + $0xf0] ss:$2 sm:$0xff]  ;;  %v396_v15 = vmax.f32 %v390_v54, %v395_v58  ;;  %v418_v17 = vld [vmem:[#allocation2 + $0xf1] ss:$2 sm:$0xff] }
 0x113   :  { %v414_v16 = vmax.f32 %v411_v12, %v413_v13  ;;  %v423_v18 = vld [vmem:[#allocation2 + $0x100] ss:$2 sm:$0xff]  ;;  %v425_v19 = vld [vmem:[#allocation2 + $0x101] ss:$2 sm:$0xff]  ;;  %385 = vst.msk [vmem:[#allocation3 + $0x6a] sm:$0xff] %vm265_vm4, %v384_v62  ;;  %v419_v21 = vmax.f32 %v416_v14, %v418_v17 }
 0x114   :  { %v408_v20 = vmax.f32 %v402_v63, %v407_v11  ;;  %v426_v22 = vmax.f32 %v423_v18, %v425_v19  ;;  %v428_v23 = vld [vmem:[#allocation2 + $0x110] ss:$2 sm:$0xff]  ;;  %v430_v24 = vld [vmem:[#allocation2 + $0x111] ss:$2 sm:$0xff]  ;;  %v435_v25 = vld [vmem:[#allocation2 + $0x120] ss:$2 sm:$0xff] }
 0x115   :  { %397 = vst.msk [vmem:[#allocation3 + $0x76] sm:$0xff] %vm265_vm4, %v396_v15  ;;  %v431_v26 = vmax.f32 %v428_v23, %v430_v24  ;;  %v437_v28 = vld [vmem:[#allocation2 + $0x121] ss:$2 sm:$0xff]  ;;  %v440_v0 = vld [vmem:[#allocation2 + $0x130] ss:$2 sm:$0xff]  ;;  %v420_v2 = vmax.f32 %v414_v16, %v419_v21 }
 0x116   :  { %v442_v1 = vld [vmem:[#allocation2 + $0x131] ss:$2 sm:$0xff]  ;;  %409 = vst.msk [vmem:[#allocation3 + $0x82] sm:$0xff] %vm265_vm4, %v408_v20  ;;  %v438_v3 = vmax.f32 %v435_v25, %v437_v28  ;;  %v447_v5 = vld [vmem:[#allocation2 + $0x140] ss:$2 sm:$0xff] }
 0x117   :  { %v443_v4 = vmax.f32 %v440_v0, %v442_v1  ;;  %v449_v6 = vld [vmem:[#allocation2 + $0x141] ss:$2 sm:$0xff]  ;;  %v452_v7 = vld [vmem:[#allocation2 + $0x150] ss:$2 sm:$0xff]  ;;  %v432_v8 = vmax.f32 %v426_v22, %v431_v26  ;;  %v454_v10 = vld [vmem:[#allocation2 + $0x151] ss:$2 sm:$0xff] }
 0x118   :  { %v450_v9 = vmax.f32 %v447_v5, %v449_v6  ;;  %v459_v30 = vld [vmem:[#allocation2 + $0x160] ss:$2 sm:$0xff]  ;;  %v461_v31 = vld [vmem:[#allocation2 + $0x161] ss:$2 sm:$0xff]  ;;  %421 = vst.msk [vmem:[#allocation3 + $0x8e] sm:$0xff] %vm265_vm4, %v420_v2  ;;  %v455_v33 = vmax.f32 %v452_v7, %v454_v10 }
 0x119   :  { %v444_v32 = vmax.f32 %v438_v3, %v443_v4  ;;  %v462_v34 = vmax.f32 %v459_v30, %v461_v31  ;;  %v464_v35 = vld [vmem:[#allocation2 + $0x170] ss:$2 sm:$0xff]  ;;  %v466_v36 = vld [vmem:[#allocation2 + $0x171] ss:$2 sm:$0xff]  ;;  %v471_v37 = vld [vmem:[#allocation2 + $0x180] ss:$2 sm:$0xff] }
 0x11a   :  { %433 = vst.msk [vmem:[#allocation3 + $0xca] sm:$0xff] %vm265_vm4, %v432_v8  ;;  %v467_v38 = vmax.f32 %v464_v35, %v466_v36  ;;  %v473_v39 = vld [vmem:[#allocation2 + $0x181] ss:$2 sm:$0xff]  ;;  %v476_v40 = vld [vmem:[#allocation2 + $0x190] ss:$2 sm:$0xff]  ;;  %v456_v42 = vmax.f32 %v450_v9, %v455_v33 }
 0x11b   :  { %v478_v41 = vld [vmem:[#allocation2 + $0x191] ss:$2 sm:$0xff]  ;;  %445 = vst.msk [vmem:[#allocation3 + $0xd6] sm:$0xff] %vm265_vm4, %v444_v32  ;;  %v474_v43 = vmax.f32 %v471_v37, %v473_v39  ;;  %v483_v45 = vld [vmem:[#allocation2 + $0x1a0] ss:$2 sm:$0xff] }
 0x11c   :  { %v479_v44 = vmax.f32 %v476_v40, %v478_v41  ;;  %v485_v46 = vld [vmem:[#allocation2 + $0x1a1] ss:$2 sm:$0xff]  ;;  %v488_v47 = vld [vmem:[#allocation2 + $0x1b0] ss:$2 sm:$0xff]  ;;  %v468_v48 = vmax.f32 %v462_v34, %v467_v38  ;;  %v490_v50 = vld [vmem:[#allocation2 + $0x1b1] ss:$2 sm:$0xff] }
 0x11d   :  { %v486_v49 = vmax.f32 %v483_v45, %v485_v46  ;;  %v495_v51 = vld [vmem:[#allocation2 + $0x1c0] ss:$2 sm:$0xff]  ;;  %v497_v52 = vld [vmem:[#allocation2 + $0x1c1] ss:$2 sm:$0xff]  ;;  %457 = vst.msk [vmem:[#allocation3 + $0xe2] sm:$0xff] %vm265_vm4, %v456_v42  ;;  %v491_v54 = vmax.f32 %v488_v47, %v490_v50 }
 0x11e   :  { %v480_v53 = vmax.f32 %v474_v43, %v479_v44  ;;  %v498_v55 = vmax.f32 %v495_v51, %v497_v52  ;;  %v500_v56 = vld [vmem:[#allocation2 + $0x1d0] ss:$2 sm:$0xff]  ;;  %v502_v57 = vld [vmem:[#allocation2 + $0x1d1] ss:$2 sm:$0xff]  ;;  %v507_v58 = vld [vmem:[#allocation2 + $0x1e0] ss:$2 sm:$0xff] }
 0x11f   :  { %469 = vst.msk [vmem:[#allocation3 + $0xee] sm:$0xff] %vm265_vm4, %v468_v48  ;;  %v503_v59 = vmax.f32 %v500_v56, %v502_v57  ;;  %v509_v60 = vld [vmem:[#allocation2 + $0x1e1] ss:$2 sm:$0xff]  ;;  %v512_v61 = vld [vmem:[#allocation2 + $0x1f0] ss:$2 sm:$0xff]  ;;  %v492_v63 = vmax.f32 %v486_v49, %v491_v54 }
 0x120   :  { %v514_v62 = vld [vmem:[#allocation2 + $0x1f1] ss:$2 sm:$0xff]  ;;  %481 = vst.msk [vmem:[#allocation3 + $0xfa] sm:$0xff] %vm265_vm4, %v480_v53  ;;  %v510_v11 = vmax.f32 %v507_v58, %v509_v60 }
 0x121   :  { %v515_v12 = vmax.f32 %v512_v61, %v514_v62  ;;  %v504_v13 = vmax.f32 %v498_v55, %v503_v59  ;;  %493 = vst.msk [vmem:[#allocation3 + $0x106] sm:$0xff] %vm265_vm4, %v492_v63 }
 0x123   :  { %v516_v14 = vmax.f32 %v510_v11, %v515_v12  ;;  %505 = vst.msk [vmem:[#allocation3 + $0x112] sm:$0xff] %vm265_vm4, %v504_v13 }
 0x125   :  { %517 = vst.msk [vmem:[#allocation3 + $0x11e] sm:$0xff] %vm265_vm4, %v516_v14 }
 0x126 LB: > { %s525_s11 = smul.u32 96, %s3435_s0  ;;  %v3840_v15 = vmov 0.0   ;;  %v3842_v16 = vmov 0.0   ;;  %v3844_v17 = vmov 0.0   ;;  %v3846_v18 = vmov 0.0   ;;  %s3864_s12 = smov 0   ;;  %s3435_s0 = sphi %s3834_s0, %s524_s0  }
 0x127   : > { %v3848_v19 = vmov 0.0   ;;  %v3850_v20 = vmov 0.0   ;;  %v3852_v21 = vmov 0.0   ;;  %v3854_v22 = vmov 0.0  }
 0x128   : > { %v3856_v23 = vmov 0.0   ;;  %v3858_v24 = vmov 0.0   ;;  %v3860_v25 = vmov 0.0   ;;  %v3862_v26 = vmov 0.0  }
 0x129 LB: >> { %s3905_s13 = smov 0   ;;  %s3487_s12 = sphi %s3864_s12, %s531_s12   ;;  %v3483_v26 = vphi %v3862_v26, %v4350_v26   ;;  %v3479_v25 = vphi %v3860_v25, %v4349_v25   ;;  %v3475_v24 = vphi %v3858_v24, %v4348_v24   ;;  %v3471_v23 = vphi %v3856_v23, %v4347_v23   ;;  %v3467_v22 = vphi %v3854_v22, %v4346_v22   ;;  %v3463_v21 = vphi %v3852_v21, %v4345_v21   ;;  %v3459_v20 = vphi %v3850_v20, %v4344_v20   ;;  %v3455_v19 = vphi %v3848_v19, %v4343_v19   ;;  %v3451_v18 = vphi %v3846_v18, %v4342_v18   ;;  %v3447_v17 = vphi %v3844_v17, %v4341_v17   ;;  %v3443_v16 = vphi %v3842_v16, %v4340_v16   ;;  %v3439_v15 = vphi %v3840_v15, %v4339_v15  }
 0x12a LB: >>> { %s2484_s14 = sadd.s32 4294967294, %s3487_s12  ;;  %s2485_s16 = sadd.s32 4294967294, %s3539_s13  ;;  %s3539_s13 = sphi %s3905_s13, %s549_s13   ;;  %v3535_v26 = vphi %v3483_v26, %v4337_v26   ;;  %v3531_v25 = vphi %v3479_v25, %v4336_v25   ;;  %v3527_v24 = vphi %v3475_v24, %v4335_v24   ;;  %v3523_v23 = vphi %v3471_v23, %v4334_v23   ;;  %v3519_v22 = vphi %v3467_v22, %v4333_v22   ;;  %v3515_v21 = vphi %v3463_v21, %v4332_v21   ;;  %v3511_v20 = vphi %v3459_v20, %v4331_v20   ;;  %v3507_v19 = vphi %v3455_v19, %v4330_v19   ;;  %v3503_v18 = vphi %v3451_v18, %v4329_v18   ;;  %v3499_v17 = vphi %v3447_v17, %v4328_v17   ;;  %v3495_v16 = vphi %v3443_v16, %v4327_v16   ;;  %v3491_v15 = vphi %v3439_v15, %v4326_v15  }
 0x12b   : >>> { %s2361_s15 = smul.u32 12, %s2484_s14 }
 0x12c   : >>> { %s2366_s17 = smul.u32 5, %s3487_s12 }
 0x12d   : >>> { %s2362_s18 = sadd.s32 %s2485_s16, %s2361_s15 }
 0x12e   : >>> { %s2363_s19 = sadd.s32 %s2362_s18, %s525_s11  ;;  %s2367_s20 = sadd.s32 %s3539_s13, %s2366_s17 }
 0x12f   : >>> { %s2498_s21 = sshll.u32 %s2367_s20, 3  ;;  %s3949_s25 = scalar_lea.vmem [#allocation3], %s2363_s19 }
 0x130   : >>> { %s2369_s24 = scalar_lea.vmem %s4322_s1, %s2498_s21  ;;  %v2486_v28 = vld [vmem:[%s3949_s25 + $0x20] sm:$0xff]  ;;  %v2492_v0 = vld [vmem:[%s3949_s25 + $0x50] sm:$0xff]  ;;  %v2487_v7 = vld [vmem:[%s3949_s25 + $0x28] sm:$0xff]  ;;  %s549_s13 = sadd.s32 1, %s3539_s13  }
 0x131   : >>> { %v2499_v1 = vld [vmem:[%s2369_s24 + $0x4c] sm:$0xff]  ;;  %v2500_v2 = vld [vmem:[%s2369_s24 + $0x54] sm:$0xff]  ;;  %v2501_v3 = vld [vmem:[%s2369_s24 + $0x5c] sm:$0xff]  ;;  %2721 = vmatprep.mubr.msk.f32.mxu0 %vm265_vm4, %v2486_v28  ;;  %2730 = vmatprep.mubr.msk.f32.mxu1 %vm265_vm4, %v2492_v0  ;;  %p3987_p1 = scmp.ge.s32.totalorder %s549_s13, 5  }
 0x132   : >>> { %v2959_v4 = vpack.c.bf16 %v2500_v2, %v2499_v1  ;;  %v2502_v5 = vld [vmem:[%s2369_s24 + $0x64] sm:$0xff]  ;;  %v2493_v8 = vld [vmem:[%s3949_s25 + $0x58] sm:$0xff]  ;;  %v2488_v9 = vld [vmem:[%s3949_s25 + $0x30] sm:$0xff]  ;;  %s531_s12 = sadd.s32 (%p3987_p1), 1, %s3487_s12  }
 0x133   : >>> { %v2963_v6 = vpack.c.bf16 %v2502_v5, %v2501_v3  ;;  %v2494_v10 = vld [vmem:[%s3949_s25 + $0x60] sm:$0xff]  ;;  %v2489_v30 = vld [vmem:[%s3949_s25 + $0x38] sm:$0xff]  ;;  %v2495_v31 = vld [vmem:[%s3949_s25 + $0x68] sm:$0xff]  ;;  %p4021_p2 = scmp.ge.s32.totalorder (%p3987_p1), %s531_s12, 5  }
 0x134   : >>> { %2960 = vmatprep.subr.bf16.mxu0 %v2959_v4  ;;  %3085 = vmatprep.subr.bf16.mxu1 %v2959_v4  ;;  %v2490_v32 = vld [vmem:[%s3949_s25 + $0x40] sm:$0xff]  ;;  %v2496_v33 = vld [vmem:[%s3949_s25 + $0x70] sm:$0xff]  ;;  %v2491_v34 = vld [vmem:[%s3949_s25 + $0x48] sm:$0xff] }
 0x135   : >>> { %2962 = vmatpush3.bf16.msra.mxu0 %v2959_v4  ;;  %3087 = vmatpush3.bf16.msra.mxu1 %v2959_v4  ;;  %v2497_v35 = vld [vmem:[%s3949_s25 + $0x78] sm:$0xff] }
 0x136   : >>> { %2964 = vmatprep.subr.bf16.mxu0 %v2963_v6  ;;  %3086 = vmatprep.subr.bf16.mxu1 %v2963_v6 }
 0x139   : >>> { %2966 = vmatpush3.bf16.msra.mxu0 %v2963_v6  ;;  %3088 = vmatpush3.bf16.msra.mxu1 %v2963_v6 }
 0x13c   : >>> { %2722 = vmatmul.mubr.msk.f32.vlgmr.msra.gmra.mrb[0].mxu0 %vm265_vm4, %v2487_v7  ;;  %2731 = vmatmul.mubr.msk.f32.vlgmr.msra.gmra.mrb[0].mxu1 %vm265_vm4, %v2493_v8 }
 0x13d   : >>> { %2724 = vmatprep.mubr.msk.f32.mxu0 %vm265_vm4, %v2488_v9  ;;  %2733 = vmatprep.mubr.msk.f32.mxu1 %vm265_vm4, %v2494_v10 }
 0x140   : >>> { %2725 = vmatmul.mubr.msk.f32.gmra.mrb[2].mxu0 %vm265_vm4, %v2489_v30  ;;  %2734 = vmatmul.mubr.msk.f32.gmra.mrb[2].mxu1 %vm265_vm4, %v2495_v31 }
 0x141   : >>> { %2727 = vmatprep.mubr.msk.f32.mxu0 %vm265_vm4, %v2490_v32  ;;  %2736 = vmatprep.mubr.msk.f32.mxu1 %vm265_vm4, %v2496_v33 }
 0x144   : >>> { %2728 = vmatmul.mubr.msk.f32.gmra.mrb[4].mxu0 %vm265_vm4, %v2491_v34  ;;  %2737 = vmatmul.mubr.msk.f32.gmra.mrb[4].mxu1 %vm265_vm4, %v2497_v35 }
 0x20f   : >>> { %v2723_v36 = vpop.f32.mrb[0].mxu0  ;;  %v2732_v37 = vpop.f32.mrb[0].mxu1 }
 0x210   : >>> { %v752_v38 = vadd.f32 %v3531_v25, %v2723_v36   ;;  %v758_v39 = vadd.f32 %v3507_v19, %v2732_v37   ;;  %v692_v40 = vpop.f32.mrb[1].mxu0  ;;  %v722_v41 = vpop.f32.mrb[1].mxu1 }
 0x211   : >>> { %v751_v42 = vadd.f32 %v3535_v26, %v692_v40   ;;  %v757_v43 = vadd.f32 %v3511_v20, %v722_v41  }
 0x212   : >>> { %v4330_v19 = vmov %v758_v39  ;;  %v4336_v25 = vmov %v752_v38 }
 0x213   : >>> { %v2726_v44 = vpop.f32.mrb[2].mxu0  ;;  %v2735_v45 = vpop.f32.mrb[2].mxu1  ;;  %v4331_v20 = vmov %v757_v43  ;;  %v4337_v26 = vmov %v751_v42  ;;  %v4343_v19 = vmov (%p3987_p1), %v758_v39  ;;  %v4349_v25 = vmov (%p3987_p1), %v752_v38 }
 0x214   : >>> { %v754_v46 = vadd.f32 %v3523_v23, %v2726_v44   ;;  %v3978_v17 = vadd.f32 %v3499_v17, %v2735_v45   ;;  %v702_v48 = vpop.f32.mrb[3].mxu0  ;;  %v732_v49 = vpop.f32.mrb[3].mxu1  ;;  %v4344_v20 = vmov (%p3987_p1), %v757_v43  ;;  %v4350_v26 = vmov (%p3987_p1), %v751_v42 }
 0x215   : >>> { %v753_v50 = vadd.f32 %v3527_v24, %v702_v48   ;;  %v759_v51 = vadd.f32 %v3503_v18, %v732_v49   ;;  %548 = sbr.rel (!%p3987_p1) target bundleno = 298 (0x12a), region = 182 }
 0x216   : >>> { %v4324_v47 = vmov %v3978_v17  ;;  %v4334_v23 = vmov %v754_v46 }
 0x217   : >>> { %v2729_v52 = vpop.f32.mrb[4].mxu0  ;;  %v2738_v53 = vpop.f32.mrb[4].mxu1  ;;  %v4328_v17 = vmov %v4324_v47  ;;  %v4329_v18 = vmov %v759_v51  ;;  %v4335_v24 = vmov %v753_v50  ;;  %v4347_v23 = vmov (%p3987_p1), %v754_v46 }
 0x218   : >>> { %v756_v54 = vadd.f32 %v3515_v21, %v2729_v52   ;;  %v762_v55 = vadd.f32 %v3491_v15, %v2738_v53   ;;  %v712_v56 = vpop.f32.mrb[5].mxu0  ;;  %v742_v57 = vpop.f32.mrb[5].mxu1  ;;  %v4341_v17 = vmov (%p3987_p1), %v4324_v47  ;;  %v4342_v18 = vmov (%p3987_p1), %v759_v51 }
 0x219   : >>> { %v755_v58 = vadd.f32 %v3519_v22, %v712_v56   ;;  %v761_v59 = vadd.f32 %v3495_v16, %v742_v57   ;;  %v4348_v24 = vmov (%p3987_p1), %v753_v50 }
 0x21a   : >>> { %v4326_v15 = vmov %v762_v55  ;;  %v4332_v21 = vmov %v756_v54 }
 0x21b   : >>> { %v4327_v16 = vmov %v761_v59  ;;  %v4333_v22 = vmov %v755_v58  ;;  %v4339_v15 = vmov (%p3987_p1), %v762_v55  ;;  %v4345_v21 = vmov (%p3987_p1), %v756_v54 }
 0x21c   : >> { %v4340_v16 = vmov %v761_v59  ;;  %v4346_v22 = vmov %v755_v58  ;;  %530 = sbr.rel (!%p4021_p2) target bundleno = 297 (0x129), region = 193  ;;  %v767_v60 = vadd.f32 (%p4021_p2), %v3728_v27, %v751_v42  ;;  %v768_v61 = vadd.f32 (%p4021_p2), %v3728_v27, %v752_v38  ;;  %s791_s28 = scalar_lea.vmem (%p4021_p2), [#allocation4], %s525_s11 }
 0x21d   : > { %v769_v62 = vadd.f32 (%p4021_p2), %v3728_v27, %v753_v50  ;;  %v770_v63 = vadd.f32 (%p4021_p2), %v3728_v27, %v754_v46  ;;  %v771_v11 = vadd.f32 (%p4021_p2), %v3728_v27, %v755_v58  ;;  %v772_v12 = vadd.f32 (%p4021_p2), %v3728_v27, %v756_v54  ;;  %s524_s0 = sadd.s32 (%p4021_p2), 1, %s3435_s0  }
 0x21e   : > { %v773_v13 = vadd.f32 (%p4021_p2), %v3728_v27, %v757_v43  ;;  %v774_v14 = vadd.f32 (%p4021_p2), %v3728_v27, %v758_v39  ;;  %v779_v26 = vmax.f32 (%p4021_p2), %v767_v60, 0.0  ;;  %v780_v28 = vmax.f32 (%p4021_p2), %v768_v61, 0.0  ;;  %p521_p3 = scmp.ge.s32.totalorder (%p4021_p2), %s524_s0, 3  }
 0x21f   : > { %v781_v0 = vmax.f32 (%p4021_p2), %v769_v62, 0.0  ;;  %v782_v15 = vmax.f32 (%p4021_p2), %v770_v63, 0.0  ;;  %v783_v16 = vmax.f32 (%p4021_p2), %v771_v11, 0.0  ;;  %v784_v17 = vmax.f32 (%p4021_p2), %v772_v12, 0.0 }
 0x220   : > { %v785_v18 = vmax.f32 (%p4021_p2), %v773_v13, 0.0  ;;  %v786_v19 = vmax.f32 (%p4021_p2), %v774_v14, 0.0  ;;  %792 = vst.msk [vmem:[%s791_s28] sm:$0xff] (%p4021_p2), %vm265_vm4, %v779_v26  ;;  %793 = vst.msk [vmem:[%s791_s28 + $0x8] sm:$0xff] (%p4021_p2), %vm265_vm4, %v780_v28  ;;  %v775_v20 = vadd.f32 (%p4021_p2), %v3728_v27, %v759_v51  ;;  %v776_v21 = vadd.f32 (%p4021_p2), %v3728_v27, %v4324_v47 }
 0x221   : > { %794 = vst.msk [vmem:[%s791_s28 + $0x10] sm:$0xff] (%p4021_p2), %vm265_vm4, %v781_v0  ;;  %795 = vst.msk [vmem:[%s791_s28 + $0x18] sm:$0xff] (%p4021_p2), %vm265_vm4, %v782_v15  ;;  %v777_v22 = vadd.f32 (%p4021_p2), %v3728_v27, %v761_v59  ;;  %v778_v23 = vadd.f32 (%p4021_p2), %v3728_v27, %v762_v55 }
 0x222   : > { %796 = vst.msk [vmem:[%s791_s28 + $0x20] sm:$0xff] (%p4021_p2), %vm265_vm4, %v783_v16  ;;  %797 = vst.msk [vmem:[%s791_s28 + $0x28] sm:$0xff] (%p4021_p2), %vm265_vm4, %v784_v17  ;;  %v787_v24 = vmax.f32 (%p4021_p2), %v775_v20, 0.0  ;;  %v788_v25 = vmax.f32 (%p4021_p2), %v776_v21, 0.0 }
 0x223   : > { %798 = vst.msk [vmem:[%s791_s28 + $0x30] sm:$0xff] %vm265_vm4, %v785_v18  ;;  %799 = vst.msk [vmem:[%s791_s28 + $0x38] sm:$0xff] %vm265_vm4, %v786_v19  ;;  %v789_v1 = vmax.f32 %v777_v22, 0.0  ;;  %v790_v2 = vmax.f32 %v778_v23, 0.0  ;;  %523 = sbr.rel (!%p521_p3) target bundleno = 294 (0x126), region = 204  ;;  %v904_v3 = vld [vmem:[%s4322_s1 + $0x125] sm:$0xff] (%p521_p3) }
 0x224   : > { %800 = vst.msk [vmem:[%s791_s28 + $0x40] sm:$0xff] %vm265_vm4, %v787_v24  ;;  %801 = vst.msk [vmem:[%s791_s28 + $0x48] sm:$0xff] %vm265_vm4, %v788_v25  ;;  %v905_v4 = vld [vmem:[%s4322_s1 + $0x12d] sm:$0xff] (%p521_p3)  ;;  %v902_v5 = vld [vmem:[%s4322_s1 + $0x115] sm:$0xff] (%p521_p3)  ;;  %v3543_v6 = vmov (%p521_p3), 0.0|0.0   ;;  %vm815_vm5 = vcmask (%p521_p3), 257024  }
 0x225   : > { %802 = vst.msk [vmem:[%s791_s28 + $0x50] sm:$0xff] %vm265_vm4, %v789_v1  ;;  %803 = vst.msk [vmem:[%s791_s28 + $0x58] sm:$0xff] %vm265_vm4, %v790_v2  ;;  %2967 = vmatprep.subr.bf16.mxu0 (%p521_p3), %v3543_v6  ;;  %v2968_v7 = vpack.c.bf16 (%p521_p3), %v905_v4, %v904_v3  ;;  %2973 = vmatprep.subr.bf16.mxu1 (%p521_p3), %v3543_v6  ;;  %v903_v27 = vld [vmem:[%s4322_s1 + $0x11d] sm:$0xff] (%p521_p3)  ;;  %v908_v8 = vld [vmem:[%s4322_s1 + $0x135] sm:$0xff] (%p521_p3)  ;;  %vm3544_vm6 = vmmov (%p521_p3), 0   ;;  %vm2348_vm7 = vcmask (%p521_p3), 1041408  }
 0x226   :  { %v909_v9 = vld [vmem:[%s4322_s1 + $0x13d] sm:$0xff] (%p521_p3)  ;;  %v2974_v10 = vpack.c.bf16 (%p521_p3), %v903_v27, %v902_v5  ;;  %2747 = vmatprep.mubr.msk.f32.mxu0 (%p521_p3), %vm3544_vm6, %v3542_v29  ;;  %2758 = vmatprep.mubr.msk.f32.mxu1 (%p521_p3), %vm3544_vm6, %v3542_v29  ;;  %v1138_v54 = vld [vmem:[%s4322_s1 + $0x145] sm:$0xff] (%p521_p3)  ;;  %v1139_v55 = vld [vmem:[%s4322_s1 + $0x14d] sm:$0xff] (%p521_p3) }
 0x227   :  { %2969 = vmatpush3.bf16.msra.mxu0 (%p521_p3), %v2968_v7  ;;  %v2971_v32 = vpack.c.bf16 (%p521_p3), %v909_v9, %v908_v8  ;;  %v1140_v60 = vld [vmem:[%s4322_s1 + $0x155] sm:$0xff] (%p521_p3)  ;;  %v1141_v61 = vld [vmem:[%s4322_s1 + $0x15d] sm:$0xff] (%p521_p3)  ;;  %v2986_v62 = vpack.c.bf16 (%p521_p3), %v1139_v55, %v1138_v54  ;;  %v1298_v16 = vld [vmem:[%s4322_s1 + $0x165] sm:$0xff] (%p521_p3) }
 0x228   :  { %2975 = vmatpush3.bf16.msra.mxu1 (%p521_p3), %v2974_v10  ;;  %2970 = vmatprep.subr.bf16.mxu0 (%p521_p3), %v3543_v6  ;;  %v1299_v17 = vld [vmem:[%s4322_s1 + $0x16d] sm:$0xff] (%p521_p3)  ;;  %v2989_v18 = vpack.c.bf16 (%p521_p3), %v1141_v61, %v1140_v60  ;;  %v1300_v5 = vld [vmem:[%s4322_s1 + $0x175] sm:$0xff] (%p521_p3)  ;;  %v1458_v8 = vld [vmem:[%s4322_s1 + $0x185] sm:$0xff] (%p521_p3) }
 0x229   :  { %2976 = vmatprep.subr.bf16.mxu1 (%p521_p3), %v3543_v6  ;;  %v2998_v3 = vpack.c.bf16 (%p521_p3), %v1299_v17, %v1298_v16  ;;  %v1459_v9 = vld [vmem:[%s4322_s1 + $0x18d] sm:$0xff] (%p521_p3)  ;;  %v1620_v54 = vld [vmem:[%s4322_s1 + $0x1b5] sm:$0xff] (%p521_p3)  ;;  %v1621_v55 = vld [vmem:[%s4322_s1 + $0x1bd] sm:$0xff] (%p521_p3) }
 0x22a   :  { %v2098_v17 = vld [vmem:[%s4322_s1 + $0x205] sm:$0xff] }
 0x22b   :  { %2972 = vmatpush3.bf16.msra.mxu0 %v2971_v32 }
 0x22c   :  { %v805_v30 = vld [vmem:[#allocation4 + $0x1a] ss:$2 sm:$0xf]  ;;  %v807_v31 = vld [vmem:[#allocation4 + $0x1b] ss:$2 sm:$0xf]  ;;  %2978 = vmatpush3.bf16.msra.mxu1 %v2968_v7  ;;  %2979 = vmatprep.subr.bf16.mxu0 %v3543_v6 }
 0x22d   :  { %v808_v33 = vmax.f32 %v805_v30, %v807_v31  ;;  %v810_v34 = vld [vmem:[#allocation4 + $0x26] ss:$2 sm:$0xf]  ;;  %v812_v35 = vld [vmem:[#allocation4 + $0x27] ss:$2 sm:$0xf]  ;;  %2985 = vmatprep.subr.bf16.mxu1 %v3543_v6 }
 0x22e   :  { %v813_v36 = vmax.f32 %v810_v34, %v812_v35  ;;  %v854_v37 = vld [vmem:[#allocation4 + $0xaa] ss:$2 sm:$0xf]  ;;  %v856_v38 = vld [vmem:[#allocation4 + $0xab] ss:$2 sm:$0xf] }
 0x22f   :  { %v857_v39 = vmax.f32 %v854_v37, %v856_v38  ;;  %v859_v40 = vld [vmem:[#allocation4 + $0xb6] ss:$2 sm:$0xf]  ;;  %v861_v41 = vld [vmem:[#allocation4 + $0xb7] ss:$2 sm:$0xf] }
 0x230   :  { %v814_v42 = vmax.f32 %v808_v33, %v813_v36  ;;  %v862_v43 = vmax.f32 %v859_v40, %v861_v41  ;;  %v818_v45 = vld [vmem:[#allocation4 + $0x32] ss:$2 sm:$0xf]  ;;  %v820_v46 = vld [vmem:[#allocation4 + $0x33] ss:$2 sm:$0xf] }
 0x231   :  { %v823_v47 = vld [vmem:[#allocation4 + $0x3e] ss:$2 sm:$0xf]  ;;  %v821_v48 = vmax.f32 %v818_v45, %v820_v46  ;;  %v825_v49 = vld [vmem:[#allocation4 + $0x3f] ss:$2 sm:$0xf] }
 0x232   :  { %816 = vst.msk [vmem:[#allocation5] sm:$0xf] %vm815_vm5, %v814_v42  ;;  %v863_v44 = vmax.f32 %v857_v39, %v862_v43  ;;  %v866_v50 = vld [vmem:[#allocation4 + $0xc2] ss:$2 sm:$0xf]  ;;  %v826_v51 = vmax.f32 %v823_v47, %v825_v49  ;;  %v1460_v45 = vld [vmem:[%s4322_s1 + $0x195] sm:$0xff] }
 0x233   :  { %v868_v52 = vld [vmem:[#allocation4 + $0xc3] ss:$2 sm:$0xf]  ;;  %v871_v53 = vld [vmem:[#allocation4 + $0xce] ss:$2 sm:$0xf] }
 0x234   :  { %864 = vst.msk [vmem:[#allocation5 + $0x10] sm:$0xf] %vm815_vm5, %v863_v44  ;;  %v869_v56 = vmax.f32 %v866_v50, %v868_v52  ;;  %v873_v57 = vld [vmem:[#allocation4 + $0xcf] ss:$2 sm:$0xf]  ;;  %v827_v58 = vmax.f32 %v821_v48, %v826_v51  ;;  %v1301_v7 = vld [vmem:[%s4322_s1 + $0x17d] sm:$0xff]  ;;  %v3010_v44 = vpack.c.bf16 %v1459_v9, %v1458_v8 }
 0x235   :  { %v874_v59 = vmax.f32 %v871_v53, %v873_v57  ;;  %v830_v11 = vld [vmem:[#allocation4 + $0x4a] ss:$2 sm:$0xf]  ;;  %v832_v12 = vld [vmem:[#allocation4 + $0x4b] ss:$2 sm:$0xf]  ;;  %v3001_v31 = vpack.c.bf16 %v1301_v7, %v1300_v5 }
 0x236   :  { %828 = vst.msk [vmem:[#allocation5 + $0x4] sm:$0xf] %vm815_vm5, %v827_v58  ;;  %v833_v13 = vmax.f32 %v830_v11, %v832_v12  ;;  %v835_v14 = vld [vmem:[#allocation4 + $0x56] ss:$2 sm:$0xf]  ;;  %v1461_v46 = vld [vmem:[%s4322_s1 + $0x19d] sm:$0xff] }
 0x237   :  { %v875_v63 = vmax.f32 %v869_v56, %v874_v59  ;;  %v837_v26 = vld [vmem:[#allocation4 + $0x57] ss:$2 sm:$0xf]  ;;  %v878_v20 = vld [vmem:[#allocation4 + $0xda] ss:$2 sm:$0xf]  ;;  %v3013_v48 = vpack.c.bf16 %v1461_v46, %v1460_v45  ;;  %v3025_v56 = vpack.c.bf16 %v1621_v55, %v1620_v54 }
 0x238   :  { %v838_v15 = vmax.f32 %v835_v14, %v837_v26  ;;  %v880_v21 = vld [vmem:[#allocation4 + $0xdb] ss:$2 sm:$0xf]  ;;  %v883_v23 = vld [vmem:[#allocation4 + $0xe6] ss:$2 sm:$0xf] }
 0x239   :  { %876 = vst.msk [vmem:[#allocation5 + $0x14] sm:$0xf] %vm815_vm5, %v875_v63  ;;  %v881_v22 = vmax.f32 %v878_v20, %v880_v21  ;;  %v885_v24 = vld [vmem:[#allocation4 + $0xe7] ss:$2 sm:$0xf]  ;;  %v1781_v63 = vld [vmem:[%s4322_s1 + $0x1dd] sm:$0xff] }
 0x23a   :  { %v839_v19 = vmax.f32 %v833_v13, %v838_v15  ;;  %v886_v25 = vmax.f32 %v883_v23, %v885_v24  ;;  %v842_v27 = vld [vmem:[#allocation4 + $0x62] ss:$2 sm:$0xf]  ;;  %v844_v10 = vld [vmem:[#allocation4 + $0x63] ss:$2 sm:$0xf] }
 0x23b   :  { %v907_v28 = vld [vmem:[#allocation5 + $0x1] ss:$16 sm:$0x3]  ;;  %v901_v0 = vld [vmem:[#allocation5] ss:$16 sm:$0x3] }
 0x23c   :  { %2748 = vmatmul.mubr.msk.f32.vlgmr.msra.gmra.mrb[0].mxu0 %vm265_vm4, %v907_v28  ;;  %2759 = vmatmul.mubr.msk.f32.vlgmr.msra.gmra.mrb[0].mxu1 %vm265_vm4, %v901_v0  ;;  %840 = vst.msk [vmem:[#allocation5 + $0x8] sm:$0xf] %vm815_vm5, %v839_v19  ;;  %v1057_v1 = vld [vmem:[#allocation5 + $0x2] ss:$16 sm:$0x3]  ;;  %v887_v4 = vmax.f32 %v881_v22, %v886_v25  ;;  %v1618_v49 = vld [vmem:[%s4322_s1 + $0x1a5] sm:$0xff] }
 0x23d   :  { %2981 = vmatpush3.bf16.msra.mxu0 %v2971_v32  ;;  %2987 = vmatpush3.bf16.msra.mxu1 %v2986_v62  ;;  %v1137_v2 = vld [vmem:[#allocation5 + $0x3] ss:$16 sm:$0x3]  ;;  %v847_v30 = vld [vmem:[#allocation4 + $0x6e] ss:$2 sm:$0xf]  ;;  %v845_v32 = vmax.f32 %v842_v27, %v844_v10 }
 0x23e   :  { %2982 = vmatprep.subr.bf16.mxu0 %v3543_v6  ;;  %2988 = vmatprep.subr.bf16.mxu1 %v3543_v6  ;;  %888 = vst.msk [vmem:[#allocation5 + $0x18] sm:$0xf] %vm815_vm5, %v887_v4  ;;  %v849_v33 = vld [vmem:[#allocation4 + $0x6f] ss:$2 sm:$0xf]  ;;  %v1778_v57 = vld [vmem:[%s4322_s1 + $0x1c5] sm:$0xff] }
 0x23f   :  { %2769 = vmatprep.mubr.msk.f32.mxu0 %vm3544_vm6, %v3542_v29  ;;  %2780 = vmatprep.mubr.msk.f32.mxu1 %vm3544_vm6, %v3542_v29  ;;  %v890_v34 = vld [vmem:[#allocation4 + $0xf2] ss:$2 sm:$0xf]  ;;  %v850_v35 = vmax.f32 %v847_v30, %v849_v33  ;;  %v892_v36 = vld [vmem:[#allocation4 + $0xf3] ss:$2 sm:$0xf] }
 0x240   :  { %v895_v37 = vld [vmem:[#allocation4 + $0xfe] ss:$2 sm:$0xf]  ;;  %v893_v38 = vmax.f32 %v890_v34, %v892_v36  ;;  %v897_v39 = vld [vmem:[#allocation4 + $0xff] ss:$2 sm:$0xf] }
 0x241   :  { %2984 = vmatpush3.bf16.msra.mxu0 %v2986_v62  ;;  %2990 = vmatpush3.bf16.msra.mxu1 %v2989_v18  ;;  %v851_v40 = vmax.f32 %v845_v32, %v850_v35  ;;  %v898_v41 = vmax.f32 %v895_v37, %v897_v39  ;;  %v1217_v42 = vld [vmem:[#allocation5 + $0x4] ss:$16 sm:$0x3]  ;;  %v1297_v43 = vld [vmem:[#allocation5 + $0x5] ss:$16 sm:$0x3] }
 0x242   :  { %2991 = vmatprep.subr.bf16.mxu0 %v3543_v6  ;;  %2997 = vmatprep.subr.bf16.mxu1 %v3543_v6  ;;  %v1619_v50 = vld [vmem:[%s4322_s1 + $0x1ad] sm:$0xff]  ;;  %v1377_v51 = vld [vmem:[#allocation5 + $0x6] ss:$16 sm:$0x3]  ;;  %v1941_v15 = vld [vmem:[%s4322_s1 + $0x1fd] sm:$0xff] }
 0x243   :  { %852 = vst.msk [vmem:[#allocation5 + $0xc] sm:$0xf] %vm815_vm5, %v851_v40  ;;  %v899_v47 = vmax.f32 %v893_v38, %v898_v41  ;;  %v1457_v52 = vld [vmem:[#allocation5 + $0x7] ss:$16 sm:$0x3]  ;;  %v3022_v53 = vpack.c.bf16 %v1619_v50, %v1618_v49  ;;  %v1779_v58 = vld [vmem:[%s4322_s1 + $0x1cd] sm:$0xff] }
 0x244   :  { %2770 = vmatmul.mubr.msk.f32.vlgmr.msra.gmra.mrb[2].mxu0 %vm265_vm4, %v1057_v1  ;;  %2781 = vmatmul.mubr.msk.f32.vlgmr.msra.gmra.mrb[2].mxu1 %vm265_vm4, %v1137_v2  ;;  %v3034_v61 = vpack.c.bf16 %v1779_v58, %v1778_v57  ;;  %v1780_v62 = vld [vmem:[%s4322_s1 + $0x1d5] sm:$0xff]  ;;  %v1938_v12 = vld [vmem:[%s4322_s1 + $0x1e5] sm:$0xff]  ;;  %v1939_v13 = vld [vmem:[%s4322_s1 + $0x1ed] sm:$0xff] }
 0x245   :  { %2993 = vmatpush3.bf16.msra.mxu0 %v2989_v18  ;;  %2999 = vmatpush3.bf16.msra.mxu1 %v2998_v3  ;;  %900 = vst.msk [vmem:[#allocation5 + $0x1c] sm:$0xf] %vm815_vm5, %v899_v47  ;;  %v1537_v59 = vld [vmem:[#allocation5 + $0x8] ss:$16 sm:$0x3]  ;;  %v3037_v11 = vpack.c.bf16 %v1781_v63, %v1780_v62  ;;  %v3046_v28 = vpack.c.bf16 %v1939_v13, %v1938_v12  ;;  %v2099_v18 = vld [vmem:[%s4322_s1 + $0x20d] sm:$0xff] }
 0x246   :  { %2994 = vmatprep.subr.bf16.mxu0 %v3543_v6  ;;  %3000 = vmatprep.subr.bf16.mxu1 %v3543_v6  ;;  %v1617_v60 = vld [vmem:[#allocation5 + $0x9] ss:$16 sm:$0x3]  ;;  %v1697_v14 = vld [vmem:[#allocation5 + $0xa] ss:$16 sm:$0x3]  ;;  %v3058_v21 = vpack.c.bf16 %v2099_v18, %v2098_v17 }
 0x247   :  { %2791 = vmatprep.mubr.msk.f32.mxu0 %vm3544_vm6, %v3542_v29  ;;  %2802 = vmatprep.mubr.msk.f32.mxu1 %vm3544_vm6, %v3542_v29  ;;  %v1777_v26 = vld [vmem:[#allocation5 + $0xb] ss:$16 sm:$0x3]  ;;  %v2101_v23 = vld [vmem:[%s4322_s1 + $0x21d] sm:$0xff]  ;;  %v2532_v18 = vld [vmem:[%s4322_s1 + $0x215] ss:$0 sm:$0xff] }
 0x248   :  { %v1940_v0 = vld [vmem:[%s4322_s1 + $0x1f5] sm:$0xff]  ;;  %v2185_v5 = vld [vmem:[%s4322_s1 + $0x226] sm:$0xff] }
 0x249   :  { %2996 = vmatpush3.bf16.msra.mxu0 %v2998_v3  ;;  %3002 = vmatpush3.bf16.msra.mxu1 %v3001_v31  ;;  %v3049_v16 = vpack.c.bf16 %v1941_v15, %v1940_v0  ;;  %v2100_v22 = vld [vmem:[%s4322_s1 + $0x215] sm:$0xff]  ;;  %v2184_v3 = vld [vmem:[%s4322_s1 + $0x21e] sm:$0xff] }
 0x24a   :  { %3003 = vmatprep.subr.bf16.mxu0 %v3543_v6  ;;  %3009 = vmatprep.subr.bf16.mxu1 %v3543_v6  ;;  %v3061_v24 = vpack.c.bf16 %v2101_v23, %v2100_v22  ;;  %v2183_v2 = vld [vmem:[%s4322_s1 + $0x216] sm:$0xff]  ;;  %v2267_v8 = vld [vmem:[%s4322_s1 + $0x23f] sm:$0xff]  ;;  %v2268_v22 = vld [vmem:[%s4322_s1 + $0x247] sm:$0xff] }
 0x24b   :  { %v3064_v4 = vpack.c.bf16 %v2184_v3, %v2183_v2  ;;  %v2266_v27 = vld [vmem:[%s4322_s1 + $0x237] sm:$0xff]  ;;  %v2269_v23 = vld [vmem:[%s4322_s1 + $0x24f] sm:$0xff] }
 0x24c   :  { %2792 = vmatmul.mubr.msk.f32.vlgmr.msra.gmra.mrb[4].mxu0 %vm265_vm4, %v1217_v42  ;;  %2803 = vmatmul.mubr.msk.f32.vlgmr.msra.gmra.mrb[4].mxu1 %vm265_vm4, %v1297_v43  ;;  %v1857_v19 = vld [vmem:[#allocation5 + $0xc] ss:$16 sm:$0x3]  ;;  %v1937_v20 = vld [vmem:[#allocation5 + $0xd] ss:$16 sm:$0x3]  ;;  %v3070_v9 = vpack.c.bf16 %v2267_v8, %v2266_v27 }
 0x24d   :  { %3005 = vmatpush3.bf16.msra.mxu0 %v3001_v31  ;;  %3011 = vmatpush3.bf16.msra.mxu1 %v3010_v44  ;;  %v2017_v25 = vld [vmem:[#allocation5 + $0xe] ss:$16 sm:$0x3]  ;;  %v2097_v1 = vld [vmem:[#allocation5 + $0xf] ss:$16 sm:$0x3] }
 0x24e   :  { %3006 = vmatprep.subr.bf16.mxu0 %v3543_v6  ;;  %3012 = vmatprep.subr.bf16.mxu1 %v3543_v6 }
 0x24f   :  { %2813 = vmatprep.mubr.msk.f32.mxu0 %vm3544_vm6, %v3542_v29  ;;  %2824 = vmatprep.mubr.msk.f32.mxu1 %vm3544_vm6, %v3542_v29 }
 0x251   :  { %3008 = vmatpush3.bf16.msra.mxu0 %v3010_v44  ;;  %3014 = vmatpush3.bf16.msra.mxu1 %v3013_v48 }
 0x252   :  { %3015 = vmatprep.subr.bf16.mxu0 %v3543_v6  ;;  %3021 = vmatprep.subr.bf16.mxu1 %v3543_v6 }
 0x254   :  { %2814 = vmatmul.mubr.msk.f32.vlgmr.msra.gmra.mrb[6].mxu0 %vm265_vm4, %v1377_v51  ;;  %2825 = vmatmul.mubr.msk.f32.vlgmr.msra.gmra.mrb[6].mxu1 %vm265_vm4, %v1457_v52 }
 0x255   :  { %3017 = vmatpush3.bf16.msra.mxu0 %v3013_v48  ;;  %3023 = vmatpush3.bf16.msra.mxu1 %v3022_v53 }
 0x256   :  { %3018 = vmatprep.subr.bf16.mxu0 %v3543_v6  ;;  %3024 = vmatprep.subr.bf16.mxu1 %v3543_v6 }
 0x257   :  { %2835 = vmatprep.mubr.msk.f32.mxu0 %vm3544_vm6, %v3542_v29  ;;  %2846 = vmatprep.mubr.msk.f32.mxu1 %vm3544_vm6, %v3542_v29 }
 0x259   :  { %3020 = vmatpush3.bf16.msra.mxu0 %v3022_v53  ;;  %3026 = vmatpush3.bf16.msra.mxu1 %v3025_v56 }
 0x25a   :  { %3027 = vmatprep.subr.bf16.mxu0 %v3543_v6  ;;  %3033 = vmatprep.subr.bf16.mxu1 %v3543_v6 }
 0x25c   :  { %2836 = vmatmul.mubr.msk.f32.vlgmr.msra.gmra.mrb[8].mxu0 %vm265_vm4, %v1537_v59  ;;  %2847 = vmatmul.mubr.msk.f32.vlgmr.msra.gmra.mrb[8].mxu1 %vm265_vm4, %v1617_v60 }
 0x25d   :  { %3029 = vmatpush3.bf16.msra.mxu0 %v3025_v56  ;;  %3035 = vmatpush3.bf16.msra.mxu1 %v3034_v61 }
 0x25e   :  { %3030 = vmatprep.subr.bf16.mxu0 %v3543_v6  ;;  %3036 = vmatprep.subr.bf16.mxu1 %v3543_v6 }
 0x25f   :  { %2857 = vmatprep.mubr.msk.f32.mxu0 %vm3544_vm6, %v3542_v29  ;;  %2868 = vmatprep.mubr.msk.f32.mxu1 %vm3544_vm6, %v3542_v29 }
 0x261   :  { %3032 = vmatpush3.bf16.msra.mxu0 %v3034_v61  ;;  %3038 = vmatpush3.bf16.msra.mxu1 %v3037_v11 }
 0x262   :  { %3039 = vmatprep.subr.bf16.mxu0 %v3543_v6  ;;  %3045 = vmatprep.subr.bf16.mxu1 %v3543_v6 }
 0x264   :  { %2858 = vmatmul.mubr.msk.f32.vlgmr.msra.gmra.mrb[10].mxu0 %vm265_vm4, %v1697_v14  ;;  %2869 = vmatmul.mubr.msk.f32.vlgmr.msra.gmra.mrb[10].mxu1 %vm265_vm4, %v1777_v26 }
 0x265   :  { %3041 = vmatpush3.bf16.msra.mxu0 %v3037_v11  ;;  %3047 = vmatpush3.bf16.msra.mxu1 %v3046_v28 }
 0x266   :  { %3042 = vmatprep.subr.bf16.mxu0 %v3543_v6  ;;  %3048 = vmatprep.subr.bf16.mxu1 %v3543_v6 }
 0x267   :  { %2879 = vmatprep.mubr.msk.f32.mxu0 %vm3544_vm6, %v3542_v29  ;;  %2890 = vmatprep.mubr.msk.f32.mxu1 %vm3544_vm6, %v3542_v29 }
 0x269   :  { %3044 = vmatpush3.bf16.msra.mxu0 %v3046_v28  ;;  %3050 = vmatpush3.bf16.msra.mxu1 %v3049_v16 }
 0x26a   :  { %3051 = vmatprep.subr.bf16.mxu0 %v3543_v6  ;;  %3057 = vmatprep.subr.bf16.mxu1 %v3543_v6 }
 0x26c   :  { %2880 = vmatmul.mubr.msk.f32.vlgmr.msra.gmra.mrb[12].mxu0 %vm265_vm4, %v1857_v19  ;;  %2891 = vmatmul.mubr.msk.f32.vlgmr.msra.gmra.mrb[12].mxu1 %vm265_vm4, %v1937_v20 }
 0x26d   :  { %3053 = vmatpush3.bf16.msra.mxu0 %v3049_v16  ;;  %3059 = vmatpush3.bf16.msra.mxu1 %v3058_v21 }
 0x26e   :  { %3054 = vmatprep.subr.bf16.mxu0 %v3543_v6  ;;  %3060 = vmatprep.subr.bf16.mxu1 %v3543_v6 }
 0x26f   :  { %2901 = vmatprep.mubr.msk.f32.mxu0 %vm3544_vm6, %v3542_v29  ;;  %2912 = vmatprep.mubr.msk.f32.mxu1 %vm3544_vm6, %v3542_v29 }
 0x271   :  { %3056 = vmatpush3.bf16.msra.mxu0 %v3058_v21  ;;  %3062 = vmatpush3.bf16.msra.mxu1 %v3061_v24  ;;  %v3073_v24 = vpack.c.bf16 %v2269_v23, %v2268_v22 }
 0x272   :  { %3063 = vmatprep.subr.bf16.mxu0 %v3543_v6  ;;  %3069 = vmatprep.subr.bf16.mxu1 %v3543_v6 }
 0x274   :  { %2902 = vmatmul.mubr.msk.f32.vlgmr.msra.gmra.mrb[14].mxu0 %vm265_vm4, %v2017_v25  ;;  %2913 = vmatmul.mubr.msk.f32.vlgmr.msra.gmra.mrb[14].mxu1 %vm265_vm4, %v2097_v1  ;;  %v2533_v25 = vld [vmem:[%s4322_s1 + $0x236] ss:$0 sm:$0xff] }
 0x275   :  { %2923 = vmatprep.mubr.msk.f32.mxu0 %vm3544_vm6, %v3542_v29  ;;  %2934 = vmatprep.mubr.msk.f32.mxu1 %vm3544_vm6, %v3542_v29  ;;  %v2186_v29 = vld [vmem:[%s4322_s1 + $0x22e] sm:$0xff] }
 0x276   :  { %3065 = vmatpush3.bf16.msra.mxu0 %v3064_v4  ;;  %v3067_v7 = vpack.c.bf16 %v2186_v29, %v2185_v5  ;;  %3071 = vmatpush3.bf16.msra.mxu1 %v3070_v9  ;;  %v2535_v5 = vld [vmem:[%s4322_s1 + $0x257] ss:$0 sm:$0xff] }
 0x277   :  { %3066 = vmatprep.subr.bf16.mxu0 %v3543_v6  ;;  %3072 = vmatprep.subr.bf16.mxu1 %v3543_v6 }
 0x27a   :  { %3068 = vmatpush3.bf16.msra.mxu0 %v3067_v7  ;;  %3074 = vmatpush3.bf16.msra.mxu1 %v3073_v24 }
 0x30f   :  { %v979_v10 = vpop.f32.mrb[0].mxu0  ;;  %v1052_v30 = vpop.f32.mrb[0].mxu1 }
 0x310   :  { %v1053_v31 = vadd.f32 %v1052_v30, %v979_v10  ;;  %v2749_v32 = vpop.f32.mrb[1].mxu0  ;;  %v2760_v33 = vpop.f32.mrb[1].mxu1 }
 0x317   :  { %v1131_v34 = vpop.f32.mrb[2].mxu0  ;;  %v1211_v35 = vpop.f32.mrb[2].mxu1 }
 0x318   :  { %v1135_v36 = vadd.f32 %v1131_v34, %v1053_v31  ;;  %v2771_v37 = vpop.f32.mrb[3].mxu0  ;;  %v2782_v38 = vpop.f32.mrb[3].mxu1 }
 0x31a   :  { %v1215_v39 = vadd.f32 %v1211_v35, %v1135_v36 }
 0x31f   :  { %v1291_v40 = vpop.f32.mrb[4].mxu0  ;;  %v1371_v41 = vpop.f32.mrb[4].mxu1 }
 0x320   :  { %v1295_v42 = vadd.f32 %v1291_v40, %v1215_v39  ;;  %v2793_v43 = vpop.f32.mrb[5].mxu0  ;;  %v2804_v44 = vpop.f32.mrb[5].mxu1 }
 0x322   :  { %v1375_v45 = vadd.f32 %v1371_v41, %v1295_v42 }
 0x327   :  { %v1451_v46 = vpop.f32.mrb[6].mxu0  ;;  %v1531_v47 = vpop.f32.mrb[6].mxu1 }
 0x328   :  { %v1455_v6 = vadd.f32 %v1451_v46, %v1375_v45  ;;  %v2815_v48 = vpop.f32.mrb[7].mxu0  ;;  %v2826_v49 = vpop.f32.mrb[7].mxu1 }
 0x32a   :  { %v1535_v50 = vadd.f32 %v1531_v47, %v1455_v6 }
 0x32f   :  { %v1611_v51 = vpop.f32.mrb[8].mxu0  ;;  %v1691_v52 = vpop.f32.mrb[8].mxu1 }
 0x330   :  { %v1615_v53 = vadd.f32 %v1611_v51, %v1535_v50  ;;  %v2837_v54 = vpop.f32.mrb[9].mxu0  ;;  %v2848_v55 = vpop.f32.mrb[9].mxu1 }
 0x332   :  { %v1695_v56 = vadd.f32 %v1691_v52, %v1615_v53 }
 0x337   :  { %v1771_v57 = vpop.f32.mrb[10].mxu0  ;;  %v1851_v58 = vpop.f32.mrb[10].mxu1 }
 0x338   :  { %v1775_v59 = vadd.f32 %v1771_v57, %v1695_v56  ;;  %v2859_v60 = vpop.f32.mrb[11].mxu0  ;;  %v2870_v61 = vpop.f32.mrb[11].mxu1 }
 0x33a   :  { %v1855_v62 = vadd.f32 %v1851_v58, %v1775_v59 }
 0x33f   :  { %v1931_v63 = vpop.f32.mrb[12].mxu0  ;;  %v2011_v11 = vpop.f32.mrb[12].mxu1 }
 0x340   :  { %v1935_v12 = vadd.f32 %v1931_v63, %v1855_v62  ;;  %v2881_v13 = vpop.f32.mrb[13].mxu0  ;;  %v2892_v14 = vpop.f32.mrb[13].mxu1 }
 0x342   :  { %v2015_v26 = vadd.f32 %v2011_v11, %v1935_v12 }
 0x347   :  { %v2091_v28 = vpop.f32.mrb[14].mxu0  ;;  %v2171_v0 = vpop.f32.mrb[14].mxu1 }
 0x348   :  { %v2095_v15 = vadd.f32 %v2091_v28, %v2015_v26  ;;  %v2903_v16 = vpop.f32.mrb[15].mxu0  ;;  %v2914_v17 = vpop.f32.mrb[15].mxu1 }
 0x34a   :  { %v2175_v19 = vadd.f32 %v2171_v0, %v2095_v15 }
 0x34c   :  { %v2181_v20 = vadd.f32 %v2532_v18, %v2175_v19 }
 0x34e   :  { %v2182_v21 = vmax.f32 %v2181_v20, 0.0 }
 0x350   :  { %2924 = vmatmul.mubr.msk.f32.vlgmr.msra.gmra.mrb[16].mxu0 %vm265_vm4, %v2182_v21 }
 0x423   :  { %v2261_v1 = vpop.f32.mrb[16].mxu0 }
 0x424   :  { %v2262_v2 = vadd.f32 %v2533_v25, %v2261_v1  ;;  %v2925_v3 = vpop.f32.mrb[17].mxu0 }
 0x426   :  { %v2265_v4 = vmax.f32 %v2262_v2, 0.0 }
 0x428   :  { %2935 = vmatmul.mubr.msk.f32.vlgmr.msra.gmra.mrb[16].mxu1 %vm265_vm4, %v2265_v4 }
 0x4fb   :  { %v2344_v29 = vpop.f32.mrb[16].mxu1 }
 0x4fc   :  { %v2345_v7 = vadd.f32 %v2535_v5, %v2344_v29  ;;  %v2936_v27 = vpop.f32.mrb[17].mxu1 }
 0x4fe   :  { %v2349_v8 = vsel %vm2348_vm7, %v2345_v7, 0.0 }
 0x4ff   :  { %v2350_v9 = vsel %vm265_vm4, %v2349_v8, 0.0 }
 0x500   :  { %2351 = vst [vmem:[%s4323_s2] sm:$0xff] %v2350_v9 }

// kernel: hcnn_forward.2
= control target key start
LH: loop header
LB: loop body
LE: loop exit
PB: predicated region body
PF: predicated region fallthrough
CT: control target
= control target key end

     0   :  { %s9569_s24 = smov 0   ;;  %s9571_s25 = smov 0   ;;  %s11906_s0 = inlined_call_operand.vmem [shape: f32[1,128], index: 0, kind: input, shape index: {}]   ;;  %s11907_s1 = inlined_call_operand.vmem [shape: f32[1,128], index: 1, kind: input, shape index: {}]   ;;  %s11908_s2 = inlined_call_operand.vmem [shape: f32[1,128], index: 2, kind: input, shape index: {}]   ;;  %s11909_s3 = inlined_call_operand.vmem [shape: f32[128,128], index: 3, kind: input, shape index: {}]   ;;  %s11910_s4 = inlined_call_operand.vmem [shape: f32[1,128], index: 4, kind: input, shape index: {}]   ;;  %s11911_s5 = inlined_call_operand.vmem [shape: bf16[128,19456], index: 5, kind: input, shape index: {}]   ;;  %s11912_s6 = inlined_call_operand.vmem [shape: f32[1,19456], index: 6, kind: input, shape index: {}]   ;;  %s11913_s7 = inlined_call_operand.vmem [shape: f32[1,19456], index: 7, kind: output, shape index: {}]  }
   0x1   :  { %s9573_s26 = smov 0  }
   0x2 LB: > { %s7864_s27 = sadd.s32 4294967295, %s9522_s26   ;;  %s9586_s28 = sadd.s32 1, %s9522_s26   ;;  %s9522_s26 = sphi %s9573_s26, %s11916_s26   ;;  %s9518_s25 = sphi %s9571_s25, %s11915_s25   ;;  %s9514_s24 = sphi %s9569_s24, %s11914_s24  }
   0x3   : > { %s126_s29 = ssub.s32 %s9522_s26, %s9586_s28  ;;  %s129_s30 = sadd.s32 1, %s9518_s25 }
   0x4   : > { %p127_p0 = scmp.eq.s32.totalorder %s126_s29, 0  ;;  %p136_p1 = scmp.ne.s32.totalorder %s9518_s25, %s9514_s24 }
   0x5   : > { %p137_p2 = scmp.eq.s32.totalorder %s9522_s26, 0  ;;  %p7867_p4 = scmp.ge.s32.totalorder %s9522_s26, 2 }
   0x6   : > { %s9595_s8 = scalar_select %p127_p0, %s9518_s25, %s129_s30  }
   0x7   : > { %p138_p3 = por %p137_p2, %p136_p1  ;;  %229 = sbr.rel (%p7867_p4) target bundleno = 323 (0x143), region = 36 }
   0xe   : > { %232 = sbr.rel (!%p138_p3) target bundleno = 323 (0x143), region = 40  ;;  %s234_s9 = sand.u32 (%p138_p3), 1, %s9518_s25  }
   0xf   : > { %s8480_s10 = smul.u32 (%p138_p3), 304, %s9522_s26 }
  0x10   : > { %s8557_s11 = smul.u32 (%p138_p3), 4864, %s234_s9 }
  0x11   : > { %s9603_s14 = scalar_lea.vmem (%p138_p3), %s11911_s5, %s8480_s10 }
  0x12   : > { %v252_v0 = vld [vmem:[%s9603_s14] sm:$0xff] (%p138_p3)  ;;  %v254_v1 = vld [vmem:[%s9603_s14 + $0x8] sm:$0xff] (%p138_p3)  ;;  %v256_v2 = vld [vmem:[%s9603_s14 + $0x10] sm:$0xff] (%p138_p3)  ;;  %s9608_s15 = scalar_lea.vmem (%p138_p3), [#allocation2], %s8557_s11 }
  0x13   : > { %253 = vst [vmem:[%s9608_s15] sm:$0xff] (%p138_p3), %v252_v0  ;;  %255 = vst [vmem:[%s9608_s15 + $0x8] sm:$0xff] (%p138_p3), %v254_v1  ;;  %v258_v3 = vld [vmem:[%s9603_s14 + $0x18] sm:$0xff] (%p138_p3)  ;;  %v260_v4 = vld [vmem:[%s9603_s14 + $0x20] sm:$0xff] (%p138_p3) }
  0x14   : > { %257 = vst [vmem:[%s9608_s15 + $0x10] sm:$0xff] (%p138_p3), %v256_v2  ;;  %v262_v5 = vld [vmem:[%s9603_s14 + $0x28] sm:$0xff] (%p138_p3)  ;;  %259 = vst [vmem:[%s9608_s15 + $0x18] sm:$0xff] (%p138_p3), %v258_v3  ;;  %v264_v6 = vld [vmem:[%s9603_s14 + $0x30] sm:$0xff] (%p138_p3) }
  0x15   : > { %261 = vst [vmem:[%s9608_s15 + $0x20] sm:$0xff] %v260_v4  ;;  %263 = vst [vmem:[%s9608_s15 + $0x28] sm:$0xff] %v262_v5  ;;  %v266_v7 = vld [vmem:[%s9603_s14 + $0x38] sm:$0xff]  ;;  %v268_v8 = vld [vmem:[%s9603_s14 + $0x40] sm:$0xff] }
  0x16   : > { %265 = vst [vmem:[%s9608_s15 + $0x30] sm:$0xff] %v264_v6  ;;  %267 = vst [vmem:[%s9608_s15 + $0x38] sm:$0xff] %v266_v7  ;;  %v270_v9 = vld [vmem:[%s9603_s14 + $0x48] sm:$0xff]  ;;  %v272_v10 = vld [vmem:[%s9603_s14 + $0x50] sm:$0xff] }
  0x17   : > { %269 = vst [vmem:[%s9608_s15 + $0x40] sm:$0xff] %v268_v8  ;;  %v274_v11 = vld [vmem:[%s9603_s14 + $0x58] sm:$0xff]  ;;  %271 = vst [vmem:[%s9608_s15 + $0x48] sm:$0xff] %v270_v9  ;;  %v276_v12 = vld [vmem:[%s9603_s14 + $0x60] sm:$0xff] }
  0x18   : > { %273 = vst [vmem:[%s9608_s15 + $0x50] sm:$0xff] %v272_v10  ;;  %275 = vst [vmem:[%s9608_s15 + $0x58] sm:$0xff] %v274_v11  ;;  %v278_v13 = vld [vmem:[%s9603_s14 + $0x68] sm:$0xff]  ;;  %v280_v14 = vld [vmem:[%s9603_s14 + $0x70] sm:$0xff] }
  0x19   : > { %277 = vst [vmem:[%s9608_s15 + $0x60] sm:$0xff] %v276_v12  ;;  %279 = vst [vmem:[%s9608_s15 + $0x68] sm:$0xff] %v278_v13  ;;  %v282_v15 = vld [vmem:[%s9603_s14 + $0x78] sm:$0xff]  ;;  %v284_v16 = vld [vmem:[%s9603_s14 + $0x80] sm:$0xff] }
  0x1a   : > { %281 = vst [vmem:[%s9608_s15 + $0x70] sm:$0xff] %v280_v14  ;;  %v286_v17 = vld [vmem:[%s9603_s14 + $0x88] sm:$0xff]  ;;  %283 = vst [vmem:[%s9608_s15 + $0x78] sm:$0xff] %v282_v15  ;;  %v288_v18 = vld [vmem:[%s9603_s14 + $0x90] sm:$0xff] }
  0x1b   : > { %285 = vst [vmem:[%s9608_s15 + $0x80] sm:$0xff] %v284_v16  ;;  %287 = vst [vmem:[%s9608_s15 + $0x88] sm:$0xff] %v286_v17  ;;  %v290_v19 = vld [vmem:[%s9603_s14 + $0x98] sm:$0xff]  ;;  %v292_v20 = vld [vmem:[%s9603_s14 + $0xa0] sm:$0xff] }
  0x1c   : > { %289 = vst [vmem:[%s9608_s15 + $0x90] sm:$0xff] %v288_v18  ;;  %291 = vst [vmem:[%s9608_s15 + $0x98] sm:$0xff] %v290_v19  ;;  %v294_v21 = vld [vmem:[%s9603_s14 + $0xa8] sm:$0xff]  ;;  %v296_v22 = vld [vmem:[%s9603_s14 + $0xb0] sm:$0xff] }
  0x1d   : > { %293 = vst [vmem:[%s9608_s15 + $0xa0] sm:$0xff] %v292_v20  ;;  %v298_v23 = vld [vmem:[%s9603_s14 + $0xb8] sm:$0xff]  ;;  %295 = vst [vmem:[%s9608_s15 + $0xa8] sm:$0xff] %v294_v21  ;;  %v300_v24 = vld [vmem:[%s9603_s14 + $0xc0] sm:$0xff] }
  0x1e   : > { %297 = vst [vmem:[%s9608_s15 + $0xb0] sm:$0xff] %v296_v22  ;;  %299 = vst [vmem:[%s9608_s15 + $0xb8] sm:$0xff] %v298_v23  ;;  %v302_v25 = vld [vmem:[%s9603_s14 + $0xc8] sm:$0xff]  ;;  %v304_v26 = vld [vmem:[%s9603_s14 + $0xd0] sm:$0xff] }
  0x1f   : > { %301 = vst [vmem:[%s9608_s15 + $0xc0] sm:$0xff] %v300_v24  ;;  %303 = vst [vmem:[%s9608_s15 + $0xc8] sm:$0xff] %v302_v25  ;;  %v306_v27 = vld [vmem:[%s9603_s14 + $0xd8] sm:$0xff]  ;;  %v308_v28 = vld [vmem:[%s9603_s14 + $0xe0] sm:$0xff] }
  0x20   : > { %305 = vst [vmem:[%s9608_s15 + $0xd0] sm:$0xff] %v304_v26  ;;  %v310_v29 = vld [vmem:[%s9603_s14 + $0xe8] sm:$0xff]  ;;  %307 = vst [vmem:[%s9608_s15 + $0xd8] sm:$0xff] %v306_v27  ;;  %v312_v30 = vld [vmem:[%s9603_s14 + $0xf0] sm:$0xff] }
  0x21   : > { %309 = vst [vmem:[%s9608_s15 + $0xe0] sm:$0xff] %v308_v28  ;;  %311 = vst [vmem:[%s9608_s15 + $0xe8] sm:$0xff] %v310_v29  ;;  %v314_v31 = vld [vmem:[%s9603_s14 + $0xf8] sm:$0xff]  ;;  %v316_v32 = vld [vmem:[%s9603_s14 + $0x100] sm:$0xff] }
  0x22   : > { %313 = vst [vmem:[%s9608_s15 + $0xf0] sm:$0xff] %v312_v30  ;;  %315 = vst [vmem:[%s9608_s15 + $0xf8] sm:$0xff] %v314_v31  ;;  %v318_v33 = vld [vmem:[%s9603_s14 + $0x108] sm:$0xff]  ;;  %v320_v34 = vld [vmem:[%s9603_s14 + $0x110] sm:$0xff] }
  0x23   : > { %317 = vst [vmem:[%s9608_s15 + $0x100] sm:$0xff] %v316_v32  ;;  %v322_v35 = vld [vmem:[%s9603_s14 + $0x118] sm:$0xff]  ;;  %319 = vst [vmem:[%s9608_s15 + $0x108] sm:$0xff] %v318_v33  ;;  %v324_v36 = vld [vmem:[%s9603_s14 + $0x120] sm:$0xff] }
  0x24   : > { %321 = vst [vmem:[%s9608_s15 + $0x110] sm:$0xff] %v320_v34  ;;  %323 = vst [vmem:[%s9608_s15 + $0x118] sm:$0xff] %v322_v35  ;;  %v326_v37 = vld [vmem:[%s9603_s14 + $0x128] sm:$0xff]  ;;  %v328_v38 = vld [vmem:[%s9603_s14 + $0x260] sm:$0xff] }
  0x25   : > { %325 = vst [vmem:[%s9608_s15 + $0x120] sm:$0xff] %v324_v36  ;;  %327 = vst [vmem:[%s9608_s15 + $0x128] sm:$0xff] %v326_v37  ;;  %v330_v39 = vld [vmem:[%s9603_s14 + $0x268] sm:$0xff]  ;;  %v332_v40 = vld [vmem:[%s9603_s14 + $0x270] sm:$0xff] }
  0x26   : > { %329 = vst [vmem:[%s9608_s15 + $0x130] sm:$0xff] %v328_v38  ;;  %v334_v41 = vld [vmem:[%s9603_s14 + $0x278] sm:$0xff]  ;;  %331 = vst [vmem:[%s9608_s15 + $0x138] sm:$0xff] %v330_v39  ;;  %v336_v42 = vld [vmem:[%s9603_s14 + $0x280] sm:$0xff] }
  0x27   : > { %333 = vst [vmem:[%s9608_s15 + $0x140] sm:$0xff] %v332_v40  ;;  %335 = vst [vmem:[%s9608_s15 + $0x148] sm:$0xff] %v334_v41  ;;  %v338_v43 = vld [vmem:[%s9603_s14 + $0x288] sm:$0xff]  ;;  %v340_v44 = vld [vmem:[%s9603_s14 + $0x290] sm:$0xff] }
  0x28   : > { %337 = vst [vmem:[%s9608_s15 + $0x150] sm:$0xff] %v336_v42  ;;  %339 = vst [vmem:[%s9608_s15 + $0x158] sm:$0xff] %v338_v43  ;;  %v342_v45 = vld [vmem:[%s9603_s14 + $0x298] sm:$0xff]  ;;  %v344_v46 = vld [vmem:[%s9603_s14 + $0x2a0] sm:$0xff] }
  0x29   : > { %341 = vst [vmem:[%s9608_s15 + $0x160] sm:$0xff] %v340_v44  ;;  %v346_v47 = vld [vmem:[%s9603_s14 + $0x2a8] sm:$0xff]  ;;  %343 = vst [vmem:[%s9608_s15 + $0x168] sm:$0xff] %v342_v45  ;;  %v348_v48 = vld [vmem:[%s9603_s14 + $0x2b0] sm:$0xff] }
  0x2a   : > { %345 = vst [vmem:[%s9608_s15 + $0x170] sm:$0xff] %v344_v46  ;;  %347 = vst [vmem:[%s9608_s15 + $0x178] sm:$0xff] %v346_v47  ;;  %v350_v49 = vld [vmem:[%s9603_s14 + $0x2b8] sm:$0xff]  ;;  %v352_v50 = vld [vmem:[%s9603_s14 + $0x2c0] sm:$0xff] }
  0x2b   : > { %349 = vst [vmem:[%s9608_s15 + $0x180] sm:$0xff] %v348_v48  ;;  %351 = vst [vmem:[%s9608_s15 + $0x188] sm:$0xff] %v350_v49  ;;  %v354_v51 = vld [vmem:[%s9603_s14 + $0x2c8] sm:$0xff]  ;;  %v356_v52 = vld [vmem:[%s9603_s14 + $0x2d0] sm:$0xff] }
  0x2c   : > { %353 = vst [vmem:[%s9608_s15 + $0x190] sm:$0xff] %v352_v50  ;;  %v358_v53 = vld [vmem:[%s9603_s14 + $0x2d8] sm:$0xff]  ;;  %355 = vst [vmem:[%s9608_s15 + $0x198] sm:$0xff] %v354_v51  ;;  %v360_v54 = vld [vmem:[%s9603_s14 + $0x2e0] sm:$0xff] }
  0x2d   : > { %357 = vst [vmem:[%s9608_s15 + $0x1a0] sm:$0xff] %v356_v52  ;;  %359 = vst [vmem:[%s9608_s15 + $0x1a8] sm:$0xff] %v358_v53  ;;  %v362_v55 = vld [vmem:[%s9603_s14 + $0x2e8] sm:$0xff]  ;;  %v364_v56 = vld [vmem:[%s9603_s14 + $0x2f0] sm:$0xff] }
  0x2e   : > { %361 = vst [vmem:[%s9608_s15 + $0x1b0] sm:$0xff] %v360_v54  ;;  %363 = vst [vmem:[%s9608_s15 + $0x1b8] sm:$0xff] %v362_v55  ;;  %v366_v57 = vld [vmem:[%s9603_s14 + $0x2f8] sm:$0xff]  ;;  %v368_v58 = vld [vmem:[%s9603_s14 + $0x300] sm:$0xff] }
  0x2f   : > { %365 = vst [vmem:[%s9608_s15 + $0x1c0] sm:$0xff] %v364_v56  ;;  %v370_v59 = vld [vmem:[%s9603_s14 + $0x308] sm:$0xff]  ;;  %367 = vst [vmem:[%s9608_s15 + $0x1c8] sm:$0xff] %v366_v57  ;;  %v372_v60 = vld [vmem:[%s9603_s14 + $0x310] sm:$0xff] }
  0x30   : > { %369 = vst [vmem:[%s9608_s15 + $0x1d0] sm:$0xff] %v368_v58  ;;  %371 = vst [vmem:[%s9608_s15 + $0x1d8] sm:$0xff] %v370_v59  ;;  %v374_v61 = vld [vmem:[%s9603_s14 + $0x318] sm:$0xff]  ;;  %v376_v62 = vld [vmem:[%s9603_s14 + $0x320] sm:$0xff] }
  0x31   : > { %373 = vst [vmem:[%s9608_s15 + $0x1e0] sm:$0xff] %v372_v60  ;;  %375 = vst [vmem:[%s9608_s15 + $0x1e8] sm:$0xff] %v374_v61  ;;  %v378_v63 = vld [vmem:[%s9603_s14 + $0x328] sm:$0xff]  ;;  %v380_v0 = vld [vmem:[%s9603_s14 + $0x330] sm:$0xff] }
  0x32   : > { %377 = vst [vmem:[%s9608_s15 + $0x1f0] sm:$0xff] %v376_v62  ;;  %v382_v1 = vld [vmem:[%s9603_s14 + $0x338] sm:$0xff]  ;;  %379 = vst [vmem:[%s9608_s15 + $0x1f8] sm:$0xff] %v378_v63  ;;  %v384_v2 = vld [vmem:[%s9603_s14 + $0x340] sm:$0xff] }
  0x33   : > { %381 = vst [vmem:[%s9608_s15 + $0x200] sm:$0xff] %v380_v0  ;;  %383 = vst [vmem:[%s9608_s15 + $0x208] sm:$0xff] %v382_v1  ;;  %v386_v3 = vld [vmem:[%s9603_s14 + $0x348] sm:$0xff]  ;;  %v388_v4 = vld [vmem:[%s9603_s14 + $0x350] sm:$0xff] }
  0x34   : > { %385 = vst [vmem:[%s9608_s15 + $0x210] sm:$0xff] %v384_v2  ;;  %387 = vst [vmem:[%s9608_s15 + $0x218] sm:$0xff] %v386_v3  ;;  %v390_v5 = vld [vmem:[%s9603_s14 + $0x358] sm:$0xff]  ;;  %v392_v6 = vld [vmem:[%s9603_s14 + $0x360] sm:$0xff] }
  0x35   : > { %389 = vst [vmem:[%s9608_s15 + $0x220] sm:$0xff] %v388_v4  ;;  %v394_v7 = vld [vmem:[%s9603_s14 + $0x368] sm:$0xff]  ;;  %391 = vst [vmem:[%s9608_s15 + $0x228] sm:$0xff] %v390_v5  ;;  %v396_v8 = vld [vmem:[%s9603_s14 + $0x370] sm:$0xff] }
  0x36   : > { %393 = vst [vmem:[%s9608_s15 + $0x230] sm:$0xff] %v392_v6  ;;  %395 = vst [vmem:[%s9608_s15 + $0x238] sm:$0xff] %v394_v7  ;;  %v398_v9 = vld [vmem:[%s9603_s14 + $0x378] sm:$0xff]  ;;  %v400_v10 = vld [vmem:[%s9603_s14 + $0x380] sm:$0xff] }
  0x37   : > { %397 = vst [vmem:[%s9608_s15 + $0x240] sm:$0xff] %v396_v8  ;;  %399 = vst [vmem:[%s9608_s15 + $0x248] sm:$0xff] %v398_v9  ;;  %v402_v11 = vld [vmem:[%s9603_s14 + $0x388] sm:$0xff]  ;;  %v404_v12 = vld [vmem:[%s9603_s14 + $0x4c0] sm:$0xff] }
  0x38   : > { %401 = vst [vmem:[%s9608_s15 + $0x250] sm:$0xff] %v400_v10  ;;  %v406_v13 = vld [vmem:[%s9603_s14 + $0x4c8] sm:$0xff]  ;;  %403 = vst [vmem:[%s9608_s15 + $0x258] sm:$0xff] %v402_v11  ;;  %v408_v14 = vld [vmem:[%s9603_s14 + $0x4d0] sm:$0xff] }
  0x39   : > { %405 = vst [vmem:[%s9608_s15 + $0x260] sm:$0xff] %v404_v12  ;;  %407 = vst [vmem:[%s9608_s15 + $0x268] sm:$0xff] %v406_v13  ;;  %v410_v15 = vld [vmem:[%s9603_s14 + $0x4d8] sm:$0xff]  ;;  %v412_v16 = vld [vmem:[%s9603_s14 + $0x4e0] sm:$0xff] }
  0x3a   : > { %409 = vst [vmem:[%s9608_s15 + $0x270] sm:$0xff] %v408_v14  ;;  %411 = vst [vmem:[%s9608_s15 + $0x278] sm:$0xff] %v410_v15  ;;  %v414_v17 = vld [vmem:[%s9603_s14 + $0x4e8] sm:$0xff]  ;;  %v416_v18 = vld [vmem:[%s9603_s14 + $0x4f0] sm:$0xff] }
  0x3b   : > { %413 = vst [vmem:[%s9608_s15 + $0x280] sm:$0xff] %v412_v16  ;;  %v418_v19 = vld [vmem:[%s9603_s14 + $0x4f8] sm:$0xff]  ;;  %415 = vst [vmem:[%s9608_s15 + $0x288] sm:$0xff] %v414_v17  ;;  %v420_v20 = vld [vmem:[%s9603_s14 + $0x500] sm:$0xff] }
  0x3c   : > { %417 = vst [vmem:[%s9608_s15 + $0x290] sm:$0xff] %v416_v18  ;;  %419 = vst [vmem:[%s9608_s15 + $0x298] sm:$0xff] %v418_v19  ;;  %v422_v21 = vld [vmem:[%s9603_s14 + $0x508] sm:$0xff]  ;;  %v424_v22 = vld [vmem:[%s9603_s14 + $0x510] sm:$0xff] }
  0x3d   : > { %421 = vst [vmem:[%s9608_s15 + $0x2a0] sm:$0xff] %v420_v20  ;;  %423 = vst [vmem:[%s9608_s15 + $0x2a8] sm:$0xff] %v422_v21  ;;  %v426_v23 = vld [vmem:[%s9603_s14 + $0x518] sm:$0xff]  ;;  %v428_v24 = vld [vmem:[%s9603_s14 + $0x520] sm:$0xff] }
  0x3e   : > { %425 = vst [vmem:[%s9608_s15 + $0x2b0] sm:$0xff] %v424_v22  ;;  %v430_v25 = vld [vmem:[%s9603_s14 + $0x528] sm:$0xff]  ;;  %427 = vst [vmem:[%s9608_s15 + $0x2b8] sm:$0xff] %v426_v23  ;;  %v432_v26 = vld [vmem:[%s9603_s14 + $0x530] sm:$0xff] }
  0x3f   : > { %429 = vst [vmem:[%s9608_s15 + $0x2c0] sm:$0xff] %v428_v24  ;;  %431 = vst [vmem:[%s9608_s15 + $0x2c8] sm:$0xff] %v430_v25  ;;  %v434_v27 = vld [vmem:[%s9603_s14 + $0x538] sm:$0xff]  ;;  %v436_v28 = vld [vmem:[%s9603_s14 + $0x540] sm:$0xff] }
  0x40   : > { %433 = vst [vmem:[%s9608_s15 + $0x2d0] sm:$0xff] %v432_v26  ;;  %435 = vst [vmem:[%s9608_s15 + $0x2d8] sm:$0xff] %v434_v27  ;;  %v438_v29 = vld [vmem:[%s9603_s14 + $0x548] sm:$0xff]  ;;  %v440_v30 = vld [vmem:[%s9603_s14 + $0x550] sm:$0xff] }
  0x41   : > { %437 = vst [vmem:[%s9608_s15 + $0x2e0] sm:$0xff] %v436_v28  ;;  %v442_v31 = vld [vmem:[%s9603_s14 + $0x558] sm:$0xff]  ;;  %439 = vst [vmem:[%s9608_s15 + $0x2e8] sm:$0xff] %v438_v29  ;;  %v444_v32 = vld [vmem:[%s9603_s14 + $0x560] sm:$0xff] }
  0x42   : > { %441 = vst [vmem:[%s9608_s15 + $0x2f0] sm:$0xff] %v440_v30  ;;  %443 = vst [vmem:[%s9608_s15 + $0x2f8] sm:$0xff] %v442_v31  ;;  %v446_v33 = vld [vmem:[%s9603_s14 + $0x568] sm:$0xff]  ;;  %v448_v34 = vld [vmem:[%s9603_s14 + $0x570] sm:$0xff] }
  0x43   : > { %445 = vst [vmem:[%s9608_s15 + $0x300] sm:$0xff] %v444_v32  ;;  %447 = vst [vmem:[%s9608_s15 + $0x308] sm:$0xff] %v446_v33  ;;  %v450_v35 = vld [vmem:[%s9603_s14 + $0x578] sm:$0xff]  ;;  %v452_v36 = vld [vmem:[%s9603_s14 + $0x580] sm:$0xff] }
  0x44   : > { %449 = vst [vmem:[%s9608_s15 + $0x310] sm:$0xff] %v448_v34  ;;  %v454_v37 = vld [vmem:[%s9603_s14 + $0x588] sm:$0xff]  ;;  %451 = vst [vmem:[%s9608_s15 + $0x318] sm:$0xff] %v450_v35  ;;  %v456_v38 = vld [vmem:[%s9603_s14 + $0x590] sm:$0xff] }
  0x45   : > { %453 = vst [vmem:[%s9608_s15 + $0x320] sm:$0xff] %v452_v36  ;;  %455 = vst [vmem:[%s9608_s15 + $0x328] sm:$0xff] %v454_v37  ;;  %v458_v39 = vld [vmem:[%s9603_s14 + $0x598] sm:$0xff]  ;;  %v460_v40 = vld [vmem:[%s9603_s14 + $0x5a0] sm:$0xff] }
  0x46   : > { %457 = vst [vmem:[%s9608_s15 + $0x330] sm:$0xff] %v456_v38  ;;  %459 = vst [vmem:[%s9608_s15 + $0x338] sm:$0xff] %v458_v39  ;;  %v462_v41 = vld [vmem:[%s9603_s14 + $0x5a8] sm:$0xff]  ;;  %v464_v42 = vld [vmem:[%s9603_s14 + $0x5b0] sm:$0xff] }
  0x47   : > { %461 = vst [vmem:[%s9608_s15 + $0x340] sm:$0xff] %v460_v40  ;;  %v466_v43 = vld [vmem:[%s9603_s14 + $0x5b8] sm:$0xff]  ;;  %463 = vst [vmem:[%s9608_s15 + $0x348] sm:$0xff] %v462_v41  ;;  %v468_v44 = vld [vmem:[%s9603_s14 + $0x5c0] sm:$0xff] }
  0x48   : > { %465 = vst [vmem:[%s9608_s15 + $0x350] sm:$0xff] %v464_v42  ;;  %467 = vst [vmem:[%s9608_s15 + $0x358] sm:$0xff] %v466_v43  ;;  %v470_v45 = vld [vmem:[%s9603_s14 + $0x5c8] sm:$0xff]  ;;  %v472_v46 = vld [vmem:[%s9603_s14 + $0x5d0] sm:$0xff] }
  0x49   : > { %469 = vst [vmem:[%s9608_s15 + $0x360] sm:$0xff] %v468_v44  ;;  %471 = vst [vmem:[%s9608_s15 + $0x368] sm:$0xff] %v470_v45  ;;  %v474_v47 = vld [vmem:[%s9603_s14 + $0x5d8] sm:$0xff]  ;;  %v476_v48 = vld [vmem:[%s9603_s14 + $0x5e0] sm:$0xff] }
  0x4a   : > { %473 = vst [vmem:[%s9608_s15 + $0x370] sm:$0xff] %v472_v46  ;;  %v478_v49 = vld [vmem:[%s9603_s14 + $0x5e8] sm:$0xff]  ;;  %475 = vst [vmem:[%s9608_s15 + $0x378] sm:$0xff] %v474_v47  ;;  %v480_v50 = vld [vmem:[%s9603_s14 + $0x720] sm:$0xff] }
  0x4b   : > { %477 = vst [vmem:[%s9608_s15 + $0x380] sm:$0xff] %v476_v48  ;;  %479 = vst [vmem:[%s9608_s15 + $0x388] sm:$0xff] %v478_v49  ;;  %v482_v51 = vld [vmem:[%s9603_s14 + $0x728] sm:$0xff]  ;;  %v484_v52 = vld [vmem:[%s9603_s14 + $0x730] sm:$0xff] }
  0x4c   : > { %481 = vst [vmem:[%s9608_s15 + $0x390] sm:$0xff] %v480_v50  ;;  %483 = vst [vmem:[%s9608_s15 + $0x398] sm:$0xff] %v482_v51  ;;  %v486_v53 = vld [vmem:[%s9603_s14 + $0x738] sm:$0xff]  ;;  %v488_v54 = vld [vmem:[%s9603_s14 + $0x740] sm:$0xff] }
  0x4d   : > { %485 = vst [vmem:[%s9608_s15 + $0x3a0] sm:$0xff] %v484_v52  ;;  %v490_v55 = vld [vmem:[%s9603_s14 + $0x748] sm:$0xff]  ;;  %487 = vst [vmem:[%s9608_s15 + $0x3a8] sm:$0xff] %v486_v53  ;;  %v492_v56 = vld [vmem:[%s9603_s14 + $0x750] sm:$0xff] }
  0x4e   : > { %489 = vst [vmem:[%s9608_s15 + $0x3b0] sm:$0xff] %v488_v54  ;;  %491 = vst [vmem:[%s9608_s15 + $0x3b8] sm:$0xff] %v490_v55  ;;  %v494_v57 = vld [vmem:[%s9603_s14 + $0x758] sm:$0xff]  ;;  %v496_v58 = vld [vmem:[%s9603_s14 + $0x760] sm:$0xff] }
  0x4f   : > { %493 = vst [vmem:[%s9608_s15 + $0x3c0] sm:$0xff] %v492_v56  ;;  %495 = vst [vmem:[%s9608_s15 + $0x3c8] sm:$0xff] %v494_v57  ;;  %v498_v59 = vld [vmem:[%s9603_s14 + $0x768] sm:$0xff]  ;;  %v500_v60 = vld [vmem:[%s9603_s14 + $0x770] sm:$0xff] }
  0x50   : > { %497 = vst [vmem:[%s9608_s15 + $0x3d0] sm:$0xff] %v496_v58  ;;  %v502_v61 = vld [vmem:[%s9603_s14 + $0x778] sm:$0xff]  ;;  %499 = vst [vmem:[%s9608_s15 + $0x3d8] sm:$0xff] %v498_v59  ;;  %v504_v62 = vld [vmem:[%s9603_s14 + $0x780] sm:$0xff] }
  0x51   : > { %501 = vst [vmem:[%s9608_s15 + $0x3e0] sm:$0xff] %v500_v60  ;;  %503 = vst [vmem:[%s9608_s15 + $0x3e8] sm:$0xff] %v502_v61  ;;  %v506_v63 = vld [vmem:[%s9603_s14 + $0x788] sm:$0xff]  ;;  %v508_v0 = vld [vmem:[%s9603_s14 + $0x790] sm:$0xff] }
  0x52   : > { %505 = vst [vmem:[%s9608_s15 + $0x3f0] sm:$0xff] %v504_v62  ;;  %507 = vst [vmem:[%s9608_s15 + $0x3f8] sm:$0xff] %v506_v63  ;;  %v510_v1 = vld [vmem:[%s9603_s14 + $0x798] sm:$0xff]  ;;  %v512_v2 = vld [vmem:[%s9603_s14 + $0x7a0] sm:$0xff] }
  0x53   : > { %509 = vst [vmem:[%s9608_s15 + $0x400] sm:$0xff] %v508_v0  ;;  %v514_v3 = vld [vmem:[%s9603_s14 + $0x7a8] sm:$0xff]  ;;  %511 = vst [vmem:[%s9608_s15 + $0x408] sm:$0xff] %v510_v1  ;;  %v516_v4 = vld [vmem:[%s9603_s14 + $0x7b0] sm:$0xff] }
  0x54   : > { %513 = vst [vmem:[%s9608_s15 + $0x410] sm:$0xff] %v512_v2  ;;  %515 = vst [vmem:[%s9608_s15 + $0x418] sm:$0xff] %v514_v3  ;;  %v518_v5 = vld [vmem:[%s9603_s14 + $0x7b8] sm:$0xff]  ;;  %v520_v6 = vld [vmem:[%s9603_s14 + $0x7c0] sm:$0xff] }
  0x55   : > { %517 = vst [vmem:[%s9608_s15 + $0x420] sm:$0xff] %v516_v4  ;;  %519 = vst [vmem:[%s9608_s15 + $0x428] sm:$0xff] %v518_v5  ;;  %v522_v7 = vld [vmem:[%s9603_s14 + $0x7c8] sm:$0xff]  ;;  %v524_v8 = vld [vmem:[%s9603_s14 + $0x7d0] sm:$0xff] }
  0x56   : > { %521 = vst [vmem:[%s9608_s15 + $0x430] sm:$0xff] %v520_v6  ;;  %v526_v9 = vld [vmem:[%s9603_s14 + $0x7d8] sm:$0xff]  ;;  %523 = vst [vmem:[%s9608_s15 + $0x438] sm:$0xff] %v522_v7  ;;  %v528_v10 = vld [vmem:[%s9603_s14 + $0x7e0] sm:$0xff] }
  0x57   : > { %525 = vst [vmem:[%s9608_s15 + $0x440] sm:$0xff] %v524_v8  ;;  %527 = vst [vmem:[%s9608_s15 + $0x448] sm:$0xff] %v526_v9  ;;  %v530_v11 = vld [vmem:[%s9603_s14 + $0x7e8] sm:$0xff]  ;;  %v532_v12 = vld [vmem:[%s9603_s14 + $0x7f0] sm:$0xff] }
  0x58   : > { %529 = vst [vmem:[%s9608_s15 + $0x450] sm:$0xff] %v528_v10  ;;  %531 = vst [vmem:[%s9608_s15 + $0x458] sm:$0xff] %v530_v11  ;;  %v534_v13 = vld [vmem:[%s9603_s14 + $0x7f8] sm:$0xff]  ;;  %v536_v14 = vld [vmem:[%s9603_s14 + $0x800] sm:$0xff] }
  0x59   : > { %533 = vst [vmem:[%s9608_s15 + $0x460] sm:$0xff] %v532_v12  ;;  %v538_v15 = vld [vmem:[%s9603_s14 + $0x808] sm:$0xff]  ;;  %535 = vst [vmem:[%s9608_s15 + $0x468] sm:$0xff] %v534_v13  ;;  %v540_v16 = vld [vmem:[%s9603_s14 + $0x810] sm:$0xff] }
  0x5a   : > { %537 = vst [vmem:[%s9608_s15 + $0x470] sm:$0xff] %v536_v14  ;;  %539 = vst [vmem:[%s9608_s15 + $0x478] sm:$0xff] %v538_v15  ;;  %v542_v17 = vld [vmem:[%s9603_s14 + $0x818] sm:$0xff]  ;;  %v544_v18 = vld [vmem:[%s9603_s14 + $0x820] sm:$0xff] }
  0x5b   : > { %541 = vst [vmem:[%s9608_s15 + $0x480] sm:$0xff] %v540_v16  ;;  %543 = vst [vmem:[%s9608_s15 + $0x488] sm:$0xff] %v542_v17  ;;  %v546_v19 = vld [vmem:[%s9603_s14 + $0x828] sm:$0xff]  ;;  %v548_v20 = vld [vmem:[%s9603_s14 + $0x830] sm:$0xff] }
  0x5c   : > { %545 = vst [vmem:[%s9608_s15 + $0x490] sm:$0xff] %v544_v18  ;;  %v550_v21 = vld [vmem:[%s9603_s14 + $0x838] sm:$0xff]  ;;  %547 = vst [vmem:[%s9608_s15 + $0x498] sm:$0xff] %v546_v19  ;;  %v552_v22 = vld [vmem:[%s9603_s14 + $0x840] sm:$0xff] }
  0x5d   : > { %549 = vst [vmem:[%s9608_s15 + $0x4a0] sm:$0xff] %v548_v20  ;;  %551 = vst [vmem:[%s9608_s15 + $0x4a8] sm:$0xff] %v550_v21  ;;  %v554_v23 = vld [vmem:[%s9603_s14 + $0x848] sm:$0xff]  ;;  %v556_v24 = vld [vmem:[%s9603_s14 + $0x980] sm:$0xff] }
  0x5e   : > { %553 = vst [vmem:[%s9608_s15 + $0x4b0] sm:$0xff] %v552_v22  ;;  %555 = vst [vmem:[%s9608_s15 + $0x4b8] sm:$0xff] %v554_v23  ;;  %v558_v25 = vld [vmem:[%s9603_s14 + $0x988] sm:$0xff]  ;;  %v560_v26 = vld [vmem:[%s9603_s14 + $0x990] sm:$0xff] }
  0x5f   : > { %557 = vst [vmem:[%s9608_s15 + $0x4c0] sm:$0xff] %v556_v24  ;;  %v562_v27 = vld [vmem:[%s9603_s14 + $0x998] sm:$0xff]  ;;  %559 = vst [vmem:[%s9608_s15 + $0x4c8] sm:$0xff] %v558_v25  ;;  %v564_v28 = vld [vmem:[%s9603_s14 + $0x9a0] sm:$0xff] }
  0x60   : > { %561 = vst [vmem:[%s9608_s15 + $0x4d0] sm:$0xff] %v560_v26  ;;  %563 = vst [vmem:[%s9608_s15 + $0x4d8] sm:$0xff] %v562_v27  ;;  %v566_v29 = vld [vmem:[%s9603_s14 + $0x9a8] sm:$0xff]  ;;  %v568_v30 = vld [vmem:[%s9603_s14 + $0x9b0] sm:$0xff] }
  0x61   : > { %565 = vst [vmem:[%s9608_s15 + $0x4e0] sm:$0xff] %v564_v28  ;;  %567 = vst [vmem:[%s9608_s15 + $0x4e8] sm:$0xff] %v566_v29  ;;  %v570_v31 = vld [vmem:[%s9603_s14 + $0x9b8] sm:$0xff]  ;;  %v572_v32 = vld [vmem:[%s9603_s14 + $0x9c0] sm:$0xff] }
  0x62   : > { %569 = vst [vmem:[%s9608_s15 + $0x4f0] sm:$0xff] %v568_v30  ;;  %v574_v33 = vld [vmem:[%s9603_s14 + $0x9c8] sm:$0xff]  ;;  %571 = vst [vmem:[%s9608_s15 + $0x4f8] sm:$0xff] %v570_v31  ;;  %v576_v34 = vld [vmem:[%s9603_s14 + $0x9d0] sm:$0xff] }
  0x63   : > { %573 = vst [vmem:[%s9608_s15 + $0x500] sm:$0xff] %v572_v32  ;;  %575 = vst [vmem:[%s9608_s15 + $0x508] sm:$0xff] %v574_v33  ;;  %v578_v35 = vld [vmem:[%s9603_s14 + $0x9d8] sm:$0xff]  ;;  %v580_v36 = vld [vmem:[%s9603_s14 + $0x9e0] sm:$0xff] }
  0x64   : > { %577 = vst [vmem:[%s9608_s15 + $0x510] sm:$0xff] %v576_v34  ;;  %579 = vst [vmem:[%s9608_s15 + $0x518] sm:$0xff] %v578_v35  ;;  %v582_v37 = vld [vmem:[%s9603_s14 + $0x9e8] sm:$0xff]  ;;  %v584_v38 = vld [vmem:[%s9603_s14 + $0x9f0] sm:$0xff] }
  0x65   : > { %581 = vst [vmem:[%s9608_s15 + $0x520] sm:$0xff] %v580_v36  ;;  %v586_v39 = vld [vmem:[%s9603_s14 + $0x9f8] sm:$0xff]  ;;  %583 = vst [vmem:[%s9608_s15 + $0x528] sm:$0xff] %v582_v37  ;;  %v588_v40 = vld [vmem:[%s9603_s14 + $0xa00] sm:$0xff] }
  0x66   : > { %585 = vst [vmem:[%s9608_s15 + $0x530] sm:$0xff] %v584_v38  ;;  %587 = vst [vmem:[%s9608_s15 + $0x538] sm:$0xff] %v586_v39  ;;  %v590_v41 = vld [vmem:[%s9603_s14 + $0xa08] sm:$0xff]  ;;  %v592_v42 = vld [vmem:[%s9603_s14 + $0xa10] sm:$0xff] }
  0x67   : > { %589 = vst [vmem:[%s9608_s15 + $0x540] sm:$0xff] %v588_v40  ;;  %591 = vst [vmem:[%s9608_s15 + $0x548] sm:$0xff] %v590_v41  ;;  %v594_v43 = vld [vmem:[%s9603_s14 + $0xa18] sm:$0xff]  ;;  %v596_v44 = vld [vmem:[%s9603_s14 + $0xa20] sm:$0xff] }
  0x68   : > { %593 = vst [vmem:[%s9608_s15 + $0x550] sm:$0xff] %v592_v42  ;;  %v598_v45 = vld [vmem:[%s9603_s14 + $0xa28] sm:$0xff]  ;;  %595 = vst [vmem:[%s9608_s15 + $0x558] sm:$0xff] %v594_v43  ;;  %v600_v46 = vld [vmem:[%s9603_s14 + $0xa30] sm:$0xff] }
  0x69   : > { %597 = vst [vmem:[%s9608_s15 + $0x560] sm:$0xff] %v596_v44  ;;  %599 = vst [vmem:[%s9608_s15 + $0x568] sm:$0xff] %v598_v45  ;;  %v602_v47 = vld [vmem:[%s9603_s14 + $0xa38] sm:$0xff]  ;;  %v604_v48 = vld [vmem:[%s9603_s14 + $0xa40] sm:$0xff] }
  0x6a   : > { %601 = vst [vmem:[%s9608_s15 + $0x570] sm:$0xff] %v600_v46  ;;  %603 = vst [vmem:[%s9608_s15 + $0x578] sm:$0xff] %v602_v47  ;;  %v606_v49 = vld [vmem:[%s9603_s14 + $0xa48] sm:$0xff]  ;;  %v608_v50 = vld [vmem:[%s9603_s14 + $0xa50] sm:$0xff] }
  0x6b   : > { %605 = vst [vmem:[%s9608_s15 + $0x580] sm:$0xff] %v604_v48  ;;  %v610_v51 = vld [vmem:[%s9603_s14 + $0xa58] sm:$0xff]  ;;  %607 = vst [vmem:[%s9608_s15 + $0x588] sm:$0xff] %v606_v49  ;;  %v612_v52 = vld [vmem:[%s9603_s14 + $0xa60] sm:$0xff] }
  0x6c   : > { %609 = vst [vmem:[%s9608_s15 + $0x590] sm:$0xff] %v608_v50  ;;  %611 = vst [vmem:[%s9608_s15 + $0x598] sm:$0xff] %v610_v51  ;;  %v614_v53 = vld [vmem:[%s9603_s14 + $0xa68] sm:$0xff]  ;;  %v616_v54 = vld [vmem:[%s9603_s14 + $0xa70] sm:$0xff] }
  0x6d   : > { %613 = vst [vmem:[%s9608_s15 + $0x5a0] sm:$0xff] %v612_v52  ;;  %615 = vst [vmem:[%s9608_s15 + $0x5a8] sm:$0xff] %v614_v53  ;;  %v618_v55 = vld [vmem:[%s9603_s14 + $0xa78] sm:$0xff]  ;;  %v620_v56 = vld [vmem:[%s9603_s14 + $0xa80] sm:$0xff] }
  0x6e   : > { %617 = vst [vmem:[%s9608_s15 + $0x5b0] sm:$0xff] %v616_v54  ;;  %v622_v57 = vld [vmem:[%s9603_s14 + $0xa88] sm:$0xff]  ;;  %619 = vst [vmem:[%s9608_s15 + $0x5b8] sm:$0xff] %v618_v55  ;;  %v624_v58 = vld [vmem:[%s9603_s14 + $0xa90] sm:$0xff] }
  0x6f   : > { %621 = vst [vmem:[%s9608_s15 + $0x5c0] sm:$0xff] %v620_v56  ;;  %623 = vst [vmem:[%s9608_s15 + $0x5c8] sm:$0xff] %v622_v57  ;;  %v626_v59 = vld [vmem:[%s9603_s14 + $0xa98] sm:$0xff]  ;;  %v628_v60 = vld [vmem:[%s9603_s14 + $0xaa0] sm:$0xff] }
  0x70   : > { %625 = vst [vmem:[%s9608_s15 + $0x5d0] sm:$0xff] %v624_v58  ;;  %627 = vst [vmem:[%s9608_s15 + $0x5d8] sm:$0xff] %v626_v59  ;;  %v630_v61 = vld [vmem:[%s9603_s14 + $0xaa8] sm:$0xff]  ;;  %v632_v62 = vld [vmem:[%s9603_s14 + $0xbe0] sm:$0xff] }
  0x71   : > { %629 = vst [vmem:[%s9608_s15 + $0x5e0] sm:$0xff] %v628_v60  ;;  %v634_v63 = vld [vmem:[%s9603_s14 + $0xbe8] sm:$0xff]  ;;  %631 = vst [vmem:[%s9608_s15 + $0x5e8] sm:$0xff] %v630_v61  ;;  %v636_v0 = vld [vmem:[%s9603_s14 + $0xbf0] sm:$0xff] }
  0x72   : > { %633 = vst [vmem:[%s9608_s15 + $0x5f0] sm:$0xff] %v632_v62  ;;  %635 = vst [vmem:[%s9608_s15 + $0x5f8] sm:$0xff] %v634_v63  ;;  %v638_v1 = vld [vmem:[%s9603_s14 + $0xbf8] sm:$0xff]  ;;  %v640_v2 = vld [vmem:[%s9603_s14 + $0xc00] sm:$0xff] }
  0x73   : > { %637 = vst [vmem:[%s9608_s15 + $0x600] sm:$0xff] %v636_v0  ;;  %639 = vst [vmem:[%s9608_s15 + $0x608] sm:$0xff] %v638_v1  ;;  %v642_v3 = vld [vmem:[%s9603_s14 + $0xc08] sm:$0xff]  ;;  %v644_v4 = vld [vmem:[%s9603_s14 + $0xc10] sm:$0xff] }
  0x74   : > { %641 = vst [vmem:[%s9608_s15 + $0x610] sm:$0xff] %v640_v2  ;;  %v646_v5 = vld [vmem:[%s9603_s14 + $0xc18] sm:$0xff]  ;;  %643 = vst [vmem:[%s9608_s15 + $0x618] sm:$0xff] %v642_v3  ;;  %v648_v6 = vld [vmem:[%s9603_s14 + $0xc20] sm:$0xff] }
  0x75   : > { %645 = vst [vmem:[%s9608_s15 + $0x620] sm:$0xff] %v644_v4  ;;  %647 = vst [vmem:[%s9608_s15 + $0x628] sm:$0xff] %v646_v5  ;;  %v650_v7 = vld [vmem:[%s9603_s14 + $0xc28] sm:$0xff]  ;;  %v652_v8 = vld [vmem:[%s9603_s14 + $0xc30] sm:$0xff] }
  0x76   : > { %649 = vst [vmem:[%s9608_s15 + $0x630] sm:$0xff] %v648_v6  ;;  %651 = vst [vmem:[%s9608_s15 + $0x638] sm:$0xff] %v650_v7  ;;  %v654_v9 = vld [vmem:[%s9603_s14 + $0xc38] sm:$0xff]  ;;  %v656_v10 = vld [vmem:[%s9603_s14 + $0xc40] sm:$0xff] }
  0x77   : > { %653 = vst [vmem:[%s9608_s15 + $0x640] sm:$0xff] %v652_v8  ;;  %v658_v11 = vld [vmem:[%s9603_s14 + $0xc48] sm:$0xff]  ;;  %655 = vst [vmem:[%s9608_s15 + $0x648] sm:$0xff] %v654_v9  ;;  %v660_v12 = vld [vmem:[%s9603_s14 + $0xc50] sm:$0xff] }
  0x78   : > { %657 = vst [vmem:[%s9608_s15 + $0x650] sm:$0xff] %v656_v10  ;;  %659 = vst [vmem:[%s9608_s15 + $0x658] sm:$0xff] %v658_v11  ;;  %v662_v13 = vld [vmem:[%s9603_s14 + $0xc58] sm:$0xff]  ;;  %v664_v14 = vld [vmem:[%s9603_s14 + $0xc60] sm:$0xff] }
  0x79   : > { %661 = vst [vmem:[%s9608_s15 + $0x660] sm:$0xff] %v660_v12  ;;  %663 = vst [vmem:[%s9608_s15 + $0x668] sm:$0xff] %v662_v13  ;;  %v666_v15 = vld [vmem:[%s9603_s14 + $0xc68] sm:$0xff]  ;;  %v668_v16 = vld [vmem:[%s9603_s14 + $0xc70] sm:$0xff] }
  0x7a   : > { %665 = vst [vmem:[%s9608_s15 + $0x670] sm:$0xff] %v664_v14  ;;  %v670_v17 = vld [vmem:[%s9603_s14 + $0xc78] sm:$0xff]  ;;  %667 = vst [vmem:[%s9608_s15 + $0x678] sm:$0xff] %v666_v15  ;;  %v672_v18 = vld [vmem:[%s9603_s14 + $0xc80] sm:$0xff] }
  0x7b   : > { %669 = vst [vmem:[%s9608_s15 + $0x680] sm:$0xff] %v668_v16  ;;  %671 = vst [vmem:[%s9608_s15 + $0x688] sm:$0xff] %v670_v17  ;;  %v674_v19 = vld [vmem:[%s9603_s14 + $0xc88] sm:$0xff]  ;;  %v676_v20 = vld [vmem:[%s9603_s14 + $0xc90] sm:$0xff] }
  0x7c   : > { %673 = vst [vmem:[%s9608_s15 + $0x690] sm:$0xff] %v672_v18  ;;  %675 = vst [vmem:[%s9608_s15 + $0x698] sm:$0xff] %v674_v19  ;;  %v678_v21 = vld [vmem:[%s9603_s14 + $0xc98] sm:$0xff]  ;;  %v680_v22 = vld [vmem:[%s9603_s14 + $0xca0] sm:$0xff] }
  0x7d   : > { %677 = vst [vmem:[%s9608_s15 + $0x6a0] sm:$0xff] %v676_v20  ;;  %v682_v23 = vld [vmem:[%s9603_s14 + $0xca8] sm:$0xff]  ;;  %679 = vst [vmem:[%s9608_s15 + $0x6a8] sm:$0xff] %v678_v21  ;;  %v684_v24 = vld [vmem:[%s9603_s14 + $0xcb0] sm:$0xff] }
  0x7e   : > { %681 = vst [vmem:[%s9608_s15 + $0x6b0] sm:$0xff] %v680_v22  ;;  %683 = vst [vmem:[%s9608_s15 + $0x6b8] sm:$0xff] %v682_v23  ;;  %v686_v25 = vld [vmem:[%s9603_s14 + $0xcb8] sm:$0xff]  ;;  %v688_v26 = vld [vmem:[%s9603_s14 + $0xcc0] sm:$0xff] }
  0x7f   : > { %685 = vst [vmem:[%s9608_s15 + $0x6c0] sm:$0xff] %v684_v24  ;;  %687 = vst [vmem:[%s9608_s15 + $0x6c8] sm:$0xff] %v686_v25  ;;  %v690_v27 = vld [vmem:[%s9603_s14 + $0xcc8] sm:$0xff]  ;;  %v692_v28 = vld [vmem:[%s9603_s14 + $0xcd0] sm:$0xff] }
  0x80   : > { %689 = vst [vmem:[%s9608_s15 + $0x6d0] sm:$0xff] %v688_v26  ;;  %v694_v29 = vld [vmem:[%s9603_s14 + $0xcd8] sm:$0xff]  ;;  %691 = vst [vmem:[%s9608_s15 + $0x6d8] sm:$0xff] %v690_v27  ;;  %v696_v30 = vld [vmem:[%s9603_s14 + $0xce0] sm:$0xff] }
  0x81   : > { %693 = vst [vmem:[%s9608_s15 + $0x6e0] sm:$0xff] %v692_v28  ;;  %695 = vst [vmem:[%s9608_s15 + $0x6e8] sm:$0xff] %v694_v29  ;;  %v698_v31 = vld [vmem:[%s9603_s14 + $0xce8] sm:$0xff]  ;;  %v700_v32 = vld [vmem:[%s9603_s14 + $0xcf0] sm:$0xff] }
  0x82   : > { %697 = vst [vmem:[%s9608_s15 + $0x6f0] sm:$0xff] %v696_v30  ;;  %699 = vst [vmem:[%s9608_s15 + $0x6f8] sm:$0xff] %v698_v31  ;;  %v702_v33 = vld [vmem:[%s9603_s14 + $0xcf8] sm:$0xff]  ;;  %v704_v34 = vld [vmem:[%s9603_s14 + $0xd00] sm:$0xff] }
  0x83   : > { %701 = vst [vmem:[%s9608_s15 + $0x700] sm:$0xff] %v700_v32  ;;  %v706_v35 = vld [vmem:[%s9603_s14 + $0xd08] sm:$0xff]  ;;  %703 = vst [vmem:[%s9608_s15 + $0x708] sm:$0xff] %v702_v33  ;;  %v708_v36 = vld [vmem:[%s9603_s14 + $0xe40] sm:$0xff] }
  0x84   : > { %705 = vst [vmem:[%s9608_s15 + $0x710] sm:$0xff] %v704_v34  ;;  %707 = vst [vmem:[%s9608_s15 + $0x718] sm:$0xff] %v706_v35  ;;  %v710_v37 = vld [vmem:[%s9603_s14 + $0xe48] sm:$0xff]  ;;  %v712_v38 = vld [vmem:[%s9603_s14 + $0xe50] sm:$0xff] }
  0x85   : > { %709 = vst [vmem:[%s9608_s15 + $0x720] sm:$0xff] %v708_v36  ;;  %711 = vst [vmem:[%s9608_s15 + $0x728] sm:$0xff] %v710_v37  ;;  %v714_v39 = vld [vmem:[%s9603_s14 + $0xe58] sm:$0xff]  ;;  %v716_v40 = vld [vmem:[%s9603_s14 + $0xe60] sm:$0xff] }
  0x86   : > { %713 = vst [vmem:[%s9608_s15 + $0x730] sm:$0xff] %v712_v38  ;;  %v718_v41 = vld [vmem:[%s9603_s14 + $0xe68] sm:$0xff]  ;;  %715 = vst [vmem:[%s9608_s15 + $0x738] sm:$0xff] %v714_v39  ;;  %v720_v42 = vld [vmem:[%s9603_s14 + $0xe70] sm:$0xff] }
  0x87   : > { %717 = vst [vmem:[%s9608_s15 + $0x740] sm:$0xff] %v716_v40  ;;  %719 = vst [vmem:[%s9608_s15 + $0x748] sm:$0xff] %v718_v41  ;;  %v722_v43 = vld [vmem:[%s9603_s14 + $0xe78] sm:$0xff]  ;;  %v724_v44 = vld [vmem:[%s9603_s14 + $0xe80] sm:$0xff] }
  0x88   : > { %721 = vst [vmem:[%s9608_s15 + $0x750] sm:$0xff] %v720_v42  ;;  %723 = vst [vmem:[%s9608_s15 + $0x758] sm:$0xff] %v722_v43  ;;  %v726_v45 = vld [vmem:[%s9603_s14 + $0xe88] sm:$0xff]  ;;  %v728_v46 = vld [vmem:[%s9603_s14 + $0xe90] sm:$0xff] }
  0x89   : > { %725 = vst [vmem:[%s9608_s15 + $0x760] sm:$0xff] %v724_v44  ;;  %v730_v47 = vld [vmem:[%s9603_s14 + $0xe98] sm:$0xff]  ;;  %727 = vst [vmem:[%s9608_s15 + $0x768] sm:$0xff] %v726_v45  ;;  %v732_v48 = vld [vmem:[%s9603_s14 + $0xea0] sm:$0xff] }
  0x8a   : > { %729 = vst [vmem:[%s9608_s15 + $0x770] sm:$0xff] %v728_v46  ;;  %731 = vst [vmem:[%s9608_s15 + $0x778] sm:$0xff] %v730_v47  ;;  %v734_v49 = vld [vmem:[%s9603_s14 + $0xea8] sm:$0xff]  ;;  %v736_v50 = vld [vmem:[%s9603_s14 + $0xeb0] sm:$0xff] }
  0x8b   : > { %733 = vst [vmem:[%s9608_s15 + $0x780] sm:$0xff] %v732_v48  ;;  %735 = vst [vmem:[%s9608_s15 + $0x788] sm:$0xff] %v734_v49  ;;  %v738_v51 = vld [vmem:[%s9603_s14 + $0xeb8] sm:$0xff]  ;;  %v740_v52 = vld [vmem:[%s9603_s14 + $0xec0] sm:$0xff] }
  0x8c   : > { %737 = vst [vmem:[%s9608_s15 + $0x790] sm:$0xff] %v736_v50  ;;  %v742_v53 = vld [vmem:[%s9603_s14 + $0xec8] sm:$0xff]  ;;  %739 = vst [vmem:[%s9608_s15 + $0x798] sm:$0xff] %v738_v51  ;;  %v744_v54 = vld [vmem:[%s9603_s14 + $0xed0] sm:$0xff] }
  0x8d   : > { %741 = vst [vmem:[%s9608_s15 + $0x7a0] sm:$0xff] %v740_v52  ;;  %743 = vst [vmem:[%s9608_s15 + $0x7a8] sm:$0xff] %v742_v53  ;;  %v746_v55 = vld [vmem:[%s9603_s14 + $0xed8] sm:$0xff]  ;;  %v748_v56 = vld [vmem:[%s9603_s14 + $0xee0] sm:$0xff] }
  0x8e   : > { %745 = vst [vmem:[%s9608_s15 + $0x7b0] sm:$0xff] %v744_v54  ;;  %747 = vst [vmem:[%s9608_s15 + $0x7b8] sm:$0xff] %v746_v55  ;;  %v750_v57 = vld [vmem:[%s9603_s14 + $0xee8] sm:$0xff]  ;;  %v752_v58 = vld [vmem:[%s9603_s14 + $0xef0] sm:$0xff] }
  0x8f   : > { %749 = vst [vmem:[%s9608_s15 + $0x7c0] sm:$0xff] %v748_v56  ;;  %v754_v59 = vld [vmem:[%s9603_s14 + $0xef8] sm:$0xff]  ;;  %751 = vst [vmem:[%s9608_s15 + $0x7c8] sm:$0xff] %v750_v57  ;;  %v756_v60 = vld [vmem:[%s9603_s14 + $0xf00] sm:$0xff] }
  0x90   : > { %753 = vst [vmem:[%s9608_s15 + $0x7d0] sm:$0xff] %v752_v58  ;;  %755 = vst [vmem:[%s9608_s15 + $0x7d8] sm:$0xff] %v754_v59  ;;  %v758_v61 = vld [vmem:[%s9603_s14 + $0xf08] sm:$0xff]  ;;  %v760_v62 = vld [vmem:[%s9603_s14 + $0xf10] sm:$0xff] }
  0x91   : > { %757 = vst [vmem:[%s9608_s15 + $0x7e0] sm:$0xff] %v756_v60  ;;  %759 = vst [vmem:[%s9608_s15 + $0x7e8] sm:$0xff] %v758_v61  ;;  %v762_v63 = vld [vmem:[%s9603_s14 + $0xf18] sm:$0xff]  ;;  %v764_v0 = vld [vmem:[%s9603_s14 + $0xf20] sm:$0xff] }
  0x92   : > { %761 = vst [vmem:[%s9608_s15 + $0x7f0] sm:$0xff] %v760_v62  ;;  %v766_v1 = vld [vmem:[%s9603_s14 + $0xf28] sm:$0xff]  ;;  %763 = vst [vmem:[%s9608_s15 + $0x7f8] sm:$0xff] %v762_v63  ;;  %v768_v2 = vld [vmem:[%s9603_s14 + $0xf30] sm:$0xff] }
  0x93   : > { %765 = vst [vmem:[%s9608_s15 + $0x800] sm:$0xff] %v764_v0  ;;  %767 = vst [vmem:[%s9608_s15 + $0x808] sm:$0xff] %v766_v1  ;;  %v770_v3 = vld [vmem:[%s9603_s14 + $0xf38] sm:$0xff]  ;;  %v772_v4 = vld [vmem:[%s9603_s14 + $0xf40] sm:$0xff] }
  0x94   : > { %769 = vst [vmem:[%s9608_s15 + $0x810] sm:$0xff] %v768_v2  ;;  %771 = vst [vmem:[%s9608_s15 + $0x818] sm:$0xff] %v770_v3  ;;  %v774_v5 = vld [vmem:[%s9603_s14 + $0xf48] sm:$0xff]  ;;  %v776_v6 = vld [vmem:[%s9603_s14 + $0xf50] sm:$0xff] }
  0x95   : > { %773 = vst [vmem:[%s9608_s15 + $0x820] sm:$0xff] %v772_v4  ;;  %v778_v7 = vld [vmem:[%s9603_s14 + $0xf58] sm:$0xff]  ;;  %775 = vst [vmem:[%s9608_s15 + $0x828] sm:$0xff] %v774_v5  ;;  %v780_v8 = vld [vmem:[%s9603_s14 + $0xf60] sm:$0xff] }
  0x96   : > { %777 = vst [vmem:[%s9608_s15 + $0x830] sm:$0xff] %v776_v6  ;;  %779 = vst [vmem:[%s9608_s15 + $0x838] sm:$0xff] %v778_v7  ;;  %v782_v9 = vld [vmem:[%s9603_s14 + $0xf68] sm:$0xff]  ;;  %v784_v10 = vld [vmem:[%s9603_s14 + $0x10a0] sm:$0xff] }
  0x97   : > { %781 = vst [vmem:[%s9608_s15 + $0x840] sm:$0xff] %v780_v8  ;;  %783 = vst [vmem:[%s9608_s15 + $0x848] sm:$0xff] %v782_v9  ;;  %v786_v11 = vld [vmem:[%s9603_s14 + $0x10a8] sm:$0xff]  ;;  %v788_v12 = vld [vmem:[%s9603_s14 + $0x10b0] sm:$0xff] }
  0x98   : > { %785 = vst [vmem:[%s9608_s15 + $0x850] sm:$0xff] %v784_v10  ;;  %v790_v13 = vld [vmem:[%s9603_s14 + $0x10b8] sm:$0xff]  ;;  %787 = vst [vmem:[%s9608_s15 + $0x858] sm:$0xff] %v786_v11  ;;  %v792_v14 = vld [vmem:[%s9603_s14 + $0x10c0] sm:$0xff] }
  0x99   : > { %789 = vst [vmem:[%s9608_s15 + $0x860] sm:$0xff] %v788_v12  ;;  %791 = vst [vmem:[%s9608_s15 + $0x868] sm:$0xff] %v790_v13  ;;  %v794_v15 = vld [vmem:[%s9603_s14 + $0x10c8] sm:$0xff]  ;;  %v796_v16 = vld [vmem:[%s9603_s14 + $0x10d0] sm:$0xff] }
  0x9a   : > { %793 = vst [vmem:[%s9608_s15 + $0x870] sm:$0xff] %v792_v14  ;;  %795 = vst [vmem:[%s9608_s15 + $0x878] sm:$0xff] %v794_v15  ;;  %v798_v17 = vld [vmem:[%s9603_s14 + $0x10d8] sm:$0xff]  ;;  %v800_v18 = vld [vmem:[%s9603_s14 + $0x10e0] sm:$0xff] }
  0x9b   : > { %797 = vst [vmem:[%s9608_s15 + $0x880] sm:$0xff] %v796_v16  ;;  %v802_v19 = vld [vmem:[%s9603_s14 + $0x10e8] sm:$0xff]  ;;  %799 = vst [vmem:[%s9608_s15 + $0x888] sm:$0xff] %v798_v17  ;;  %v804_v20 = vld [vmem:[%s9603_s14 + $0x10f0] sm:$0xff] }
  0x9c   : > { %801 = vst [vmem:[%s9608_s15 + $0x890] sm:$0xff] %v800_v18  ;;  %803 = vst [vmem:[%s9608_s15 + $0x898] sm:$0xff] %v802_v19  ;;  %v806_v21 = vld [vmem:[%s9603_s14 + $0x10f8] sm:$0xff]  ;;  %v808_v22 = vld [vmem:[%s9603_s14 + $0x1100] sm:$0xff] }
  0x9d   : > { %805 = vst [vmem:[%s9608_s15 + $0x8a0] sm:$0xff] %v804_v20  ;;  %807 = vst [vmem:[%s9608_s15 + $0x8a8] sm:$0xff] %v806_v21  ;;  %v810_v23 = vld [vmem:[%s9603_s14 + $0x1108] sm:$0xff]  ;;  %v812_v24 = vld [vmem:[%s9603_s14 + $0x1110] sm:$0xff] }
  0x9e   : > { %809 = vst [vmem:[%s9608_s15 + $0x8b0] sm:$0xff] %v808_v22  ;;  %v814_v25 = vld [vmem:[%s9603_s14 + $0x1118] sm:$0xff]  ;;  %811 = vst [vmem:[%s9608_s15 + $0x8b8] sm:$0xff] %v810_v23  ;;  %v816_v26 = vld [vmem:[%s9603_s14 + $0x1120] sm:$0xff] }
  0x9f   : > { %813 = vst [vmem:[%s9608_s15 + $0x8c0] sm:$0xff] %v812_v24  ;;  %815 = vst [vmem:[%s9608_s15 + $0x8c8] sm:$0xff] %v814_v25  ;;  %v818_v27 = vld [vmem:[%s9603_s14 + $0x1128] sm:$0xff]  ;;  %v820_v28 = vld [vmem:[%s9603_s14 + $0x1130] sm:$0xff] }
  0xa0   : > { %817 = vst [vmem:[%s9608_s15 + $0x8d0] sm:$0xff] %v816_v26  ;;  %819 = vst [vmem:[%s9608_s15 + $0x8d8] sm:$0xff] %v818_v27  ;;  %v822_v29 = vld [vmem:[%s9603_s14 + $0x1138] sm:$0xff]  ;;  %v824_v30 = vld [vmem:[%s9603_s14 + $0x1140] sm:$0xff] }
  0xa1   : > { %821 = vst [vmem:[%s9608_s15 + $0x8e0] sm:$0xff] %v820_v28  ;;  %v826_v31 = vld [vmem:[%s9603_s14 + $0x1148] sm:$0xff]  ;;  %823 = vst [vmem:[%s9608_s15 + $0x8e8] sm:$0xff] %v822_v29  ;;  %v828_v32 = vld [vmem:[%s9603_s14 + $0x1150] sm:$0xff] }
  0xa2   : > { %825 = vst [vmem:[%s9608_s15 + $0x8f0] sm:$0xff] %v824_v30  ;;  %827 = vst [vmem:[%s9608_s15 + $0x8f8] sm:$0xff] %v826_v31  ;;  %v830_v33 = vld [vmem:[%s9603_s14 + $0x1158] sm:$0xff]  ;;  %v832_v34 = vld [vmem:[%s9603_s14 + $0x1160] sm:$0xff] }
  0xa3   : > { %829 = vst [vmem:[%s9608_s15 + $0x900] sm:$0xff] %v828_v32  ;;  %831 = vst [vmem:[%s9608_s15 + $0x908] sm:$0xff] %v830_v33  ;;  %v834_v35 = vld [vmem:[%s9603_s14 + $0x1168] sm:$0xff]  ;;  %v836_v36 = vld [vmem:[%s9603_s14 + $0x1170] sm:$0xff] }
  0xa4   : > { %833 = vst [vmem:[%s9608_s15 + $0x910] sm:$0xff] %v832_v34  ;;  %v838_v37 = vld [vmem:[%s9603_s14 + $0x1178] sm:$0xff]  ;;  %835 = vst [vmem:[%s9608_s15 + $0x918] sm:$0xff] %v834_v35  ;;  %v840_v38 = vld [vmem:[%s9603_s14 + $0x1180] sm:$0xff] }
  0xa5   : > { %837 = vst [vmem:[%s9608_s15 + $0x920] sm:$0xff] %v836_v36  ;;  %839 = vst [vmem:[%s9608_s15 + $0x928] sm:$0xff] %v838_v37  ;;  %v842_v39 = vld [vmem:[%s9603_s14 + $0x1188] sm:$0xff]  ;;  %v844_v40 = vld [vmem:[%s9603_s14 + $0x1190] sm:$0xff] }
  0xa6   : > { %841 = vst [vmem:[%s9608_s15 + $0x930] sm:$0xff] %v840_v38  ;;  %843 = vst [vmem:[%s9608_s15 + $0x938] sm:$0xff] %v842_v39  ;;  %v846_v41 = vld [vmem:[%s9603_s14 + $0x1198] sm:$0xff]  ;;  %v848_v42 = vld [vmem:[%s9603_s14 + $0x11a0] sm:$0xff] }
  0xa7   : > { %845 = vst [vmem:[%s9608_s15 + $0x940] sm:$0xff] %v844_v40  ;;  %v850_v43 = vld [vmem:[%s9603_s14 + $0x11a8] sm:$0xff]  ;;  %847 = vst [vmem:[%s9608_s15 + $0x948] sm:$0xff] %v846_v41  ;;  %v852_v44 = vld [vmem:[%s9603_s14 + $0x11b0] sm:$0xff] }
  0xa8   : > { %849 = vst [vmem:[%s9608_s15 + $0x950] sm:$0xff] %v848_v42  ;;  %851 = vst [vmem:[%s9608_s15 + $0x958] sm:$0xff] %v850_v43  ;;  %v854_v45 = vld [vmem:[%s9603_s14 + $0x11b8] sm:$0xff]  ;;  %v856_v46 = vld [vmem:[%s9603_s14 + $0x11c0] sm:$0xff] }
  0xa9   : > { %853 = vst [vmem:[%s9608_s15 + $0x960] sm:$0xff] %v852_v44  ;;  %855 = vst [vmem:[%s9608_s15 + $0x968] sm:$0xff] %v854_v45  ;;  %v858_v47 = vld [vmem:[%s9603_s14 + $0x11c8] sm:$0xff]  ;;  %v860_v48 = vld [vmem:[%s9603_s14 + $0x1300] sm:$0xff] }
  0xaa   : > { %857 = vst [vmem:[%s9608_s15 + $0x970] sm:$0xff] %v856_v46  ;;  %v862_v49 = vld [vmem:[%s9603_s14 + $0x1308] sm:$0xff]  ;;  %859 = vst [vmem:[%s9608_s15 + $0x978] sm:$0xff] %v858_v47  ;;  %v864_v50 = vld [vmem:[%s9603_s14 + $0x1310] sm:$0xff] }
  0xab   : > { %861 = vst [vmem:[%s9608_s15 + $0x980] sm:$0xff] %v860_v48  ;;  %863 = vst [vmem:[%s9608_s15 + $0x988] sm:$0xff] %v862_v49  ;;  %v866_v51 = vld [vmem:[%s9603_s14 + $0x1318] sm:$0xff]  ;;  %v868_v52 = vld [vmem:[%s9603_s14 + $0x1320] sm:$0xff] }
  0xac   : > { %865 = vst [vmem:[%s9608_s15 + $0x990] sm:$0xff] %v864_v50  ;;  %867 = vst [vmem:[%s9608_s15 + $0x998] sm:$0xff] %v866_v51  ;;  %v870_v53 = vld [vmem:[%s9603_s14 + $0x1328] sm:$0xff]  ;;  %v872_v54 = vld [vmem:[%s9603_s14 + $0x1330] sm:$0xff] }
  0xad   : > { %869 = vst [vmem:[%s9608_s15 + $0x9a0] sm:$0xff] %v868_v52  ;;  %v874_v55 = vld [vmem:[%s9603_s14 + $0x1338] sm:$0xff]  ;;  %871 = vst [vmem:[%s9608_s15 + $0x9a8] sm:$0xff] %v870_v53  ;;  %v876_v56 = vld [vmem:[%s9603_s14 + $0x1340] sm:$0xff] }
  0xae   : > { %873 = vst [vmem:[%s9608_s15 + $0x9b0] sm:$0xff] %v872_v54  ;;  %875 = vst [vmem:[%s9608_s15 + $0x9b8] sm:$0xff] %v874_v55  ;;  %v878_v57 = vld [vmem:[%s9603_s14 + $0x1348] sm:$0xff]  ;;  %v880_v58 = vld [vmem:[%s9603_s14 + $0x1350] sm:$0xff] }
  0xaf   : > { %877 = vst [vmem:[%s9608_s15 + $0x9c0] sm:$0xff] %v876_v56  ;;  %879 = vst [vmem:[%s9608_s15 + $0x9c8] sm:$0xff] %v878_v57  ;;  %v882_v59 = vld [vmem:[%s9603_s14 + $0x1358] sm:$0xff]  ;;  %v884_v60 = vld [vmem:[%s9603_s14 + $0x1360] sm:$0xff] }
  0xb0   : > { %881 = vst [vmem:[%s9608_s15 + $0x9d0] sm:$0xff] %v880_v58  ;;  %v886_v61 = vld [vmem:[%s9603_s14 + $0x1368] sm:$0xff]  ;;  %883 = vst [vmem:[%s9608_s15 + $0x9d8] sm:$0xff] %v882_v59  ;;  %v888_v62 = vld [vmem:[%s9603_s14 + $0x1370] sm:$0xff] }
  0xb1   : > { %885 = vst [vmem:[%s9608_s15 + $0x9e0] sm:$0xff] %v884_v60  ;;  %887 = vst [vmem:[%s9608_s15 + $0x9e8] sm:$0xff] %v886_v61  ;;  %v890_v63 = vld [vmem:[%s9603_s14 + $0x1378] sm:$0xff]  ;;  %v892_v0 = vld [vmem:[%s9603_s14 + $0x1380] sm:$0xff] }
  0xb2   : > { %889 = vst [vmem:[%s9608_s15 + $0x9f0] sm:$0xff] %v888_v62  ;;  %891 = vst [vmem:[%s9608_s15 + $0x9f8] sm:$0xff] %v890_v63  ;;  %v894_v1 = vld [vmem:[%s9603_s14 + $0x1388] sm:$0xff]  ;;  %v896_v2 = vld [vmem:[%s9603_s14 + $0x1390] sm:$0xff] }
  0xb3   : > { %893 = vst [vmem:[%s9608_s15 + $0xa00] sm:$0xff] %v892_v0  ;;  %v898_v3 = vld [vmem:[%s9603_s14 + $0x1398] sm:$0xff]  ;;  %895 = vst [vmem:[%s9608_s15 + $0xa08] sm:$0xff] %v894_v1  ;;  %v900_v4 = vld [vmem:[%s9603_s14 + $0x13a0] sm:$0xff] }
  0xb4   : > { %897 = vst [vmem:[%s9608_s15 + $0xa10] sm:$0xff] %v896_v2  ;;  %899 = vst [vmem:[%s9608_s15 + $0xa18] sm:$0xff] %v898_v3  ;;  %v902_v5 = vld [vmem:[%s9603_s14 + $0x13a8] sm:$0xff]  ;;  %v904_v6 = vld [vmem:[%s9603_s14 + $0x13b0] sm:$0xff] }
  0xb5   : > { %901 = vst [vmem:[%s9608_s15 + $0xa20] sm:$0xff] %v900_v4  ;;  %903 = vst [vmem:[%s9608_s15 + $0xa28] sm:$0xff] %v902_v5  ;;  %v906_v7 = vld [vmem:[%s9603_s14 + $0x13b8] sm:$0xff]  ;;  %v908_v8 = vld [vmem:[%s9603_s14 + $0x13c0] sm:$0xff] }
  0xb6   : > { %905 = vst [vmem:[%s9608_s15 + $0xa30] sm:$0xff] %v904_v6  ;;  %v910_v9 = vld [vmem:[%s9603_s14 + $0x13c8] sm:$0xff]  ;;  %907 = vst [vmem:[%s9608_s15 + $0xa38] sm:$0xff] %v906_v7  ;;  %v912_v10 = vld [vmem:[%s9603_s14 + $0x13d0] sm:$0xff] }
  0xb7   : > { %909 = vst [vmem:[%s9608_s15 + $0xa40] sm:$0xff] %v908_v8  ;;  %911 = vst [vmem:[%s9608_s15 + $0xa48] sm:$0xff] %v910_v9  ;;  %v914_v11 = vld [vmem:[%s9603_s14 + $0x13d8] sm:$0xff]  ;;  %v916_v12 = vld [vmem:[%s9603_s14 + $0x13e0] sm:$0xff] }
  0xb8   : > { %913 = vst [vmem:[%s9608_s15 + $0xa50] sm:$0xff] %v912_v10  ;;  %915 = vst [vmem:[%s9608_s15 + $0xa58] sm:$0xff] %v914_v11  ;;  %v918_v13 = vld [vmem:[%s9603_s14 + $0x13e8] sm:$0xff]  ;;  %v920_v14 = vld [vmem:[%s9603_s14 + $0x13f0] sm:$0xff] }
  0xb9   : > { %917 = vst [vmem:[%s9608_s15 + $0xa60] sm:$0xff] %v916_v12  ;;  %v922_v15 = vld [vmem:[%s9603_s14 + $0x13f8] sm:$0xff]  ;;  %919 = vst [vmem:[%s9608_s15 + $0xa68] sm:$0xff] %v918_v13  ;;  %v924_v16 = vld [vmem:[%s9603_s14 + $0x1400] sm:$0xff] }
  0xba   : > { %921 = vst [vmem:[%s9608_s15 + $0xa70] sm:$0xff] %v920_v14  ;;  %923 = vst [vmem:[%s9608_s15 + $0xa78] sm:$0xff] %v922_v15  ;;  %v926_v17 = vld [vmem:[%s9603_s14 + $0x1408] sm:$0xff]  ;;  %v928_v18 = vld [vmem:[%s9603_s14 + $0x1410] sm:$0xff] }
  0xbb   : > { %925 = vst [vmem:[%s9608_s15 + $0xa80] sm:$0xff] %v924_v16  ;;  %927 = vst [vmem:[%s9608_s15 + $0xa88] sm:$0xff] %v926_v17  ;;  %v930_v19 = vld [vmem:[%s9603_s14 + $0x1418] sm:$0xff]  ;;  %v932_v20 = vld [vmem:[%s9603_s14 + $0x1420] sm:$0xff] }
  0xbc   : > { %929 = vst [vmem:[%s9608_s15 + $0xa90] sm:$0xff] %v928_v18  ;;  %v934_v21 = vld [vmem:[%s9603_s14 + $0x1428] sm:$0xff]  ;;  %931 = vst [vmem:[%s9608_s15 + $0xa98] sm:$0xff] %v930_v19  ;;  %v936_v22 = vld [vmem:[%s9603_s14 + $0x1560] sm:$0xff] }
  0xbd   : > { %933 = vst [vmem:[%s9608_s15 + $0xaa0] sm:$0xff] %v932_v20  ;;  %935 = vst [vmem:[%s9608_s15 + $0xaa8] sm:$0xff] %v934_v21  ;;  %v938_v23 = vld [vmem:[%s9603_s14 + $0x1568] sm:$0xff]  ;;  %v940_v24 = vld [vmem:[%s9603_s14 + $0x1570] sm:$0xff] }
  0xbe   : > { %937 = vst [vmem:[%s9608_s15 + $0xab0] sm:$0xff] %v936_v22  ;;  %939 = vst [vmem:[%s9608_s15 + $0xab8] sm:$0xff] %v938_v23  ;;  %v942_v25 = vld [vmem:[%s9603_s14 + $0x1578] sm:$0xff]  ;;  %v944_v26 = vld [vmem:[%s9603_s14 + $0x1580] sm:$0xff] }
  0xbf   : > { %941 = vst [vmem:[%s9608_s15 + $0xac0] sm:$0xff] %v940_v24  ;;  %v946_v27 = vld [vmem:[%s9603_s14 + $0x1588] sm:$0xff]  ;;  %943 = vst [vmem:[%s9608_s15 + $0xac8] sm:$0xff] %v942_v25  ;;  %v948_v28 = vld [vmem:[%s9603_s14 + $0x1590] sm:$0xff] }
  0xc0   : > { %945 = vst [vmem:[%s9608_s15 + $0xad0] sm:$0xff] %v944_v26  ;;  %947 = vst [vmem:[%s9608_s15 + $0xad8] sm:$0xff] %v946_v27  ;;  %v950_v29 = vld [vmem:[%s9603_s14 + $0x1598] sm:$0xff]  ;;  %v952_v30 = vld [vmem:[%s9603_s14 + $0x15a0] sm:$0xff] }
  0xc1   : > { %949 = vst [vmem:[%s9608_s15 + $0xae0] sm:$0xff] %v948_v28  ;;  %951 = vst [vmem:[%s9608_s15 + $0xae8] sm:$0xff] %v950_v29  ;;  %v954_v31 = vld [vmem:[%s9603_s14 + $0x15a8] sm:$0xff]  ;;  %v956_v32 = vld [vmem:[%s9603_s14 + $0x15b0] sm:$0xff] }
  0xc2   : > { %953 = vst [vmem:[%s9608_s15 + $0xaf0] sm:$0xff] %v952_v30  ;;  %v958_v33 = vld [vmem:[%s9603_s14 + $0x15b8] sm:$0xff]  ;;  %955 = vst [vmem:[%s9608_s15 + $0xaf8] sm:$0xff] %v954_v31  ;;  %v960_v34 = vld [vmem:[%s9603_s14 + $0x15c0] sm:$0xff] }
  0xc3   : > { %957 = vst [vmem:[%s9608_s15 + $0xb00] sm:$0xff] %v956_v32  ;;  %959 = vst [vmem:[%s9608_s15 + $0xb08] sm:$0xff] %v958_v33  ;;  %v962_v35 = vld [vmem:[%s9603_s14 + $0x15c8] sm:$0xff]  ;;  %v964_v36 = vld [vmem:[%s9603_s14 + $0x15d0] sm:$0xff] }
  0xc4   : > { %961 = vst [vmem:[%s9608_s15 + $0xb10] sm:$0xff] %v960_v34  ;;  %963 = vst [vmem:[%s9608_s15 + $0xb18] sm:$0xff] %v962_v35  ;;  %v966_v37 = vld [vmem:[%s9603_s14 + $0x15d8] sm:$0xff]  ;;  %v968_v38 = vld [vmem:[%s9603_s14 + $0x15e0] sm:$0xff] }
  0xc5   : > { %965 = vst [vmem:[%s9608_s15 + $0xb20] sm:$0xff] %v964_v36  ;;  %v970_v39 = vld [vmem:[%s9603_s14 + $0x15e8] sm:$0xff]  ;;  %967 = vst [vmem:[%s9608_s15 + $0xb28] sm:$0xff] %v966_v37  ;;  %v972_v40 = vld [vmem:[%s9603_s14 + $0x15f0] sm:$0xff] }
  0xc6   : > { %969 = vst [vmem:[%s9608_s15 + $0xb30] sm:$0xff] %v968_v38  ;;  %971 = vst [vmem:[%s9608_s15 + $0xb38] sm:$0xff] %v970_v39  ;;  %v974_v41 = vld [vmem:[%s9603_s14 + $0x15f8] sm:$0xff]  ;;  %v976_v42 = vld [vmem:[%s9603_s14 + $0x1600] sm:$0xff] }
  0xc7   : > { %973 = vst [vmem:[%s9608_s15 + $0xb40] sm:$0xff] %v972_v40  ;;  %975 = vst [vmem:[%s9608_s15 + $0xb48] sm:$0xff] %v974_v41  ;;  %v978_v43 = vld [vmem:[%s9603_s14 + $0x1608] sm:$0xff]  ;;  %v980_v44 = vld [vmem:[%s9603_s14 + $0x1610] sm:$0xff] }
  0xc8   : > { %977 = vst [vmem:[%s9608_s15 + $0xb50] sm:$0xff] %v976_v42  ;;  %v982_v45 = vld [vmem:[%s9603_s14 + $0x1618] sm:$0xff]  ;;  %979 = vst [vmem:[%s9608_s15 + $0xb58] sm:$0xff] %v978_v43  ;;  %v984_v46 = vld [vmem:[%s9603_s14 + $0x1620] sm:$0xff] }
  0xc9   : > { %981 = vst [vmem:[%s9608_s15 + $0xb60] sm:$0xff] %v980_v44  ;;  %983 = vst [vmem:[%s9608_s15 + $0xb68] sm:$0xff] %v982_v45  ;;  %v986_v47 = vld [vmem:[%s9603_s14 + $0x1628] sm:$0xff]  ;;  %v988_v48 = vld [vmem:[%s9603_s14 + $0x1630] sm:$0xff] }
  0xca   : > { %985 = vst [vmem:[%s9608_s15 + $0xb70] sm:$0xff] %v984_v46  ;;  %987 = vst [vmem:[%s9608_s15 + $0xb78] sm:$0xff] %v986_v47  ;;  %v990_v49 = vld [vmem:[%s9603_s14 + $0x1638] sm:$0xff]  ;;  %v992_v50 = vld [vmem:[%s9603_s14 + $0x1640] sm:$0xff] }
  0xcb   : > { %989 = vst [vmem:[%s9608_s15 + $0xb80] sm:$0xff] %v988_v48  ;;  %v994_v51 = vld [vmem:[%s9603_s14 + $0x1648] sm:$0xff]  ;;  %991 = vst [vmem:[%s9608_s15 + $0xb88] sm:$0xff] %v990_v49  ;;  %v996_v52 = vld [vmem:[%s9603_s14 + $0x1650] sm:$0xff] }
  0xcc   : > { %993 = vst [vmem:[%s9608_s15 + $0xb90] sm:$0xff] %v992_v50  ;;  %995 = vst [vmem:[%s9608_s15 + $0xb98] sm:$0xff] %v994_v51  ;;  %v998_v53 = vld [vmem:[%s9603_s14 + $0x1658] sm:$0xff]  ;;  %v1000_v54 = vld [vmem:[%s9603_s14 + $0x1660] sm:$0xff] }
  0xcd   : > { %997 = vst [vmem:[%s9608_s15 + $0xba0] sm:$0xff] %v996_v52  ;;  %999 = vst [vmem:[%s9608_s15 + $0xba8] sm:$0xff] %v998_v53  ;;  %v1002_v55 = vld [vmem:[%s9603_s14 + $0x1668] sm:$0xff]  ;;  %v1004_v56 = vld [vmem:[%s9603_s14 + $0x1670] sm:$0xff] }
  0xce   : > { %1001 = vst [vmem:[%s9608_s15 + $0xbb0] sm:$0xff] %v1000_v54  ;;  %v1006_v57 = vld [vmem:[%s9603_s14 + $0x1678] sm:$0xff]  ;;  %1003 = vst [vmem:[%s9608_s15 + $0xbb8] sm:$0xff] %v1002_v55  ;;  %v1008_v58 = vld [vmem:[%s9603_s14 + $0x1680] sm:$0xff] }
  0xcf   : > { %1005 = vst [vmem:[%s9608_s15 + $0xbc0] sm:$0xff] %v1004_v56  ;;  %1007 = vst [vmem:[%s9608_s15 + $0xbc8] sm:$0xff] %v1006_v57  ;;  %v1010_v59 = vld [vmem:[%s9603_s14 + $0x1688] sm:$0xff]  ;;  %v1012_v60 = vld [vmem:[%s9603_s14 + $0x17c0] sm:$0xff] }
  0xd0   : > { %1009 = vst [vmem:[%s9608_s15 + $0xbd0] sm:$0xff] %v1008_v58  ;;  %1011 = vst [vmem:[%s9608_s15 + $0xbd8] sm:$0xff] %v1010_v59  ;;  %v1014_v61 = vld [vmem:[%s9603_s14 + $0x17c8] sm:$0xff]  ;;  %v1016_v62 = vld [vmem:[%s9603_s14 + $0x17d0] sm:$0xff] }
  0xd1   : > { %1013 = vst [vmem:[%s9608_s15 + $0xbe0] sm:$0xff] %v1012_v60  ;;  %v1018_v63 = vld [vmem:[%s9603_s14 + $0x17d8] sm:$0xff]  ;;  %1015 = vst [vmem:[%s9608_s15 + $0xbe8] sm:$0xff] %v1014_v61  ;;  %v1020_v0 = vld [vmem:[%s9603_s14 + $0x17e0] sm:$0xff] }
  0xd2   : > { %1017 = vst [vmem:[%s9608_s15 + $0xbf0] sm:$0xff] %v1016_v62  ;;  %1019 = vst [vmem:[%s9608_s15 + $0xbf8] sm:$0xff] %v1018_v63  ;;  %v1022_v1 = vld [vmem:[%s9603_s14 + $0x17e8] sm:$0xff]  ;;  %v1024_v2 = vld [vmem:[%s9603_s14 + $0x17f0] sm:$0xff] }
  0xd3   : > { %1021 = vst [vmem:[%s9608_s15 + $0xc00] sm:$0xff] %v1020_v0  ;;  %1023 = vst [vmem:[%s9608_s15 + $0xc08] sm:$0xff] %v1022_v1  ;;  %v1026_v3 = vld [vmem:[%s9603_s14 + $0x17f8] sm:$0xff]  ;;  %v1028_v4 = vld [vmem:[%s9603_s14 + $0x1800] sm:$0xff] }
  0xd4   : > { %1025 = vst [vmem:[%s9608_s15 + $0xc10] sm:$0xff] %v1024_v2  ;;  %v1030_v5 = vld [vmem:[%s9603_s14 + $0x1808] sm:$0xff]  ;;  %1027 = vst [vmem:[%s9608_s15 + $0xc18] sm:$0xff] %v1026_v3  ;;  %v1032_v6 = vld [vmem:[%s9603_s14 + $0x1810] sm:$0xff] }
  0xd5   : > { %1029 = vst [vmem:[%s9608_s15 + $0xc20] sm:$0xff] %v1028_v4  ;;  %1031 = vst [vmem:[%s9608_s15 + $0xc28] sm:$0xff] %v1030_v5  ;;  %v1034_v7 = vld [vmem:[%s9603_s14 + $0x1818] sm:$0xff]  ;;  %v1036_v8 = vld [vmem:[%s9603_s14 + $0x1820] sm:$0xff] }
  0xd6   : > { %1033 = vst [vmem:[%s9608_s15 + $0xc30] sm:$0xff] %v1032_v6  ;;  %1035 = vst [vmem:[%s9608_s15 + $0xc38] sm:$0xff] %v1034_v7  ;;  %v1038_v9 = vld [vmem:[%s9603_s14 + $0x1828] sm:$0xff]  ;;  %v1040_v10 = vld [vmem:[%s9603_s14 + $0x1830] sm:$0xff] }
  0xd7   : > { %1037 = vst [vmem:[%s9608_s15 + $0xc40] sm:$0xff] %v1036_v8  ;;  %v1042_v11 = vld [vmem:[%s9603_s14 + $0x1838] sm:$0xff]  ;;  %1039 = vst [vmem:[%s9608_s15 + $0xc48] sm:$0xff] %v1038_v9  ;;  %v1044_v12 = vld [vmem:[%s9603_s14 + $0x1840] sm:$0xff] }
  0xd8   : > { %1041 = vst [vmem:[%s9608_s15 + $0xc50] sm:$0xff] %v1040_v10  ;;  %1043 = vst [vmem:[%s9608_s15 + $0xc58] sm:$0xff] %v1042_v11  ;;  %v1046_v13 = vld [vmem:[%s9603_s14 + $0x1848] sm:$0xff]  ;;  %v1048_v14 = vld [vmem:[%s9603_s14 + $0x1850] sm:$0xff] }
  0xd9   : > { %1045 = vst [vmem:[%s9608_s15 + $0xc60] sm:$0xff] %v1044_v12  ;;  %1047 = vst [vmem:[%s9608_s15 + $0xc68] sm:$0xff] %v1046_v13  ;;  %v1050_v15 = vld [vmem:[%s9603_s14 + $0x1858] sm:$0xff]  ;;  %v1052_v16 = vld [vmem:[%s9603_s14 + $0x1860] sm:$0xff] }
  0xda   : > { %1049 = vst [vmem:[%s9608_s15 + $0xc70] sm:$0xff] %v1048_v14  ;;  %v1054_v17 = vld [vmem:[%s9603_s14 + $0x1868] sm:$0xff]  ;;  %1051 = vst [vmem:[%s9608_s15 + $0xc78] sm:$0xff] %v1050_v15  ;;  %v1056_v18 = vld [vmem:[%s9603_s14 + $0x1870] sm:$0xff] }
  0xdb   : > { %1053 = vst [vmem:[%s9608_s15 + $0xc80] sm:$0xff] %v1052_v16  ;;  %1055 = vst [vmem:[%s9608_s15 + $0xc88] sm:$0xff] %v1054_v17  ;;  %v1058_v19 = vld [vmem:[%s9603_s14 + $0x1878] sm:$0xff]  ;;  %v1060_v20 = vld [vmem:[%s9603_s14 + $0x1880] sm:$0xff] }
  0xdc   : > { %1057 = vst [vmem:[%s9608_s15 + $0xc90] sm:$0xff] %v1056_v18  ;;  %1059 = vst [vmem:[%s9608_s15 + $0xc98] sm:$0xff] %v1058_v19  ;;  %v1062_v21 = vld [vmem:[%s9603_s14 + $0x1888] sm:$0xff]  ;;  %v1064_v22 = vld [vmem:[%s9603_s14 + $0x1890] sm:$0xff] }
  0xdd   : > { %1061 = vst [vmem:[%s9608_s15 + $0xca0] sm:$0xff] %v1060_v20  ;;  %v1066_v23 = vld [vmem:[%s9603_s14 + $0x1898] sm:$0xff]  ;;  %1063 = vst [vmem:[%s9608_s15 + $0xca8] sm:$0xff] %v1062_v21  ;;  %v1068_v24 = vld [vmem:[%s9603_s14 + $0x18a0] sm:$0xff] }
  0xde   : > { %1065 = vst [vmem:[%s9608_s15 + $0xcb0] sm:$0xff] %v1064_v22  ;;  %1067 = vst [vmem:[%s9608_s15 + $0xcb8] sm:$0xff] %v1066_v23  ;;  %v1070_v25 = vld [vmem:[%s9603_s14 + $0x18a8] sm:$0xff]  ;;  %v1072_v26 = vld [vmem:[%s9603_s14 + $0x18b0] sm:$0xff] }
  0xdf   : > { %1069 = vst [vmem:[%s9608_s15 + $0xcc0] sm:$0xff] %v1068_v24  ;;  %1071 = vst [vmem:[%s9608_s15 + $0xcc8] sm:$0xff] %v1070_v25  ;;  %v1074_v27 = vld [vmem:[%s9603_s14 + $0x18b8] sm:$0xff]  ;;  %v1076_v28 = vld [vmem:[%s9603_s14 + $0x18c0] sm:$0xff] }
  0xe0   : > { %1073 = vst [vmem:[%s9608_s15 + $0xcd0] sm:$0xff] %v1072_v26  ;;  %v1078_v29 = vld [vmem:[%s9603_s14 + $0x18c8] sm:$0xff]  ;;  %1075 = vst [vmem:[%s9608_s15 + $0xcd8] sm:$0xff] %v1074_v27  ;;  %v1080_v30 = vld [vmem:[%s9603_s14 + $0x18d0] sm:$0xff] }
  0xe1   : > { %1077 = vst [vmem:[%s9608_s15 + $0xce0] sm:$0xff] %v1076_v28  ;;  %1079 = vst [vmem:[%s9608_s15 + $0xce8] sm:$0xff] %v1078_v29  ;;  %v1082_v31 = vld [vmem:[%s9603_s14 + $0x18d8] sm:$0xff]  ;;  %v1084_v32 = vld [vmem:[%s9603_s14 + $0x18e0] sm:$0xff] }
  0xe2   : > { %1081 = vst [vmem:[%s9608_s15 + $0xcf0] sm:$0xff] %v1080_v30  ;;  %1083 = vst [vmem:[%s9608_s15 + $0xcf8] sm:$0xff] %v1082_v31  ;;  %v1086_v33 = vld [vmem:[%s9603_s14 + $0x18e8] sm:$0xff]  ;;  %v1088_v34 = vld [vmem:[%s9603_s14 + $0x1a20] sm:$0xff] }
  0xe3   : > { %1085 = vst [vmem:[%s9608_s15 + $0xd00] sm:$0xff] %v1084_v32  ;;  %v1090_v35 = vld [vmem:[%s9603_s14 + $0x1a28] sm:$0xff]  ;;  %1087 = vst [vmem:[%s9608_s15 + $0xd08] sm:$0xff] %v1086_v33  ;;  %v1092_v36 = vld [vmem:[%s9603_s14 + $0x1a30] sm:$0xff] }
  0xe4   : > { %1089 = vst [vmem:[%s9608_s15 + $0xd10] sm:$0xff] %v1088_v34  ;;  %1091 = vst [vmem:[%s9608_s15 + $0xd18] sm:$0xff] %v1090_v35  ;;  %v1094_v37 = vld [vmem:[%s9603_s14 + $0x1a38] sm:$0xff]  ;;  %v1096_v38 = vld [vmem:[%s9603_s14 + $0x1a40] sm:$0xff] }
  0xe5   : > { %1093 = vst [vmem:[%s9608_s15 + $0xd20] sm:$0xff] %v1092_v36  ;;  %1095 = vst [vmem:[%s9608_s15 + $0xd28] sm:$0xff] %v1094_v37  ;;  %v1098_v39 = vld [vmem:[%s9603_s14 + $0x1a48] sm:$0xff]  ;;  %v1100_v40 = vld [vmem:[%s9603_s14 + $0x1a50] sm:$0xff] }
  0xe6   : > { %1097 = vst [vmem:[%s9608_s15 + $0xd30] sm:$0xff] %v1096_v38  ;;  %v1102_v41 = vld [vmem:[%s9603_s14 + $0x1a58] sm:$0xff]  ;;  %1099 = vst [vmem:[%s9608_s15 + $0xd38] sm:$0xff] %v1098_v39  ;;  %v1104_v42 = vld [vmem:[%s9603_s14 + $0x1a60] sm:$0xff] }
  0xe7   : > { %1101 = vst [vmem:[%s9608_s15 + $0xd40] sm:$0xff] %v1100_v40  ;;  %1103 = vst [vmem:[%s9608_s15 + $0xd48] sm:$0xff] %v1102_v41  ;;  %v1106_v43 = vld [vmem:[%s9603_s14 + $0x1a68] sm:$0xff]  ;;  %v1108_v44 = vld [vmem:[%s9603_s14 + $0x1a70] sm:$0xff] }
  0xe8   : > { %1105 = vst [vmem:[%s9608_s15 + $0xd50] sm:$0xff] %v1104_v42  ;;  %1107 = vst [vmem:[%s9608_s15 + $0xd58] sm:$0xff] %v1106_v43  ;;  %v1110_v45 = vld [vmem:[%s9603_s14 + $0x1a78] sm:$0xff]  ;;  %v1112_v46 = vld [vmem:[%s9603_s14 + $0x1a80] sm:$0xff] }
  0xe9   : > { %1109 = vst [vmem:[%s9608_s15 + $0xd60] sm:$0xff] %v1108_v44  ;;  %v1114_v47 = vld [vmem:[%s9603_s14 + $0x1a88] sm:$0xff]  ;;  %1111 = vst [vmem:[%s9608_s15 + $0xd68] sm:$0xff] %v1110_v45  ;;  %v1116_v48 = vld [vmem:[%s9603_s14 + $0x1a90] sm:$0xff] }
  0xea   : > { %1113 = vst [vmem:[%s9608_s15 + $0xd70] sm:$0xff] %v1112_v46  ;;  %1115 = vst [vmem:[%s9608_s15 + $0xd78] sm:$0xff] %v1114_v47  ;;  %v1118_v49 = vld [vmem:[%s9603_s14 + $0x1a98] sm:$0xff]  ;;  %v1120_v50 = vld [vmem:[%s9603_s14 + $0x1aa0] sm:$0xff] }
  0xeb   : > { %1117 = vst [vmem:[%s9608_s15 + $0xd80] sm:$0xff] %v1116_v48  ;;  %1119 = vst [vmem:[%s9608_s15 + $0xd88] sm:$0xff] %v1118_v49  ;;  %v1122_v51 = vld [vmem:[%s9603_s14 + $0x1aa8] sm:$0xff]  ;;  %v1124_v52 = vld [vmem:[%s9603_s14 + $0x1ab0] sm:$0xff] }
  0xec   : > { %1121 = vst [vmem:[%s9608_s15 + $0xd90] sm:$0xff] %v1120_v50  ;;  %v1126_v53 = vld [vmem:[%s9603_s14 + $0x1ab8] sm:$0xff]  ;;  %1123 = vst [vmem:[%s9608_s15 + $0xd98] sm:$0xff] %v1122_v51  ;;  %v1128_v54 = vld [vmem:[%s9603_s14 + $0x1ac0] sm:$0xff] }
  0xed   : > { %1125 = vst [vmem:[%s9608_s15 + $0xda0] sm:$0xff] %v1124_v52  ;;  %1127 = vst [vmem:[%s9608_s15 + $0xda8] sm:$0xff] %v1126_v53  ;;  %v1130_v55 = vld [vmem:[%s9603_s14 + $0x1ac8] sm:$0xff]  ;;  %v1132_v56 = vld [vmem:[%s9603_s14 + $0x1ad0] sm:$0xff] }
  0xee   : > { %1129 = vst [vmem:[%s9608_s15 + $0xdb0] sm:$0xff] %v1128_v54  ;;  %1131 = vst [vmem:[%s9608_s15 + $0xdb8] sm:$0xff] %v1130_v55  ;;  %v1134_v57 = vld [vmem:[%s9603_s14 + $0x1ad8] sm:$0xff]  ;;  %v1136_v58 = vld [vmem:[%s9603_s14 + $0x1ae0] sm:$0xff] }
  0xef   : > { %1133 = vst [vmem:[%s9608_s15 + $0xdc0] sm:$0xff] %v1132_v56  ;;  %v1138_v59 = vld [vmem:[%s9603_s14 + $0x1ae8] sm:$0xff]  ;;  %1135 = vst [vmem:[%s9608_s15 + $0xdc8] sm:$0xff] %v1134_v57  ;;  %v1140_v60 = vld [vmem:[%s9603_s14 + $0x1af0] sm:$0xff] }
  0xf0   : > { %1137 = vst [vmem:[%s9608_s15 + $0xdd0] sm:$0xff] %v1136_v58  ;;  %1139 = vst [vmem:[%s9608_s15 + $0xdd8] sm:$0xff] %v1138_v59  ;;  %v1142_v61 = vld [vmem:[%s9603_s14 + $0x1af8] sm:$0xff]  ;;  %v1144_v62 = vld [vmem:[%s9603_s14 + $0x1b00] sm:$0xff] }
  0xf1   : > { %1141 = vst [vmem:[%s9608_s15 + $0xde0] sm:$0xff] %v1140_v60  ;;  %1143 = vst [vmem:[%s9608_s15 + $0xde8] sm:$0xff] %v1142_v61  ;;  %v1146_v63 = vld [vmem:[%s9603_s14 + $0x1b08] sm:$0xff]  ;;  %v1148_v0 = vld [vmem:[%s9603_s14 + $0x1b10] sm:$0xff] }
  0xf2   : > { %1145 = vst [vmem:[%s9608_s15 + $0xdf0] sm:$0xff] %v1144_v62  ;;  %v1150_v1 = vld [vmem:[%s9603_s14 + $0x1b18] sm:$0xff]  ;;  %1147 = vst [vmem:[%s9608_s15 + $0xdf8] sm:$0xff] %v1146_v63  ;;  %v1152_v2 = vld [vmem:[%s9603_s14 + $0x1b20] sm:$0xff] }
  0xf3   : > { %1149 = vst [vmem:[%s9608_s15 + $0xe00] sm:$0xff] %v1148_v0  ;;  %1151 = vst [vmem:[%s9608_s15 + $0xe08] sm:$0xff] %v1150_v1  ;;  %v1154_v3 = vld [vmem:[%s9603_s14 + $0x1b28] sm:$0xff]  ;;  %v1156_v4 = vld [vmem:[%s9603_s14 + $0x1b30] sm:$0xff] }
  0xf4   : > { %1153 = vst [vmem:[%s9608_s15 + $0xe10] sm:$0xff] %v1152_v2  ;;  %1155 = vst [vmem:[%s9608_s15 + $0xe18] sm:$0xff] %v1154_v3  ;;  %v1158_v5 = vld [vmem:[%s9603_s14 + $0x1b38] sm:$0xff]  ;;  %v1160_v6 = vld [vmem:[%s9603_s14 + $0x1b40] sm:$0xff] }
  0xf5   : > { %1157 = vst [vmem:[%s9608_s15 + $0xe20] sm:$0xff] %v1156_v4  ;;  %v1162_v7 = vld [vmem:[%s9603_s14 + $0x1b48] sm:$0xff]  ;;  %1159 = vst [vmem:[%s9608_s15 + $0xe28] sm:$0xff] %v1158_v5  ;;  %v1164_v8 = vld [vmem:[%s9603_s14 + $0x1c80] sm:$0xff] }
  0xf6   : > { %1161 = vst [vmem:[%s9608_s15 + $0xe30] sm:$0xff] %v1160_v6  ;;  %1163 = vst [vmem:[%s9608_s15 + $0xe38] sm:$0xff] %v1162_v7  ;;  %v1166_v9 = vld [vmem:[%s9603_s14 + $0x1c88] sm:$0xff]  ;;  %v1168_v10 = vld [vmem:[%s9603_s14 + $0x1c90] sm:$0xff] }
  0xf7   : > { %1165 = vst [vmem:[%s9608_s15 + $0xe40] sm:$0xff] %v1164_v8  ;;  %1167 = vst [vmem:[%s9608_s15 + $0xe48] sm:$0xff] %v1166_v9  ;;  %v1170_v11 = vld [vmem:[%s9603_s14 + $0x1c98] sm:$0xff]  ;;  %v1172_v12 = vld [vmem:[%s9603_s14 + $0x1ca0] sm:$0xff] }
  0xf8   : > { %1169 = vst [vmem:[%s9608_s15 + $0xe50] sm:$0xff] %v1168_v10  ;;  %v1174_v13 = vld [vmem:[%s9603_s14 + $0x1ca8] sm:$0xff]  ;;  %1171 = vst [vmem:[%s9608_s15 + $0xe58] sm:$0xff] %v1170_v11  ;;  %v1176_v14 = vld [vmem:[%s9603_s14 + $0x1cb0] sm:$0xff] }
  0xf9   : > { %1173 = vst [vmem:[%s9608_s15 + $0xe60] sm:$0xff] %v1172_v12  ;;  %1175 = vst [vmem:[%s9608_s15 + $0xe68] sm:$0xff] %v1174_v13  ;;  %v1178_v15 = vld [vmem:[%s9603_s14 + $0x1cb8] sm:$0xff]  ;;  %v1180_v16 = vld [vmem:[%s9603_s14 + $0x1cc0] sm:$0xff] }
  0xfa   : > { %1177 = vst [vmem:[%s9608_s15 + $0xe70] sm:$0xff] %v1176_v14  ;;  %1179 = vst [vmem:[%s9608_s15 + $0xe78] sm:$0xff] %v1178_v15  ;;  %v1182_v17 = vld [vmem:[%s9603_s14 + $0x1cc8] sm:$0xff]  ;;  %v1184_v18 = vld [vmem:[%s9603_s14 + $0x1cd0] sm:$0xff] }
  0xfb   : > { %1181 = vst [vmem:[%s9608_s15 + $0xe80] sm:$0xff] %v1180_v16  ;;  %v1186_v19 = vld [vmem:[%s9603_s14 + $0x1cd8] sm:$0xff]  ;;  %1183 = vst [vmem:[%s9608_s15 + $0xe88] sm:$0xff] %v1182_v17  ;;  %v1188_v20 = vld [vmem:[%s9603_s14 + $0x1ce0] sm:$0xff] }
  0xfc   : > { %1185 = vst [vmem:[%s9608_s15 + $0xe90] sm:$0xff] %v1184_v18  ;;  %1187 = vst [vmem:[%s9608_s15 + $0xe98] sm:$0xff] %v1186_v19  ;;  %v1190_v21 = vld [vmem:[%s9603_s14 + $0x1ce8] sm:$0xff]  ;;  %v1192_v22 = vld [vmem:[%s9603_s14 + $0x1cf0] sm:$0xff] }
  0xfd   : > { %1189 = vst [vmem:[%s9608_s15 + $0xea0] sm:$0xff] %v1188_v20  ;;  %1191 = vst [vmem:[%s9608_s15 + $0xea8] sm:$0xff] %v1190_v21  ;;  %v1194_v23 = vld [vmem:[%s9603_s14 + $0x1cf8] sm:$0xff]  ;;  %v1196_v24 = vld [vmem:[%s9603_s14 + $0x1d00] sm:$0xff] }
  0xfe   : > { %1193 = vst [vmem:[%s9608_s15 + $0xeb0] sm:$0xff] %v1192_v22  ;;  %v1198_v25 = vld [vmem:[%s9603_s14 + $0x1d08] sm:$0xff]  ;;  %1195 = vst [vmem:[%s9608_s15 + $0xeb8] sm:$0xff] %v1194_v23  ;;  %v1200_v26 = vld [vmem:[%s9603_s14 + $0x1d10] sm:$0xff] }
  0xff   : > { %1197 = vst [vmem:[%s9608_s15 + $0xec0] sm:$0xff] %v1196_v24  ;;  %1199 = vst [vmem:[%s9608_s15 + $0xec8] sm:$0xff] %v1198_v25  ;;  %v1202_v27 = vld [vmem:[%s9603_s14 + $0x1d18] sm:$0xff]  ;;  %v1204_v28 = vld [vmem:[%s9603_s14 + $0x1d20] sm:$0xff] }
 0x100   : > { %1201 = vst [vmem:[%s9608_s15 + $0xed0] sm:$0xff] %v1200_v26  ;;  %1203 = vst [vmem:[%s9608_s15 + $0xed8] sm:$0xff] %v1202_v27  ;;  %v1206_v29 = vld [vmem:[%s9603_s14 + $0x1d28] sm:$0xff]  ;;  %v1208_v30 = vld [vmem:[%s9603_s14 + $0x1d30] sm:$0xff] }
 0x101   : > { %1205 = vst [vmem:[%s9608_s15 + $0xee0] sm:$0xff] %v1204_v28  ;;  %v1210_v31 = vld [vmem:[%s9603_s14 + $0x1d38] sm:$0xff]  ;;  %1207 = vst [vmem:[%s9608_s15 + $0xee8] sm:$0xff] %v1206_v29  ;;  %v1212_v32 = vld [vmem:[%s9603_s14 + $0x1d40] sm:$0xff] }
 0x102   : > { %1209 = vst [vmem:[%s9608_s15 + $0xef0] sm:$0xff] %v1208_v30  ;;  %1211 = vst [vmem:[%s9608_s15 + $0xef8] sm:$0xff] %v1210_v31  ;;  %v1214_v33 = vld [vmem:[%s9603_s14 + $0x1d48] sm:$0xff]  ;;  %v1216_v34 = vld [vmem:[%s9603_s14 + $0x1d50] sm:$0xff] }
 0x103   : > { %1213 = vst [vmem:[%s9608_s15 + $0xf00] sm:$0xff] %v1212_v32  ;;  %1215 = vst [vmem:[%s9608_s15 + $0xf08] sm:$0xff] %v1214_v33  ;;  %v1218_v35 = vld [vmem:[%s9603_s14 + $0x1d58] sm:$0xff]  ;;  %v1220_v36 = vld [vmem:[%s9603_s14 + $0x1d60] sm:$0xff] }
 0x104   : > { %1217 = vst [vmem:[%s9608_s15 + $0xf10] sm:$0xff] %v1216_v34  ;;  %v1222_v37 = vld [vmem:[%s9603_s14 + $0x1d68] sm:$0xff]  ;;  %1219 = vst [vmem:[%s9608_s15 + $0xf18] sm:$0xff] %v1218_v35  ;;  %v1224_v38 = vld [vmem:[%s9603_s14 + $0x1d70] sm:$0xff] }
 0x105   : > { %1221 = vst [vmem:[%s9608_s15 + $0xf20] sm:$0xff] %v1220_v36  ;;  %1223 = vst [vmem:[%s9608_s15 + $0xf28] sm:$0xff] %v1222_v37  ;;  %v1226_v39 = vld [vmem:[%s9603_s14 + $0x1d78] sm:$0xff]  ;;  %v1228_v40 = vld [vmem:[%s9603_s14 + $0x1d80] sm:$0xff] }
 0x106   : > { %1225 = vst [vmem:[%s9608_s15 + $0xf30] sm:$0xff] %v1224_v38  ;;  %1227 = vst [vmem:[%s9608_s15 + $0xf38] sm:$0xff] %v1226_v39  ;;  %v1230_v41 = vld [vmem:[%s9603_s14 + $0x1d88] sm:$0xff]  ;;  %v1232_v42 = vld [vmem:[%s9603_s14 + $0x1d90] sm:$0xff] }
 0x107   : > { %1229 = vst [vmem:[%s9608_s15 + $0xf40] sm:$0xff] %v1228_v40  ;;  %v1234_v43 = vld [vmem:[%s9603_s14 + $0x1d98] sm:$0xff]  ;;  %1231 = vst [vmem:[%s9608_s15 + $0xf48] sm:$0xff] %v1230_v41  ;;  %v1236_v44 = vld [vmem:[%s9603_s14 + $0x1da0] sm:$0xff] }
 0x108   : > { %1233 = vst [vmem:[%s9608_s15 + $0xf50] sm:$0xff] %v1232_v42  ;;  %1235 = vst [vmem:[%s9608_s15 + $0xf58] sm:$0xff] %v1234_v43  ;;  %v1238_v45 = vld [vmem:[%s9603_s14 + $0x1da8] sm:$0xff]  ;;  %v1240_v46 = vld [vmem:[%s9603_s14 + $0x1ee0] sm:$0xff] }
 0x109   : > { %1237 = vst [vmem:[%s9608_s15 + $0xf60] sm:$0xff] %v1236_v44  ;;  %1239 = vst [vmem:[%s9608_s15 + $0xf68] sm:$0xff] %v1238_v45  ;;  %v1242_v47 = vld [vmem:[%s9603_s14 + $0x1ee8] sm:$0xff]  ;;  %v1244_v48 = vld [vmem:[%s9603_s14 + $0x1ef0] sm:$0xff] }
 0x10a   : > { %1241 = vst [vmem:[%s9608_s15 + $0xf70] sm:$0xff] %v1240_v46  ;;  %v1246_v49 = vld [vmem:[%s9603_s14 + $0x1ef8] sm:$0xff]  ;;  %1243 = vst [vmem:[%s9608_s15 + $0xf78] sm:$0xff] %v1242_v47  ;;  %v1248_v50 = vld [vmem:[%s9603_s14 + $0x1f00] sm:$0xff] }
 0x10b   : > { %1245 = vst [vmem:[%s9608_s15 + $0xf80] sm:$0xff] %v1244_v48  ;;  %1247 = vst [vmem:[%s9608_s15 + $0xf88] sm:$0xff] %v1246_v49  ;;  %v1250_v51 = vld [vmem:[%s9603_s14 + $0x1f08] sm:$0xff]  ;;  %v1252_v52 = vld [vmem:[%s9603_s14 + $0x1f10] sm:$0xff] }
 0x10c   : > { %1249 = vst [vmem:[%s9608_s15 + $0xf90] sm:$0xff] %v1248_v50  ;;  %1251 = vst [vmem:[%s9608_s15 + $0xf98] sm:$0xff] %v1250_v51  ;;  %v1254_v53 = vld [vmem:[%s9603_s14 + $0x1f18] sm:$0xff]  ;;  %v1256_v54 = vld [vmem:[%s9603_s14 + $0x1f20] sm:$0xff] }
 0x10d   : > { %1253 = vst [vmem:[%s9608_s15 + $0xfa0] sm:$0xff] %v1252_v52  ;;  %v1258_v55 = vld [vmem:[%s9603_s14 + $0x1f28] sm:$0xff]  ;;  %1255 = vst [vmem:[%s9608_s15 + $0xfa8] sm:$0xff] %v1254_v53  ;;  %v1260_v56 = vld [vmem:[%s9603_s14 + $0x1f30] sm:$0xff] }
 0x10e   : > { %1257 = vst [vmem:[%s9608_s15 + $0xfb0] sm:$0xff] %v1256_v54  ;;  %1259 = vst [vmem:[%s9608_s15 + $0xfb8] sm:$0xff] %v1258_v55  ;;  %v1262_v57 = vld [vmem:[%s9603_s14 + $0x1f38] sm:$0xff]  ;;  %v1264_v58 = vld [vmem:[%s9603_s14 + $0x1f40] sm:$0xff] }
 0x10f   : > { %1261 = vst [vmem:[%s9608_s15 + $0xfc0] sm:$0xff] %v1260_v56  ;;  %1263 = vst [vmem:[%s9608_s15 + $0xfc8] sm:$0xff] %v1262_v57  ;;  %v1266_v59 = vld [vmem:[%s9603_s14 + $0x1f48] sm:$0xff]  ;;  %v1268_v60 = vld [vmem:[%s9603_s14 + $0x1f50] sm:$0xff] }
 0x110   : > { %1265 = vst [vmem:[%s9608_s15 + $0xfd0] sm:$0xff] %v1264_v58  ;;  %v1270_v61 = vld [vmem:[%s9603_s14 + $0x1f58] sm:$0xff]  ;;  %1267 = vst [vmem:[%s9608_s15 + $0xfd8] sm:$0xff] %v1266_v59  ;;  %v1272_v62 = vld [vmem:[%s9603_s14 + $0x1f60] sm:$0xff] }
 0x111   : > { %1269 = vst [vmem:[%s9608_s15 + $0xfe0] sm:$0xff] %v1268_v60  ;;  %1271 = vst [vmem:[%s9608_s15 + $0xfe8] sm:$0xff] %v1270_v61  ;;  %v1274_v63 = vld [vmem:[%s9603_s14 + $0x1f68] sm:$0xff]  ;;  %v1276_v0 = vld [vmem:[%s9603_s14 + $0x1f70] sm:$0xff] }
 0x112   : > { %1273 = vst [vmem:[%s9608_s15 + $0xff0] sm:$0xff] %v1272_v62  ;;  %1275 = vst [vmem:[%s9608_s15 + $0xff8] sm:$0xff] %v1274_v63  ;;  %v1278_v1 = vld [vmem:[%s9603_s14 + $0x1f78] sm:$0xff]  ;;  %v1280_v2 = vld [vmem:[%s9603_s14 + $0x1f80] sm:$0xff] }
 0x113   : > { %1277 = vst [vmem:[%s9608_s15 + $0x1000] sm:$0xff] %v1276_v0  ;;  %v1282_v3 = vld [vmem:[%s9603_s14 + $0x1f88] sm:$0xff]  ;;  %1279 = vst [vmem:[%s9608_s15 + $0x1008] sm:$0xff] %v1278_v1  ;;  %v1284_v4 = vld [vmem:[%s9603_s14 + $0x1f90] sm:$0xff] }
 0x114   : > { %1281 = vst [vmem:[%s9608_s15 + $0x1010] sm:$0xff] %v1280_v2  ;;  %1283 = vst [vmem:[%s9608_s15 + $0x1018] sm:$0xff] %v1282_v3  ;;  %v1286_v5 = vld [vmem:[%s9603_s14 + $0x1f98] sm:$0xff]  ;;  %v1288_v6 = vld [vmem:[%s9603_s14 + $0x1fa0] sm:$0xff] }
 0x115   : > { %1285 = vst [vmem:[%s9608_s15 + $0x1020] sm:$0xff] %v1284_v4  ;;  %1287 = vst [vmem:[%s9608_s15 + $0x1028] sm:$0xff] %v1286_v5  ;;  %v1290_v7 = vld [vmem:[%s9603_s14 + $0x1fa8] sm:$0xff]  ;;  %v1292_v8 = vld [vmem:[%s9603_s14 + $0x1fb0] sm:$0xff] }
 0x116   : > { %1289 = vst [vmem:[%s9608_s15 + $0x1030] sm:$0xff] %v1288_v6  ;;  %v1294_v9 = vld [vmem:[%s9603_s14 + $0x1fb8] sm:$0xff]  ;;  %1291 = vst [vmem:[%s9608_s15 + $0x1038] sm:$0xff] %v1290_v7  ;;  %v1296_v10 = vld [vmem:[%s9603_s14 + $0x1fc0] sm:$0xff] }
 0x117   : > { %1293 = vst [vmem:[%s9608_s15 + $0x1040] sm:$0xff] %v1292_v8  ;;  %1295 = vst [vmem:[%s9608_s15 + $0x1048] sm:$0xff] %v1294_v9  ;;  %v1298_v11 = vld [vmem:[%s9603_s14 + $0x1fc8] sm:$0xff]  ;;  %v1300_v12 = vld [vmem:[%s9603_s14 + $0x1fd0] sm:$0xff] }
 0x118   : > { %1297 = vst [vmem:[%s9608_s15 + $0x1050] sm:$0xff] %v1296_v10  ;;  %1299 = vst [vmem:[%s9608_s15 + $0x1058] sm:$0xff] %v1298_v11  ;;  %v1302_v13 = vld [vmem:[%s9603_s14 + $0x1fd8] sm:$0xff]  ;;  %v1304_v14 = vld [vmem:[%s9603_s14 + $0x1fe0] sm:$0xff] }
 0x119   : > { %1301 = vst [vmem:[%s9608_s15 + $0x1060] sm:$0xff] %v1300_v12  ;;  %v1306_v15 = vld [vmem:[%s9603_s14 + $0x1fe8] sm:$0xff]  ;;  %1303 = vst [vmem:[%s9608_s15 + $0x1068] sm:$0xff] %v1302_v13  ;;  %v1308_v16 = vld [vmem:[%s9603_s14 + $0x1ff0] sm:$0xff] }
 0x11a   : > { %1305 = vst [vmem:[%s9608_s15 + $0x1070] sm:$0xff] %v1304_v14  ;;  %1307 = vst [vmem:[%s9608_s15 + $0x1078] sm:$0xff] %v1306_v15  ;;  %v1310_v17 = vld [vmem:[%s9603_s14 + $0x1ff8] sm:$0xff]  ;;  %v1312_v18 = vld [vmem:[%s9603_s14 + $0x2000] sm:$0xff] }
 0x11b   : > { %1309 = vst [vmem:[%s9608_s15 + $0x1080] sm:$0xff] %v1308_v16  ;;  %1311 = vst [vmem:[%s9608_s15 + $0x1088] sm:$0xff] %v1310_v17  ;;  %v1314_v19 = vld [vmem:[%s9603_s14 + $0x2008] sm:$0xff]  ;;  %v1316_v20 = vld [vmem:[%s9603_s14 + $0x2140] sm:$0xff] }
 0x11c   : > { %1313 = vst [vmem:[%s9608_s15 + $0x1090] sm:$0xff] %v1312_v18  ;;  %v1318_v21 = vld [vmem:[%s9603_s14 + $0x2148] sm:$0xff]  ;;  %1315 = vst [vmem:[%s9608_s15 + $0x1098] sm:$0xff] %v1314_v19  ;;  %v1320_v22 = vld [vmem:[%s9603_s14 + $0x2150] sm:$0xff] }
 0x11d   : > { %1317 = vst [vmem:[%s9608_s15 + $0x10a0] sm:$0xff] %v1316_v20  ;;  %1319 = vst [vmem:[%s9608_s15 + $0x10a8] sm:$0xff] %v1318_v21  ;;  %v1322_v23 = vld [vmem:[%s9603_s14 + $0x2158] sm:$0xff]  ;;  %v1324_v24 = vld [vmem:[%s9603_s14 + $0x2160] sm:$0xff] }
 0x11e   : > { %1321 = vst [vmem:[%s9608_s15 + $0x10b0] sm:$0xff] %v1320_v22  ;;  %1323 = vst [vmem:[%s9608_s15 + $0x10b8] sm:$0xff] %v1322_v23  ;;  %v1326_v25 = vld [vmem:[%s9603_s14 + $0x2168] sm:$0xff]  ;;  %v1328_v26 = vld [vmem:[%s9603_s14 + $0x2170] sm:$0xff] }
 0x11f   : > { %1325 = vst [vmem:[%s9608_s15 + $0x10c0] sm:$0xff] %v1324_v24  ;;  %v1330_v27 = vld [vmem:[%s9603_s14 + $0x2178] sm:$0xff]  ;;  %1327 = vst [vmem:[%s9608_s15 + $0x10c8] sm:$0xff] %v1326_v25  ;;  %v1332_v28 = vld [vmem:[%s9603_s14 + $0x2180] sm:$0xff] }
 0x120   : > { %1329 = vst [vmem:[%s9608_s15 + $0x10d0] sm:$0xff] %v1328_v26  ;;  %1331 = vst [vmem:[%s9608_s15 + $0x10d8] sm:$0xff] %v1330_v27  ;;  %v1334_v29 = vld [vmem:[%s9603_s14 + $0x2188] sm:$0xff]  ;;  %v1336_v30 = vld [vmem:[%s9603_s14 + $0x2190] sm:$0xff] }
 0x121   : > { %1333 = vst [vmem:[%s9608_s15 + $0x10e0] sm:$0xff] %v1332_v28  ;;  %1335 = vst [vmem:[%s9608_s15 + $0x10e8] sm:$0xff] %v1334_v29  ;;  %v1338_v31 = vld [vmem:[%s9603_s14 + $0x2198] sm:$0xff]  ;;  %v1340_v32 = vld [vmem:[%s9603_s14 + $0x21a0] sm:$0xff] }
 0x122   : > { %1337 = vst [vmem:[%s9608_s15 + $0x10f0] sm:$0xff] %v1336_v30  ;;  %v1342_v33 = vld [vmem:[%s9603_s14 + $0x21a8] sm:$0xff]  ;;  %1339 = vst [vmem:[%s9608_s15 + $0x10f8] sm:$0xff] %v1338_v31  ;;  %v1344_v34 = vld [vmem:[%s9603_s14 + $0x21b0] sm:$0xff] }
 0x123   : > { %1341 = vst [vmem:[%s9608_s15 + $0x1100] sm:$0xff] %v1340_v32  ;;  %1343 = vst [vmem:[%s9608_s15 + $0x1108] sm:$0xff] %v1342_v33  ;;  %v1346_v35 = vld [vmem:[%s9603_s14 + $0x21b8] sm:$0xff]  ;;  %v1348_v36 = vld [vmem:[%s9603_s14 + $0x21c0] sm:$0xff] }
 0x124   : > { %1345 = vst [vmem:[%s9608_s15 + $0x1110] sm:$0xff] %v1344_v34  ;;  %1347 = vst [vmem:[%s9608_s15 + $0x1118] sm:$0xff] %v1346_v35  ;;  %v1350_v37 = vld [vmem:[%s9603_s14 + $0x21c8] sm:$0xff]  ;;  %v1352_v38 = vld [vmem:[%s9603_s14 + $0x21d0] sm:$0xff] }
 0x125   : > { %1349 = vst [vmem:[%s9608_s15 + $0x1120] sm:$0xff] %v1348_v36  ;;  %v1354_v39 = vld [vmem:[%s9603_s14 + $0x21d8] sm:$0xff]  ;;  %1351 = vst [vmem:[%s9608_s15 + $0x1128] sm:$0xff] %v1350_v37  ;;  %v1356_v40 = vld [vmem:[%s9603_s14 + $0x21e0] sm:$0xff] }
 0x126   : > { %1353 = vst [vmem:[%s9608_s15 + $0x1130] sm:$0xff] %v1352_v38  ;;  %1355 = vst [vmem:[%s9608_s15 + $0x1138] sm:$0xff] %v1354_v39  ;;  %v1358_v41 = vld [vmem:[%s9603_s14 + $0x21e8] sm:$0xff]  ;;  %v1360_v42 = vld [vmem:[%s9603_s14 + $0x21f0] sm:$0xff] }
 0x127   : > { %1357 = vst [vmem:[%s9608_s15 + $0x1140] sm:$0xff] %v1356_v40  ;;  %1359 = vst [vmem:[%s9608_s15 + $0x1148] sm:$0xff] %v1358_v41  ;;  %v1362_v43 = vld [vmem:[%s9603_s14 + $0x21f8] sm:$0xff]  ;;  %v1364_v44 = vld [vmem:[%s9603_s14 + $0x2200] sm:$0xff] }
 0x128   : > { %1361 = vst [vmem:[%s9608_s15 + $0x1150] sm:$0xff] %v1360_v42  ;;  %v1366_v45 = vld [vmem:[%s9603_s14 + $0x2208] sm:$0xff]  ;;  %1363 = vst [vmem:[%s9608_s15 + $0x1158] sm:$0xff] %v1362_v43  ;;  %v1368_v46 = vld [vmem:[%s9603_s14 + $0x2210] sm:$0xff] }
 0x129   : > { %1365 = vst [vmem:[%s9608_s15 + $0x1160] sm:$0xff] %v1364_v44  ;;  %1367 = vst [vmem:[%s9608_s15 + $0x1168] sm:$0xff] %v1366_v45  ;;  %v1370_v47 = vld [vmem:[%s9603_s14 + $0x2218] sm:$0xff]  ;;  %v1372_v48 = vld [vmem:[%s9603_s14 + $0x2220] sm:$0xff] }
 0x12a   : > { %1369 = vst [vmem:[%s9608_s15 + $0x1170] sm:$0xff] %v1368_v46  ;;  %1371 = vst [vmem:[%s9608_s15 + $0x1178] sm:$0xff] %v1370_v47  ;;  %v1374_v49 = vld [vmem:[%s9603_s14 + $0x2228] sm:$0xff]  ;;  %v1376_v50 = vld [vmem:[%s9603_s14 + $0x2230] sm:$0xff] }
 0x12b   : > { %1373 = vst [vmem:[%s9608_s15 + $0x1180] sm:$0xff] %v1372_v48  ;;  %v1378_v51 = vld [vmem:[%s9603_s14 + $0x2238] sm:$0xff]  ;;  %1375 = vst [vmem:[%s9608_s15 + $0x1188] sm:$0xff] %v1374_v49  ;;  %v1380_v52 = vld [vmem:[%s9603_s14 + $0x2240] sm:$0xff] }
 0x12c   : > { %1377 = vst [vmem:[%s9608_s15 + $0x1190] sm:$0xff] %v1376_v50  ;;  %1379 = vst [vmem:[%s9608_s15 + $0x1198] sm:$0xff] %v1378_v51  ;;  %v1382_v53 = vld [vmem:[%s9603_s14 + $0x2248] sm:$0xff]  ;;  %v1384_v54 = vld [vmem:[%s9603_s14 + $0x2250] sm:$0xff] }
 0x12d   : > { %1381 = vst [vmem:[%s9608_s15 + $0x11a0] sm:$0xff] %v1380_v52  ;;  %1383 = vst [vmem:[%s9608_s15 + $0x11a8] sm:$0xff] %v1382_v53  ;;  %v1386_v55 = vld [vmem:[%s9603_s14 + $0x2258] sm:$0xff]  ;;  %v1388_v56 = vld [vmem:[%s9603_s14 + $0x2260] sm:$0xff] }
 0x12e   : > { %1385 = vst [vmem:[%s9608_s15 + $0x11b0] sm:$0xff] %v1384_v54  ;;  %v1390_v57 = vld [vmem:[%s9603_s14 + $0x2268] sm:$0xff]  ;;  %1387 = vst [vmem:[%s9608_s15 + $0x11b8] sm:$0xff] %v1386_v55  ;;  %v1392_v58 = vld [vmem:[%s9603_s14 + $0x23a0] sm:$0xff] }
 0x12f   : > { %1389 = vst [vmem:[%s9608_s15 + $0x11c0] sm:$0xff] %v1388_v56  ;;  %1391 = vst [vmem:[%s9608_s15 + $0x11c8] sm:$0xff] %v1390_v57  ;;  %v1394_v59 = vld [vmem:[%s9603_s14 + $0x23a8] sm:$0xff]  ;;  %v1396_v60 = vld [vmem:[%s9603_s14 + $0x23b0] sm:$0xff] }
 0x130   : > { %1393 = vst [vmem:[%s9608_s15 + $0x11d0] sm:$0xff] %v1392_v58  ;;  %1395 = vst [vmem:[%s9608_s15 + $0x11d8] sm:$0xff] %v1394_v59  ;;  %v1398_v61 = vld [vmem:[%s9603_s14 + $0x23b8] sm:$0xff]  ;;  %v1400_v62 = vld [vmem:[%s9603_s14 + $0x23c0] sm:$0xff] }
 0x131   : > { %1397 = vst [vmem:[%s9608_s15 + $0x11e0] sm:$0xff] %v1396_v60  ;;  %v1402_v63 = vld [vmem:[%s9603_s14 + $0x23c8] sm:$0xff]  ;;  %1399 = vst [vmem:[%s9608_s15 + $0x11e8] sm:$0xff] %v1398_v61  ;;  %v1404_v0 = vld [vmem:[%s9603_s14 + $0x23d0] sm:$0xff] }
 0x132   : > { %1401 = vst [vmem:[%s9608_s15 + $0x11f0] sm:$0xff] %v1400_v62  ;;  %1403 = vst [vmem:[%s9608_s15 + $0x11f8] sm:$0xff] %v1402_v63  ;;  %v1406_v1 = vld [vmem:[%s9603_s14 + $0x23d8] sm:$0xff]  ;;  %v1408_v2 = vld [vmem:[%s9603_s14 + $0x23e0] sm:$0xff] }
 0x133   : > { %1405 = vst [vmem:[%s9608_s15 + $0x1200] sm:$0xff] %v1404_v0  ;;  %1407 = vst [vmem:[%s9608_s15 + $0x1208] sm:$0xff] %v1406_v1  ;;  %v1410_v3 = vld [vmem:[%s9603_s14 + $0x23e8] sm:$0xff]  ;;  %v1412_v4 = vld [vmem:[%s9603_s14 + $0x23f0] sm:$0xff] }
 0x134   : > { %1409 = vst [vmem:[%s9608_s15 + $0x1210] sm:$0xff] %v1408_v2  ;;  %v1414_v5 = vld [vmem:[%s9603_s14 + $0x23f8] sm:$0xff]  ;;  %1411 = vst [vmem:[%s9608_s15 + $0x1218] sm:$0xff] %v1410_v3  ;;  %v1416_v6 = vld [vmem:[%s9603_s14 + $0x2400] sm:$0xff] }
 0x135   : > { %1413 = vst [vmem:[%s9608_s15 + $0x1220] sm:$0xff] %v1412_v4  ;;  %1415 = vst [vmem:[%s9608_s15 + $0x1228] sm:$0xff] %v1414_v5  ;;  %v1418_v7 = vld [vmem:[%s9603_s14 + $0x2408] sm:$0xff]  ;;  %v1420_v8 = vld [vmem:[%s9603_s14 + $0x2410] sm:$0xff] }
 0x136   : > { %1417 = vst [vmem:[%s9608_s15 + $0x1230] sm:$0xff] %v1416_v6  ;;  %1419 = vst [vmem:[%s9608_s15 + $0x1238] sm:$0xff] %v1418_v7  ;;  %v1422_v9 = vld [vmem:[%s9603_s14 + $0x2418] sm:$0xff]  ;;  %v1424_v10 = vld [vmem:[%s9603_s14 + $0x2420] sm:$0xff] }
 0x137   : > { %1421 = vst [vmem:[%s9608_s15 + $0x1240] sm:$0xff] %v1420_v8  ;;  %v1426_v11 = vld [vmem:[%s9603_s14 + $0x2428] sm:$0xff]  ;;  %1423 = vst [vmem:[%s9608_s15 + $0x1248] sm:$0xff] %v1422_v9  ;;  %v1428_v12 = vld [vmem:[%s9603_s14 + $0x2430] sm:$0xff] }
 0x138   : > { %1425 = vst [vmem:[%s9608_s15 + $0x1250] sm:$0xff] %v1424_v10  ;;  %1427 = vst [vmem:[%s9608_s15 + $0x1258] sm:$0xff] %v1426_v11  ;;  %v1430_v13 = vld [vmem:[%s9603_s14 + $0x2438] sm:$0xff]  ;;  %v1432_v14 = vld [vmem:[%s9603_s14 + $0x2440] sm:$0xff] }
 0x139   : > { %1429 = vst [vmem:[%s9608_s15 + $0x1260] sm:$0xff] %v1428_v12  ;;  %1431 = vst [vmem:[%s9608_s15 + $0x1268] sm:$0xff] %v1430_v13  ;;  %v1434_v15 = vld [vmem:[%s9603_s14 + $0x2448] sm:$0xff]  ;;  %v1436_v16 = vld [vmem:[%s9603_s14 + $0x2450] sm:$0xff] }
 0x13a   : > { %1433 = vst [vmem:[%s9608_s15 + $0x1270] sm:$0xff] %v1432_v14  ;;  %v1438_v17 = vld [vmem:[%s9603_s14 + $0x2458] sm:$0xff]  ;;  %1435 = vst [vmem:[%s9608_s15 + $0x1278] sm:$0xff] %v1434_v15  ;;  %v1440_v18 = vld [vmem:[%s9603_s14 + $0x2460] sm:$0xff] }
 0x13b   : > { %1437 = vst [vmem:[%s9608_s15 + $0x1280] sm:$0xff] %v1436_v16  ;;  %1439 = vst [vmem:[%s9608_s15 + $0x1288] sm:$0xff] %v1438_v17  ;;  %v1442_v19 = vld [vmem:[%s9603_s14 + $0x2468] sm:$0xff]  ;;  %v1444_v20 = vld [vmem:[%s9603_s14 + $0x2470] sm:$0xff] }
 0x13c   : > { %1441 = vst [vmem:[%s9608_s15 + $0x1290] sm:$0xff] %v1440_v18  ;;  %1443 = vst [vmem:[%s9608_s15 + $0x1298] sm:$0xff] %v1442_v19  ;;  %v1446_v21 = vld [vmem:[%s9603_s14 + $0x2478] sm:$0xff]  ;;  %v1448_v22 = vld [vmem:[%s9603_s14 + $0x2480] sm:$0xff] }
 0x13d   : > { %1445 = vst [vmem:[%s9608_s15 + $0x12a0] sm:$0xff] %v1444_v20  ;;  %v1450_v23 = vld [vmem:[%s9603_s14 + $0x2488] sm:$0xff]  ;;  %1447 = vst [vmem:[%s9608_s15 + $0x12a8] sm:$0xff] %v1446_v21  ;;  %v1452_v24 = vld [vmem:[%s9603_s14 + $0x2490] sm:$0xff] }
 0x13e   : > { %1449 = vst [vmem:[%s9608_s15 + $0x12b0] sm:$0xff] %v1448_v22  ;;  %1451 = vst [vmem:[%s9608_s15 + $0x12b8] sm:$0xff] %v1450_v23  ;;  %v1454_v25 = vld [vmem:[%s9603_s14 + $0x2498] sm:$0xff]  ;;  %v1456_v26 = vld [vmem:[%s9603_s14 + $0x24a0] sm:$0xff] }
 0x13f   : > { %1453 = vst [vmem:[%s9608_s15 + $0x12c0] sm:$0xff] %v1452_v24  ;;  %1455 = vst [vmem:[%s9608_s15 + $0x12c8] sm:$0xff] %v1454_v25  ;;  %v1458_v27 = vld [vmem:[%s9603_s14 + $0x24a8] sm:$0xff]  ;;  %v1460_v28 = vld [vmem:[%s9603_s14 + $0x24b0] sm:$0xff] }
 0x140   : > { %1457 = vst [vmem:[%s9608_s15 + $0x12d0] sm:$0xff] %v1456_v26  ;;  %v1462_v29 = vld [vmem:[%s9603_s14 + $0x24b8] sm:$0xff]  ;;  %1459 = vst [vmem:[%s9608_s15 + $0x12d8] sm:$0xff] %v1458_v27  ;;  %v1464_v30 = vld [vmem:[%s9603_s14 + $0x24c0] sm:$0xff] }
 0x141   : > { %1461 = vst [vmem:[%s9608_s15 + $0x12e0] sm:$0xff] %v1460_v28  ;;  %1463 = vst [vmem:[%s9608_s15 + $0x12e8] sm:$0xff] %v1462_v29  ;;  %v1466_v31 = vld [vmem:[%s9603_s14 + $0x24c8] sm:$0xff] }
 0x142   : > { %1465 = vst [vmem:[%s9608_s15 + $0x12f0] sm:$0xff] %v1464_v30  ;;  %1467 = vst [vmem:[%s9608_s15 + $0x12f8] sm:$0xff] %v1466_v31 }
 0x143 PF: > { %p7869_p5 = scmp.ge.s32.totalorder %s9522_s26, 1  ;;  %p1480_p6 = scmp.lt.s32.totalorder %s9522_s26, 3 }
 0x145   : > { %p1481_p7 = pnand %p7869_p5, %p1480_p6 }
 0x146   : > { %v1539_v32 = vld [vmem:[%s11909_s3] sm:$0xff] (!%p1481_p7)  ;;  %v1540_v33 = vld [vmem:[%s11909_s3 + $0x8] sm:$0xff] (!%p1481_p7)  ;;  %v1541_v34 = vld [vmem:[%s11909_s3 + $0x10] sm:$0xff] (!%p1481_p7)  ;;  %v9524_v35 = vmov (!%p1481_p7), 0.0|0.0   ;;  %vm9525_vm0 = vmmov (!%p1481_p7), 0   ;;  %v9526_v38 = vmov (!%p1481_p7), 0.0  }
 0x147   : > { %1484 = sbr.rel (%p1481_p7) target bundleno = 1378 (0x562), region = 67  ;;  %8533 = vmatprep.subr.bf16.mxu0 (!%p1481_p7), %v9524_v35  ;;  %v8534_v36 = vpack.c.bf16 (!%p1481_p7), %v1540_v33, %v1539_v32  ;;  %v1542_v37 = vld [vmem:[%s11909_s3 + $0x18] sm:$0xff] (!%p1481_p7)  ;;  %8530 = vmatprep.mubr.msk.f32.mxu0 (!%p1481_p7), %vm9525_vm0, %v9526_v38  ;;  %s1487_s29 = sand.u32 (!%p1481_p7), 1, %s9514_s24   ;;  %v1543_v40 = vld [vmem:[%s11909_s3 + $0x20] sm:$0xff] (!%p1481_p7)  ;;  %v1544_v41 = vld [vmem:[%s11909_s3 + $0x28] sm:$0xff] (!%p1481_p7) }
 0x148   : > { %s8558_s30 = smul.u32 (!%p1481_p7), 4864, %s1487_s29  ;;  %v8537_v39 = vpack.c.bf16 (!%p1481_p7), %v1542_v37, %v1541_v34  ;;  %v8540_v42 = vpack.c.bf16 (!%p1481_p7), %v1544_v41, %v1543_v40  ;;  %v1545_v44 = vld [vmem:[%s11909_s3 + $0x30] sm:$0xff] (!%p1481_p7)  ;;  %v1546_v45 = vld [vmem:[%s11909_s3 + $0x38] sm:$0xff] (!%p1481_p7)  ;;  %v1547_v48 = vld [vmem:[%s11909_s3 + $0x40] sm:$0xff] (!%p1481_p7)  ;;  %v9527_v34 = vmov (!%p1481_p7), 0  }
 0x149   : > { %8535 = vmatpush3.bf16.msra.mxu0 (!%p1481_p7), %v8534_v36  ;;  %v8543_v49 = vpack.c.bf16 (!%p1481_p7), %v1546_v45, %v1545_v44  ;;  %v1548_v50 = vld [vmem:[%s11909_s3 + $0x48] sm:$0xff] (!%p1481_p7)  ;;  %v1549_v56 = vld [vmem:[%s11909_s3 + $0x50] sm:$0xff] (!%p1481_p7)  ;;  %v1550_v57 = vld [vmem:[%s11909_s3 + $0x58] sm:$0xff] (!%p1481_p7)  ;;  %5708 = vmatprep.mubr.bf16.mxu1 (!%p1481_p7), %v9527_v34  ;;  %s1522_s29 = smul.u32 (!%p1481_p7), 76, %s7864_s27 }
 0x14a   : > { %8536 = vmatprep.subr.bf16.mxu0 (!%p1481_p7), %v9524_v35  ;;  %s10846_s13 = scalar_lea.vmem (!%p1481_p7), [#allocation2], %s8558_s30  ;;  %v8546_v54 = vpack.c.bf16 (!%p1481_p7), %v1548_v50, %v1547_v48  ;;  %v1533_v58 = vld [vmem:[%s11906_s0] sm:$0x1] (!%p1481_p7)  ;;  %v8549_v61 = vpack.c.bf16 (!%p1481_p7), %v1550_v57, %v1549_v56  ;;  %v1552_v0 = vld [vmem:[%s11909_s3 + $0x68] sm:$0xff] (!%p1481_p7)  ;;  %v1553_v6 = vld [vmem:[%s11909_s3 + $0x70] sm:$0xff] (!%p1481_p7) }
 0x14b   : > { %v8588_v43 = vld [vmem:[%s10846_s13 + $0x4] ss:$304 sps:$4 sm:$0xff] (!%p1481_p7)   ;;  %v8593_v46 = vld [vmem:[%s10846_s13] ss:$304 sps:$4 sm:$0xff] (!%p1481_p7)   ;;  %v1554_v7 = vld [vmem:[%s11909_s3 + $0x78] sm:$0xff] (!%p1481_p7)  ;;  %p1523_p8 = scmp.lt.s32.totalorder (!%p1481_p7), %s1522_s29, 151 }
 0x14c   : > { %5676 = vmatprep.subr.bf16.mxu1 (!%p1481_p7), %v8588_v43  ;;  %v8594_v47 = vld [vmem:[%s10846_s13 + $0x264] ss:$304 sps:$4 sm:$0xff] (!%p1481_p7)   ;;  %v8599_v51 = vld [vmem:[%s10846_s13 + $0x260] ss:$304 sps:$4 sm:$0xff] (!%p1481_p7)   ;;  %v8592_v11 = vld [vmem:[%s10846_s13 + $0xc] ss:$304 sps:$4 sm:$0xff] (!%p1481_p7)   ;;  %v8555_v12 = vpack.c.bf16 (!%p1481_p7), %v1554_v7, %v1553_v6 }
 0x14d   : > { %8538 = vmatpush3.bf16.msra.mxu0 (!%p1481_p7), %v8537_v39  ;;  %5677 = vmatpush1.bf16.msra.mxu1 (!%p1481_p7), %v8593_v46  ;;  %v8600_v52 = vld [vmem:[%s10846_s13 + $0x4c4] ss:$304 sps:$4 sm:$0xff] (!%p1481_p7)   ;;  %v8605_v53 = vld [vmem:[%s10846_s13 + $0x4c0] ss:$304 sps:$4 sm:$0xff] (!%p1481_p7)   ;;  %v8590_v14 = vld [vmem:[%s10846_s13 + $0x8] ss:$304 sps:$4 sm:$0xff] (!%p1481_p7)  }
 0x14e   : > { %8539 = vmatprep.subr.bf16.mxu0 %v9524_v35  ;;  %5678 = vmatprep.subr.bf16.mxu1 %v8594_v47  ;;  %v8606_v55 = vld [vmem:[%s10846_s13 + $0x724] ss:$304 sps:$4 sm:$0xff]   ;;  %v8611_v60 = vld [vmem:[%s10846_s13 + $0x720] ss:$304 sps:$4 sm:$0xff]   ;;  %v8598_v16 = vld [vmem:[%s10846_s13 + $0x26c] ss:$304 sps:$4 sm:$0xff]  }
 0x14f   : > { %v1551_v59 = vld [vmem:[%s11909_s3 + $0x60] sm:$0xff]  ;;  %v8596_v17 = vld [vmem:[%s10846_s13 + $0x268] ss:$304 sps:$4 sm:$0xff]   ;;  %v8604_v18 = vld [vmem:[%s10846_s13 + $0x4cc] ss:$304 sps:$4 sm:$0xff]   ;;  %s11918_s29 = smov (!%p1523_p8, %s1522_s29), 151 }
 0x150   : > { %v1534_v62 = vld [vmem:[%s11907_s1] sm:$0x1]  ;;  %v8612_v63 = vld [vmem:[%s10846_s13 + $0x984] ss:$304 sps:$4 sm:$0xff]   ;;  %v8552_v4 = vpack.c.bf16 %v1552_v0, %v1551_v59  ;;  %v8602_v19 = vld [vmem:[%s10846_s13 + $0x4c8] ss:$304 sps:$4 sm:$0xff]   ;;  %s11181_s30 = scalar_lea.vmem %s11912_s6, %s11918_s29  ;;  %s11302_s11 = scalar_lea.vmem %s11913_s7, %s11918_s29 }
 0x151   : > { %8541 = vmatpush3.bf16.msra.mxu0 %v8540_v42  ;;  %5679 = vmatpush1.bf16.msra.mxu1 %v8599_v51  ;;  %v1536_v1 = vld [vmem:[%s11908_s2] sm:$0x1]  ;;  %v1535_v2 = vmul.f32 %v1534_v62, %v1533_v58  ;;  %v8618_v5 = vld [vmem:[%s10846_s13 + $0xbe4] ss:$304 sps:$4 sm:$0xff]   ;;  %v8610_v20 = vld [vmem:[%s10846_s13 + $0x72c] ss:$304 sps:$4 sm:$0xff]  }
 0x152   : > { %8542 = vmatprep.subr.bf16.mxu0 %v9524_v35  ;;  %5680 = vmatprep.subr.bf16.mxu1 %v8600_v52  ;;  %v8617_v3 = vld [vmem:[%s10846_s13 + $0x980] ss:$304 sps:$4 sm:$0xff]   ;;  %v8624_v9 = vld [vmem:[%s10846_s13 + $0xe44] ss:$304 sps:$4 sm:$0xff]   ;;  %v8608_v21 = vld [vmem:[%s10846_s13 + $0x728] ss:$304 sps:$4 sm:$0xff]  }
 0x153   : > { %v8623_v8 = vld [vmem:[%s10846_s13 + $0xbe0] ss:$304 sps:$4 sm:$0xff]   ;;  %v1537_v10 = vadd.f32 %v1536_v1, %v1535_v2  ;;  %v8616_v22 = vld [vmem:[%s10846_s13 + $0x98c] ss:$304 sps:$4 sm:$0xff]   ;;  %v8614_v23 = vld [vmem:[%s10846_s13 + $0x988] ss:$304 sps:$4 sm:$0xff]  }
 0x154   : > { %v8629_v13 = vld [vmem:[%s10846_s13 + $0xe40] ss:$304 sps:$4 sm:$0xff]   ;;  %v8622_v24 = vld [vmem:[%s10846_s13 + $0xbec] ss:$304 sps:$4 sm:$0xff]   ;;  %v8620_v25 = vld [vmem:[%s10846_s13 + $0xbe8] ss:$304 sps:$4 sm:$0xff]  }
 0x155   : > { %8544 = vmatpush3.bf16.msra.mxu0 %v8543_v49  ;;  %5681 = vmatpush1.bf16.msra.mxu1 %v8605_v53  ;;  %v1538_v15 = vmax.f32 %v1537_v10, 0.0  ;;  %v8628_v26 = vld [vmem:[%s10846_s13 + $0xe4c] ss:$304 sps:$4 sm:$0xff]   ;;  %v8626_v27 = vld [vmem:[%s10846_s13 + $0xe48] ss:$304 sps:$4 sm:$0xff]  }
 0x156   : > { %8545 = vmatprep.subr.bf16.mxu0 %v9524_v35  ;;  %5682 = vmatprep.subr.bf16.mxu1 %v8606_v55  ;;  %v8630_v28 = vld [vmem:[%s10846_s13 + $0x10a4] ss:$304 sps:$4 sm:$0xff]   ;;  %v8634_v29 = vld [vmem:[%s10846_s13 + $0x10ac] ss:$304 sps:$4 sm:$0xff]   ;;  %v8632_v30 = vld [vmem:[%s10846_s13 + $0x10a8] ss:$304 sps:$4 sm:$0xff]  }
 0x157   : > { %v8635_v31 = vld [vmem:[%s10846_s13 + $0x10a0] ss:$304 sps:$4 sm:$0xff]   ;;  %v8638_v32 = vld [vmem:[%s10846_s13 + $0x14] ss:$304 sps:$4 sm:$0xff]   ;;  %v8641_v33 = vld [vmem:[%s10846_s13 + $0x1c] ss:$304 sps:$4 sm:$0xff]  }
 0x158   : > { %v8636_v39 = vld [vmem:[%s10846_s13 + $0x10] ss:$304 sps:$4 sm:$0xff]   ;;  %v8639_v40 = vld [vmem:[%s10846_s13 + $0x18] ss:$304 sps:$4 sm:$0xff]   ;;  %v8644_v43 = vld [vmem:[%s10846_s13 + $0x274] ss:$304 sps:$4 sm:$0xff]  }
 0x159   : > { %8547 = vmatpush3.bf16.msra.mxu0 %v8546_v54  ;;  %5683 = vmatpush1.bf16.msra.mxu1 %v8611_v60  ;;  %v8647_v44 = vld [vmem:[%s10846_s13 + $0x27c] ss:$304 sps:$4 sm:$0xff]   ;;  %v8642_v45 = vld [vmem:[%s10846_s13 + $0x270] ss:$304 sps:$4 sm:$0xff]   ;;  %v8645_v46 = vld [vmem:[%s10846_s13 + $0x278] ss:$304 sps:$4 sm:$0xff]  }
 0x15a   : > { %8548 = vmatprep.subr.bf16.mxu0 %v9524_v35  ;;  %5684 = vmatprep.subr.bf16.mxu1 %v8612_v63  ;;  %v8650_v47 = vld [vmem:[%s10846_s13 + $0x4d4] ss:$304 sps:$4 sm:$0xff]   ;;  %v8653_v48 = vld [vmem:[%s10846_s13 + $0x4dc] ss:$304 sps:$4 sm:$0xff]   ;;  %v8648_v49 = vld [vmem:[%s10846_s13 + $0x4d0] ss:$304 sps:$4 sm:$0xff]  }
 0x15b   : > { %v8651_v50 = vld [vmem:[%s10846_s13 + $0x4d8] ss:$304 sps:$4 sm:$0xff]   ;;  %v8656_v51 = vld [vmem:[%s10846_s13 + $0x734] ss:$304 sps:$4 sm:$0xff]   ;;  %v8659_v52 = vld [vmem:[%s10846_s13 + $0x73c] ss:$304 sps:$4 sm:$0xff]  }
 0x15c   : > { %v8654_v53 = vld [vmem:[%s10846_s13 + $0x730] ss:$304 sps:$4 sm:$0xff]   ;;  %v8657_v54 = vld [vmem:[%s10846_s13 + $0x738] ss:$304 sps:$4 sm:$0xff]   ;;  %v8662_v55 = vld [vmem:[%s10846_s13 + $0x994] ss:$304 sps:$4 sm:$0xff]  }
 0x15d   : > { %8550 = vmatpush3.bf16.msra.mxu0 %v8549_v61  ;;  %5685 = vmatpush1.bf16.msra.mxu1 %v8617_v3  ;;  %v8665_v56 = vld [vmem:[%s10846_s13 + $0x99c] ss:$304 sps:$4 sm:$0xff]   ;;  %v8660_v57 = vld [vmem:[%s10846_s13 + $0x990] ss:$304 sps:$4 sm:$0xff]   ;;  %v8663_v58 = vld [vmem:[%s10846_s13 + $0x998] ss:$304 sps:$4 sm:$0xff]  }
 0x15e   : > { %8551 = vmatprep.subr.bf16.mxu0 %v9524_v35  ;;  %5686 = vmatprep.subr.bf16.mxu1 %v8618_v5  ;;  %v8668_v59 = vld [vmem:[%s10846_s13 + $0xbf4] ss:$304 sps:$4 sm:$0xff]   ;;  %v8671_v60 = vld [vmem:[%s10846_s13 + $0xbfc] ss:$304 sps:$4 sm:$0xff]   ;;  %v8666_v61 = vld [vmem:[%s10846_s13 + $0xbf0] ss:$304 sps:$4 sm:$0xff]  }
 0x15f   : > { %v8669_v62 = vld [vmem:[%s10846_s13 + $0xbf8] ss:$304 sps:$4 sm:$0xff]   ;;  %v8674_v63 = vld [vmem:[%s10846_s13 + $0xe54] ss:$304 sps:$4 sm:$0xff]   ;;  %v8677_v0 = vld [vmem:[%s10846_s13 + $0xe5c] ss:$304 sps:$4 sm:$0xff]  }
 0x160   : > { %v8672_v1 = vld [vmem:[%s10846_s13 + $0xe50] ss:$304 sps:$4 sm:$0xff]   ;;  %v8675_v2 = vld [vmem:[%s10846_s13 + $0xe58] ss:$304 sps:$4 sm:$0xff]   ;;  %v8680_v3 = vld [vmem:[%s10846_s13 + $0x10b4] ss:$304 sps:$4 sm:$0xff]  }
 0x161   : > { %8553 = vmatpush3.bf16.msra.mxu0 %v8552_v4  ;;  %5687 = vmatpush1.bf16.msra.mxu1 %v8623_v8  ;;  %v8683_v4 = vld [vmem:[%s10846_s13 + $0x10bc] ss:$304 sps:$4 sm:$0xff]   ;;  %v8678_v5 = vld [vmem:[%s10846_s13 + $0x10b0] ss:$304 sps:$4 sm:$0xff]   ;;  %v8681_v6 = vld [vmem:[%s10846_s13 + $0x10b8] ss:$304 sps:$4 sm:$0xff]  }
 0x162   : > { %8554 = vmatprep.subr.bf16.mxu0 %v9524_v35  ;;  %5688 = vmatprep.subr.bf16.mxu1 %v8624_v9  ;;  %v1555_v35 = vld [vmem:[%s11910_s4] sm:$0x1]  ;;  %v8686_v7 = vld [vmem:[%s10846_s13 + $0x24] ss:$304 sps:$4 sm:$0xff]   ;;  %v8689_v8 = vld [vmem:[%s10846_s13 + $0x2c] ss:$304 sps:$4 sm:$0xff]  }
 0x163   : > { %v8684_v9 = vld [vmem:[%s10846_s13 + $0x20] ss:$304 sps:$4 sm:$0xff]   ;;  %v8687_v10 = vld [vmem:[%s10846_s13 + $0x28] ss:$304 sps:$4 sm:$0xff]  }
 0x165   : > { %8556 = vmatpush3.bf16.msra.mxu0 %v8555_v12  ;;  %5689 = vmatpush1.bf16.msra.mxu1 %v8629_v13  ;;  %v8695_v12 = vld [vmem:[%s10846_s13 + $0x28c] ss:$304 sps:$4 sm:$0xff]   ;;  %v8690_v13 = vld [vmem:[%s10846_s13 + $0x280] ss:$304 sps:$4 sm:$0xff]  }
 0x166   : > { %5717 = vmatprep.subr.bf16.mxu0 %v8592_v11  ;;  %5690 = vmatprep.subr.bf16.mxu1 %v8630_v28  ;;  %v8692_v11 = vld [vmem:[%s10846_s13 + $0x284] ss:$304 sps:$4 sm:$0xff]   ;;  %v8719_v28 = vld [vmem:[%s10846_s13 + $0xc0c] ss:$304 sps:$4 sm:$0xff]  }
 0x168   : > { %8531 = vmatmul.mubr.f32.vlgmr.msra.gmra.mrb[0].mxu0 %v1538_v15  ;;  %v8698_v15 = vld [vmem:[%s10846_s13 + $0x4e4] ss:$304 sps:$4 sm:$0xff]  }
 0x169   : > { %5718 = vmatpush1.bf16.msra.mxu0 %v8590_v14  ;;  %5691 = vmatpush1.bf16.msra.mxu1 %v8635_v31  ;;  %v8693_v14 = vld [vmem:[%s10846_s13 + $0x288] ss:$304 sps:$4 sm:$0xff]   ;;  %v8722_v31 = vld [vmem:[%s10846_s13 + $0xe64] ss:$304 sps:$4 sm:$0xff]  }
 0x16a   : > { %5719 = vmatprep.subr.bf16.mxu0 %v8598_v16  ;;  %5749 = vmatprep.mubr.bf16.mxu0 %v9527_v34  ;;  %v8701_v16 = vld [vmem:[%s10846_s13 + $0x4ec] ss:$304 sps:$4 sm:$0xff]  }
 0x16b   : > { %5758 = vmatprep.subr.bf16.mxu1 %v8638_v32  ;;  %v8725_v32 = vld [vmem:[%s10846_s13 + $0xe6c] ss:$304 sps:$4 sm:$0xff]  }
 0x16d   : > { %5720 = vmatpush1.bf16.msra.mxu0 %v8596_v17  ;;  %v8696_v17 = vld [vmem:[%s10846_s13 + $0x4e0] ss:$304 sps:$4 sm:$0xff]  }
 0x16e   : > { %5721 = vmatprep.subr.bf16.mxu0 %v8604_v18  ;;  %v8699_v18 = vld [vmem:[%s10846_s13 + $0x4e8] ss:$304 sps:$4 sm:$0xff]  }
 0x171   : > { %5722 = vmatpush1.bf16.msra.mxu0 %v8602_v19  ;;  %v8704_v19 = vld [vmem:[%s10846_s13 + $0x744] ss:$304 sps:$4 sm:$0xff]  }
 0x172   : > { %5723 = vmatprep.subr.bf16.mxu0 %v8610_v20  ;;  %v8707_v20 = vld [vmem:[%s10846_s13 + $0x74c] ss:$304 sps:$4 sm:$0xff]  }
 0x175   : > { %5724 = vmatpush1.bf16.msra.mxu0 %v8608_v21  ;;  %v8702_v21 = vld [vmem:[%s10846_s13 + $0x740] ss:$304 sps:$4 sm:$0xff]  }
 0x176   : > { %5725 = vmatprep.subr.bf16.mxu0 %v8616_v22  ;;  %v8705_v22 = vld [vmem:[%s10846_s13 + $0x748] ss:$304 sps:$4 sm:$0xff]  }
 0x179   : > { %5726 = vmatpush1.bf16.msra.mxu0 %v8614_v23  ;;  %v8710_v23 = vld [vmem:[%s10846_s13 + $0x9a4] ss:$304 sps:$4 sm:$0xff]  }
 0x17a   : > { %5727 = vmatprep.subr.bf16.mxu0 %v8622_v24  ;;  %v8713_v24 = vld [vmem:[%s10846_s13 + $0x9ac] ss:$304 sps:$4 sm:$0xff]  }
 0x17d   : > { %5728 = vmatpush1.bf16.msra.mxu0 %v8620_v25  ;;  %v8708_v25 = vld [vmem:[%s10846_s13 + $0x9a0] ss:$304 sps:$4 sm:$0xff]  }
 0x17e   : > { %5729 = vmatprep.subr.bf16.mxu0 %v8628_v26  ;;  %v8711_v26 = vld [vmem:[%s10846_s13 + $0x9a8] ss:$304 sps:$4 sm:$0xff]  }
 0x181   : > { %5730 = vmatpush1.bf16.msra.mxu0 %v8626_v27  ;;  %v8716_v27 = vld [vmem:[%s10846_s13 + $0xc04] ss:$304 sps:$4 sm:$0xff]  }
 0x182   : > { %5731 = vmatprep.subr.bf16.mxu0 %v8634_v29  ;;  %v8714_v29 = vld [vmem:[%s10846_s13 + $0xc00] ss:$304 sps:$4 sm:$0xff]  }
 0x185   : > { %5732 = vmatpush1.bf16.msra.mxu0 %v8632_v30  ;;  %v8717_v30 = vld [vmem:[%s10846_s13 + $0xc08] ss:$304 sps:$4 sm:$0xff]  }
 0x186   : > { %5799 = vmatprep.subr.bf16.mxu0 %v8641_v33  ;;  %v8720_v33 = vld [vmem:[%s10846_s13 + $0xe60] ss:$304 sps:$4 sm:$0xff]  }
 0x23b   : > { %v1622_v36 = vpop.f32.mrb[0].mxu0 }
 0x23c   : > { %v1623_v37 = vadd.f32 %v1622_v36, %v1555_v35  ;;  %v8532_v38 = vpop.f32.mrb[1].mxu0  ;;  %v8723_v35 = vld [vmem:[%s10846_s13 + $0xe68] ss:$304 sps:$4 sm:$0xff]   ;;  %v8728_v36 = vld [vmem:[%s10846_s13 + $0x10c4] ss:$304 sps:$4 sm:$0xff]  }
 0x23d   : > { %v8726_v38 = vld [vmem:[%s10846_s13 + $0x10c0] ss:$304 sps:$4 sm:$0xff]  }
 0x23e   : > { %v1626_v41 = vmax.f32 %v1623_v37, 0.0  ;;  %v8731_v37 = vld [vmem:[%s10846_s13 + $0x10cc] ss:$304 sps:$4 sm:$0xff]  }
 0x240   : > { %v10934_v42 = vpack.c.bf16 %v1626_v41, %v1626_v41  ;;  %v8737_v41 = vld [vmem:[%s10846_s13 + $0x3c] ss:$304 sps:$4 sm:$0xff]  }
 0x242   : > { %5709 = vmatmul.mubr.bf16.vlgmr.msra.gmra.mrb[0].mxu1 %v10934_v42  ;;  %5750 = vmatmul.mubr.bf16.vlgmr.msra.gmra.mrb[4].mxu0 %v10934_v42 }
 0x243   : > { %5759 = vmatpush1.bf16.msra.mxu1 %v8636_v39  ;;  %5800 = vmatpush1.bf16.msra.mxu0 %v8639_v40  ;;  %v8729_v39 = vld [vmem:[%s10846_s13 + $0x10c8] ss:$304 sps:$4 sm:$0xff]   ;;  %v8734_v40 = vld [vmem:[%s10846_s13 + $0x34] ss:$304 sps:$4 sm:$0xff]  }
 0x244   : > { %5760 = vmatprep.subr.bf16.mxu1 %v8644_v43  ;;  %5801 = vmatprep.subr.bf16.mxu0 %v8647_v44  ;;  %v8732_v43 = vld [vmem:[%s10846_s13 + $0x30] ss:$304 sps:$4 sm:$0xff]   ;;  %v8735_v44 = vld [vmem:[%s10846_s13 + $0x38] ss:$304 sps:$4 sm:$0xff]  }
 0x245   : > { %5790 = vmatprep.mubr.bf16.mxu1 %v9527_v34  ;;  %5831 = vmatprep.mubr.bf16.mxu0 %v9527_v34 }
 0x247   : > { %5761 = vmatpush1.bf16.msra.mxu1 %v8642_v45  ;;  %5802 = vmatpush1.bf16.msra.mxu0 %v8645_v46  ;;  %v8740_v45 = vld [vmem:[%s10846_s13 + $0x294] ss:$304 sps:$4 sm:$0xff]   ;;  %v8743_v46 = vld [vmem:[%s10846_s13 + $0x29c] ss:$304 sps:$4 sm:$0xff]  }
 0x248   : > { %5762 = vmatprep.subr.bf16.mxu1 %v8650_v47  ;;  %5803 = vmatprep.subr.bf16.mxu0 %v8653_v48  ;;  %v8738_v47 = vld [vmem:[%s10846_s13 + $0x290] ss:$304 sps:$4 sm:$0xff]   ;;  %v8741_v48 = vld [vmem:[%s10846_s13 + $0x298] ss:$304 sps:$4 sm:$0xff]  }
 0x24b   : > { %5763 = vmatpush1.bf16.msra.mxu1 %v8648_v49  ;;  %5804 = vmatpush1.bf16.msra.mxu0 %v8651_v50  ;;  %v8746_v49 = vld [vmem:[%s10846_s13 + $0x4f4] ss:$304 sps:$4 sm:$0xff]   ;;  %v8749_v50 = vld [vmem:[%s10846_s13 + $0x4fc] ss:$304 sps:$4 sm:$0xff]  }
 0x24c   : > { %5764 = vmatprep.subr.bf16.mxu1 %v8656_v51  ;;  %5805 = vmatprep.subr.bf16.mxu0 %v8659_v52  ;;  %v8744_v51 = vld [vmem:[%s10846_s13 + $0x4f0] ss:$304 sps:$4 sm:$0xff]   ;;  %v8747_v52 = vld [vmem:[%s10846_s13 + $0x4f8] ss:$304 sps:$4 sm:$0xff]  }
 0x24f   : > { %5765 = vmatpush1.bf16.msra.mxu1 %v8654_v53  ;;  %5806 = vmatpush1.bf16.msra.mxu0 %v8657_v54  ;;  %v8752_v53 = vld [vmem:[%s10846_s13 + $0x754] ss:$304 sps:$4 sm:$0xff]   ;;  %v8755_v54 = vld [vmem:[%s10846_s13 + $0x75c] ss:$304 sps:$4 sm:$0xff]  }
 0x250   : > { %5766 = vmatprep.subr.bf16.mxu1 %v8662_v55  ;;  %5807 = vmatprep.subr.bf16.mxu0 %v8665_v56  ;;  %v8750_v55 = vld [vmem:[%s10846_s13 + $0x750] ss:$304 sps:$4 sm:$0xff]   ;;  %v8753_v56 = vld [vmem:[%s10846_s13 + $0x758] ss:$304 sps:$4 sm:$0xff]  }
 0x253   : > { %5767 = vmatpush1.bf16.msra.mxu1 %v8660_v57  ;;  %5808 = vmatpush1.bf16.msra.mxu0 %v8663_v58  ;;  %v8758_v57 = vld [vmem:[%s10846_s13 + $0x9b4] ss:$304 sps:$4 sm:$0xff]   ;;  %v8761_v58 = vld [vmem:[%s10846_s13 + $0x9bc] ss:$304 sps:$4 sm:$0xff]  }
 0x254   : > { %5768 = vmatprep.subr.bf16.mxu1 %v8668_v59  ;;  %5809 = vmatprep.subr.bf16.mxu0 %v8671_v60  ;;  %v8756_v59 = vld [vmem:[%s10846_s13 + $0x9b0] ss:$304 sps:$4 sm:$0xff]   ;;  %v8759_v60 = vld [vmem:[%s10846_s13 + $0x9b8] ss:$304 sps:$4 sm:$0xff]  }
 0x257   : > { %5769 = vmatpush1.bf16.msra.mxu1 %v8666_v61  ;;  %5810 = vmatpush1.bf16.msra.mxu0 %v8669_v62  ;;  %v8764_v61 = vld [vmem:[%s10846_s13 + $0xc14] ss:$304 sps:$4 sm:$0xff]   ;;  %v8767_v62 = vld [vmem:[%s10846_s13 + $0xc1c] ss:$304 sps:$4 sm:$0xff]  }
 0x258   : > { %5770 = vmatprep.subr.bf16.mxu1 %v8674_v63  ;;  %5811 = vmatprep.subr.bf16.mxu0 %v8677_v0  ;;  %v8762_v63 = vld [vmem:[%s10846_s13 + $0xc10] ss:$304 sps:$4 sm:$0xff]   ;;  %v8765_v0 = vld [vmem:[%s10846_s13 + $0xc18] ss:$304 sps:$4 sm:$0xff]  }
 0x25b   : > { %5771 = vmatpush1.bf16.msra.mxu1 %v8672_v1  ;;  %5812 = vmatpush1.bf16.msra.mxu0 %v8675_v2  ;;  %v8770_v1 = vld [vmem:[%s10846_s13 + $0xe74] ss:$304 sps:$4 sm:$0xff]   ;;  %v8773_v2 = vld [vmem:[%s10846_s13 + $0xe7c] ss:$304 sps:$4 sm:$0xff]  }
 0x25c   : > { %5772 = vmatprep.subr.bf16.mxu1 %v8680_v3  ;;  %5813 = vmatprep.subr.bf16.mxu0 %v8683_v4  ;;  %v8768_v3 = vld [vmem:[%s10846_s13 + $0xe70] ss:$304 sps:$4 sm:$0xff]   ;;  %v8771_v4 = vld [vmem:[%s10846_s13 + $0xe78] ss:$304 sps:$4 sm:$0xff]  }
 0x25f   : > { %5773 = vmatpush1.bf16.msra.mxu1 %v8678_v5  ;;  %5814 = vmatpush1.bf16.msra.mxu0 %v8681_v6  ;;  %v8776_v5 = vld [vmem:[%s10846_s13 + $0x10d4] ss:$304 sps:$4 sm:$0xff]   ;;  %v8779_v6 = vld [vmem:[%s10846_s13 + $0x10dc] ss:$304 sps:$4 sm:$0xff]  }
 0x260   : > { %5840 = vmatprep.subr.bf16.mxu1 %v8686_v7  ;;  %5881 = vmatprep.subr.bf16.mxu0 %v8689_v8  ;;  %v8774_v7 = vld [vmem:[%s10846_s13 + $0x10d0] ss:$304 sps:$4 sm:$0xff]   ;;  %v8777_v8 = vld [vmem:[%s10846_s13 + $0x10d8] ss:$304 sps:$4 sm:$0xff]  }
 0x262   : > { %5791 = vmatmul.mubr.bf16.vlgmr.msra.gmra.mrb[4].mxu1 %v10934_v42  ;;  %5832 = vmatmul.mubr.bf16.vlgmr.msra.gmra.mrb[8].mxu0 %v10934_v42 }
 0x263   : > { %5841 = vmatpush1.bf16.msra.mxu1 %v8684_v9  ;;  %5882 = vmatpush1.bf16.msra.mxu0 %v8687_v10  ;;  %v8782_v9 = vld [vmem:[%s10846_s13 + $0x44] ss:$304 sps:$4 sm:$0xff]   ;;  %v8785_v10 = vld [vmem:[%s10846_s13 + $0x4c] ss:$304 sps:$4 sm:$0xff]  }
 0x264   : > { %5842 = vmatprep.subr.bf16.mxu1 %v8692_v11  ;;  %5883 = vmatprep.subr.bf16.mxu0 %v8695_v12  ;;  %v8780_v11 = vld [vmem:[%s10846_s13 + $0x40] ss:$304 sps:$4 sm:$0xff]   ;;  %v8783_v12 = vld [vmem:[%s10846_s13 + $0x48] ss:$304 sps:$4 sm:$0xff]  }
 0x265   : > { %5872 = vmatprep.mubr.bf16.mxu1 %v9527_v34  ;;  %5913 = vmatprep.mubr.bf16.mxu0 %v9527_v34 }
 0x267   : > { %5843 = vmatpush1.bf16.msra.mxu1 %v8690_v13  ;;  %5884 = vmatpush1.bf16.msra.mxu0 %v8693_v14  ;;  %v8788_v13 = vld [vmem:[%s10846_s13 + $0x2a4] ss:$304 sps:$4 sm:$0xff]   ;;  %v8791_v14 = vld [vmem:[%s10846_s13 + $0x2ac] ss:$304 sps:$4 sm:$0xff]  }
 0x268   : > { %5844 = vmatprep.subr.bf16.mxu1 %v8698_v15  ;;  %5885 = vmatprep.subr.bf16.mxu0 %v8701_v16  ;;  %v8786_v15 = vld [vmem:[%s10846_s13 + $0x2a0] ss:$304 sps:$4 sm:$0xff]   ;;  %v8789_v16 = vld [vmem:[%s10846_s13 + $0x2a8] ss:$304 sps:$4 sm:$0xff]  }
 0x26b   : > { %5845 = vmatpush1.bf16.msra.mxu1 %v8696_v17  ;;  %5886 = vmatpush1.bf16.msra.mxu0 %v8699_v18  ;;  %v8794_v17 = vld [vmem:[%s10846_s13 + $0x504] ss:$304 sps:$4 sm:$0xff]   ;;  %v8797_v18 = vld [vmem:[%s10846_s13 + $0x50c] ss:$304 sps:$4 sm:$0xff]  }
 0x26c   : > { %5846 = vmatprep.subr.bf16.mxu1 %v8704_v19  ;;  %5887 = vmatprep.subr.bf16.mxu0 %v8707_v20  ;;  %v8792_v19 = vld [vmem:[%s10846_s13 + $0x500] ss:$304 sps:$4 sm:$0xff]   ;;  %v8795_v20 = vld [vmem:[%s10846_s13 + $0x508] ss:$304 sps:$4 sm:$0xff]  }
 0x26f   : > { %5847 = vmatpush1.bf16.msra.mxu1 %v8702_v21  ;;  %5888 = vmatpush1.bf16.msra.mxu0 %v8705_v22  ;;  %v8800_v21 = vld [vmem:[%s10846_s13 + $0x764] ss:$304 sps:$4 sm:$0xff]   ;;  %v8803_v22 = vld [vmem:[%s10846_s13 + $0x76c] ss:$304 sps:$4 sm:$0xff]  }
 0x270   : > { %5848 = vmatprep.subr.bf16.mxu1 %v8710_v23  ;;  %5889 = vmatprep.subr.bf16.mxu0 %v8713_v24  ;;  %v8798_v23 = vld [vmem:[%s10846_s13 + $0x760] ss:$304 sps:$4 sm:$0xff]   ;;  %v8801_v24 = vld [vmem:[%s10846_s13 + $0x768] ss:$304 sps:$4 sm:$0xff]  }
 0x273   : > { %5849 = vmatpush1.bf16.msra.mxu1 %v8708_v25  ;;  %5890 = vmatpush1.bf16.msra.mxu0 %v8711_v26  ;;  %v8806_v25 = vld [vmem:[%s10846_s13 + $0x9c4] ss:$304 sps:$4 sm:$0xff]   ;;  %v8809_v26 = vld [vmem:[%s10846_s13 + $0x9cc] ss:$304 sps:$4 sm:$0xff]  }
 0x274   : > { %5850 = vmatprep.subr.bf16.mxu1 %v8716_v27  ;;  %5891 = vmatprep.subr.bf16.mxu0 %v8719_v28  ;;  %v8804_v27 = vld [vmem:[%s10846_s13 + $0x9c0] ss:$304 sps:$4 sm:$0xff]   ;;  %v8807_v28 = vld [vmem:[%s10846_s13 + $0x9c8] ss:$304 sps:$4 sm:$0xff]  }
 0x277   : > { %5851 = vmatpush1.bf16.msra.mxu1 %v8714_v29  ;;  %5892 = vmatpush1.bf16.msra.mxu0 %v8717_v30  ;;  %v8812_v29 = vld [vmem:[%s10846_s13 + $0xc24] ss:$304 sps:$4 sm:$0xff]   ;;  %v8815_v30 = vld [vmem:[%s10846_s13 + $0xc2c] ss:$304 sps:$4 sm:$0xff]  }
 0x278   : > { %5852 = vmatprep.subr.bf16.mxu1 %v8722_v31  ;;  %5893 = vmatprep.subr.bf16.mxu0 %v8725_v32  ;;  %v8810_v31 = vld [vmem:[%s10846_s13 + $0xc20] ss:$304 sps:$4 sm:$0xff]   ;;  %v8813_v32 = vld [vmem:[%s10846_s13 + $0xc28] ss:$304 sps:$4 sm:$0xff]  }
 0x27b   : > { %5853 = vmatpush1.bf16.msra.mxu1 %v8720_v33  ;;  %5894 = vmatpush1.bf16.msra.mxu0 %v8723_v35  ;;  %v8818_v33 = vld [vmem:[%s10846_s13 + $0xe84] ss:$304 sps:$4 sm:$0xff]   ;;  %v8821_v35 = vld [vmem:[%s10846_s13 + $0xe8c] ss:$304 sps:$4 sm:$0xff]  }
 0x27c   : > { %5854 = vmatprep.subr.bf16.mxu1 %v8728_v36  ;;  %5895 = vmatprep.subr.bf16.mxu0 %v8731_v37  ;;  %v8816_v36 = vld [vmem:[%s10846_s13 + $0xe80] ss:$304 sps:$4 sm:$0xff]   ;;  %v8819_v37 = vld [vmem:[%s10846_s13 + $0xe88] ss:$304 sps:$4 sm:$0xff]  }
 0x27f   : > { %5855 = vmatpush1.bf16.msra.mxu1 %v8726_v38  ;;  %5896 = vmatpush1.bf16.msra.mxu0 %v8729_v39  ;;  %v8824_v38 = vld [vmem:[%s10846_s13 + $0x10e4] ss:$304 sps:$4 sm:$0xff]   ;;  %v8827_v39 = vld [vmem:[%s10846_s13 + $0x10ec] ss:$304 sps:$4 sm:$0xff]  }
 0x280   : > { %5922 = vmatprep.subr.bf16.mxu1 %v8734_v40  ;;  %5963 = vmatprep.subr.bf16.mxu0 %v8737_v41  ;;  %v8822_v40 = vld [vmem:[%s10846_s13 + $0x10e0] ss:$304 sps:$4 sm:$0xff]   ;;  %v8825_v41 = vld [vmem:[%s10846_s13 + $0x10e8] ss:$304 sps:$4 sm:$0xff]  }
 0x282   : > { %5873 = vmatmul.mubr.bf16.vlgmr.msra.gmra.mrb[8].mxu1 %v10934_v42  ;;  %5914 = vmatmul.mubr.bf16.vlgmr.msra.gmra.mrb[12].mxu0 %v10934_v42 }
 0x283   : > { %5923 = vmatpush1.bf16.msra.mxu1 %v8732_v43  ;;  %5964 = vmatpush1.bf16.msra.mxu0 %v8735_v44  ;;  %v8830_v43 = vld [vmem:[%s10846_s13 + $0x54] ss:$304 sps:$4 sm:$0xff]   ;;  %v8833_v44 = vld [vmem:[%s10846_s13 + $0x5c] ss:$304 sps:$4 sm:$0xff]  }
 0x284   : > { %5924 = vmatprep.subr.bf16.mxu1 %v8740_v45  ;;  %5965 = vmatprep.subr.bf16.mxu0 %v8743_v46  ;;  %v8828_v45 = vld [vmem:[%s10846_s13 + $0x50] ss:$304 sps:$4 sm:$0xff]   ;;  %v8831_v46 = vld [vmem:[%s10846_s13 + $0x58] ss:$304 sps:$4 sm:$0xff]  }
 0x285   : > { %5954 = vmatprep.mubr.bf16.mxu1 %v9527_v34  ;;  %5995 = vmatprep.mubr.bf16.mxu0 %v9527_v34 }
 0x287   : > { %5925 = vmatpush1.bf16.msra.mxu1 %v8738_v47  ;;  %5966 = vmatpush1.bf16.msra.mxu0 %v8741_v48  ;;  %v8836_v47 = vld [vmem:[%s10846_s13 + $0x2b4] ss:$304 sps:$4 sm:$0xff]   ;;  %v8839_v48 = vld [vmem:[%s10846_s13 + $0x2bc] ss:$304 sps:$4 sm:$0xff]  }
 0x288   : > { %5926 = vmatprep.subr.bf16.mxu1 %v8746_v49  ;;  %5967 = vmatprep.subr.bf16.mxu0 %v8749_v50  ;;  %v8834_v49 = vld [vmem:[%s10846_s13 + $0x2b0] ss:$304 sps:$4 sm:$0xff]   ;;  %v8837_v50 = vld [vmem:[%s10846_s13 + $0x2b8] ss:$304 sps:$4 sm:$0xff]  }
 0x28b   : > { %5927 = vmatpush1.bf16.msra.mxu1 %v8744_v51  ;;  %5968 = vmatpush1.bf16.msra.mxu0 %v8747_v52  ;;  %v8842_v51 = vld [vmem:[%s10846_s13 + $0x514] ss:$304 sps:$4 sm:$0xff]   ;;  %v8845_v52 = vld [vmem:[%s10846_s13 + $0x51c] ss:$304 sps:$4 sm:$0xff]  }
 0x28c   : > { %5928 = vmatprep.subr.bf16.mxu1 %v8752_v53  ;;  %5969 = vmatprep.subr.bf16.mxu0 %v8755_v54  ;;  %v8840_v53 = vld [vmem:[%s10846_s13 + $0x510] ss:$304 sps:$4 sm:$0xff]   ;;  %v8843_v54 = vld [vmem:[%s10846_s13 + $0x518] ss:$304 sps:$4 sm:$0xff]  }
 0x28f   : > { %5929 = vmatpush1.bf16.msra.mxu1 %v8750_v55  ;;  %5970 = vmatpush1.bf16.msra.mxu0 %v8753_v56  ;;  %v8848_v55 = vld [vmem:[%s10846_s13 + $0x774] ss:$304 sps:$4 sm:$0xff]   ;;  %v8851_v56 = vld [vmem:[%s10846_s13 + $0x77c] ss:$304 sps:$4 sm:$0xff]  }
 0x290   : > { %5930 = vmatprep.subr.bf16.mxu1 %v8758_v57  ;;  %5971 = vmatprep.subr.bf16.mxu0 %v8761_v58  ;;  %v8846_v57 = vld [vmem:[%s10846_s13 + $0x770] ss:$304 sps:$4 sm:$0xff]   ;;  %v8849_v58 = vld [vmem:[%s10846_s13 + $0x778] ss:$304 sps:$4 sm:$0xff]  }
 0x293   : > { %5931 = vmatpush1.bf16.msra.mxu1 %v8756_v59  ;;  %5972 = vmatpush1.bf16.msra.mxu0 %v8759_v60  ;;  %v8854_v59 = vld [vmem:[%s10846_s13 + $0x9d4] ss:$304 sps:$4 sm:$0xff]   ;;  %v8857_v60 = vld [vmem:[%s10846_s13 + $0x9dc] ss:$304 sps:$4 sm:$0xff]  }
 0x294   : > { %5932 = vmatprep.subr.bf16.mxu1 %v8764_v61  ;;  %5973 = vmatprep.subr.bf16.mxu0 %v8767_v62  ;;  %v8852_v61 = vld [vmem:[%s10846_s13 + $0x9d0] ss:$304 sps:$4 sm:$0xff]   ;;  %v8855_v62 = vld [vmem:[%s10846_s13 + $0x9d8] ss:$304 sps:$4 sm:$0xff]  }
 0x297   : > { %5933 = vmatpush1.bf16.msra.mxu1 %v8762_v63  ;;  %5974 = vmatpush1.bf16.msra.mxu0 %v8765_v0  ;;  %v8860_v63 = vld [vmem:[%s10846_s13 + $0xc34] ss:$304 sps:$4 sm:$0xff]   ;;  %v8863_v0 = vld [vmem:[%s10846_s13 + $0xc3c] ss:$304 sps:$4 sm:$0xff]  }
 0x298   : > { %5934 = vmatprep.subr.bf16.mxu1 %v8770_v1  ;;  %5975 = vmatprep.subr.bf16.mxu0 %v8773_v2  ;;  %v8858_v1 = vld [vmem:[%s10846_s13 + $0xc30] ss:$304 sps:$4 sm:$0xff]   ;;  %v8861_v2 = vld [vmem:[%s10846_s13 + $0xc38] ss:$304 sps:$4 sm:$0xff]  }
 0x29b   : > { %5935 = vmatpush1.bf16.msra.mxu1 %v8768_v3  ;;  %5976 = vmatpush1.bf16.msra.mxu0 %v8771_v4  ;;  %v8866_v3 = vld [vmem:[%s10846_s13 + $0xe94] ss:$304 sps:$4 sm:$0xff]   ;;  %v8869_v4 = vld [vmem:[%s10846_s13 + $0xe9c] ss:$304 sps:$4 sm:$0xff]  }
 0x29c   : > { %5936 = vmatprep.subr.bf16.mxu1 %v8776_v5  ;;  %5977 = vmatprep.subr.bf16.mxu0 %v8779_v6  ;;  %v8864_v5 = vld [vmem:[%s10846_s13 + $0xe90] ss:$304 sps:$4 sm:$0xff]   ;;  %v8867_v6 = vld [vmem:[%s10846_s13 + $0xe98] ss:$304 sps:$4 sm:$0xff]  }
 0x29f   : > { %5937 = vmatpush1.bf16.msra.mxu1 %v8774_v7  ;;  %5978 = vmatpush1.bf16.msra.mxu0 %v8777_v8  ;;  %v8872_v7 = vld [vmem:[%s10846_s13 + $0x10f4] ss:$304 sps:$4 sm:$0xff]   ;;  %v8875_v8 = vld [vmem:[%s10846_s13 + $0x10fc] ss:$304 sps:$4 sm:$0xff]  }
 0x2a0   : > { %6004 = vmatprep.subr.bf16.mxu1 %v8782_v9  ;;  %6045 = vmatprep.subr.bf16.mxu0 %v8785_v10  ;;  %v8870_v9 = vld [vmem:[%s10846_s13 + $0x10f0] ss:$304 sps:$4 sm:$0xff]   ;;  %v8873_v10 = vld [vmem:[%s10846_s13 + $0x10f8] ss:$304 sps:$4 sm:$0xff]  }
 0x2a2   : > { %5955 = vmatmul.mubr.bf16.vlgmr.msra.gmra.mrb[12].mxu1 %v10934_v42  ;;  %5996 = vmatmul.mubr.bf16.vlgmr.msra.gmra.mrb[16].mxu0 %v10934_v42 }
 0x2a3   : > { %6005 = vmatpush1.bf16.msra.mxu1 %v8780_v11  ;;  %6046 = vmatpush1.bf16.msra.mxu0 %v8783_v12  ;;  %v8878_v11 = vld [vmem:[%s10846_s13 + $0x64] ss:$304 sps:$4 sm:$0xff]   ;;  %v8881_v12 = vld [vmem:[%s10846_s13 + $0x6c] ss:$304 sps:$4 sm:$0xff]  }
 0x2a4   : > { %6006 = vmatprep.subr.bf16.mxu1 %v8788_v13  ;;  %6047 = vmatprep.subr.bf16.mxu0 %v8791_v14  ;;  %v8876_v13 = vld [vmem:[%s10846_s13 + $0x60] ss:$304 sps:$4 sm:$0xff]   ;;  %v8879_v14 = vld [vmem:[%s10846_s13 + $0x68] ss:$304 sps:$4 sm:$0xff]  }
 0x2a5   : > { %6036 = vmatprep.mubr.bf16.mxu1 %v9527_v34  ;;  %6077 = vmatprep.mubr.bf16.mxu0 %v9527_v34 }
 0x2a7   : > { %6007 = vmatpush1.bf16.msra.mxu1 %v8786_v15  ;;  %6048 = vmatpush1.bf16.msra.mxu0 %v8789_v16  ;;  %v8884_v15 = vld [vmem:[%s10846_s13 + $0x2c4] ss:$304 sps:$4 sm:$0xff]   ;;  %v8887_v16 = vld [vmem:[%s10846_s13 + $0x2cc] ss:$304 sps:$4 sm:$0xff]  }
 0x2a8   : > { %6008 = vmatprep.subr.bf16.mxu1 %v8794_v17  ;;  %6049 = vmatprep.subr.bf16.mxu0 %v8797_v18  ;;  %v8882_v17 = vld [vmem:[%s10846_s13 + $0x2c0] ss:$304 sps:$4 sm:$0xff]   ;;  %v8885_v18 = vld [vmem:[%s10846_s13 + $0x2c8] ss:$304 sps:$4 sm:$0xff]  }
 0x2ab   : > { %6009 = vmatpush1.bf16.msra.mxu1 %v8792_v19  ;;  %6050 = vmatpush1.bf16.msra.mxu0 %v8795_v20  ;;  %v8890_v19 = vld [vmem:[%s10846_s13 + $0x524] ss:$304 sps:$4 sm:$0xff]   ;;  %v8893_v20 = vld [vmem:[%s10846_s13 + $0x52c] ss:$304 sps:$4 sm:$0xff]  }
 0x2ac   : > { %6010 = vmatprep.subr.bf16.mxu1 %v8800_v21  ;;  %6051 = vmatprep.subr.bf16.mxu0 %v8803_v22  ;;  %v8888_v21 = vld [vmem:[%s10846_s13 + $0x520] ss:$304 sps:$4 sm:$0xff]   ;;  %v8891_v22 = vld [vmem:[%s10846_s13 + $0x528] ss:$304 sps:$4 sm:$0xff]  }
 0x2af   : > { %6011 = vmatpush1.bf16.msra.mxu1 %v8798_v23  ;;  %6052 = vmatpush1.bf16.msra.mxu0 %v8801_v24  ;;  %v8896_v23 = vld [vmem:[%s10846_s13 + $0x784] ss:$304 sps:$4 sm:$0xff]   ;;  %v8899_v24 = vld [vmem:[%s10846_s13 + $0x78c] ss:$304 sps:$4 sm:$0xff]  }
 0x2b0   : > { %6012 = vmatprep.subr.bf16.mxu1 %v8806_v25  ;;  %6053 = vmatprep.subr.bf16.mxu0 %v8809_v26  ;;  %v8894_v25 = vld [vmem:[%s10846_s13 + $0x780] ss:$304 sps:$4 sm:$0xff]   ;;  %v8897_v26 = vld [vmem:[%s10846_s13 + $0x788] ss:$304 sps:$4 sm:$0xff]  }
 0x2b3   : > { %6013 = vmatpush1.bf16.msra.mxu1 %v8804_v27  ;;  %6054 = vmatpush1.bf16.msra.mxu0 %v8807_v28  ;;  %v8902_v27 = vld [vmem:[%s10846_s13 + $0x9e4] ss:$304 sps:$4 sm:$0xff]   ;;  %v8905_v28 = vld [vmem:[%s10846_s13 + $0x9ec] ss:$304 sps:$4 sm:$0xff]  }
 0x2b4   : > { %6014 = vmatprep.subr.bf16.mxu1 %v8812_v29  ;;  %6055 = vmatprep.subr.bf16.mxu0 %v8815_v30  ;;  %v8900_v29 = vld [vmem:[%s10846_s13 + $0x9e0] ss:$304 sps:$4 sm:$0xff]   ;;  %v8903_v30 = vld [vmem:[%s10846_s13 + $0x9e8] ss:$304 sps:$4 sm:$0xff]  }
 0x2b7   : > { %6015 = vmatpush1.bf16.msra.mxu1 %v8810_v31  ;;  %6056 = vmatpush1.bf16.msra.mxu0 %v8813_v32  ;;  %v8908_v31 = vld [vmem:[%s10846_s13 + $0xc44] ss:$304 sps:$4 sm:$0xff]   ;;  %v8911_v32 = vld [vmem:[%s10846_s13 + $0xc4c] ss:$304 sps:$4 sm:$0xff]  }
 0x2b8   : > { %6016 = vmatprep.subr.bf16.mxu1 %v8818_v33  ;;  %6057 = vmatprep.subr.bf16.mxu0 %v8821_v35  ;;  %v8906_v33 = vld [vmem:[%s10846_s13 + $0xc40] ss:$304 sps:$4 sm:$0xff]   ;;  %v8909_v35 = vld [vmem:[%s10846_s13 + $0xc48] ss:$304 sps:$4 sm:$0xff]  }
 0x2bb   : > { %6017 = vmatpush1.bf16.msra.mxu1 %v8816_v36  ;;  %6058 = vmatpush1.bf16.msra.mxu0 %v8819_v37  ;;  %v8914_v36 = vld [vmem:[%s10846_s13 + $0xea4] ss:$304 sps:$4 sm:$0xff]   ;;  %v8917_v37 = vld [vmem:[%s10846_s13 + $0xeac] ss:$304 sps:$4 sm:$0xff]  }
 0x2bc   : > { %6018 = vmatprep.subr.bf16.mxu1 %v8824_v38  ;;  %6059 = vmatprep.subr.bf16.mxu0 %v8827_v39  ;;  %v8912_v38 = vld [vmem:[%s10846_s13 + $0xea0] ss:$304 sps:$4 sm:$0xff]   ;;  %v8915_v39 = vld [vmem:[%s10846_s13 + $0xea8] ss:$304 sps:$4 sm:$0xff]  }
 0x2bf   : > { %6019 = vmatpush1.bf16.msra.mxu1 %v8822_v40  ;;  %6060 = vmatpush1.bf16.msra.mxu0 %v8825_v41  ;;  %v8920_v40 = vld [vmem:[%s10846_s13 + $0x1104] ss:$304 sps:$4 sm:$0xff]   ;;  %v8923_v41 = vld [vmem:[%s10846_s13 + $0x110c] ss:$304 sps:$4 sm:$0xff]  }
 0x2c0   : > { %6086 = vmatprep.subr.bf16.mxu1 %v8830_v43  ;;  %6127 = vmatprep.subr.bf16.mxu0 %v8833_v44  ;;  %v8918_v43 = vld [vmem:[%s10846_s13 + $0x1100] ss:$304 sps:$4 sm:$0xff]   ;;  %v8921_v44 = vld [vmem:[%s10846_s13 + $0x1108] ss:$304 sps:$4 sm:$0xff]  }
 0x2c2   : > { %6037 = vmatmul.mubr.bf16.vlgmr.msra.gmra.mrb[16].mxu1 %v10934_v42  ;;  %6078 = vmatmul.mubr.bf16.vlgmr.msra.gmra.mrb[20].mxu0 %v10934_v42 }
 0x2c3   : > { %6087 = vmatpush1.bf16.msra.mxu1 %v8828_v45  ;;  %6128 = vmatpush1.bf16.msra.mxu0 %v8831_v46  ;;  %v8926_v45 = vld [vmem:[%s10846_s13 + $0x74] ss:$304 sps:$4 sm:$0xff]   ;;  %v8929_v46 = vld [vmem:[%s10846_s13 + $0x7c] ss:$304 sps:$4 sm:$0xff]  }
 0x2c4   : > { %6088 = vmatprep.subr.bf16.mxu1 %v8836_v47  ;;  %6129 = vmatprep.subr.bf16.mxu0 %v8839_v48  ;;  %v8924_v47 = vld [vmem:[%s10846_s13 + $0x70] ss:$304 sps:$4 sm:$0xff]   ;;  %v8927_v48 = vld [vmem:[%s10846_s13 + $0x78] ss:$304 sps:$4 sm:$0xff]  }
 0x2c5   : > { %6118 = vmatprep.mubr.bf16.mxu1 %v9527_v34  ;;  %6159 = vmatprep.mubr.bf16.mxu0 %v9527_v34 }
 0x2c7   : > { %6089 = vmatpush1.bf16.msra.mxu1 %v8834_v49  ;;  %6130 = vmatpush1.bf16.msra.mxu0 %v8837_v50  ;;  %v8932_v49 = vld [vmem:[%s10846_s13 + $0x2d4] ss:$304 sps:$4 sm:$0xff]   ;;  %v8935_v50 = vld [vmem:[%s10846_s13 + $0x2dc] ss:$304 sps:$4 sm:$0xff]  }
 0x2c8   : > { %6090 = vmatprep.subr.bf16.mxu1 %v8842_v51  ;;  %6131 = vmatprep.subr.bf16.mxu0 %v8845_v52  ;;  %v8930_v51 = vld [vmem:[%s10846_s13 + $0x2d0] ss:$304 sps:$4 sm:$0xff]   ;;  %v8933_v52 = vld [vmem:[%s10846_s13 + $0x2d8] ss:$304 sps:$4 sm:$0xff]  }
 0x2cb   : > { %6091 = vmatpush1.bf16.msra.mxu1 %v8840_v53  ;;  %6132 = vmatpush1.bf16.msra.mxu0 %v8843_v54  ;;  %v8938_v53 = vld [vmem:[%s10846_s13 + $0x534] ss:$304 sps:$4 sm:$0xff]   ;;  %v8941_v54 = vld [vmem:[%s10846_s13 + $0x53c] ss:$304 sps:$4 sm:$0xff]  }
 0x2cc   : > { %6092 = vmatprep.subr.bf16.mxu1 %v8848_v55  ;;  %6133 = vmatprep.subr.bf16.mxu0 %v8851_v56  ;;  %v5296_v55 = vlaneseq  ;;  %v8936_v56 = vld [vmem:[%s10846_s13 + $0x530] ss:$304 sps:$4 sm:$0xff]  }
 0x2ce   : > { %vm7796_vm1 = vcmp.lt.s32.totalorder %v5296_v55, 512 }
 0x2cf   : > { %6093 = vmatpush1.bf16.msra.mxu1 %v8846_v57  ;;  %6134 = vmatpush1.bf16.msra.mxu0 %v8849_v58  ;;  %v8939_v57 = vld [vmem:[%s10846_s13 + $0x538] ss:$304 sps:$4 sm:$0xff]   ;;  %v8944_v58 = vld [vmem:[%s10846_s13 + $0x794] ss:$304 sps:$4 sm:$0xff]  }
 0x2d0   : > { %6094 = vmatprep.subr.bf16.mxu1 %v8854_v59  ;;  %6135 = vmatprep.subr.bf16.mxu0 %v8857_v60  ;;  %v8947_v59 = vld [vmem:[%s10846_s13 + $0x79c] ss:$304 sps:$4 sm:$0xff]   ;;  %v11171_v60 = vshrl.u32 %v5296_v55, 7 }
 0x2d3   : > { %6095 = vmatpush1.bf16.msra.mxu1 %v8852_v61  ;;  %6136 = vmatpush1.bf16.msra.mxu0 %v8855_v62  ;;  %v8942_v61 = vld [vmem:[%s10846_s13 + $0x790] ss:$304 sps:$4 sm:$0xff]   ;;  %v8945_v62 = vld [vmem:[%s10846_s13 + $0x798] ss:$304 sps:$4 sm:$0xff]  }
 0x2d4   : > { %6096 = vmatprep.subr.bf16.mxu1 %v8860_v63  ;;  %6137 = vmatprep.subr.bf16.mxu0 %v8863_v0  ;;  %v8950_v63 = vld [vmem:[%s10846_s13 + $0x9f4] ss:$304 sps:$4 sm:$0xff]   ;;  %v8953_v0 = vld [vmem:[%s10846_s13 + $0x9fc] ss:$304 sps:$4 sm:$0xff]  }
 0x2d7   : > { %6097 = vmatpush1.bf16.msra.mxu1 %v8858_v1  ;;  %6138 = vmatpush1.bf16.msra.mxu0 %v8861_v2  ;;  %v8948_v1 = vld [vmem:[%s10846_s13 + $0x9f0] ss:$304 sps:$4 sm:$0xff]   ;;  %v11185_v2 = vsub.s32 0, %v11171_v60 }
 0x2d8   : > { %6098 = vmatprep.subr.bf16.mxu1 %v8866_v3  ;;  %6139 = vmatprep.subr.bf16.mxu0 %v8869_v4  ;;  %v11188_v3 = vsub.s32 2, %v11171_v60  ;;  %v8951_v4 = vld [vmem:[%s10846_s13 + $0x9f8] ss:$304 sps:$4 sm:$0xff]  }
 0x2db   : > { %6099 = vmatpush1.bf16.msra.mxu1 %v8864_v5  ;;  %6140 = vmatpush1.bf16.msra.mxu0 %v8867_v6  ;;  %v11192_v5 = vld [vmem:[%s11181_s30] sm:$0xff]  ;;  %v11195_v6 = vsub.s32 1, %v11171_v60 }
 0x2dc   : > { %6100 = vmatprep.subr.bf16.mxu1 %v8872_v7  ;;  %6141 = vmatprep.subr.bf16.mxu0 %v8875_v8  ;;  %v9528_v7 = vmov 1966171168  }
 0x2dd   : > { %v7315_v8 = vunpack.c.l.s4 %v9528_v7  ;;  %v11254_v7 = vsub.s32 4, %v11171_v60 }
 0x2df   : > { %6101 = vmatpush1.bf16.msra.mxu1 %v8870_v9  ;;  %6142 = vmatpush1.bf16.msra.mxu0 %v8873_v10  ;;  %v11198_v9 = vsub.s32 3, %v11171_v60  ;;  %v8956_v10 = vld [vmem:[%s10846_s13 + $0xc54] ss:$304 sps:$4 sm:$0xff]  }
 0x2e0   : > { %6168 = vmatprep.subr.bf16.mxu1 %v8878_v11  ;;  %6209 = vmatprep.subr.bf16.mxu0 %v8881_v12  ;;  %v8959_v11 = vld [vmem:[%s10846_s13 + $0xc5c] ss:$304 sps:$4 sm:$0xff]   ;;  %v5299_v12 = vrot.slane %v11192_v5, %v11185_v2 }
 0x2e2   : > { %6119 = vmatmul.mubr.bf16.vlgmr.msra.gmra.mrb[20].mxu1 %v10934_v42  ;;  %6160 = vmatmul.mubr.bf16.vlgmr.msra.gmra.mrb[24].mxu0 %v10934_v42 }
 0x2e3   : > { %6169 = vmatpush1.bf16.msra.mxu1 %v8876_v13  ;;  %6210 = vmatpush1.bf16.msra.mxu0 %v8879_v14  ;;  %v5307_v13 = vrot.slane %v11192_v5, %v11188_v3  ;;  %v8954_v14 = vld [vmem:[%s10846_s13 + $0xc50] ss:$304 sps:$4 sm:$0xff]  }
 0x2e4   : > { %6170 = vmatprep.subr.bf16.mxu1 %v8884_v15  ;;  %6211 = vmatprep.subr.bf16.mxu0 %v8887_v16  ;;  %v8957_v15 = vld [vmem:[%s10846_s13 + $0xc58] ss:$304 sps:$4 sm:$0xff]   ;;  %v5303_v16 = vrot.slane %v11192_v5, %v11195_v6 }
 0x2e5   : > { %6200 = vmatprep.mubr.bf16.mxu1 %v9527_v34  ;;  %6241 = vmatprep.mubr.bf16.mxu0 %v9527_v34 }
 0x2e7   : > { %6171 = vmatpush1.bf16.msra.mxu1 %v8882_v17  ;;  %6212 = vmatpush1.bf16.msra.mxu0 %v8885_v18  ;;  %v7316_v17 = vunpack.c.0.s8 %v7315_v8  ;;  %v5311_v18 = vrot.slane %v11192_v5, %v11198_v9  ;;  %v11257_v8 = vsub.s32 6, %v11171_v60 }
 0x2e8   : > { %6172 = vmatprep.subr.bf16.mxu1 %v8890_v19  ;;  %6213 = vmatprep.subr.bf16.mxu0 %v8893_v20  ;;  %v8962_v19 = vld [vmem:[%s10846_s13 + $0xeb4] ss:$304 sps:$4 sm:$0xff]   ;;  %v8965_v20 = vld [vmem:[%s10846_s13 + $0xebc] ss:$304 sps:$4 sm:$0xff]  }
 0x2eb   : > { %6173 = vmatpush1.bf16.msra.mxu1 %v8888_v21  ;;  %6214 = vmatpush1.bf16.msra.mxu0 %v8891_v22 }
 0x2ec   : > { %6174 = vmatprep.subr.bf16.mxu1 %v8896_v23  ;;  %6215 = vmatprep.subr.bf16.mxu0 %v8899_v24 }
 0x2ef   : > { %6175 = vmatpush1.bf16.msra.mxu1 %v8894_v25  ;;  %6216 = vmatpush1.bf16.msra.mxu0 %v8897_v26 }
 0x2f0   : > { %6176 = vmatprep.subr.bf16.mxu1 %v8902_v27  ;;  %6217 = vmatprep.subr.bf16.mxu0 %v8905_v28  ;;  %v11215_v28 = vsub.s32 %v7316_v17, %v11171_v60  ;;  %v5323_v17 = vrot.slane %v11192_v5, %v11257_v8 }
 0x2f3   : > { %6177 = vmatpush1.bf16.msra.mxu1 %v8900_v29  ;;  %6218 = vmatpush1.bf16.msra.mxu0 %v8903_v30 }
 0x2f4   : > { %6178 = vmatprep.subr.bf16.mxu1 %v8908_v31  ;;  %6219 = vmatprep.subr.bf16.mxu0 %v8911_v32  ;;  %v8960_v32 = vld [vmem:[%s10846_s13 + $0xeb0] ss:$304 sps:$4 sm:$0xff]  }
 0x2f7   : > { %6179 = vmatpush1.bf16.msra.mxu1 %v8906_v33  ;;  %6220 = vmatpush1.bf16.msra.mxu0 %v8909_v35  ;;  %v8963_v33 = vld [vmem:[%s10846_s13 + $0xeb8] ss:$304 sps:$4 sm:$0xff]  }
 0x2f8   : > { %6180 = vmatprep.subr.bf16.mxu1 %v8914_v36  ;;  %6221 = vmatprep.subr.bf16.mxu0 %v8917_v37  ;;  %v8968_v37 = vld [vmem:[%s10846_s13 + $0x1114] ss:$304 sps:$4 sm:$0xff]  }
 0x2fb   : > { %6181 = vmatpush1.bf16.msra.mxu1 %v8912_v38  ;;  %6222 = vmatpush1.bf16.msra.mxu0 %v8915_v39  ;;  %v8971_v38 = vld [vmem:[%s10846_s13 + $0x111c] ss:$304 sps:$4 sm:$0xff]  }
 0x2fc   : > { %6182 = vmatprep.subr.bf16.mxu1 %v8920_v40  ;;  %6223 = vmatprep.subr.bf16.mxu0 %v8923_v41 }
 0x2ff   : > { %6183 = vmatpush1.bf16.msra.mxu1 %v8918_v43  ;;  %6224 = vmatpush1.bf16.msra.mxu0 %v8921_v44  ;;  %v8966_v44 = vld [vmem:[%s10846_s13 + $0x1110] ss:$304 sps:$4 sm:$0xff]  }
 0x300   : > { %6250 = vmatprep.subr.bf16.mxu1 %v8926_v45  ;;  %6291 = vmatprep.subr.bf16.mxu0 %v8929_v46  ;;  %v8969_v45 = vld [vmem:[%s10846_s13 + $0x1118] ss:$304 sps:$4 sm:$0xff]   ;;  %v8974_v46 = vld [vmem:[%s10846_s13 + $0x84] ss:$304 sps:$4 sm:$0xff]  }
 0x302   : > { %6201 = vmatmul.mubr.bf16.vlgmr.msra.gmra.mrb[24].mxu1 %v10934_v42  ;;  %6242 = vmatmul.mubr.bf16.vlgmr.msra.gmra.mrb[28].mxu0 %v10934_v42 }
 0x303   : > { %6251 = vmatpush1.bf16.msra.mxu1 %v8924_v47  ;;  %6292 = vmatpush1.bf16.msra.mxu0 %v8927_v48  ;;  %v8977_v47 = vld [vmem:[%s10846_s13 + $0x8c] ss:$304 sps:$4 sm:$0xff]  }
 0x304   : > { %6252 = vmatprep.subr.bf16.mxu1 %v8932_v49  ;;  %6293 = vmatprep.subr.bf16.mxu0 %v8935_v50  ;;  %v8972_v49 = vld [vmem:[%s10846_s13 + $0x80] ss:$304 sps:$4 sm:$0xff]   ;;  %v8975_v50 = vld [vmem:[%s10846_s13 + $0x88] ss:$304 sps:$4 sm:$0xff]  }
 0x305   : > { %6282 = vmatprep.mubr.bf16.mxu1 %v9527_v34  ;;  %6323 = vmatprep.mubr.bf16.mxu0 %v9527_v34 }
 0x307   : > { %6253 = vmatpush1.bf16.msra.mxu1 %v8930_v51  ;;  %6294 = vmatpush1.bf16.msra.mxu0 %v8933_v52  ;;  %v8980_v51 = vld [vmem:[%s10846_s13 + $0x2e4] ss:$304 sps:$4 sm:$0xff]   ;;  %v8983_v52 = vld [vmem:[%s10846_s13 + $0x2ec] ss:$304 sps:$4 sm:$0xff]  }
 0x308   : > { %6254 = vmatprep.subr.bf16.mxu1 %v8938_v53  ;;  %6295 = vmatprep.subr.bf16.mxu0 %v8941_v54  ;;  %v8978_v53 = vld [vmem:[%s10846_s13 + $0x2e0] ss:$304 sps:$4 sm:$0xff]   ;;  %v8981_v54 = vld [vmem:[%s10846_s13 + $0x2e8] ss:$304 sps:$4 sm:$0xff]  }
 0x30b   : > { %6255 = vmatpush1.bf16.msra.mxu1 %v8936_v56  ;;  %6296 = vmatpush1.bf16.msra.mxu0 %v8939_v57  ;;  %v8986_v56 = vld [vmem:[%s10846_s13 + $0x544] ss:$304 sps:$4 sm:$0xff]   ;;  %v8989_v57 = vld [vmem:[%s10846_s13 + $0x54c] ss:$304 sps:$4 sm:$0xff]  }
 0x30c   : > { %6256 = vmatprep.subr.bf16.mxu1 %v8944_v58  ;;  %6297 = vmatprep.subr.bf16.mxu0 %v8947_v59  ;;  %v8984_v58 = vld [vmem:[%s10846_s13 + $0x540] ss:$304 sps:$4 sm:$0xff]   ;;  %v8987_v59 = vld [vmem:[%s10846_s13 + $0x548] ss:$304 sps:$4 sm:$0xff]  }
 0x30f   : > { %6257 = vmatpush1.bf16.msra.mxu1 %v8942_v61  ;;  %6298 = vmatpush1.bf16.msra.mxu0 %v8945_v62  ;;  %v8992_v61 = vld [vmem:[%s10846_s13 + $0x7a4] ss:$304 sps:$4 sm:$0xff]   ;;  %v8995_v62 = vld [vmem:[%s10846_s13 + $0x7ac] ss:$304 sps:$4 sm:$0xff]  }
 0x310   : > { %6258 = vmatprep.subr.bf16.mxu1 %v8950_v63  ;;  %6299 = vmatprep.subr.bf16.mxu0 %v8953_v0  ;;  %v8990_v63 = vld [vmem:[%s10846_s13 + $0x7a0] ss:$304 sps:$4 sm:$0xff]   ;;  %v8993_v0 = vld [vmem:[%s10846_s13 + $0x7a8] ss:$304 sps:$4 sm:$0xff]  }
 0x313   : > { %6259 = vmatpush1.bf16.msra.mxu1 %v8948_v1  ;;  %6300 = vmatpush1.bf16.msra.mxu0 %v8951_v4  ;;  %v8998_v1 = vld [vmem:[%s10846_s13 + $0xa04] ss:$304 sps:$4 sm:$0xff]   ;;  %v9001_v4 = vld [vmem:[%s10846_s13 + $0xa0c] ss:$304 sps:$4 sm:$0xff]  }
 0x314   : > { %6260 = vmatprep.subr.bf16.mxu1 %v8956_v10  ;;  %6301 = vmatprep.subr.bf16.mxu0 %v8959_v11  ;;  %v8996_v10 = vld [vmem:[%s10846_s13 + $0xa00] ss:$304 sps:$4 sm:$0xff]   ;;  %v8999_v11 = vld [vmem:[%s10846_s13 + $0xa08] ss:$304 sps:$4 sm:$0xff]  }
 0x315   : > { %v5710_v21 = vpop.f32.mrb[0].mxu1  ;;  %v5751_v22 = vpop.f32.mrb[4].mxu0 }
 0x316   : > { %v5711_v23 = vadd.f32 %v5710_v21, %v5299_v12  ;;  %v5752_v24 = vadd.f32 %v5751_v22, %v5307_v13  ;;  %v5712_v25 = vpop.f32.mrb[1].mxu1  ;;  %v5753_v26 = vpop.f32.mrb[5].mxu0  ;;  %v11262_v12 = vsub.s32 5, %v11171_v60  ;;  %v11265_v13 = vsub.s32 7, %v11171_v60  ;;  %v9010_v21 = vld [vmem:[%s10846_s13 + $0xec4] ss:$304 sps:$4 sm:$0xff]  }
 0x317   : > { %v5713_v27 = vadd.f32 %v5712_v25, %v5303_v16  ;;  %v5754_v29 = vadd.f32 %v5753_v26, %v5311_v18  ;;  %6261 = vmatpush1.bf16.msra.mxu1 %v8954_v14  ;;  %6302 = vmatpush1.bf16.msra.mxu0 %v8957_v15  ;;  %v5714_v30 = vpop.f32.mrb[2].mxu1  ;;  %v5755_v31 = vpop.f32.mrb[6].mxu0  ;;  %v9004_v14 = vld [vmem:[%s10846_s13 + $0xc64] ss:$304 sps:$4 sm:$0xff]   ;;  %v9007_v15 = vld [vmem:[%s10846_s13 + $0xc6c] ss:$304 sps:$4 sm:$0xff]   ;;  %v5315_v16 = vrot.slane %v11192_v5, %v11254_v7 }
 0x318   : > { %v5715_v35 = vpop.f32.mrb[3].mxu1  ;;  %v5756_v36 = vpop.f32.mrb[7].mxu0  ;;  %6262 = vmatprep.subr.bf16.mxu1 %v8962_v19  ;;  %6303 = vmatprep.subr.bf16.mxu0 %v8965_v20  ;;  %v5319_v18 = vrot.slane %v11192_v5, %v11262_v12  ;;  %v5327_v60 = vrot.slane %v11192_v5, %v11265_v13  ;;  %v9002_v19 = vld [vmem:[%s10846_s13 + $0xc60] ss:$304 sps:$4 sm:$0xff]   ;;  %v9005_v20 = vld [vmem:[%s10846_s13 + $0xc68] ss:$304 sps:$4 sm:$0xff]  }
 0x319   : > { %v7310_v39 = vcombine.low %v5711_v23, %v5713_v27  ;;  %v7311_v40 = vcombine.low %v5752_v24, %v5754_v29  ;;  %v9013_v22 = vld [vmem:[%s10846_s13 + $0xecc] ss:$304 sps:$4 sm:$0xff]   ;;  %v9011_v35 = vld [vmem:[%s10846_s13 + $0xec8] ss:$304 sps:$4 sm:$0xff]  }
 0x31b   : > { %v11222_v41 = vrot.slane %v7310_v39, %v11215_v28  ;;  %v11225_v43 = vrot.slane %v7311_v40, %v11215_v28  ;;  %6263 = vmatpush1.bf16.msra.mxu1 %v8960_v32  ;;  %6304 = vmatpush1.bf16.msra.mxu0 %v8963_v33  ;;  %v9008_v33 = vld [vmem:[%s10846_s13 + $0xec0] ss:$304 sps:$4 sm:$0xff]   ;;  %v9019_v39 = vld [vmem:[%s10846_s13 + $0x112c] ss:$304 sps:$4 sm:$0xff]  }
 0x31c   : > { %6264 = vmatprep.subr.bf16.mxu1 %v8968_v37  ;;  %6305 = vmatprep.subr.bf16.mxu0 %v8971_v38  ;;  %v9016_v38 = vld [vmem:[%s10846_s13 + $0x1124] ss:$304 sps:$4 sm:$0xff]  }
 0x31d   : > { %v7342_v48 = vcombine.low %v11222_v41, %v11225_v43  ;;  %v9028_v41 = vld [vmem:[%s10846_s13 + $0x2f4] ss:$304 sps:$4 sm:$0xff]   ;;  %v9031_v43 = vld [vmem:[%s10846_s13 + $0x2fc] ss:$304 sps:$4 sm:$0xff]  }
 0x31f   : > { %6265 = vmatpush1.bf16.msra.mxu1 %v8966_v44  ;;  %6306 = vmatpush1.bf16.msra.mxu0 %v8969_v45 }
 0x320   : > { %6332 = vmatprep.subr.bf16.mxu1 %v8974_v46  ;;  %6373 = vmatprep.subr.bf16.mxu0 %v8977_v47  ;;  %v9014_v47 = vld [vmem:[%s10846_s13 + $0x1120] ss:$304 sps:$4 sm:$0xff]  }
 0x322   : > { %6283 = vmatmul.mubr.bf16.vlgmr.msra.gmra.mrb[28].mxu1 %v10934_v42  ;;  %6324 = vmatmul.mubr.bf16.vlgmr.msra.gmra.mrb[32].mxu0 %v10934_v42 }
 0x323   : > { %6333 = vmatpush1.bf16.msra.mxu1 %v8972_v49  ;;  %6374 = vmatpush1.bf16.msra.mxu0 %v8975_v50  ;;  %v9017_v49 = vld [vmem:[%s10846_s13 + $0x1128] ss:$304 sps:$4 sm:$0xff]   ;;  %v9022_v50 = vld [vmem:[%s10846_s13 + $0x94] ss:$304 sps:$4 sm:$0xff]  }
 0x324   : > { %6334 = vmatprep.subr.bf16.mxu1 %v8980_v51  ;;  %6375 = vmatprep.subr.bf16.mxu0 %v8983_v52  ;;  %v9025_v51 = vld [vmem:[%s10846_s13 + $0x9c] ss:$304 sps:$4 sm:$0xff]  }
 0x325   : > { %6364 = vmatprep.mubr.bf16.mxu1 %v9527_v34  ;;  %6405 = vmatprep.mubr.bf16.mxu0 %v9527_v34 }
 0x327   : > { %6335 = vmatpush1.bf16.msra.mxu1 %v8978_v53  ;;  %6376 = vmatpush1.bf16.msra.mxu0 %v8981_v54  ;;  %v7350_v53 = vrot.slane %v7342_v48, %v11215_v28 }
 0x328   : > { %6336 = vmatprep.subr.bf16.mxu1 %v8986_v56  ;;  %6377 = vmatprep.subr.bf16.mxu0 %v8989_v57  ;;  %v9020_v56 = vld [vmem:[%s10846_s13 + $0x90] ss:$304 sps:$4 sm:$0xff]   ;;  %v9023_v57 = vld [vmem:[%s10846_s13 + $0x98] ss:$304 sps:$4 sm:$0xff]  }
 0x32b   : > { %6337 = vmatpush1.bf16.msra.mxu1 %v8984_v58  ;;  %6378 = vmatpush1.bf16.msra.mxu0 %v8987_v59  ;;  %v9026_v58 = vld [vmem:[%s10846_s13 + $0x2f0] ss:$304 sps:$4 sm:$0xff]   ;;  %v9029_v59 = vld [vmem:[%s10846_s13 + $0x2f8] ss:$304 sps:$4 sm:$0xff]  }
 0x32c   : > { %6338 = vmatprep.subr.bf16.mxu1 %v8992_v61  ;;  %6379 = vmatprep.subr.bf16.mxu0 %v8995_v62  ;;  %v9034_v61 = vld [vmem:[%s10846_s13 + $0x554] ss:$304 sps:$4 sm:$0xff]   ;;  %v9037_v62 = vld [vmem:[%s10846_s13 + $0x55c] ss:$304 sps:$4 sm:$0xff]  }
 0x32f   : > { %6339 = vmatpush1.bf16.msra.mxu1 %v8990_v63  ;;  %6380 = vmatpush1.bf16.msra.mxu0 %v8993_v0  ;;  %v9032_v63 = vld [vmem:[%s10846_s13 + $0x550] ss:$304 sps:$4 sm:$0xff]   ;;  %v9035_v0 = vld [vmem:[%s10846_s13 + $0x558] ss:$304 sps:$4 sm:$0xff]  }
 0x330   : > { %6340 = vmatprep.subr.bf16.mxu1 %v8998_v1  ;;  %6381 = vmatprep.subr.bf16.mxu0 %v9001_v4  ;;  %v9040_v1 = vld [vmem:[%s10846_s13 + $0x7b4] ss:$304 sps:$4 sm:$0xff]   ;;  %v9043_v4 = vld [vmem:[%s10846_s13 + $0x7bc] ss:$304 sps:$4 sm:$0xff]  }
 0x333   : > { %6341 = vmatpush1.bf16.msra.mxu1 %v8996_v10  ;;  %6382 = vmatpush1.bf16.msra.mxu0 %v8999_v11  ;;  %v9038_v10 = vld [vmem:[%s10846_s13 + $0x7b0] ss:$304 sps:$4 sm:$0xff]   ;;  %v9041_v11 = vld [vmem:[%s10846_s13 + $0x7b8] ss:$304 sps:$4 sm:$0xff]  }
 0x334   : > { %6342 = vmatprep.subr.bf16.mxu1 %v9004_v14  ;;  %6383 = vmatprep.subr.bf16.mxu0 %v9007_v15  ;;  %v9046_v14 = vld [vmem:[%s10846_s13 + $0xa14] ss:$304 sps:$4 sm:$0xff]   ;;  %v9049_v15 = vld [vmem:[%s10846_s13 + $0xa1c] ss:$304 sps:$4 sm:$0xff]  }
 0x335   : > { %v5792_v23 = vpop.f32.mrb[4].mxu1  ;;  %v5833_v24 = vpop.f32.mrb[8].mxu0 }
 0x336   : > { %v5793_v25 = vadd.f32 %v5792_v23, %v5315_v16  ;;  %v5834_v26 = vadd.f32 %v5833_v24, %v5323_v17  ;;  %v5794_v27 = vpop.f32.mrb[5].mxu1  ;;  %v5835_v29 = vpop.f32.mrb[9].mxu0  ;;  %v9044_v16 = vld [vmem:[%s10846_s13 + $0xa10] ss:$304 sps:$4 sm:$0xff]   ;;  %v9047_v17 = vld [vmem:[%s10846_s13 + $0xa18] ss:$304 sps:$4 sm:$0xff]  }
 0x337   : > { %v5795_v30 = vadd.f32 %v5794_v27, %v5319_v18  ;;  %v5836_v31 = vadd.f32 %v5835_v29, %v5327_v60  ;;  %v5796_v32 = vpop.f32.mrb[6].mxu1  ;;  %v5837_v5 = vpop.f32.mrb[10].mxu0  ;;  %6343 = vmatpush1.bf16.msra.mxu1 %v9002_v19  ;;  %6384 = vmatpush1.bf16.msra.mxu0 %v9005_v20  ;;  %v11326_v18 = vld [vmem:[%s11181_s30 + $0x8] sm:$0xff]  ;;  %v9052_v60 = vld [vmem:[%s10846_s13 + $0xc74] ss:$304 sps:$4 sm:$0xff]  }
 0x338   : > { %v5797_v36 = vpop.f32.mrb[7].mxu1  ;;  %v5838_v37 = vpop.f32.mrb[11].mxu0  ;;  %6344 = vmatprep.subr.bf16.mxu1 %v9010_v21  ;;  %6385 = vmatprep.subr.bf16.mxu0 %v9013_v22  ;;  %v9055_v19 = vld [vmem:[%s10846_s13 + $0xc7c] ss:$304 sps:$4 sm:$0xff]   ;;  %v5331_v20 = vrot.slane %v11326_v18, %v11185_v2  ;;  %v5339_v21 = vrot.slane %v11326_v18, %v11188_v3  ;;  %v5335_v22 = vrot.slane %v11326_v18, %v11195_v6  ;;  %v9050_v24 = vld [vmem:[%s10846_s13 + $0xc70] ss:$304 sps:$4 sm:$0xff]  }
 0x339   : > { %v7312_v40 = vcombine.low %v5793_v25, %v5795_v30  ;;  %v7313_v44 = vcombine.low %v5834_v26, %v5836_v31  ;;  %v5343_v23 = vrot.slane %v11326_v18, %v11198_v9  ;;  %v9053_v25 = vld [vmem:[%s10846_s13 + $0xc78] ss:$304 sps:$4 sm:$0xff]   ;;  %v9058_v26 = vld [vmem:[%s10846_s13 + $0xed4] ss:$304 sps:$4 sm:$0xff]   ;;  %v9061_v27 = vld [vmem:[%s10846_s13 + $0xedc] ss:$304 sps:$4 sm:$0xff]  }
 0x33b   : > { %v7334_v45 = vrot.slane %v7312_v40, %v11215_v28  ;;  %v7341_v46 = vrot.slane %v7313_v44, %v11215_v28  ;;  %6345 = vmatpush1.bf16.msra.mxu1 %v9008_v33  ;;  %6386 = vmatpush1.bf16.msra.mxu0 %v9011_v35  ;;  %v9059_v40 = vld [vmem:[%s10846_s13 + $0xed8] ss:$304 sps:$4 sm:$0xff]  }
 0x33c   : > { %6346 = vmatprep.subr.bf16.mxu1 %v9016_v38  ;;  %6387 = vmatprep.subr.bf16.mxu0 %v9019_v39  ;;  %v9056_v39 = vld [vmem:[%s10846_s13 + $0xed0] ss:$304 sps:$4 sm:$0xff]  }
 0x33d   : > { %v7343_v52 = vcombine.low %v7334_v45, %v7341_v46  ;;  %v9064_v46 = vld [vmem:[%s10846_s13 + $0x1134] ss:$304 sps:$4 sm:$0xff]  }
 0x33f   : > { %v7357_v54 = vrot.slane %v7343_v52, %v11215_v28  ;;  %6347 = vmatpush1.bf16.msra.mxu1 %v9014_v47  ;;  %6388 = vmatpush1.bf16.msra.mxu0 %v9017_v49  ;;  %v9067_v47 = vld [vmem:[%s10846_s13 + $0x113c] ss:$304 sps:$4 sm:$0xff]  }
 0x340   : > { %6414 = vmatprep.subr.bf16.mxu1 %v9022_v50  ;;  %6455 = vmatprep.subr.bf16.mxu0 %v9025_v51 }
 0x341   : > { %v7358_v48 = vcombine.low %v7350_v53, %v7357_v54  ;;  %v9062_v53 = vld [vmem:[%s10846_s13 + $0x1130] ss:$304 sps:$4 sm:$0xff]   ;;  %v9065_v54 = vld [vmem:[%s10846_s13 + $0x1138] ss:$304 sps:$4 sm:$0xff]  }
 0x342   : > { %6365 = vmatmul.mubr.bf16.vlgmr.msra.gmra.mrb[32].mxu1 %v10934_v42  ;;  %6406 = vmatmul.mubr.bf16.vlgmr.msra.gmra.mrb[36].mxu0 %v10934_v42 }
 0x343   : > { %7785 = vst [vmem:[%s11302_s11] sm:$0xff] %v7358_v48  ;;  %6415 = vmatpush1.bf16.msra.mxu1 %v9020_v56  ;;  %6456 = vmatpush1.bf16.msra.mxu0 %v9023_v57  ;;  %v9070_v56 = vld [vmem:[%s10846_s13 + $0xa4] ss:$304 sps:$4 sm:$0xff]   ;;  %v9073_v57 = vld [vmem:[%s10846_s13 + $0xac] ss:$304 sps:$4 sm:$0xff]   ;;  %v9071_v48 = vld [vmem:[%s10846_s13 + $0xa8] ss:$304 sps:$4 sm:$0xff]  }
 0x344   : > { %6416 = vmatprep.subr.bf16.mxu1 %v9028_v41  ;;  %6457 = vmatprep.subr.bf16.mxu0 %v9031_v43  ;;  %v9068_v43 = vld [vmem:[%s10846_s13 + $0xa0] ss:$304 sps:$4 sm:$0xff]  }
 0x345   : > { %6446 = vmatprep.mubr.bf16.mxu1 %v9527_v34  ;;  %6487 = vmatprep.mubr.bf16.mxu0 %v9527_v34 }
 0x347   : > { %6417 = vmatpush1.bf16.msra.mxu1 %v9026_v58  ;;  %6458 = vmatpush1.bf16.msra.mxu0 %v9029_v59  ;;  %v9076_v58 = vld [vmem:[%s10846_s13 + $0x304] ss:$304 sps:$4 sm:$0xff]   ;;  %v9079_v59 = vld [vmem:[%s10846_s13 + $0x30c] ss:$304 sps:$4 sm:$0xff]  }
 0x348   : > { %6418 = vmatprep.subr.bf16.mxu1 %v9034_v61  ;;  %6459 = vmatprep.subr.bf16.mxu0 %v9037_v62  ;;  %v9074_v61 = vld [vmem:[%s10846_s13 + $0x300] ss:$304 sps:$4 sm:$0xff]   ;;  %v9077_v62 = vld [vmem:[%s10846_s13 + $0x308] ss:$304 sps:$4 sm:$0xff]  }
 0x34b   : > { %6419 = vmatpush1.bf16.msra.mxu1 %v9032_v63  ;;  %6460 = vmatpush1.bf16.msra.mxu0 %v9035_v0  ;;  %v9082_v63 = vld [vmem:[%s10846_s13 + $0x564] ss:$304 sps:$4 sm:$0xff]   ;;  %v9085_v0 = vld [vmem:[%s10846_s13 + $0x56c] ss:$304 sps:$4 sm:$0xff]  }
 0x34c   : > { %6420 = vmatprep.subr.bf16.mxu1 %v9040_v1  ;;  %6461 = vmatprep.subr.bf16.mxu0 %v9043_v4  ;;  %v9080_v1 = vld [vmem:[%s10846_s13 + $0x560] ss:$304 sps:$4 sm:$0xff]   ;;  %v9083_v4 = vld [vmem:[%s10846_s13 + $0x568] ss:$304 sps:$4 sm:$0xff]  }
 0x34f   : > { %6421 = vmatpush1.bf16.msra.mxu1 %v9038_v10  ;;  %6462 = vmatpush1.bf16.msra.mxu0 %v9041_v11  ;;  %v9088_v10 = vld [vmem:[%s10846_s13 + $0x7c4] ss:$304 sps:$4 sm:$0xff]   ;;  %v9091_v11 = vld [vmem:[%s10846_s13 + $0x7cc] ss:$304 sps:$4 sm:$0xff]  }
 0x350   : > { %6422 = vmatprep.subr.bf16.mxu1 %v9046_v14  ;;  %6463 = vmatprep.subr.bf16.mxu0 %v9049_v15  ;;  %v9086_v14 = vld [vmem:[%s10846_s13 + $0x7c0] ss:$304 sps:$4 sm:$0xff]   ;;  %v9089_v15 = vld [vmem:[%s10846_s13 + $0x7c8] ss:$304 sps:$4 sm:$0xff]  }
 0x353   : > { %6423 = vmatpush1.bf16.msra.mxu1 %v9044_v16  ;;  %6464 = vmatpush1.bf16.msra.mxu0 %v9047_v17  ;;  %v9094_v16 = vld [vmem:[%s10846_s13 + $0xa24] ss:$304 sps:$4 sm:$0xff]   ;;  %v9097_v17 = vld [vmem:[%s10846_s13 + $0xa2c] ss:$304 sps:$4 sm:$0xff]  }
 0x354   : > { %6424 = vmatprep.subr.bf16.mxu1 %v9052_v60  ;;  %6465 = vmatprep.subr.bf16.mxu0 %v9055_v19  ;;  %v9092_v60 = vld [vmem:[%s10846_s13 + $0xa20] ss:$304 sps:$4 sm:$0xff]   ;;  %v9095_v19 = vld [vmem:[%s10846_s13 + $0xa28] ss:$304 sps:$4 sm:$0xff]  }
 0x355   : > { %v5874_v29 = vpop.f32.mrb[8].mxu1  ;;  %v5915_v30 = vpop.f32.mrb[12].mxu0 }
 0x356   : > { %v5875_v31 = vadd.f32 %v5874_v29, %v5331_v20  ;;  %v5916_v32 = vadd.f32 %v5915_v30, %v5339_v21  ;;  %v5876_v5 = vpop.f32.mrb[9].mxu1  ;;  %v5917_v33 = vpop.f32.mrb[13].mxu0  ;;  %v9100_v20 = vld [vmem:[%s10846_s13 + $0xc84] ss:$304 sps:$4 sm:$0xff]   ;;  %v9103_v21 = vld [vmem:[%s10846_s13 + $0xc8c] ss:$304 sps:$4 sm:$0xff]  }
 0x357   : > { %v5877_v35 = vadd.f32 %v5876_v5, %v5335_v22  ;;  %v5918_v36 = vadd.f32 %v5917_v33, %v5343_v23  ;;  %v5878_v37 = vpop.f32.mrb[10].mxu1  ;;  %v5919_v38 = vpop.f32.mrb[14].mxu0  ;;  %6425 = vmatpush1.bf16.msra.mxu1 %v9050_v24  ;;  %6466 = vmatpush1.bf16.msra.mxu0 %v9053_v25  ;;  %v5347_v22 = vrot.slane %v11326_v18, %v11254_v7  ;;  %v9106_v29 = vld [vmem:[%s10846_s13 + $0xee4] ss:$304 sps:$4 sm:$0xff]   ;;  %v9109_v30 = vld [vmem:[%s10846_s13 + $0xeec] ss:$304 sps:$4 sm:$0xff]  }
 0x358   : > { %v5879_v44 = vpop.f32.mrb[11].mxu1  ;;  %v5920_v45 = vpop.f32.mrb[15].mxu0  ;;  %6426 = vmatprep.subr.bf16.mxu1 %v9058_v26  ;;  %6467 = vmatprep.subr.bf16.mxu0 %v9061_v27  ;;  %v5355_v23 = vrot.slane %v11326_v18, %v11257_v8  ;;  %v5351_v24 = vrot.slane %v11326_v18, %v11262_v12  ;;  %v5359_v25 = vrot.slane %v11326_v18, %v11265_v13  ;;  %v9098_v26 = vld [vmem:[%s10846_s13 + $0xc80] ss:$304 sps:$4 sm:$0xff]   ;;  %v9101_v27 = vld [vmem:[%s10846_s13 + $0xc88] ss:$304 sps:$4 sm:$0xff]  }
 0x359   : > { %v7359_v49 = vcombine.low %v5875_v31, %v5877_v35  ;;  %v7360_v50 = vcombine.low %v5916_v32, %v5918_v36  ;;  %v9107_v44 = vld [vmem:[%s10846_s13 + $0xee8] ss:$304 sps:$4 sm:$0xff]  }
 0x35b   : > { %v11347_v51 = vrot.slane %v7359_v49, %v11215_v28  ;;  %v11350_v52 = vrot.slane %v7360_v50, %v11215_v28  ;;  %6427 = vmatpush1.bf16.msra.mxu1 %v9056_v39  ;;  %6468 = vmatpush1.bf16.msra.mxu0 %v9059_v40  ;;  %v9104_v40 = vld [vmem:[%s10846_s13 + $0xee0] ss:$304 sps:$4 sm:$0xff]   ;;  %v9115_v49 = vld [vmem:[%s10846_s13 + $0x114c] ss:$304 sps:$4 sm:$0xff]  }
 0x35c   : > { %6428 = vmatprep.subr.bf16.mxu1 %v9064_v46  ;;  %6469 = vmatprep.subr.bf16.mxu0 %v9067_v47  ;;  %v9112_v47 = vld [vmem:[%s10846_s13 + $0x1144] ss:$304 sps:$4 sm:$0xff]  }
 0x35d   : > { %v7391_v41 = vcombine.low %v11347_v51, %v11350_v52  ;;  %v9122_v51 = vld [vmem:[%s10846_s13 + $0x310] ss:$304 sps:$4 sm:$0xff]   ;;  %v9125_v52 = vld [vmem:[%s10846_s13 + $0x318] ss:$304 sps:$4 sm:$0xff]  }
 0x35f   : > { %6429 = vmatpush1.bf16.msra.mxu1 %v9062_v53  ;;  %6470 = vmatpush1.bf16.msra.mxu0 %v9065_v54 }
 0x360   : > { %6496 = vmatprep.subr.bf16.mxu1 %v9070_v56  ;;  %6537 = vmatprep.subr.bf16.mxu0 %v9073_v57  ;;  %v9110_v57 = vld [vmem:[%s10846_s13 + $0x1140] ss:$304 sps:$4 sm:$0xff]  }
 0x362   : > { %6447 = vmatmul.mubr.bf16.vlgmr.msra.gmra.mrb[36].mxu1 %v10934_v42  ;;  %6488 = vmatmul.mubr.bf16.vlgmr.msra.gmra.mrb[40].mxu0 %v10934_v42 }
 0x363   : > { %6497 = vmatpush1.bf16.msra.mxu1 %v9068_v43  ;;  %6538 = vmatpush1.bf16.msra.mxu0 %v9071_v48  ;;  %v9113_v43 = vld [vmem:[%s10846_s13 + $0x1148] ss:$304 sps:$4 sm:$0xff]   ;;  %v9118_v48 = vld [vmem:[%s10846_s13 + $0xb4] ss:$304 sps:$4 sm:$0xff]  }
 0x364   : > { %6498 = vmatprep.subr.bf16.mxu1 %v9076_v58  ;;  %6539 = vmatprep.subr.bf16.mxu0 %v9079_v59  ;;  %v9121_v58 = vld [vmem:[%s10846_s13 + $0xbc] ss:$304 sps:$4 sm:$0xff]  }
 0x365   : > { %6528 = vmatprep.mubr.bf16.mxu1 %v9527_v34  ;;  %6569 = vmatprep.mubr.bf16.mxu0 %v9527_v34 }
 0x367   : > { %6499 = vmatpush1.bf16.msra.mxu1 %v9074_v61  ;;  %6540 = vmatpush1.bf16.msra.mxu0 %v9077_v62  ;;  %v7399_v61 = vrot.slane %v7391_v41, %v11215_v28  ;;  %v9130_v41 = vld [vmem:[%s10846_s13 + $0x574] ss:$304 sps:$4 sm:$0xff]  }
 0x368   : > { %6500 = vmatprep.subr.bf16.mxu1 %v9082_v63  ;;  %6541 = vmatprep.subr.bf16.mxu0 %v9085_v0  ;;  %v9116_v63 = vld [vmem:[%s10846_s13 + $0xb0] ss:$304 sps:$4 sm:$0xff]   ;;  %v9119_v0 = vld [vmem:[%s10846_s13 + $0xb8] ss:$304 sps:$4 sm:$0xff]  }
 0x36b   : > { %6501 = vmatpush1.bf16.msra.mxu1 %v9080_v1  ;;  %6542 = vmatpush1.bf16.msra.mxu0 %v9083_v4  ;;  %v9124_v1 = vld [vmem:[%s10846_s13 + $0x314] ss:$304 sps:$4 sm:$0xff]   ;;  %v9127_v4 = vld [vmem:[%s10846_s13 + $0x31c] ss:$304 sps:$4 sm:$0xff]  }
 0x36c   : > { %6502 = vmatprep.subr.bf16.mxu1 %v9088_v10  ;;  %6543 = vmatprep.subr.bf16.mxu0 %v9091_v11  ;;  %v9133_v11 = vld [vmem:[%s10846_s13 + $0x57c] ss:$304 sps:$4 sm:$0xff]  }
 0x36f   : > { %6503 = vmatpush1.bf16.msra.mxu1 %v9086_v14  ;;  %6544 = vmatpush1.bf16.msra.mxu0 %v9089_v15  ;;  %v9128_v14 = vld [vmem:[%s10846_s13 + $0x570] ss:$304 sps:$4 sm:$0xff]   ;;  %v9131_v15 = vld [vmem:[%s10846_s13 + $0x578] ss:$304 sps:$4 sm:$0xff]  }
 0x370   : > { %6504 = vmatprep.subr.bf16.mxu1 %v9094_v16  ;;  %6545 = vmatprep.subr.bf16.mxu0 %v9097_v17  ;;  %v9136_v16 = vld [vmem:[%s10846_s13 + $0x7d4] ss:$304 sps:$4 sm:$0xff]   ;;  %v9139_v17 = vld [vmem:[%s10846_s13 + $0x7dc] ss:$304 sps:$4 sm:$0xff]  }
 0x373   : > { %6505 = vmatpush1.bf16.msra.mxu1 %v9092_v60  ;;  %6546 = vmatpush1.bf16.msra.mxu0 %v9095_v19  ;;  %v9134_v60 = vld [vmem:[%s10846_s13 + $0x7d0] ss:$304 sps:$4 sm:$0xff]   ;;  %v9137_v19 = vld [vmem:[%s10846_s13 + $0x7d8] ss:$304 sps:$4 sm:$0xff]  }
 0x374   : > { %6506 = vmatprep.subr.bf16.mxu1 %v9100_v20  ;;  %6547 = vmatprep.subr.bf16.mxu0 %v9103_v21  ;;  %v9142_v20 = vld [vmem:[%s10846_s13 + $0xa34] ss:$304 sps:$4 sm:$0xff]   ;;  %v9145_v21 = vld [vmem:[%s10846_s13 + $0xa3c] ss:$304 sps:$4 sm:$0xff]  }
 0x375   : > { %v5956_v31 = vpop.f32.mrb[12].mxu1  ;;  %v5997_v32 = vpop.f32.mrb[16].mxu0 }
 0x376   : > { %v5957_v5 = vadd.f32 %v5956_v31, %v5347_v22  ;;  %v5998_v33 = vadd.f32 %v5997_v32, %v5355_v23  ;;  %v5958_v35 = vpop.f32.mrb[13].mxu1  ;;  %v5999_v36 = vpop.f32.mrb[17].mxu0  ;;  %v9140_v22 = vld [vmem:[%s10846_s13 + $0xa30] ss:$304 sps:$4 sm:$0xff]   ;;  %v9143_v23 = vld [vmem:[%s10846_s13 + $0xa38] ss:$304 sps:$4 sm:$0xff]  }
 0x377   : > { %v5959_v37 = vadd.f32 %v5958_v35, %v5351_v24  ;;  %v6000_v38 = vadd.f32 %v5999_v36, %v5359_v25  ;;  %v5960_v39 = vpop.f32.mrb[14].mxu1  ;;  %v6001_v18 = vpop.f32.mrb[18].mxu0  ;;  %6507 = vmatpush1.bf16.msra.mxu1 %v9098_v26  ;;  %6548 = vmatpush1.bf16.msra.mxu0 %v9101_v27  ;;  %v11433_v24 = vld [vmem:[%s11181_s30 + $0x10] sm:$0xff]  ;;  %v9151_v26 = vld [vmem:[%s10846_s13 + $0xc9c] ss:$304 sps:$4 sm:$0xff]  }
 0x378   : > { %v5961_v45 = vpop.f32.mrb[15].mxu1  ;;  %v6002_v46 = vpop.f32.mrb[19].mxu0  ;;  %6508 = vmatprep.subr.bf16.mxu1 %v9106_v29  ;;  %6549 = vmatprep.subr.bf16.mxu0 %v9109_v30  ;;  %v9148_v25 = vld [vmem:[%s10846_s13 + $0xc94] ss:$304 sps:$4 sm:$0xff]   ;;  %v5363_v27 = vrot.slane %v11433_v24, %v11185_v2  ;;  %v5371_v29 = vrot.slane %v11433_v24, %v11188_v3  ;;  %v5367_v30 = vrot.slane %v11433_v24, %v11195_v6  ;;  %v9146_v32 = vld [vmem:[%s10846_s13 + $0xc90] ss:$304 sps:$4 sm:$0xff]  }
 0x379   : > { %v7361_v50 = vcombine.low %v5957_v5, %v5959_v37  ;;  %v7362_v53 = vcombine.low %v5998_v33, %v6000_v38  ;;  %v5375_v31 = vrot.slane %v11433_v24, %v11198_v9  ;;  %v9149_v5 = vld [vmem:[%s10846_s13 + $0xc98] ss:$304 sps:$4 sm:$0xff]   ;;  %v9154_v33 = vld [vmem:[%s10846_s13 + $0xef4] ss:$304 sps:$4 sm:$0xff]   ;;  %v9157_v35 = vld [vmem:[%s10846_s13 + $0xefc] ss:$304 sps:$4 sm:$0xff]  }
 0x37b   : > { %v7383_v54 = vrot.slane %v7361_v50, %v11215_v28  ;;  %v7390_v56 = vrot.slane %v7362_v53, %v11215_v28  ;;  %6509 = vmatpush1.bf16.msra.mxu1 %v9104_v40  ;;  %6550 = vmatpush1.bf16.msra.mxu0 %v9107_v44  ;;  %v9155_v50 = vld [vmem:[%s10846_s13 + $0xef8] ss:$304 sps:$4 sm:$0xff]  }
 0x37c   : > { %6510 = vmatprep.subr.bf16.mxu1 %v9112_v47  ;;  %6551 = vmatprep.subr.bf16.mxu0 %v9115_v49  ;;  %v9152_v49 = vld [vmem:[%s10846_s13 + $0xef0] ss:$304 sps:$4 sm:$0xff]  }
 0x37d   : > { %v7392_v59 = vcombine.low %v7383_v54, %v7390_v56  ;;  %v9160_v56 = vld [vmem:[%s10846_s13 + $0x1154] ss:$304 sps:$4 sm:$0xff]  }
 0x37f   : > { %v7406_v62 = vrot.slane %v7392_v59, %v11215_v28  ;;  %6511 = vmatpush1.bf16.msra.mxu1 %v9110_v57  ;;  %6552 = vmatpush1.bf16.msra.mxu0 %v9113_v43  ;;  %v9163_v57 = vld [vmem:[%s10846_s13 + $0x115c] ss:$304 sps:$4 sm:$0xff]  }
 0x380   : > { %6578 = vmatprep.subr.bf16.mxu1 %v9118_v48  ;;  %6619 = vmatprep.subr.bf16.mxu0 %v9121_v58 }
 0x381   : > { %v7407_v10 = vcombine.low %v7399_v61, %v7406_v62  ;;  %v9158_v61 = vld [vmem:[%s10846_s13 + $0x1150] ss:$304 sps:$4 sm:$0xff]   ;;  %v9161_v62 = vld [vmem:[%s10846_s13 + $0x1158] ss:$304 sps:$4 sm:$0xff]  }
 0x382   : > { %6529 = vmatmul.mubr.bf16.vlgmr.msra.gmra.mrb[40].mxu1 %v10934_v42  ;;  %6570 = vmatmul.mubr.bf16.vlgmr.msra.gmra.mrb[44].mxu0 %v10934_v42 }
 0x383   : > { %7786 = vst [vmem:[%s11302_s11 + $0x8] sm:$0xff] %v7407_v10  ;;  %6579 = vmatpush1.bf16.msra.mxu1 %v9116_v63  ;;  %6620 = vmatpush1.bf16.msra.mxu0 %v9119_v0  ;;  %v9166_v63 = vld [vmem:[%s10846_s13 + $0xc4] ss:$304 sps:$4 sm:$0xff]   ;;  %v9169_v0 = vld [vmem:[%s10846_s13 + $0xcc] ss:$304 sps:$4 sm:$0xff]  }
 0x384   : > { %6580 = vmatprep.subr.bf16.mxu1 %v9124_v1  ;;  %6621 = vmatprep.subr.bf16.mxu0 %v9127_v4  ;;  %v9164_v4 = vld [vmem:[%s10846_s13 + $0xc0] ss:$304 sps:$4 sm:$0xff]   ;;  %v9167_v10 = vld [vmem:[%s10846_s13 + $0xc8] ss:$304 sps:$4 sm:$0xff]  }
 0x385   : > { %6610 = vmatprep.mubr.bf16.mxu1 %v9527_v34  ;;  %6651 = vmatprep.mubr.bf16.mxu0 %v9527_v34 }
 0x387   : > { %6581 = vmatpush1.bf16.msra.mxu1 %v9122_v51  ;;  %6622 = vmatpush1.bf16.msra.mxu0 %v9125_v52  ;;  %v9172_v51 = vld [vmem:[%s10846_s13 + $0x324] ss:$304 sps:$4 sm:$0xff]   ;;  %v9175_v52 = vld [vmem:[%s10846_s13 + $0x32c] ss:$304 sps:$4 sm:$0xff]  }
 0x388   : > { %6582 = vmatprep.subr.bf16.mxu1 %v9130_v41  ;;  %6623 = vmatprep.subr.bf16.mxu0 %v9133_v11  ;;  %v9170_v41 = vld [vmem:[%s10846_s13 + $0x320] ss:$304 sps:$4 sm:$0xff]   ;;  %v9173_v11 = vld [vmem:[%s10846_s13 + $0x328] ss:$304 sps:$4 sm:$0xff]  }
 0x38b   : > { %6583 = vmatpush1.bf16.msra.mxu1 %v9128_v14  ;;  %6624 = vmatpush1.bf16.msra.mxu0 %v9131_v15  ;;  %v9178_v14 = vld [vmem:[%s10846_s13 + $0x584] ss:$304 sps:$4 sm:$0xff]   ;;  %v9181_v15 = vld [vmem:[%s10846_s13 + $0x58c] ss:$304 sps:$4 sm:$0xff]  }
 0x38c   : > { %6584 = vmatprep.subr.bf16.mxu1 %v9136_v16  ;;  %6625 = vmatprep.subr.bf16.mxu0 %v9139_v17  ;;  %v9176_v16 = vld [vmem:[%s10846_s13 + $0x580] ss:$304 sps:$4 sm:$0xff]   ;;  %v9179_v17 = vld [vmem:[%s10846_s13 + $0x588] ss:$304 sps:$4 sm:$0xff]  }
 0x38f   : > { %6585 = vmatpush1.bf16.msra.mxu1 %v9134_v60  ;;  %6626 = vmatpush1.bf16.msra.mxu0 %v9137_v19  ;;  %v9184_v60 = vld [vmem:[%s10846_s13 + $0x7e4] ss:$304 sps:$4 sm:$0xff]   ;;  %v9187_v19 = vld [vmem:[%s10846_s13 + $0x7ec] ss:$304 sps:$4 sm:$0xff]  }
 0x390   : > { %6586 = vmatprep.subr.bf16.mxu1 %v9142_v20  ;;  %6627 = vmatprep.subr.bf16.mxu0 %v9145_v21  ;;  %v9182_v20 = vld [vmem:[%s10846_s13 + $0x7e0] ss:$304 sps:$4 sm:$0xff]   ;;  %v9185_v21 = vld [vmem:[%s10846_s13 + $0x7e8] ss:$304 sps:$4 sm:$0xff]  }
 0x393   : > { %6587 = vmatpush1.bf16.msra.mxu1 %v9140_v22  ;;  %6628 = vmatpush1.bf16.msra.mxu0 %v9143_v23  ;;  %v9190_v22 = vld [vmem:[%s10846_s13 + $0xa44] ss:$304 sps:$4 sm:$0xff]   ;;  %v9193_v23 = vld [vmem:[%s10846_s13 + $0xa4c] ss:$304 sps:$4 sm:$0xff]  }
 0x394   : > { %6588 = vmatprep.subr.bf16.mxu1 %v9148_v25  ;;  %6629 = vmatprep.subr.bf16.mxu0 %v9151_v26  ;;  %v9188_v25 = vld [vmem:[%s10846_s13 + $0xa40] ss:$304 sps:$4 sm:$0xff]   ;;  %v9191_v26 = vld [vmem:[%s10846_s13 + $0xa48] ss:$304 sps:$4 sm:$0xff]  }
 0x395   : > { %v6038_v36 = vpop.f32.mrb[16].mxu1  ;;  %v6079_v37 = vpop.f32.mrb[20].mxu0 }
 0x396   : > { %v6039_v38 = vadd.f32 %v6038_v36, %v5363_v27  ;;  %v6080_v39 = vadd.f32 %v6079_v37, %v5371_v29  ;;  %v6040_v18 = vpop.f32.mrb[17].mxu1  ;;  %v6081_v40 = vpop.f32.mrb[21].mxu0  ;;  %v9196_v27 = vld [vmem:[%s10846_s13 + $0xca4] ss:$304 sps:$4 sm:$0xff]   ;;  %v9199_v29 = vld [vmem:[%s10846_s13 + $0xcac] ss:$304 sps:$4 sm:$0xff]  }
 0x397   : > { %v6041_v44 = vadd.f32 %v6040_v18, %v5367_v30  ;;  %v6082_v45 = vadd.f32 %v6081_v40, %v5375_v31  ;;  %v6042_v46 = vpop.f32.mrb[18].mxu1  ;;  %v6083_v47 = vpop.f32.mrb[22].mxu0  ;;  %6589 = vmatpush1.bf16.msra.mxu1 %v9146_v32  ;;  %6630 = vmatpush1.bf16.msra.mxu0 %v9149_v5  ;;  %v5379_v30 = vrot.slane %v11433_v24, %v11254_v7  ;;  %v9202_v36 = vld [vmem:[%s10846_s13 + $0xf04] ss:$304 sps:$4 sm:$0xff]   ;;  %v9205_v37 = vld [vmem:[%s10846_s13 + $0xf0c] ss:$304 sps:$4 sm:$0xff]  }
 0x398   : > { %v6043_v53 = vpop.f32.mrb[19].mxu1  ;;  %v6084_v54 = vpop.f32.mrb[23].mxu0  ;;  %6590 = vmatprep.subr.bf16.mxu1 %v9154_v33  ;;  %6631 = vmatprep.subr.bf16.mxu0 %v9157_v35  ;;  %v5387_v31 = vrot.slane %v11433_v24, %v11257_v8  ;;  %v5383_v32 = vrot.slane %v11433_v24, %v11262_v12  ;;  %v5391_v5 = vrot.slane %v11433_v24, %v11265_v13  ;;  %v9194_v33 = vld [vmem:[%s10846_s13 + $0xca0] ss:$304 sps:$4 sm:$0xff]   ;;  %v9197_v35 = vld [vmem:[%s10846_s13 + $0xca8] ss:$304 sps:$4 sm:$0xff]  }
 0x399   : > { %v7408_v43 = vcombine.low %v6039_v38, %v6041_v44  ;;  %v7409_v48 = vcombine.low %v6080_v39, %v6082_v45  ;;  %v9203_v53 = vld [vmem:[%s10846_s13 + $0xf08] ss:$304 sps:$4 sm:$0xff]  }
 0x39b   : > { %v11454_v58 = vrot.slane %v7408_v43, %v11215_v28  ;;  %v11457_v59 = vrot.slane %v7409_v48, %v11215_v28  ;;  %6591 = vmatpush1.bf16.msra.mxu1 %v9152_v49  ;;  %6632 = vmatpush1.bf16.msra.mxu0 %v9155_v50  ;;  %v9200_v50 = vld [vmem:[%s10846_s13 + $0xf00] ss:$304 sps:$4 sm:$0xff]   ;;  %v9211_v43 = vld [vmem:[%s10846_s13 + $0x116c] ss:$304 sps:$4 sm:$0xff]  }
 0x39c   : > { %6592 = vmatprep.subr.bf16.mxu1 %v9160_v56  ;;  %6633 = vmatprep.subr.bf16.mxu0 %v9163_v57  ;;  %v9208_v57 = vld [vmem:[%s10846_s13 + $0x1164] ss:$304 sps:$4 sm:$0xff]  }
 0x39d   : > { %v7440_v1 = vcombine.low %v11454_v58, %v11457_v59  ;;  %v9218_v58 = vld [vmem:[%s10846_s13 + $0x330] ss:$304 sps:$4 sm:$0xff]   ;;  %v9221_v59 = vld [vmem:[%s10846_s13 + $0x338] ss:$304 sps:$4 sm:$0xff]  }
 0x39f   : > { %6593 = vmatpush1.bf16.msra.mxu1 %v9158_v61  ;;  %6634 = vmatpush1.bf16.msra.mxu0 %v9161_v62 }
 0x3a0   : > { %6660 = vmatprep.subr.bf16.mxu1 %v9166_v63  ;;  %6701 = vmatprep.subr.bf16.mxu0 %v9169_v0  ;;  %v9206_v0 = vld [vmem:[%s10846_s13 + $0x1160] ss:$304 sps:$4 sm:$0xff]  }
 0x3a2   : > { %6611 = vmatmul.mubr.bf16.vlgmr.msra.gmra.mrb[44].mxu1 %v10934_v42  ;;  %6652 = vmatmul.mubr.bf16.vlgmr.msra.gmra.mrb[48].mxu0 %v10934_v42 }
 0x3a3   : > { %6661 = vmatpush1.bf16.msra.mxu1 %v9164_v4  ;;  %6702 = vmatpush1.bf16.msra.mxu0 %v9167_v10  ;;  %v9209_v4 = vld [vmem:[%s10846_s13 + $0x1168] ss:$304 sps:$4 sm:$0xff]   ;;  %v9214_v10 = vld [vmem:[%s10846_s13 + $0xd4] ss:$304 sps:$4 sm:$0xff]  }
 0x3a4   : > { %6662 = vmatprep.subr.bf16.mxu1 %v9172_v51  ;;  %6703 = vmatprep.subr.bf16.mxu0 %v9175_v52  ;;  %v9217_v51 = vld [vmem:[%s10846_s13 + $0xdc] ss:$304 sps:$4 sm:$0xff]  }
 0x3a5   : > { %6692 = vmatprep.mubr.bf16.mxu1 %v9527_v34  ;;  %6733 = vmatprep.mubr.bf16.mxu0 %v9527_v34 }
 0x3a7   : > { %6663 = vmatpush1.bf16.msra.mxu1 %v9170_v41  ;;  %6704 = vmatpush1.bf16.msra.mxu0 %v9173_v11  ;;  %v7448_v41 = vrot.slane %v7440_v1, %v11215_v28  ;;  %v9226_v1 = vld [vmem:[%s10846_s13 + $0x594] ss:$304 sps:$4 sm:$0xff]  }
 0x3a8   : > { %6664 = vmatprep.subr.bf16.mxu1 %v9178_v14  ;;  %6705 = vmatprep.subr.bf16.mxu0 %v9181_v15  ;;  %v9212_v14 = vld [vmem:[%s10846_s13 + $0xd0] ss:$304 sps:$4 sm:$0xff]   ;;  %v9215_v15 = vld [vmem:[%s10846_s13 + $0xd8] ss:$304 sps:$4 sm:$0xff]  }
 0x3ab   : > { %6665 = vmatpush1.bf16.msra.mxu1 %v9176_v16  ;;  %6706 = vmatpush1.bf16.msra.mxu0 %v9179_v17  ;;  %v9220_v16 = vld [vmem:[%s10846_s13 + $0x334] ss:$304 sps:$4 sm:$0xff]   ;;  %v9223_v17 = vld [vmem:[%s10846_s13 + $0x33c] ss:$304 sps:$4 sm:$0xff]  }
 0x3ac   : > { %6666 = vmatprep.subr.bf16.mxu1 %v9184_v60  ;;  %6707 = vmatprep.subr.bf16.mxu0 %v9187_v19  ;;  %v9229_v19 = vld [vmem:[%s10846_s13 + $0x59c] ss:$304 sps:$4 sm:$0xff]  }
 0x3af   : > { %6667 = vmatpush1.bf16.msra.mxu1 %v9182_v20  ;;  %6708 = vmatpush1.bf16.msra.mxu0 %v9185_v21  ;;  %v9224_v20 = vld [vmem:[%s10846_s13 + $0x590] ss:$304 sps:$4 sm:$0xff]   ;;  %v9227_v21 = vld [vmem:[%s10846_s13 + $0x598] ss:$304 sps:$4 sm:$0xff]  }
 0x3b0   : > { %6668 = vmatprep.subr.bf16.mxu1 %v9190_v22  ;;  %6709 = vmatprep.subr.bf16.mxu0 %v9193_v23  ;;  %v9232_v22 = vld [vmem:[%s10846_s13 + $0x7f4] ss:$304 sps:$4 sm:$0xff]   ;;  %v9235_v23 = vld [vmem:[%s10846_s13 + $0x7fc] ss:$304 sps:$4 sm:$0xff]  }
 0x3b3   : > { %6669 = vmatpush1.bf16.msra.mxu1 %v9188_v25  ;;  %6710 = vmatpush1.bf16.msra.mxu0 %v9191_v26  ;;  %v9230_v25 = vld [vmem:[%s10846_s13 + $0x7f0] ss:$304 sps:$4 sm:$0xff]   ;;  %v9233_v26 = vld [vmem:[%s10846_s13 + $0x7f8] ss:$304 sps:$4 sm:$0xff]  }
 0x3b4   : > { %6670 = vmatprep.subr.bf16.mxu1 %v9196_v27  ;;  %6711 = vmatprep.subr.bf16.mxu0 %v9199_v29  ;;  %v9238_v27 = vld [vmem:[%s10846_s13 + $0xa54] ss:$304 sps:$4 sm:$0xff]   ;;  %v9241_v29 = vld [vmem:[%s10846_s13 + $0xa5c] ss:$304 sps:$4 sm:$0xff]  }
 0x3b5   : > { %v6120_v38 = vpop.f32.mrb[20].mxu1  ;;  %v6161_v39 = vpop.f32.mrb[24].mxu0 }
 0x3b6   : > { %v6121_v18 = vadd.f32 %v6120_v38, %v5379_v30  ;;  %v6162_v40 = vadd.f32 %v6161_v39, %v5387_v31  ;;  %v6122_v44 = vpop.f32.mrb[21].mxu1  ;;  %v6163_v45 = vpop.f32.mrb[25].mxu0  ;;  %v9236_v30 = vld [vmem:[%s10846_s13 + $0xa50] ss:$304 sps:$4 sm:$0xff]   ;;  %v9239_v31 = vld [vmem:[%s10846_s13 + $0xa58] ss:$304 sps:$4 sm:$0xff]  }
 0x3b7   : > { %v6123_v46 = vadd.f32 %v6122_v44, %v5383_v32  ;;  %v6164_v47 = vadd.f32 %v6163_v45, %v5391_v5  ;;  %v6124_v49 = vpop.f32.mrb[22].mxu1  ;;  %v6165_v24 = vpop.f32.mrb[26].mxu0  ;;  %6671 = vmatpush1.bf16.msra.mxu1 %v9194_v33  ;;  %6712 = vmatpush1.bf16.msra.mxu0 %v9197_v35  ;;  %v11540_v32 = vld [vmem:[%s11181_s30 + $0x18] sm:$0xff]  ;;  %v9244_v5 = vld [vmem:[%s10846_s13 + $0xcb4] ss:$304 sps:$4 sm:$0xff]  }
 0x3b8   : > { %v6125_v54 = vpop.f32.mrb[23].mxu1  ;;  %v6166_v56 = vpop.f32.mrb[27].mxu0  ;;  %6672 = vmatprep.subr.bf16.mxu1 %v9202_v36  ;;  %6713 = vmatprep.subr.bf16.mxu0 %v9205_v37  ;;  %v9247_v33 = vld [vmem:[%s10846_s13 + $0xcbc] ss:$304 sps:$4 sm:$0xff]   ;;  %v5395_v35 = vrot.slane %v11540_v32, %v11185_v2  ;;  %v5403_v36 = vrot.slane %v11540_v32, %v11188_v3  ;;  %v5399_v37 = vrot.slane %v11540_v32, %v11195_v6  ;;  %v9242_v39 = vld [vmem:[%s10846_s13 + $0xcb0] ss:$304 sps:$4 sm:$0xff]  }
 0x3b9   : > { %v7410_v48 = vcombine.low %v6121_v18, %v6123_v46  ;;  %v7411_v61 = vcombine.low %v6162_v40, %v6164_v47  ;;  %v5407_v38 = vrot.slane %v11540_v32, %v11198_v9  ;;  %v9245_v18 = vld [vmem:[%s10846_s13 + $0xcb8] ss:$304 sps:$4 sm:$0xff]   ;;  %v9250_v40 = vld [vmem:[%s10846_s13 + $0xf14] ss:$304 sps:$4 sm:$0xff]   ;;  %v9253_v44 = vld [vmem:[%s10846_s13 + $0xf1c] ss:$304 sps:$4 sm:$0xff]  }
 0x3bb   : > { %v7432_v62 = vrot.slane %v7410_v48, %v11215_v28  ;;  %v7439_v63 = vrot.slane %v7411_v61, %v11215_v28  ;;  %6673 = vmatpush1.bf16.msra.mxu1 %v9200_v50  ;;  %6714 = vmatpush1.bf16.msra.mxu0 %v9203_v53  ;;  %v9251_v48 = vld [vmem:[%s10846_s13 + $0xf18] ss:$304 sps:$4 sm:$0xff]  }
 0x3bc   : > { %6674 = vmatprep.subr.bf16.mxu1 %v9208_v57  ;;  %6715 = vmatprep.subr.bf16.mxu0 %v9211_v43  ;;  %v9248_v43 = vld [vmem:[%s10846_s13 + $0xf10] ss:$304 sps:$4 sm:$0xff]  }
 0x3bd   : > { %v7441_v52 = vcombine.low %v7432_v62, %v7439_v63  ;;  %v9256_v63 = vld [vmem:[%s10846_s13 + $0x1174] ss:$304 sps:$4 sm:$0xff]  }
 0x3bf   : > { %v7455_v11 = vrot.slane %v7441_v52, %v11215_v28  ;;  %6675 = vmatpush1.bf16.msra.mxu1 %v9206_v0  ;;  %6716 = vmatpush1.bf16.msra.mxu0 %v9209_v4  ;;  %v9259_v0 = vld [vmem:[%s10846_s13 + $0x117c] ss:$304 sps:$4 sm:$0xff]  }
 0x3c0   : > { %6742 = vmatprep.subr.bf16.mxu1 %v9214_v10  ;;  %6783 = vmatprep.subr.bf16.mxu0 %v9217_v51 }
 0x3c1   : > { %v7456_v60 = vcombine.low %v7448_v41, %v7455_v11  ;;  %v9254_v41 = vld [vmem:[%s10846_s13 + $0x1170] ss:$304 sps:$4 sm:$0xff]   ;;  %v9257_v11 = vld [vmem:[%s10846_s13 + $0x1178] ss:$304 sps:$4 sm:$0xff]  }
 0x3c2   : > { %6693 = vmatmul.mubr.bf16.vlgmr.msra.gmra.mrb[48].mxu1 %v10934_v42  ;;  %6734 = vmatmul.mubr.bf16.vlgmr.msra.gmra.mrb[52].mxu0 %v10934_v42 }
 0x3c3   : > { %7787 = vst [vmem:[%s11302_s11 + $0x10] sm:$0xff] %v7456_v60  ;;  %6743 = vmatpush1.bf16.msra.mxu1 %v9212_v14  ;;  %6784 = vmatpush1.bf16.msra.mxu0 %v9215_v15  ;;  %v9262_v14 = vld [vmem:[%s10846_s13 + $0xe4] ss:$304 sps:$4 sm:$0xff]   ;;  %v9265_v15 = vld [vmem:[%s10846_s13 + $0xec] ss:$304 sps:$4 sm:$0xff]  }
 0x3c4   : > { %6744 = vmatprep.subr.bf16.mxu1 %v9220_v16  ;;  %6785 = vmatprep.subr.bf16.mxu0 %v9223_v17  ;;  %v9260_v17 = vld [vmem:[%s10846_s13 + $0xe0] ss:$304 sps:$4 sm:$0xff]   ;;  %v9263_v60 = vld [vmem:[%s10846_s13 + $0xe8] ss:$304 sps:$4 sm:$0xff]  }
 0x3c5   : > { %6774 = vmatprep.mubr.bf16.mxu1 %v9527_v34  ;;  %6815 = vmatprep.mubr.bf16.mxu0 %v9527_v34 }
 0x3c7   : > { %6745 = vmatpush1.bf16.msra.mxu1 %v9218_v58  ;;  %6786 = vmatpush1.bf16.msra.mxu0 %v9221_v59  ;;  %v9268_v58 = vld [vmem:[%s10846_s13 + $0x344] ss:$304 sps:$4 sm:$0xff]   ;;  %v9271_v59 = vld [vmem:[%s10846_s13 + $0x34c] ss:$304 sps:$4 sm:$0xff]  }
 0x3c8   : > { %6746 = vmatprep.subr.bf16.mxu1 %v9226_v1  ;;  %6787 = vmatprep.subr.bf16.mxu0 %v9229_v19  ;;  %v9266_v1 = vld [vmem:[%s10846_s13 + $0x340] ss:$304 sps:$4 sm:$0xff]   ;;  %v9269_v19 = vld [vmem:[%s10846_s13 + $0x348] ss:$304 sps:$4 sm:$0xff]  }
 0x3cb   : > { %6747 = vmatpush1.bf16.msra.mxu1 %v9224_v20  ;;  %6788 = vmatpush1.bf16.msra.mxu0 %v9227_v21  ;;  %v9274_v20 = vld [vmem:[%s10846_s13 + $0x5a4] ss:$304 sps:$4 sm:$0xff]   ;;  %v9277_v21 = vld [vmem:[%s10846_s13 + $0x5ac] ss:$304 sps:$4 sm:$0xff]  }
 0x3cc   : > { %6748 = vmatprep.subr.bf16.mxu1 %v9232_v22  ;;  %6789 = vmatprep.subr.bf16.mxu0 %v9235_v23  ;;  %v9272_v22 = vld [vmem:[%s10846_s13 + $0x5a0] ss:$304 sps:$4 sm:$0xff]   ;;  %v9275_v23 = vld [vmem:[%s10846_s13 + $0x5a8] ss:$304 sps:$4 sm:$0xff]  }
 0x3cf   : > { %6749 = vmatpush1.bf16.msra.mxu1 %v9230_v25  ;;  %6790 = vmatpush1.bf16.msra.mxu0 %v9233_v26  ;;  %v9280_v25 = vld [vmem:[%s10846_s13 + $0x804] ss:$304 sps:$4 sm:$0xff]   ;;  %v9283_v26 = vld [vmem:[%s10846_s13 + $0x80c] ss:$304 sps:$4 sm:$0xff]  }
 0x3d0   : > { %6750 = vmatprep.subr.bf16.mxu1 %v9238_v27  ;;  %6791 = vmatprep.subr.bf16.mxu0 %v9241_v29  ;;  %v9278_v27 = vld [vmem:[%s10846_s13 + $0x800] ss:$304 sps:$4 sm:$0xff]   ;;  %v9281_v29 = vld [vmem:[%s10846_s13 + $0x808] ss:$304 sps:$4 sm:$0xff]  }
 0x3d3   : > { %6751 = vmatpush1.bf16.msra.mxu1 %v9236_v30  ;;  %6792 = vmatpush1.bf16.msra.mxu0 %v9239_v31  ;;  %v9286_v30 = vld [vmem:[%s10846_s13 + $0xa64] ss:$304 sps:$4 sm:$0xff]   ;;  %v9289_v31 = vld [vmem:[%s10846_s13 + $0xa6c] ss:$304 sps:$4 sm:$0xff]  }
 0x3d4   : > { %6752 = vmatprep.subr.bf16.mxu1 %v9244_v5  ;;  %6793 = vmatprep.subr.bf16.mxu0 %v9247_v33  ;;  %v9284_v5 = vld [vmem:[%s10846_s13 + $0xa60] ss:$304 sps:$4 sm:$0xff]   ;;  %v9287_v33 = vld [vmem:[%s10846_s13 + $0xa68] ss:$304 sps:$4 sm:$0xff]  }
 0x3d5   : > { %v6202_v45 = vpop.f32.mrb[24].mxu1  ;;  %v6243_v46 = vpop.f32.mrb[28].mxu0 }
 0x3d6   : > { %v6203_v47 = vadd.f32 %v6202_v45, %v5395_v35  ;;  %v6244_v49 = vadd.f32 %v6243_v46, %v5403_v36  ;;  %v6204_v24 = vpop.f32.mrb[25].mxu1  ;;  %v6245_v50 = vpop.f32.mrb[29].mxu0  ;;  %v9292_v35 = vld [vmem:[%s10846_s13 + $0xcc4] ss:$304 sps:$4 sm:$0xff]   ;;  %v9295_v36 = vld [vmem:[%s10846_s13 + $0xccc] ss:$304 sps:$4 sm:$0xff]  }
 0x3d7   : > { %v6205_v53 = vadd.f32 %v6204_v24, %v5399_v37  ;;  %v6246_v54 = vadd.f32 %v6245_v50, %v5407_v38  ;;  %v6206_v56 = vpop.f32.mrb[26].mxu1  ;;  %v6247_v57 = vpop.f32.mrb[30].mxu0  ;;  %6753 = vmatpush1.bf16.msra.mxu1 %v9242_v39  ;;  %6794 = vmatpush1.bf16.msra.mxu0 %v9245_v18  ;;  %v5411_v37 = vrot.slane %v11540_v32, %v11254_v7  ;;  %v9298_v45 = vld [vmem:[%s10846_s13 + $0xf24] ss:$304 sps:$4 sm:$0xff]   ;;  %v9301_v46 = vld [vmem:[%s10846_s13 + $0xf2c] ss:$304 sps:$4 sm:$0xff]  }
 0x3d8   : > { %v6207_v61 = vpop.f32.mrb[27].mxu1  ;;  %v6248_v62 = vpop.f32.mrb[31].mxu0  ;;  %6754 = vmatprep.subr.bf16.mxu1 %v9250_v40  ;;  %6795 = vmatprep.subr.bf16.mxu0 %v9253_v44  ;;  %v5419_v38 = vrot.slane %v11540_v32, %v11257_v8  ;;  %v5415_v39 = vrot.slane %v11540_v32, %v11262_v12  ;;  %v5423_v18 = vrot.slane %v11540_v32, %v11265_v13  ;;  %v9290_v40 = vld [vmem:[%s10846_s13 + $0xcc0] ss:$304 sps:$4 sm:$0xff]   ;;  %v9293_v44 = vld [vmem:[%s10846_s13 + $0xcc8] ss:$304 sps:$4 sm:$0xff]  }
 0x3d9   : > { %v7457_v4 = vcombine.low %v6203_v47, %v6205_v53  ;;  %v7458_v10 = vcombine.low %v6244_v49, %v6246_v54  ;;  %v9299_v61 = vld [vmem:[%s10846_s13 + $0xf28] ss:$304 sps:$4 sm:$0xff]  }
 0x3db   : > { %v11561_v51 = vrot.slane %v7457_v4, %v11215_v28  ;;  %v11564_v52 = vrot.slane %v7458_v10, %v11215_v28  ;;  %6755 = vmatpush1.bf16.msra.mxu1 %v9248_v43  ;;  %6796 = vmatpush1.bf16.msra.mxu0 %v9251_v48  ;;  %v9296_v48 = vld [vmem:[%s10846_s13 + $0xf20] ss:$304 sps:$4 sm:$0xff]   ;;  %v9307_v4 = vld [vmem:[%s10846_s13 + $0x118c] ss:$304 sps:$4 sm:$0xff]  }
 0x3dc   : > { %6756 = vmatprep.subr.bf16.mxu1 %v9256_v63  ;;  %6797 = vmatprep.subr.bf16.mxu0 %v9259_v0  ;;  %v9304_v0 = vld [vmem:[%s10846_s13 + $0x1184] ss:$304 sps:$4 sm:$0xff]  }
 0x3dd   : > { %v7489_v16 = vcombine.low %v11561_v51, %v11564_v52  ;;  %v9314_v51 = vld [vmem:[%s10846_s13 + $0x350] ss:$304 sps:$4 sm:$0xff]   ;;  %v9317_v52 = vld [vmem:[%s10846_s13 + $0x358] ss:$304 sps:$4 sm:$0xff]  }
 0x3df   : > { %6757 = vmatpush1.bf16.msra.mxu1 %v9254_v41  ;;  %6798 = vmatpush1.bf16.msra.mxu0 %v9257_v11 }
 0x3e0   : > { %6824 = vmatprep.subr.bf16.mxu1 %v9262_v14  ;;  %6865 = vmatprep.subr.bf16.mxu0 %v9265_v15  ;;  %v9302_v15 = vld [vmem:[%s10846_s13 + $0x1180] ss:$304 sps:$4 sm:$0xff]  }
 0x3e2   : > { %6775 = vmatmul.mubr.bf16.vlgmr.msra.gmra.mrb[52].mxu1 %v10934_v42  ;;  %6816 = vmatmul.mubr.bf16.vlgmr.msra.gmra.mrb[56].mxu0 %v10934_v42 }
 0x3e3   : > { %6825 = vmatpush1.bf16.msra.mxu1 %v9260_v17  ;;  %6866 = vmatpush1.bf16.msra.mxu0 %v9263_v60  ;;  %v9305_v17 = vld [vmem:[%s10846_s13 + $0x1188] ss:$304 sps:$4 sm:$0xff]   ;;  %v9310_v60 = vld [vmem:[%s10846_s13 + $0xf4] ss:$304 sps:$4 sm:$0xff]  }
 0x3e4   : > { %6826 = vmatprep.subr.bf16.mxu1 %v9268_v58  ;;  %6867 = vmatprep.subr.bf16.mxu0 %v9271_v59  ;;  %v9313_v58 = vld [vmem:[%s10846_s13 + $0xfc] ss:$304 sps:$4 sm:$0xff]  }
 0x3e5   : > { %6856 = vmatprep.mubr.bf16.mxu1 %v9527_v34  ;;  %6897 = vmatprep.mubr.bf16.mxu0 %v9527_v34 }
 0x3e7   : > { %6827 = vmatpush1.bf16.msra.mxu1 %v9266_v1  ;;  %6868 = vmatpush1.bf16.msra.mxu0 %v9269_v19  ;;  %v7497_v1 = vrot.slane %v7489_v16, %v11215_v28  ;;  %v9322_v16 = vld [vmem:[%s10846_s13 + $0x5b4] ss:$304 sps:$4 sm:$0xff]  }
 0x3e8   : > { %6828 = vmatprep.subr.bf16.mxu1 %v9274_v20  ;;  %6869 = vmatprep.subr.bf16.mxu0 %v9277_v21  ;;  %v9308_v20 = vld [vmem:[%s10846_s13 + $0xf0] ss:$304 sps:$4 sm:$0xff]   ;;  %v9311_v21 = vld [vmem:[%s10846_s13 + $0xf8] ss:$304 sps:$4 sm:$0xff]  }
 0x3eb   : > { %6829 = vmatpush1.bf16.msra.mxu1 %v9272_v22  ;;  %6870 = vmatpush1.bf16.msra.mxu0 %v9275_v23  ;;  %v9316_v22 = vld [vmem:[%s10846_s13 + $0x354] ss:$304 sps:$4 sm:$0xff]   ;;  %v9319_v23 = vld [vmem:[%s10846_s13 + $0x35c] ss:$304 sps:$4 sm:$0xff]  }
 0x3ec   : > { %6830 = vmatprep.subr.bf16.mxu1 %v9280_v25  ;;  %6871 = vmatprep.subr.bf16.mxu0 %v9283_v26  ;;  %v9325_v26 = vld [vmem:[%s10846_s13 + $0x5bc] ss:$304 sps:$4 sm:$0xff]  }
 0x3ef   : > { %6831 = vmatpush1.bf16.msra.mxu1 %v9278_v27  ;;  %6872 = vmatpush1.bf16.msra.mxu0 %v9281_v29  ;;  %v9320_v27 = vld [vmem:[%s10846_s13 + $0x5b0] ss:$304 sps:$4 sm:$0xff]   ;;  %v9323_v29 = vld [vmem:[%s10846_s13 + $0x5b8] ss:$304 sps:$4 sm:$0xff]  }
 0x3f0   : > { %6832 = vmatprep.subr.bf16.mxu1 %v9286_v30  ;;  %6873 = vmatprep.subr.bf16.mxu0 %v9289_v31  ;;  %v9328_v30 = vld [vmem:[%s10846_s13 + $0x814] ss:$304 sps:$4 sm:$0xff]   ;;  %v9331_v31 = vld [vmem:[%s10846_s13 + $0x81c] ss:$304 sps:$4 sm:$0xff]  }
 0x3f3   : > { %6833 = vmatpush1.bf16.msra.mxu1 %v9284_v5  ;;  %6874 = vmatpush1.bf16.msra.mxu0 %v9287_v33  ;;  %v9326_v5 = vld [vmem:[%s10846_s13 + $0x810] ss:$304 sps:$4 sm:$0xff]   ;;  %v9329_v33 = vld [vmem:[%s10846_s13 + $0x818] ss:$304 sps:$4 sm:$0xff]  }
 0x3f4   : > { %6834 = vmatprep.subr.bf16.mxu1 %v9292_v35  ;;  %6875 = vmatprep.subr.bf16.mxu0 %v9295_v36  ;;  %v9334_v35 = vld [vmem:[%s10846_s13 + $0xa74] ss:$304 sps:$4 sm:$0xff]   ;;  %v9337_v36 = vld [vmem:[%s10846_s13 + $0xa7c] ss:$304 sps:$4 sm:$0xff]  }
 0x3f5   : > { %v6284_v47 = vpop.f32.mrb[28].mxu1  ;;  %v6325_v49 = vpop.f32.mrb[32].mxu0 }
 0x3f6   : > { %v6285_v24 = vadd.f32 %v6284_v47, %v5411_v37  ;;  %v6326_v50 = vadd.f32 %v6325_v49, %v5419_v38  ;;  %v6286_v53 = vpop.f32.mrb[29].mxu1  ;;  %v6327_v54 = vpop.f32.mrb[33].mxu0  ;;  %v9332_v37 = vld [vmem:[%s10846_s13 + $0xa70] ss:$304 sps:$4 sm:$0xff]   ;;  %v9335_v38 = vld [vmem:[%s10846_s13 + $0xa78] ss:$304 sps:$4 sm:$0xff]  }
 0x3f7   : > { %v6287_v56 = vadd.f32 %v6286_v53, %v5415_v39  ;;  %v6328_v57 = vadd.f32 %v6327_v54, %v5423_v18  ;;  %v6288_v43 = vpop.f32.mrb[30].mxu1  ;;  %v6329_v32 = vpop.f32.mrb[34].mxu0  ;;  %6835 = vmatpush1.bf16.msra.mxu1 %v9290_v40  ;;  %6876 = vmatpush1.bf16.msra.mxu0 %v9293_v44  ;;  %v11647_v39 = vld [vmem:[%s11181_s30 + $0x20] sm:$0xff]  ;;  %v9343_v40 = vld [vmem:[%s10846_s13 + $0xcdc] ss:$304 sps:$4 sm:$0xff]  }
 0x3f8   : > { %v6289_v62 = vpop.f32.mrb[31].mxu1  ;;  %v6330_v63 = vpop.f32.mrb[35].mxu0  ;;  %6836 = vmatprep.subr.bf16.mxu1 %v9298_v45  ;;  %6877 = vmatprep.subr.bf16.mxu0 %v9301_v46  ;;  %v9340_v18 = vld [vmem:[%s10846_s13 + $0xcd4] ss:$304 sps:$4 sm:$0xff]   ;;  %v5427_v44 = vrot.slane %v11647_v39, %v11185_v2  ;;  %v5435_v45 = vrot.slane %v11647_v39, %v11188_v3  ;;  %v5431_v46 = vrot.slane %v11647_v39, %v11195_v6  ;;  %v9338_v49 = vld [vmem:[%s10846_s13 + $0xcd0] ss:$304 sps:$4 sm:$0xff]  }
 0x3f9   : > { %v7459_v10 = vcombine.low %v6285_v24, %v6287_v56  ;;  %v7460_v41 = vcombine.low %v6326_v50, %v6328_v57  ;;  %v5439_v47 = vrot.slane %v11647_v39, %v11198_v9  ;;  %v9341_v24 = vld [vmem:[%s10846_s13 + $0xcd8] ss:$304 sps:$4 sm:$0xff]   ;;  %v9346_v50 = vld [vmem:[%s10846_s13 + $0xf34] ss:$304 sps:$4 sm:$0xff]   ;;  %v9349_v53 = vld [vmem:[%s10846_s13 + $0xf3c] ss:$304 sps:$4 sm:$0xff]  }
 0x3fb   : > { %v7481_v11 = vrot.slane %v7459_v10, %v11215_v28  ;;  %v7488_v14 = vrot.slane %v7460_v41, %v11215_v28  ;;  %6837 = vmatpush1.bf16.msra.mxu1 %v9296_v48  ;;  %6878 = vmatpush1.bf16.msra.mxu0 %v9299_v61  ;;  %v9347_v10 = vld [vmem:[%s10846_s13 + $0xf38] ss:$304 sps:$4 sm:$0xff]  }
 0x3fc   : > { %6838 = vmatprep.subr.bf16.mxu1 %v9304_v0  ;;  %6879 = vmatprep.subr.bf16.mxu0 %v9307_v4  ;;  %v9344_v4 = vld [vmem:[%s10846_s13 + $0xf30] ss:$304 sps:$4 sm:$0xff]  }
 0x3fd   : > { %v7490_v59 = vcombine.low %v7481_v11, %v7488_v14  ;;  %v9352_v14 = vld [vmem:[%s10846_s13 + $0x1194] ss:$304 sps:$4 sm:$0xff]  }
 0x3ff   : > { %v7504_v19 = vrot.slane %v7490_v59, %v11215_v28  ;;  %6839 = vmatpush1.bf16.msra.mxu1 %v9302_v15  ;;  %6880 = vmatpush1.bf16.msra.mxu0 %v9305_v17  ;;  %v9355_v15 = vld [vmem:[%s10846_s13 + $0x119c] ss:$304 sps:$4 sm:$0xff]  }
 0x400   : > { %6906 = vmatprep.subr.bf16.mxu1 %v9310_v60  ;;  %6947 = vmatprep.subr.bf16.mxu0 %v9313_v58 }
 0x401   : > { %v7505_v25 = vcombine.low %v7497_v1, %v7504_v19  ;;  %v9350_v1 = vld [vmem:[%s10846_s13 + $0x1190] ss:$304 sps:$4 sm:$0xff]   ;;  %v9353_v19 = vld [vmem:[%s10846_s13 + $0x1198] ss:$304 sps:$4 sm:$0xff]  }
 0x402   : > { %6857 = vmatmul.mubr.bf16.vlgmr.msra.gmra.mrb[56].mxu1 %v10934_v42  ;;  %6898 = vmatmul.mubr.bf16.vlgmr.msra.gmra.mrb[60].mxu0 %v10934_v42 }
 0x403   : > { %7788 = vst [vmem:[%s11302_s11 + $0x18] sm:$0xff] %v7505_v25  ;;  %6907 = vmatpush1.bf16.msra.mxu1 %v9308_v20  ;;  %6948 = vmatpush1.bf16.msra.mxu0 %v9311_v21  ;;  %v9358_v20 = vld [vmem:[%s10846_s13 + $0x104] ss:$304 sps:$4 sm:$0xff]   ;;  %v9361_v21 = vld [vmem:[%s10846_s13 + $0x10c] ss:$304 sps:$4 sm:$0xff]  }
 0x404   : > { %6908 = vmatprep.subr.bf16.mxu1 %v9316_v22  ;;  %6949 = vmatprep.subr.bf16.mxu0 %v9319_v23  ;;  %v9356_v23 = vld [vmem:[%s10846_s13 + $0x100] ss:$304 sps:$4 sm:$0xff]   ;;  %v9359_v25 = vld [vmem:[%s10846_s13 + $0x108] ss:$304 sps:$4 sm:$0xff]  }
 0x405   : > { %6938 = vmatprep.mubr.bf16.mxu1 %v9527_v34  ;;  %6979 = vmatprep.mubr.bf16.mxu0 %v9527_v34 }
 0x407   : > { %6909 = vmatpush1.bf16.msra.mxu1 %v9314_v51  ;;  %6950 = vmatpush1.bf16.msra.mxu0 %v9317_v52  ;;  %v9364_v51 = vld [vmem:[%s10846_s13 + $0x364] ss:$304 sps:$4 sm:$0xff]   ;;  %v9367_v52 = vld [vmem:[%s10846_s13 + $0x36c] ss:$304 sps:$4 sm:$0xff]  }
 0x408   : > { %6910 = vmatprep.subr.bf16.mxu1 %v9322_v16  ;;  %6951 = vmatprep.subr.bf16.mxu0 %v9325_v26  ;;  %v9362_v16 = vld [vmem:[%s10846_s13 + $0x360] ss:$304 sps:$4 sm:$0xff]   ;;  %v9365_v26 = vld [vmem:[%s10846_s13 + $0x368] ss:$304 sps:$4 sm:$0xff]  }
 0x40b   : > { %6911 = vmatpush1.bf16.msra.mxu1 %v9320_v27  ;;  %6952 = vmatpush1.bf16.msra.mxu0 %v9323_v29  ;;  %v9370_v27 = vld [vmem:[%s10846_s13 + $0x5c4] ss:$304 sps:$4 sm:$0xff]   ;;  %v9373_v29 = vld [vmem:[%s10846_s13 + $0x5cc] ss:$304 sps:$4 sm:$0xff]  }
 0x40c   : > { %6912 = vmatprep.subr.bf16.mxu1 %v9328_v30  ;;  %6953 = vmatprep.subr.bf16.mxu0 %v9331_v31  ;;  %v9368_v30 = vld [vmem:[%s10846_s13 + $0x5c0] ss:$304 sps:$4 sm:$0xff]   ;;  %v9371_v31 = vld [vmem:[%s10846_s13 + $0x5c8] ss:$304 sps:$4 sm:$0xff]  }
 0x40f   : > { %6913 = vmatpush1.bf16.msra.mxu1 %v9326_v5  ;;  %6954 = vmatpush1.bf16.msra.mxu0 %v9329_v33  ;;  %v9376_v5 = vld [vmem:[%s10846_s13 + $0x824] ss:$304 sps:$4 sm:$0xff]   ;;  %v9379_v33 = vld [vmem:[%s10846_s13 + $0x82c] ss:$304 sps:$4 sm:$0xff]  }
 0x410   : > { %6914 = vmatprep.subr.bf16.mxu1 %v9334_v35  ;;  %6955 = vmatprep.subr.bf16.mxu0 %v9337_v36  ;;  %v9374_v35 = vld [vmem:[%s10846_s13 + $0x820] ss:$304 sps:$4 sm:$0xff]   ;;  %v9377_v36 = vld [vmem:[%s10846_s13 + $0x828] ss:$304 sps:$4 sm:$0xff]  }
 0x413   : > { %6915 = vmatpush1.bf16.msra.mxu1 %v9332_v37  ;;  %6956 = vmatpush1.bf16.msra.mxu0 %v9335_v38  ;;  %v9382_v37 = vld [vmem:[%s10846_s13 + $0xa84] ss:$304 sps:$4 sm:$0xff]   ;;  %v9385_v38 = vld [vmem:[%s10846_s13 + $0xa8c] ss:$304 sps:$4 sm:$0xff]  }
 0x414   : > { %6916 = vmatprep.subr.bf16.mxu1 %v9340_v18  ;;  %6957 = vmatprep.subr.bf16.mxu0 %v9343_v40  ;;  %v9380_v18 = vld [vmem:[%s10846_s13 + $0xa80] ss:$304 sps:$4 sm:$0xff]   ;;  %v9383_v40 = vld [vmem:[%s10846_s13 + $0xa88] ss:$304 sps:$4 sm:$0xff]  }
 0x415   : > { %v6366_v54 = vpop.f32.mrb[32].mxu1  ;;  %v6407_v56 = vpop.f32.mrb[36].mxu0 }
 0x416   : > { %v6367_v57 = vadd.f32 %v6366_v54, %v5427_v44  ;;  %v6408_v43 = vadd.f32 %v6407_v56, %v5435_v45  ;;  %v6368_v32 = vpop.f32.mrb[33].mxu1  ;;  %v6409_v48 = vpop.f32.mrb[37].mxu0  ;;  %v9388_v44 = vld [vmem:[%s10846_s13 + $0xce4] ss:$304 sps:$4 sm:$0xff]   ;;  %v9391_v45 = vld [vmem:[%s10846_s13 + $0xcec] ss:$304 sps:$4 sm:$0xff]  }
 0x417   : > { %v6369_v61 = vadd.f32 %v6368_v32, %v5431_v46  ;;  %v6410_v62 = vadd.f32 %v6409_v48, %v5439_v47  ;;  %v6370_v63 = vpop.f32.mrb[34].mxu1  ;;  %v6411_v0 = vpop.f32.mrb[38].mxu0  ;;  %6917 = vmatpush1.bf16.msra.mxu1 %v9338_v49  ;;  %6958 = vmatpush1.bf16.msra.mxu0 %v9341_v24  ;;  %v5443_v46 = vrot.slane %v11647_v39, %v11254_v7  ;;  %v9394_v54 = vld [vmem:[%s10846_s13 + $0xf44] ss:$304 sps:$4 sm:$0xff]   ;;  %v9397_v56 = vld [vmem:[%s10846_s13 + $0xf4c] ss:$304 sps:$4 sm:$0xff]  }
 0x418   : > { %v6371_v41 = vpop.f32.mrb[35].mxu1  ;;  %v6412_v11 = vpop.f32.mrb[39].mxu0  ;;  %6918 = vmatprep.subr.bf16.mxu1 %v9346_v50  ;;  %6959 = vmatprep.subr.bf16.mxu0 %v9349_v53  ;;  %v5451_v47 = vrot.slane %v11647_v39, %v11257_v8  ;;  %v5447_v49 = vrot.slane %v11647_v39, %v11262_v12  ;;  %v5455_v24 = vrot.slane %v11647_v39, %v11265_v13  ;;  %v9386_v50 = vld [vmem:[%s10846_s13 + $0xce0] ss:$304 sps:$4 sm:$0xff]   ;;  %v9389_v53 = vld [vmem:[%s10846_s13 + $0xce8] ss:$304 sps:$4 sm:$0xff]  }
 0x419   : > { %v7506_v17 = vcombine.low %v6367_v57, %v6369_v61  ;;  %v7507_v60 = vcombine.low %v6408_v43, %v6410_v62  ;;  %v9395_v41 = vld [vmem:[%s10846_s13 + $0xf48] ss:$304 sps:$4 sm:$0xff]  }
 0x41b   : > { %v11668_v58 = vrot.slane %v7506_v17, %v11215_v28  ;;  %v11671_v59 = vrot.slane %v7507_v60, %v11215_v28  ;;  %6919 = vmatpush1.bf16.msra.mxu1 %v9344_v4  ;;  %6960 = vmatpush1.bf16.msra.mxu0 %v9347_v10  ;;  %v9392_v10 = vld [vmem:[%s10846_s13 + $0xf40] ss:$304 sps:$4 sm:$0xff]   ;;  %v9403_v17 = vld [vmem:[%s10846_s13 + $0x11ac] ss:$304 sps:$4 sm:$0xff]  }
 0x41c   : > { %6920 = vmatprep.subr.bf16.mxu1 %v9352_v14  ;;  %6961 = vmatprep.subr.bf16.mxu0 %v9355_v15  ;;  %v9400_v15 = vld [vmem:[%s10846_s13 + $0x11a4] ss:$304 sps:$4 sm:$0xff]  }
 0x41d   : > { %v7538_v22 = vcombine.low %v11668_v58, %v11671_v59  ;;  %v9410_v58 = vld [vmem:[%s10846_s13 + $0x370] ss:$304 sps:$4 sm:$0xff]   ;;  %v9413_v59 = vld [vmem:[%s10846_s13 + $0x378] ss:$304 sps:$4 sm:$0xff]  }
 0x41f   : > { %6921 = vmatpush1.bf16.msra.mxu1 %v9350_v1  ;;  %6962 = vmatpush1.bf16.msra.mxu0 %v9353_v19 }
 0x420   : > { %6988 = vmatprep.subr.bf16.mxu1 %v9358_v20  ;;  %7029 = vmatprep.subr.bf16.mxu0 %v9361_v21  ;;  %v9398_v21 = vld [vmem:[%s10846_s13 + $0x11a0] ss:$304 sps:$4 sm:$0xff]  }
 0x422   : > { %6939 = vmatmul.mubr.bf16.vlgmr.msra.gmra.mrb[60].mxu1 %v10934_v42  ;;  %6980 = vmatmul.mubr.bf16.vlgmr.msra.gmra.mrb[64].mxu0 %v10934_v42 }
 0x423   : > { %6989 = vmatpush1.bf16.msra.mxu1 %v9356_v23  ;;  %7030 = vmatpush1.bf16.msra.mxu0 %v9359_v25  ;;  %v9401_v23 = vld [vmem:[%s10846_s13 + $0x11a8] ss:$304 sps:$4 sm:$0xff]   ;;  %v9406_v25 = vld [vmem:[%s10846_s13 + $0x114] ss:$304 sps:$4 sm:$0xff]  }
 0x424   : > { %6990 = vmatprep.subr.bf16.mxu1 %v9364_v51  ;;  %7031 = vmatprep.subr.bf16.mxu0 %v9367_v52  ;;  %v9409_v51 = vld [vmem:[%s10846_s13 + $0x11c] ss:$304 sps:$4 sm:$0xff]  }
 0x425   : > { %7020 = vmatprep.mubr.bf16.mxu1 %v9527_v34  ;;  %7061 = vmatprep.mubr.bf16.mxu0 %v9527_v34 }
 0x427   : > { %6991 = vmatpush1.bf16.msra.mxu1 %v9362_v16  ;;  %7032 = vmatpush1.bf16.msra.mxu0 %v9365_v26  ;;  %v7546_v16 = vrot.slane %v7538_v22, %v11215_v28  ;;  %v9418_v22 = vld [vmem:[%s10846_s13 + $0x5d4] ss:$304 sps:$4 sm:$0xff]  }
 0x428   : > { %6992 = vmatprep.subr.bf16.mxu1 %v9370_v27  ;;  %7033 = vmatprep.subr.bf16.mxu0 %v9373_v29  ;;  %v9404_v27 = vld [vmem:[%s10846_s13 + $0x110] ss:$304 sps:$4 sm:$0xff]   ;;  %v9407_v29 = vld [vmem:[%s10846_s13 + $0x118] ss:$304 sps:$4 sm:$0xff]  }
 0x42b   : > { %6993 = vmatpush1.bf16.msra.mxu1 %v9368_v30  ;;  %7034 = vmatpush1.bf16.msra.mxu0 %v9371_v31  ;;  %v9412_v30 = vld [vmem:[%s10846_s13 + $0x374] ss:$304 sps:$4 sm:$0xff]   ;;  %v9415_v31 = vld [vmem:[%s10846_s13 + $0x37c] ss:$304 sps:$4 sm:$0xff]  }
 0x42c   : > { %6994 = vmatprep.subr.bf16.mxu1 %v9376_v5  ;;  %7035 = vmatprep.subr.bf16.mxu0 %v9379_v33  ;;  %v9421_v33 = vld [vmem:[%s10846_s13 + $0x5dc] ss:$304 sps:$4 sm:$0xff]  }
 0x42f   : > { %6995 = vmatpush1.bf16.msra.mxu1 %v9374_v35  ;;  %7036 = vmatpush1.bf16.msra.mxu0 %v9377_v36  ;;  %v9416_v35 = vld [vmem:[%s10846_s13 + $0x5d0] ss:$304 sps:$4 sm:$0xff]   ;;  %v9419_v36 = vld [vmem:[%s10846_s13 + $0x5d8] ss:$304 sps:$4 sm:$0xff]  }
 0x430   : > { %6996 = vmatprep.subr.bf16.mxu1 %v9382_v37  ;;  %7037 = vmatprep.subr.bf16.mxu0 %v9385_v38  ;;  %v9424_v37 = vld [vmem:[%s10846_s13 + $0x834] ss:$304 sps:$4 sm:$0xff]   ;;  %v9427_v38 = vld [vmem:[%s10846_s13 + $0x83c] ss:$304 sps:$4 sm:$0xff]  }
 0x433   : > { %6997 = vmatpush1.bf16.msra.mxu1 %v9380_v18  ;;  %7038 = vmatpush1.bf16.msra.mxu0 %v9383_v40  ;;  %v9422_v18 = vld [vmem:[%s10846_s13 + $0x830] ss:$304 sps:$4 sm:$0xff]   ;;  %v9425_v40 = vld [vmem:[%s10846_s13 + $0x838] ss:$304 sps:$4 sm:$0xff]  }
 0x434   : > { %6998 = vmatprep.subr.bf16.mxu1 %v9388_v44  ;;  %7039 = vmatprep.subr.bf16.mxu0 %v9391_v45  ;;  %v9430_v44 = vld [vmem:[%s10846_s13 + $0xa94] ss:$304 sps:$4 sm:$0xff]   ;;  %v9433_v45 = vld [vmem:[%s10846_s13 + $0xa9c] ss:$304 sps:$4 sm:$0xff]  }
 0x435   : > { %v6448_v57 = vpop.f32.mrb[36].mxu1  ;;  %v6489_v43 = vpop.f32.mrb[40].mxu0 }
 0x436   : > { %v6449_v32 = vadd.f32 %v6448_v57, %v5443_v46  ;;  %v6490_v48 = vadd.f32 %v6489_v43, %v5451_v47  ;;  %v6450_v61 = vpop.f32.mrb[37].mxu1  ;;  %v6491_v62 = vpop.f32.mrb[41].mxu0  ;;  %v9428_v46 = vld [vmem:[%s10846_s13 + $0xa90] ss:$304 sps:$4 sm:$0xff]   ;;  %v9431_v47 = vld [vmem:[%s10846_s13 + $0xa98] ss:$304 sps:$4 sm:$0xff]  }
 0x437   : > { %v6451_v63 = vadd.f32 %v6450_v61, %v5447_v49  ;;  %v6492_v0 = vadd.f32 %v6491_v62, %v5455_v24  ;;  %v6452_v4 = vpop.f32.mrb[38].mxu1  ;;  %v6493_v39 = vpop.f32.mrb[42].mxu0  ;;  %6999 = vmatpush1.bf16.msra.mxu1 %v9386_v50  ;;  %7040 = vmatpush1.bf16.msra.mxu0 %v9389_v53  ;;  %v11754_v49 = vld [vmem:[%s11181_s30 + $0x28] sm:$0xff]  ;;  %v9436_v24 = vld [vmem:[%s10846_s13 + $0xcf4] ss:$304 sps:$4 sm:$0xff]  }
 0x438   : > { %v6453_v11 = vpop.f32.mrb[39].mxu1  ;;  %v6494_v14 = vpop.f32.mrb[43].mxu0  ;;  %7000 = vmatprep.subr.bf16.mxu1 %v9394_v54  ;;  %7041 = vmatprep.subr.bf16.mxu0 %v9397_v56  ;;  %v9439_v50 = vld [vmem:[%s10846_s13 + $0xcfc] ss:$304 sps:$4 sm:$0xff]   ;;  %v5459_v53 = vrot.slane %v11754_v49, %v11185_v2  ;;  %v5467_v54 = vrot.slane %v11754_v49, %v11188_v3  ;;  %v5463_v56 = vrot.slane %v11754_v49, %v11195_v6  ;;  %v9434_v43 = vld [vmem:[%s10846_s13 + $0xcf0] ss:$304 sps:$4 sm:$0xff]  }
 0x439   : > { %v7508_v60 = vcombine.low %v6449_v32, %v6451_v63  ;;  %v7509_v1 = vcombine.low %v6490_v48, %v6492_v0  ;;  %v5471_v57 = vrot.slane %v11754_v49, %v11198_v9  ;;  %v9437_v32 = vld [vmem:[%s10846_s13 + $0xcf8] ss:$304 sps:$4 sm:$0xff]   ;;  %v9442_v48 = vld [vmem:[%s10846_s13 + $0xf54] ss:$304 sps:$4 sm:$0xff]   ;;  %v9445_v61 = vld [vmem:[%s10846_s13 + $0xf5c] ss:$304 sps:$4 sm:$0xff]  }
 0x43b   : > { %v7530_v19 = vrot.slane %v7508_v60, %v11215_v28  ;;  %v7537_v20 = vrot.slane %v7509_v1, %v11215_v28  ;;  %7001 = vmatpush1.bf16.msra.mxu1 %v9392_v10  ;;  %7042 = vmatpush1.bf16.msra.mxu0 %v9395_v41  ;;  %v9443_v60 = vld [vmem:[%s10846_s13 + $0xf58] ss:$304 sps:$4 sm:$0xff]  }
 0x43c   : > { %7002 = vmatprep.subr.bf16.mxu1 %v9400_v15  ;;  %7043 = vmatprep.subr.bf16.mxu0 %v9403_v17  ;;  %v9440_v17 = vld [vmem:[%s10846_s13 + $0xf50] ss:$304 sps:$4 sm:$0xff]  }
 0x43d   : > { %v7539_v52 = vcombine.low %v7530_v19, %v7537_v20  ;;  %v9448_v20 = vld [vmem:[%s10846_s13 + $0x11b4] ss:$304 sps:$4 sm:$0xff]  }
 0x43f   : > { %v7553_v26 = vrot.slane %v7539_v52, %v11215_v28  ;;  %7003 = vmatpush1.bf16.msra.mxu1 %v9398_v21  ;;  %7044 = vmatpush1.bf16.msra.mxu0 %v9401_v23  ;;  %v9451_v21 = vld [vmem:[%s10846_s13 + $0x11bc] ss:$304 sps:$4 sm:$0xff]  }
 0x440   : > { %7070 = vmatprep.subr.bf16.mxu1 %v9406_v25  ;;  %7111 = vmatprep.subr.bf16.mxu0 %v9409_v51 }
 0x441   : > { %v7554_v5 = vcombine.low %v7546_v16, %v7553_v26  ;;  %v9446_v16 = vld [vmem:[%s10846_s13 + $0x11b0] ss:$304 sps:$4 sm:$0xff]   ;;  %v9449_v26 = vld [vmem:[%s10846_s13 + $0x11b8] ss:$304 sps:$4 sm:$0xff]  }
 0x442   : > { %7021 = vmatmul.mubr.bf16.vlgmr.msra.gmra.mrb[64].mxu1 %v10934_v42  ;;  %7062 = vmatmul.mubr.bf16.vlgmr.msra.gmra.mrb[68].mxu0 %v10934_v42 }
 0x443   : > { %7789 = vst [vmem:[%s11302_s11 + $0x20] sm:$0xff] %v7554_v5  ;;  %7071 = vmatpush1.bf16.msra.mxu1 %v9404_v27  ;;  %7112 = vmatpush1.bf16.msra.mxu0 %v9407_v29  ;;  %v9454_v27 = vld [vmem:[%s10846_s13 + $0x124] ss:$304 sps:$4 sm:$0xff]   ;;  %v9457_v29 = vld [vmem:[%s10846_s13 + $0x12c] ss:$304 sps:$4 sm:$0xff]  }
 0x444   : > { %7072 = vmatprep.subr.bf16.mxu1 %v9412_v30  ;;  %7113 = vmatprep.subr.bf16.mxu0 %v9415_v31  ;;  %v9452_v31 = vld [vmem:[%s10846_s13 + $0x120] ss:$304 sps:$4 sm:$0xff]   ;;  %v9455_v5 = vld [vmem:[%s10846_s13 + $0x128] ss:$304 sps:$4 sm:$0xff]  }
 0x445   : > { %7102 = vmatprep.mubr.bf16.mxu1 %v9527_v34  ;;  %7143 = vmatprep.mubr.bf16.mxu0 %v9527_v34 }
 0x447   : > { %7073 = vmatpush1.bf16.msra.mxu1 %v9410_v58  ;;  %7114 = vmatpush1.bf16.msra.mxu0 %v9413_v59  ;;  %v9460_v58 = vld [vmem:[%s10846_s13 + $0x384] ss:$304 sps:$4 sm:$0xff]   ;;  %v9463_v59 = vld [vmem:[%s10846_s13 + $0x38c] ss:$304 sps:$4 sm:$0xff]  }
 0x448   : > { %7074 = vmatprep.subr.bf16.mxu1 %v9418_v22  ;;  %7115 = vmatprep.subr.bf16.mxu0 %v9421_v33  ;;  %v9458_v22 = vld [vmem:[%s10846_s13 + $0x380] ss:$304 sps:$4 sm:$0xff]   ;;  %v9461_v33 = vld [vmem:[%s10846_s13 + $0x388] ss:$304 sps:$4 sm:$0xff]  }
 0x44b   : > { %7075 = vmatpush1.bf16.msra.mxu1 %v9416_v35  ;;  %7116 = vmatpush1.bf16.msra.mxu0 %v9419_v36  ;;  %v9466_v35 = vld [vmem:[%s10846_s13 + $0x5e4] ss:$304 sps:$4 sm:$0xff]   ;;  %v9469_v36 = vld [vmem:[%s10846_s13 + $0x5ec] ss:$304 sps:$4 sm:$0xff]  }
 0x44c   : > { %7076 = vmatprep.subr.bf16.mxu1 %v9424_v37  ;;  %7117 = vmatprep.subr.bf16.mxu0 %v9427_v38  ;;  %v9464_v37 = vld [vmem:[%s10846_s13 + $0x5e0] ss:$304 sps:$4 sm:$0xff]   ;;  %v9467_v38 = vld [vmem:[%s10846_s13 + $0x5e8] ss:$304 sps:$4 sm:$0xff]  }
 0x44f   : > { %7077 = vmatpush1.bf16.msra.mxu1 %v9422_v18  ;;  %7118 = vmatpush1.bf16.msra.mxu0 %v9425_v40  ;;  %v9472_v18 = vld [vmem:[%s10846_s13 + $0x844] ss:$304 sps:$4 sm:$0xff]   ;;  %v9475_v40 = vld [vmem:[%s10846_s13 + $0x84c] ss:$304 sps:$4 sm:$0xff]  }
 0x450   : > { %7078 = vmatprep.subr.bf16.mxu1 %v9430_v44  ;;  %7119 = vmatprep.subr.bf16.mxu0 %v9433_v45  ;;  %v9470_v44 = vld [vmem:[%s10846_s13 + $0x840] ss:$304 sps:$4 sm:$0xff]   ;;  %v9473_v45 = vld [vmem:[%s10846_s13 + $0x848] ss:$304 sps:$4 sm:$0xff]  }
 0x453   : > { %7079 = vmatpush1.bf16.msra.mxu1 %v9428_v46  ;;  %7120 = vmatpush1.bf16.msra.mxu0 %v9431_v47  ;;  %v9481_v46 = vld [vmem:[%s10846_s13 + $0xaac] ss:$304 sps:$4 sm:$0xff]   ;;  %v9476_v47 = vld [vmem:[%s10846_s13 + $0xaa0] ss:$304 sps:$4 sm:$0xff]  }
 0x454   : > { %7080 = vmatprep.subr.bf16.mxu1 %v9436_v24  ;;  %7121 = vmatprep.subr.bf16.mxu0 %v9439_v50  ;;  %v9479_v24 = vld [vmem:[%s10846_s13 + $0xaa8] ss:$304 sps:$4 sm:$0xff]   ;;  %v9484_v50 = vld [vmem:[%s10846_s13 + $0xd04] ss:$304 sps:$4 sm:$0xff]  }
 0x455   : > { %v6530_v62 = vpop.f32.mrb[40].mxu1  ;;  %v6571_v63 = vpop.f32.mrb[44].mxu0 }
 0x456   : > { %v6531_v0 = vadd.f32 %v6530_v62, %v5459_v53  ;;  %v6572_v4 = vadd.f32 %v6571_v63, %v5467_v54  ;;  %v6532_v39 = vpop.f32.mrb[41].mxu1  ;;  %v6573_v10 = vpop.f32.mrb[45].mxu0  ;;  %v9487_v53 = vld [vmem:[%s10846_s13 + $0xd0c] ss:$304 sps:$4 sm:$0xff]   ;;  %v5475_v54 = vrot.slane %v11754_v49, %v11254_v7 }
 0x457   : > { %v6533_v41 = vadd.f32 %v6532_v39, %v5463_v56  ;;  %v6574_v11 = vadd.f32 %v6573_v10, %v5471_v57  ;;  %v6534_v14 = vpop.f32.mrb[42].mxu1  ;;  %v6575_v15 = vpop.f32.mrb[46].mxu0  ;;  %7081 = vmatpush1.bf16.msra.mxu1 %v9434_v43  ;;  %7122 = vmatpush1.bf16.msra.mxu0 %v9437_v32  ;;  %v5483_v56 = vrot.slane %v11754_v49, %v11257_v8  ;;  %v9482_v32 = vld [vmem:[%s10846_s13 + $0xd00] ss:$304 sps:$4 sm:$0xff]   ;;  %v9493_v62 = vld [vmem:[%s10846_s13 + $0xf6c] ss:$304 sps:$4 sm:$0xff]  }
 0x458   : > { %v6535_v1 = vpop.f32.mrb[43].mxu1  ;;  %v6576_v19 = vpop.f32.mrb[47].mxu0  ;;  %7082 = vmatprep.subr.bf16.mxu1 %v9442_v48  ;;  %7123 = vmatprep.subr.bf16.mxu0 %v9445_v61  ;;  %v5479_v57 = vrot.slane %v11754_v49, %v11262_v12  ;;  %v5487_v43 = vrot.slane %v11754_v49, %v11265_v13  ;;  %v9485_v48 = vld [vmem:[%s10846_s13 + $0xd08] ss:$304 sps:$4 sm:$0xff]   ;;  %v9490_v61 = vld [vmem:[%s10846_s13 + $0xf64] ss:$304 sps:$4 sm:$0xff]  }
 0x459   : > { %v7555_v23 = vcombine.low %v6531_v0, %v6533_v41  ;;  %v7556_v25 = vcombine.low %v6572_v4, %v6574_v11 }
 0x45b   : > { %v11775_v51 = vrot.slane %v7555_v23, %v11215_v28  ;;  %v11778_v52 = vrot.slane %v7556_v25, %v11215_v28  ;;  %7083 = vmatpush1.bf16.msra.mxu1 %v9440_v17  ;;  %7124 = vmatpush1.bf16.msra.mxu0 %v9443_v60  ;;  %v9488_v17 = vld [vmem:[%s10846_s13 + $0xf60] ss:$304 sps:$4 sm:$0xff]   ;;  %v9491_v60 = vld [vmem:[%s10846_s13 + $0xf68] ss:$304 sps:$4 sm:$0xff]  }
 0x45c   : > { %7084 = vmatprep.subr.bf16.mxu1 %v9448_v20  ;;  %7125 = vmatprep.subr.bf16.mxu0 %v9451_v21  ;;  %v9496_v20 = vld [vmem:[%s10846_s13 + $0x11c4] ss:$304 sps:$4 sm:$0xff]   ;;  %v9499_v21 = vld [vmem:[%s10846_s13 + $0x11cc] ss:$304 sps:$4 sm:$0xff]  }
 0x45d   : > { %v7587_v30 = vcombine.low %v11775_v51, %v11778_v52 }
 0x45f   : > { %7085 = vmatpush1.bf16.msra.mxu1 %v9446_v16  ;;  %7126 = vmatpush1.bf16.msra.mxu0 %v9449_v26 }
 0x460   : > { %7152 = vmatprep.subr.bf16.mxu1 %v9454_v27  ;;  %7193 = vmatprep.subr.bf16.mxu0 %v9457_v29  ;;  %v9494_v27 = vld [vmem:[%s10846_s13 + $0x11c0] ss:$304 sps:$4 sm:$0xff]   ;;  %v9497_v29 = vld [vmem:[%s10846_s13 + $0x11c8] ss:$304 sps:$4 sm:$0xff]  }
 0x462   : > { %7103 = vmatmul.mubr.bf16.vlgmr.msra.gmra.mrb[68].mxu1 %v10934_v42  ;;  %7144 = vmatmul.mubr.bf16.vlgmr.msra.gmra.mrb[72].mxu0 %v10934_v42 }
 0x463   : > { %7153 = vmatpush1.bf16.msra.mxu1 %v9452_v31  ;;  %7194 = vmatpush1.bf16.msra.mxu0 %v9455_v5  ;;  %v7595_v5 = vrot.slane %v7587_v30, %v11215_v28 }
 0x464   : > { %7154 = vmatprep.subr.bf16.mxu1 %v9460_v58  ;;  %7195 = vmatprep.subr.bf16.mxu0 %v9463_v59 }
 0x465   : > { %7184 = vmatprep.mubr.bf16.mxu1 %v9527_v34  ;;  %7225 = vmatprep.mubr.bf16.mxu0 %v9527_v34  ;;  %v9478_v34 = vld [vmem:[%s10846_s13 + $0xaa4] ss:$304 sps:$4 sm:$0xff]  }
 0x467   : > { %7155 = vmatpush1.bf16.msra.mxu1 %v9458_v22  ;;  %7196 = vmatpush1.bf16.msra.mxu0 %v9461_v33  ;;  %v2242_v22 = vld [vmem:[%s11181_s30 + $0x30] sm:$0xff] }
 0x468   : > { %7156 = vmatprep.subr.bf16.mxu1 %v9466_v35  ;;  %7197 = vmatprep.subr.bf16.mxu0 %v9469_v36  ;;  %v5491_v33 = vrot.slane %v2242_v22, %v11185_v2  ;;  %v5499_v35 = vrot.slane %v2242_v22, %v11188_v3  ;;  %v5495_v36 = vrot.slane %v2242_v22, %v11195_v6 }
 0x469   : > { %v5503_v51 = vrot.slane %v2242_v22, %v11198_v9 }
 0x46b   : > { %7157 = vmatpush1.bf16.msra.mxu1 %v9464_v37  ;;  %7198 = vmatpush1.bf16.msra.mxu0 %v9467_v38 }
 0x46c   : > { %7158 = vmatprep.subr.bf16.mxu1 %v9472_v18  ;;  %7199 = vmatprep.subr.bf16.mxu0 %v9475_v40 }
 0x46f   : > { %7159 = vmatpush1.bf16.msra.mxu1 %v9470_v44  ;;  %7200 = vmatpush1.bf16.msra.mxu0 %v9473_v45 }
 0x470   : > { %7160 = vmatprep.subr.bf16.mxu1 %v9478_v34  ;;  %7201 = vmatprep.subr.bf16.mxu0 %v9481_v46 }
 0x473   : > { %7161 = vmatpush1.bf16.msra.mxu1 %v9476_v47  ;;  %7202 = vmatpush1.bf16.msra.mxu0 %v9479_v24 }
 0x474   : > { %7162 = vmatprep.subr.bf16.mxu1 %v9484_v50  ;;  %7203 = vmatprep.subr.bf16.mxu0 %v9487_v53 }
 0x475   : > { %v6612_v63 = vpop.f32.mrb[44].mxu1  ;;  %v6653_v0 = vpop.f32.mrb[48].mxu0 }
 0x476   : > { %v6613_v4 = vadd.f32 %v6612_v63, %v5475_v54  ;;  %v6654_v39 = vadd.f32 %v6653_v0, %v5483_v56  ;;  %v6614_v10 = vpop.f32.mrb[45].mxu1  ;;  %v6655_v41 = vpop.f32.mrb[49].mxu0 }
 0x477   : > { %v6615_v11 = vadd.f32 %v6614_v10, %v5479_v57  ;;  %v6656_v14 = vadd.f32 %v6655_v41, %v5487_v43  ;;  %v6616_v15 = vpop.f32.mrb[46].mxu1  ;;  %v6657_v49 = vpop.f32.mrb[50].mxu0  ;;  %7163 = vmatpush1.bf16.msra.mxu1 %v9482_v32  ;;  %7204 = vmatpush1.bf16.msra.mxu0 %v9485_v48  ;;  %v5507_v57 = vrot.slane %v2242_v22, %v11254_v7 }
 0x478   : > { %v6617_v1 = vpop.f32.mrb[47].mxu1  ;;  %v6658_v19 = vpop.f32.mrb[51].mxu0  ;;  %7164 = vmatprep.subr.bf16.mxu1 %v9490_v61  ;;  %7205 = vmatprep.subr.bf16.mxu0 %v9493_v62  ;;  %v5515_v43 = vrot.slane %v2242_v22, %v11257_v8  ;;  %v5511_v32 = vrot.slane %v2242_v22, %v11262_v12  ;;  %v5519_v48 = vrot.slane %v2242_v22, %v11265_v13 }
 0x479   : > { %v7557_v23 = vcombine.low %v6613_v4, %v6615_v11  ;;  %v7558_v25 = vcombine.low %v6654_v39, %v6656_v14 }
 0x47b   : > { %v7579_v16 = vrot.slane %v7557_v23, %v11215_v28  ;;  %v7586_v26 = vrot.slane %v7558_v25, %v11215_v28  ;;  %7165 = vmatpush1.bf16.msra.mxu1 %v9488_v17  ;;  %7206 = vmatpush1.bf16.msra.mxu0 %v9491_v60 }
 0x47c   : > { %7166 = vmatprep.subr.bf16.mxu1 %v9496_v20  ;;  %7207 = vmatprep.subr.bf16.mxu0 %v9499_v21 }
 0x47d   : > { %v7588_v31 = vcombine.low %v7579_v16, %v7586_v26  ;;  %v2243_v16 = vld [vmem:[%s11181_s30 + $0x38] sm:$0xff] }
 0x47e   : > { %v5523_v26 = vrot.slane %v2243_v16, %v11185_v2 }
 0x47f   : > { %v7602_v58 = vrot.slane %v7588_v31, %v11215_v28  ;;  %7167 = vmatpush1.bf16.msra.mxu1 %v9494_v27  ;;  %7208 = vmatpush1.bf16.msra.mxu0 %v9497_v29  ;;  %v5531_v27 = vrot.slane %v2243_v16, %v11188_v3  ;;  %v5527_v29 = vrot.slane %v2243_v16, %v11195_v6 }
 0x480   : > { %v5535_v31 = vrot.slane %v2243_v16, %v11198_v9 }
 0x481   : > { %v7603_v59 = vcombine.low %v7595_v5, %v7602_v58 }
 0x482   : > { %7185 = vmatmul.mubr.bf16.vlgmr.msra.gmra.mrb[72].mxu1 %v10934_v42  ;;  %7226 = vmatmul.mubr.bf16.vlgmr.msra.gmra.mrb[76].mxu0 %v10934_v42 }
 0x483   : > { %7790 = vst [vmem:[%s11302_s11 + $0x28] sm:$0xff] %v7603_v59 }
 0x495   : > { %v6694_v52 = vpop.f32.mrb[48].mxu1  ;;  %v6735_v30 = vpop.f32.mrb[52].mxu0 }
 0x496   : > { %v6695_v37 = vadd.f32 %v6694_v52, %v5491_v33  ;;  %v6736_v38 = vadd.f32 %v6735_v30, %v5499_v35  ;;  %v6696_v18 = vpop.f32.mrb[49].mxu1  ;;  %v6737_v40 = vpop.f32.mrb[53].mxu0 }
 0x497   : > { %v6697_v44 = vadd.f32 %v6696_v18, %v5495_v36  ;;  %v6738_v45 = vadd.f32 %v6737_v40, %v5503_v51  ;;  %v6698_v34 = vpop.f32.mrb[50].mxu1  ;;  %v6739_v42 = vpop.f32.mrb[54].mxu0 }
 0x498   : > { %v6699_v46 = vpop.f32.mrb[51].mxu1  ;;  %v6740_v47 = vpop.f32.mrb[55].mxu0  ;;  %v5539_v42 = vrot.slane %v2243_v16, %v11254_v7 }
 0x499   : > { %v7604_v24 = vcombine.low %v6695_v37, %v6697_v44  ;;  %v7605_v50 = vcombine.low %v6736_v38, %v6738_v45  ;;  %v5547_v46 = vrot.slane %v2243_v16, %v11257_v8  ;;  %v5543_v47 = vrot.slane %v2243_v16, %v11262_v12 }
 0x49b   : > { %v7614_v53 = vrot.slane %v7604_v24, %v11215_v28  ;;  %v7621_v54 = vrot.slane %v7605_v50, %v11215_v28  ;;  %v5551_v24 = vrot.slane %v2243_v16, %v11265_v13 }
 0x49d   : > { %v7636_v56 = vcombine.low %v7614_v53, %v7621_v54 }
 0x49f   : > { %v7644_v21 = vrot.slane %v7636_v56, %v11215_v28 }
 0x4b5   : > { %v6776_v61 = vpop.f32.mrb[52].mxu1  ;;  %v6817_v62 = vpop.f32.mrb[56].mxu0 }
 0x4b6   : > { %v6777_v63 = vadd.f32 %v6776_v61, %v5507_v57  ;;  %v6818_v0 = vadd.f32 %v6817_v62, %v5515_v43  ;;  %v6778_v4 = vpop.f32.mrb[53].mxu1  ;;  %v6819_v39 = vpop.f32.mrb[57].mxu0 }
 0x4b7   : > { %v6779_v10 = vadd.f32 %v6778_v4, %v5511_v32  ;;  %v6820_v41 = vadd.f32 %v6819_v39, %v5519_v48  ;;  %v6780_v11 = vpop.f32.mrb[54].mxu1  ;;  %v6821_v14 = vpop.f32.mrb[58].mxu0 }
 0x4b8   : > { %v6781_v15 = vpop.f32.mrb[55].mxu1  ;;  %v6822_v49 = vpop.f32.mrb[59].mxu0 }
 0x4b9   : > { %v7606_v17 = vcombine.low %v6777_v63, %v6779_v10  ;;  %v7607_v60 = vcombine.low %v6818_v0, %v6820_v41 }
 0x4bb   : > { %v7628_v1 = vrot.slane %v7606_v17, %v11215_v28  ;;  %v7635_v19 = vrot.slane %v7607_v60, %v11215_v28  ;;  %v2244_v17 = vld [vmem:[%s11181_s30 + $0x40] sm:$0xff] }
 0x4bc   : > { %v5555_v60 = vrot.slane %v2244_v17, %v11185_v2 }
 0x4bd   : > { %v7637_v20 = vcombine.low %v7628_v1, %v7635_v19  ;;  %v5563_v1 = vrot.slane %v2244_v17, %v11188_v3  ;;  %v5559_v19 = vrot.slane %v2244_v17, %v11195_v6 }
 0x4bf   : > { %v7651_v23 = vrot.slane %v7637_v20, %v11215_v28  ;;  %v5567_v20 = vrot.slane %v2244_v17, %v11198_v9 }
 0x4c1   : > { %v7652_v25 = vcombine.low %v7644_v21, %v7651_v23 }
 0x4c3   : > { %7791 = vst [vmem:[%s11302_s11 + $0x30] sm:$0xff] %v7652_v25 }
 0x4d5   : > { %v6858_v5 = vpop.f32.mrb[56].mxu1  ;;  %v6899_v58 = vpop.f32.mrb[60].mxu0 }
 0x4d6   : > { %v6859_v59 = vadd.f32 %v6858_v5, %v5523_v26  ;;  %v6900_v22 = vadd.f32 %v6899_v58, %v5531_v27  ;;  %v6860_v33 = vpop.f32.mrb[57].mxu1  ;;  %v6901_v35 = vpop.f32.mrb[61].mxu0 }
 0x4d7   : > { %v6861_v36 = vadd.f32 %v6860_v33, %v5527_v29  ;;  %v6902_v51 = vadd.f32 %v6901_v35, %v5535_v31  ;;  %v6862_v52 = vpop.f32.mrb[58].mxu1  ;;  %v6903_v30 = vpop.f32.mrb[62].mxu0 }
 0x4d8   : > { %v6863_v37 = vpop.f32.mrb[59].mxu1  ;;  %v6904_v38 = vpop.f32.mrb[63].mxu0  ;;  %v5571_v30 = vrot.slane %v2244_v17, %v11254_v7 }
 0x4d9   : > { %v7653_v18 = vcombine.low %v6859_v59, %v6861_v36  ;;  %v7654_v40 = vcombine.low %v6900_v22, %v6902_v51  ;;  %v5579_v37 = vrot.slane %v2244_v17, %v11257_v8  ;;  %v5575_v38 = vrot.slane %v2244_v17, %v11262_v12 }
 0x4db   : > { %v7663_v44 = vrot.slane %v7653_v18, %v11215_v28  ;;  %v7670_v45 = vrot.slane %v7654_v40, %v11215_v28  ;;  %v5583_v18 = vrot.slane %v2244_v17, %v11265_v13 }
 0x4dd   : > { %v7685_v34 = vcombine.low %v7663_v44, %v7670_v45 }
 0x4df   : > { %v7693_v14 = vrot.slane %v7685_v34, %v11215_v28 }
 0x4f5   : > { %v6940_v50 = vpop.f32.mrb[60].mxu1  ;;  %v6981_v53 = vpop.f32.mrb[64].mxu0 }
 0x4f6   : > { %v6941_v54 = vadd.f32 %v6940_v50, %v5539_v42  ;;  %v6982_v56 = vadd.f32 %v6981_v53, %v5547_v46  ;;  %v6942_v57 = vpop.f32.mrb[61].mxu1  ;;  %v6983_v43 = vpop.f32.mrb[65].mxu0 }
 0x4f7   : > { %v6943_v32 = vadd.f32 %v6942_v57, %v5543_v47  ;;  %v6984_v48 = vadd.f32 %v6983_v43, %v5551_v24  ;;  %v6944_v61 = vpop.f32.mrb[62].mxu1  ;;  %v6985_v62 = vpop.f32.mrb[66].mxu0 }
 0x4f8   : > { %v6945_v63 = vpop.f32.mrb[63].mxu1  ;;  %v6986_v0 = vpop.f32.mrb[67].mxu0  ;;  %v2245_v61 = vld [vmem:[%s11181_s30 + $0x48] sm:$0xf] }
 0x4f9   : > { %v7655_v4 = vcombine.low %v6941_v54, %v6943_v32  ;;  %v7656_v39 = vcombine.low %v6982_v56, %v6984_v48  ;;  %v5587_v62 = vrot.slane %v2245_v61, %v11185_v2  ;;  %v5595_v63 = vrot.slane %v2245_v61, %v11188_v3 }
 0x4fa   : > { %v5591_v0 = vrot.slane %v2245_v61, %v11195_v6 }
 0x4fb   : > { %v7677_v10 = vrot.slane %v7655_v4, %v11215_v28  ;;  %v7684_v41 = vrot.slane %v7656_v39, %v11215_v28  ;;  %v5599_v4 = vrot.slane %v2245_v61, %v11198_v9 }
 0x4fd   : > { %v7686_v11 = vcombine.low %v7677_v10, %v7684_v41 }
 0x4ff   : > { %v7700_v15 = vrot.slane %v7686_v11, %v11215_v28 }
 0x501   : > { %v7701_v49 = vcombine.low %v7693_v14, %v7700_v15 }
 0x503   : > { %7792 = vst [vmem:[%s11302_s11 + $0x38] sm:$0xff] %v7701_v49 }
 0x515   : > { %v7022_v21 = vpop.f32.mrb[64].mxu1  ;;  %v7063_v23 = vpop.f32.mrb[68].mxu0 }
 0x516   : > { %v7023_v25 = vadd.f32 %v7022_v21, %v5555_v60  ;;  %v7064_v16 = vadd.f32 %v7063_v23, %v5563_v1  ;;  %v7024_v26 = vpop.f32.mrb[65].mxu1  ;;  %v7065_v27 = vpop.f32.mrb[69].mxu0 }
 0x517   : > { %v7025_v29 = vadd.f32 %v7024_v26, %v5559_v19  ;;  %v7066_v31 = vadd.f32 %v7065_v27, %v5567_v20  ;;  %v7026_v5 = vpop.f32.mrb[66].mxu1  ;;  %v7067_v58 = vpop.f32.mrb[70].mxu0 }
 0x518   : > { %v7027_v59 = vpop.f32.mrb[67].mxu1  ;;  %v7068_v22 = vpop.f32.mrb[71].mxu0 }
 0x519   : > { %v7702_v33 = vcombine.low %v7023_v25, %v7025_v29  ;;  %v7703_v35 = vcombine.low %v7064_v16, %v7066_v31 }
 0x51b   : > { %v7712_v36 = vrot.slane %v7702_v33, %v11215_v28  ;;  %v7719_v51 = vrot.slane %v7703_v35, %v11215_v28 }
 0x51d   : > { %v7734_v52 = vcombine.low %v7712_v36, %v7719_v51 }
 0x51f   : > { %v7742_v43 = vrot.slane %v7734_v52, %v11215_v28 }
 0x535   : > { %v7104_v40 = vpop.f32.mrb[68].mxu1  ;;  %v7145_v44 = vpop.f32.mrb[72].mxu0 }
 0x536   : > { %v7105_v45 = vadd.f32 %v7104_v40, %v5571_v30  ;;  %v7146_v34 = vadd.f32 %v7145_v44, %v5579_v37  ;;  %v7106_v42 = vpop.f32.mrb[69].mxu1  ;;  %v7147_v46 = vpop.f32.mrb[73].mxu0 }
 0x537   : > { %v7107_v47 = vadd.f32 %v7106_v42, %v5575_v38  ;;  %v7148_v24 = vadd.f32 %v7147_v46, %v5583_v18  ;;  %v7108_v50 = vpop.f32.mrb[70].mxu1  ;;  %v7149_v53 = vpop.f32.mrb[74].mxu0 }
 0x538   : > { %v7109_v54 = vpop.f32.mrb[71].mxu1  ;;  %v7150_v7 = vpop.f32.mrb[75].mxu0 }
 0x539   : > { %v7704_v56 = vcombine.low %v7105_v45, %v7107_v47  ;;  %v7705_v8 = vcombine.low %v7146_v34, %v7148_v24 }
 0x53b   : > { %v7726_v12 = vrot.slane %v7704_v56, %v11215_v28  ;;  %v7733_v13 = vrot.slane %v7705_v8, %v11215_v28 }
 0x53d   : > { %v7735_v57 = vcombine.low %v7726_v12, %v7733_v13 }
 0x53f   : > { %v7749_v32 = vrot.slane %v7735_v57, %v11215_v28 }
 0x541   : > { %v7750_v48 = vcombine.low %v7742_v43, %v7749_v32 }
 0x543   : > { %7793 = vst [vmem:[%s11302_s11 + $0x40] sm:$0xff] %v7750_v48 }
 0x555   : > { %v7186_v39 = vpop.f32.mrb[72].mxu1  ;;  %v7227_v10 = vpop.f32.mrb[76].mxu0 }
 0x556   : > { %v7187_v41 = vadd.f32 %v7186_v39, %v5587_v62  ;;  %v7228_v11 = vadd.f32 %v7227_v10, %v5595_v63  ;;  %v7188_v14 = vpop.f32.mrb[73].mxu1  ;;  %v7229_v15 = vpop.f32.mrb[77].mxu0 }
 0x557   : > { %v7189_v49 = vadd.f32 %v7188_v14, %v5591_v0  ;;  %v7230_v17 = vadd.f32 %v7229_v15, %v5599_v4  ;;  %v7190_v60 = vpop.f32.mrb[74].mxu1  ;;  %v7231_v1 = vpop.f32.mrb[78].mxu0 }
 0x558   : > { %v7191_v19 = vpop.f32.mrb[75].mxu1  ;;  %v7232_v20 = vpop.f32.mrb[79].mxu0 }
 0x559   : > { %v7751_v2 = vcombine.low %v7187_v41, %v7189_v49  ;;  %v7752_v21 = vcombine.low %v7228_v11, %v7230_v17 }
 0x55b   : > { %v7759_v3 = vrot.slane %v7751_v2, %v11215_v28  ;;  %v7766_v6 = vrot.slane %v7752_v21, %v11215_v28 }
 0x55d   : > { %v7767_v9 = vcombine.low %v7759_v3, %v7766_v6 }
 0x55f   : > { %v7774_v23 = vrot.slane %v7767_v9, %v11215_v28 }
 0x561   : > { %7798 = vst.msk [vmem:[%s11302_s11 + $0x48] sm:$0xf] %vm7796_vm1, %v7774_v23 }
 0x562 PF: > { %p14_p9 = scmp.ge.s32.totalorder %s9586_s28, 4   ;;  %s11914_s24 = smov %s9518_s25 }
 0x563   : > { %s11915_s25 = smov %s9595_s8  ;;  %s11916_s26 = smov %s9586_s28 }
 0x564   :  { %16 = sbr.rel (!%p14_p9) target bundleno = 2 (0x2), region = 109 }

</bundles_post_ra>
